<compile_context>
chip_gen: v5e
topology: v5e:2x2
jax: 0.10.0
libtpu: 0.0.40
codegen_flags: <defaults>
</compile_context>

<pallas_src>
import functools

import jax
import jax.numpy as jnp
from jax.experimental import pallas as pl
from jax.experimental.pallas import tpu as pltpu

ORDER = 2            # gcn(order=2) default used by SamePadConv
BN_EPS = 1e-5

# MXU operand dtype.  jnp.float32 keeps reference-exact numerics.  On v6e / v7x set
# jnp.bfloat16 to halve weight DMA and hit the native MXU rate (accumulation stays
# f32; GELU / BN epilogue stay f32, which is also required on v5e: no bf16 VPU/EUP).
MXU_DTYPE = jnp.float32

_SQRT_HALF = 0.7071067811865476
_ERF_P = 0.3275911
_ERF_A1, _ERF_A2, _ERF_A3, _ERF_A4, _ERF_A5 = (
    0.254829592, -0.284496736, 1.421413741, -1.453152027, 1.061405429)


# ------------------------------- kernel body ---------------------------------

def _gelu(x):
    # Exact (erf) GELU, matching torch.nn.functional.gelu default.  erf via
    # Abramowitz & Stegun 7.1.26 (|err| < 1.5e-7 ~ f32 eps); reciprocal (approx)
    # and exp run on the EUP slot, keeping the VALU free.
    z = x * _SQRT_HALF
    za = jnp.abs(z)
    t = pl.reciprocal(1.0 + _ERF_P * za, approx=True)
    poly = ((((_ERF_A5 * t + _ERF_A4) * t + _ERF_A3) * t + _ERF_A2) * t + _ERF_A1) * t
    erf_abs = 1.0 - poly * jnp.exp(-za * za)
    erf_z = jnp.where(z >= 0.0, erf_abs, -erf_abs)
    return 0.5 * x * (1.0 + erf_z)


def _layer_kernel(x_ref, skip_ref, wconv_ref, bconv_ref, wskip_ref, bskip_ref,
                  pmix_ref, wmlp0_ref, wmlph_ref, bmlp_ref, bnsc_ref, bnsh_ref,
                  y_ref, skip_out_ref, *, K, d, Lout, crop):
    """One whole SamePadConv layer for one batch element (block = full slab)."""
    md = wconv_ref.dtype          # MXU operand dtype (f32 default, bf16 optional)
    f32 = jnp.float32

    # GELU'd shifted conv windows sliced straight from the input ref (no im2col).
    # The last window (offset (K-1)*d, length Lout) is exactly residual[..., -Lout:].
    windows = [_gelu(x_ref[pl.ds(k * d, Lout), :]) for k in range(K)]

    # Dilated (1,K) conv + bias; calibration scale f is pre-folded into weights/bias.
    xs = bconv_ref[...]
    for k in range(K):
        xs = xs + jnp.dot(windows[k].astype(md), wconv_ref[k],
                          preferred_element_type=f32)

    # Skip branch: 1x1 conv + bias + cropped previous skip (no zeros "add" input).
    skip_out_ref[...] = (
        jnp.dot(xs.astype(md), wskip_ref[...], preferred_element_type=f32)
        + bskip_ref[...] + skip_ref[pl.ds(crop, Lout), :])

    # gcn: ONE node-mixing matmul covering every support / hop, then ONE mlp matmul
    # over the stacked hop segments; the identity segment carries the bias.
    xs_md = xs.astype(md)
    hops = jnp.dot(xs_md, pmix_ref[...], preferred_element_type=f32)
    g = (jnp.dot(xs_md, wmlp0_ref[...], preferred_element_type=f32)
         + jnp.dot(hops.astype(md), wmlph_ref[...], preferred_element_type=f32)
         + bmlp_ref[...])
    # F.dropout(p=0.3) is identity in eval mode.

    # Residual add + eval-mode BatchNorm2d affine, fused into the output store.
    y_ref[...] = (g + windows[K - 1]) * bnsc_ref[...] + bnsh_ref[...]


# --------------------------- layer / block wrappers ---------------------------

def samepad_conv_layer(x, skip, supports, p, V, K, d):
    """One SamePadConv layer (eval mode).  x: [N, L, V*Cin], skip: [N, Ls, V*Cskip]."""
    N, L, VCin = x.shape
    Cin = VCin // V
    Cout = p["conv_w"].shape[0]
    Cskip = p["skip_w"].shape[0]
    assert Cout == Cin, "skip_conv / residual path require out_channels == in_channels"
    Lout = L - (K - 1) * d
    Lskip = skip.shape[1]
    H = ORDER * len(supports)                       # number of gcn hop segments
    f32 = jnp.float32
    eye_v = jnp.eye(V, dtype=f32)
    eye_c = jnp.eye(Cout, dtype=f32)

    # ---- fw_chunks(): grads == 0 => controller input is zeros => rep = SiLU(bias).
    rep = jnp.broadcast_to(jax.nn.silu(p["ctrl_b"])[None, :], (Cin, p["ctrl_b"].shape[0]))
    w_cal = rep @ p["calw_w"].T + p["calw_b"]                   # [Cin, K]
    b_cal = (rep @ p["calb_w"].T + p["calb_b"]).reshape(-1)     # [Cout]
    f_cal = (rep @ p["calf_w"].T + p["calf_b"]).reshape(-1)     # [Cout]

    # ---- dilated conv: per-tap weight with calibration w and scale f folded in,
    #      expanded block-diagonally for the [*, V*C] layout.
    conv_w = p["conv_w"][:, :, 0, :]                            # [Cout, Cin, K]
    wconv = jnp.stack(
        [jnp.kron(eye_v, conv_w[:, :, k].T * w_cal[:, k][:, None] * f_cal[None, :])
         for k in range(K)], axis=0)                            # [K, V*Cin, V*Cout]
    bconv = jnp.tile(f_cal * p["conv_bias"] * b_cal, V)[None, :]

    # ---- skip 1x1 conv.
    wskip = jnp.kron(eye_v, p["skip_w"][:, :, 0, 0].T)          # [V*Cout, V*Cskip]
    bskip = jnp.tile(p["skip_b"], V)[None, :]

    # ---- gcn: stack node-mixing matrices of all supports/hops horizontally and the
    #      matching mlp weight segments vertically (single matmul each in-kernel).
    hop_mats = []
    for a in supports:
        cur = a
        hop_mats.append(cur)
        for _ in range(ORDER - 1):
            cur = cur @ a
            hop_mats.append(cur)
    pmix = jnp.concatenate([jnp.kron(ap, eye_c) for ap in hop_mats], axis=1)
    mlp_w = p["mlp_w"][:, :, 0, 0]                              # [Cin, (H+1)*Cout]
    wmlp0 = jnp.kron(eye_v, mlp_w[:, :Cout].T)                  # [V*Cout, V*Cin]
    wmlph = jnp.concatenate(
        [jnp.kron(eye_v, mlp_w[:, (1 + h) * Cout:(2 + h) * Cout].T) for h in range(H)],
        axis=0)                                                 # [H*V*Cout, V*Cin]
    bmlp = jnp.tile(p["mlp_b"], V)[None, :]

    # ---- eval-mode BatchNorm2d folded to a per-channel affine.
    bn_scale = p["bn_w"] / jnp.sqrt(p["bn_var"] + BN_EPS)
    bn_shift = p["bn_b"] - p["bn_mean"] * bn_scale
    bnsc = jnp.tile(bn_scale, V)[None, :]
    bnsh = jnp.tile(bn_shift, V)[None, :]

    kernel = functools.partial(_layer_kernel, K=K, d=d, Lout=Lout, crop=Lskip - Lout)
    VCout, VCskip = V * Cout, V * Cskip

    return pl.pallas_call(
        kernel,
        out_shape=(jax.ShapeDtypeStruct((N, Lout, VCin), f32),
                   jax.ShapeDtypeStruct((N, Lout, VCskip), f32)),
        grid=(N,),
        in_specs=[
            pl.BlockSpec((None, L, VCin), lambda b: (b, 0, 0)),
            pl.BlockSpec((None, Lskip, VCskip), lambda b: (b, 0, 0)),
            pl.BlockSpec((K, VCin, VCout), lambda b: (0, 0, 0)),
            pl.BlockSpec((1, VCout), lambda b: (0, 0)),
            pl.BlockSpec((VCout, VCskip), lambda b: (0, 0)),
            pl.BlockSpec((1, VCskip), lambda b: (0, 0)),
            pl.BlockSpec((VCout, H * VCout), lambda b: (0, 0)),
            pl.BlockSpec((VCout, VCin), lambda b: (0, 0)),
            pl.BlockSpec((H * VCout, VCin), lambda b: (0, 0)),
            pl.BlockSpec((1, VCin), lambda b: (0, 0)),
            pl.BlockSpec((1, VCin), lambda b: (0, 0)),
            pl.BlockSpec((1, VCin), lambda b: (0, 0)),
        ],
        out_specs=(pl.BlockSpec((None, Lout, VCin), lambda b: (b, 0, 0)),
                   pl.BlockSpec((None, Lout, VCskip), lambda b: (b, 0, 0))),
        compiler_params=pltpu.CompilerParams(
            dimension_semantics=("parallel",),       # batch across TCs (v7x has 2)
            vmem_limit_bytes=32 * 1024 * 1024,       # ~6 MiB used; safe on 64 MiB v7x
        ),
    )(x.astype(f32), skip.astype(f32),
      wconv.astype(MXU_DTYPE), bconv, wskip.astype(MXU_DTYPE), bskip,
      pmix.astype(MXU_DTYPE), wmlp0.astype(MXU_DTYPE), wmlph.astype(MXU_DTYPE),
      bmlp, bnsc, bnsh)


def _nchw_to_lvc(x):
    n, c, v, l = x.shape
    return jnp.transpose(x, (0, 3, 2, 1)).reshape(n, l, v * c)


def _lvc_to_nchw(x, v):
    n, l, vc = x.shape
    return jnp.transpose(x.reshape(n, l, v, vc // v), (0, 3, 2, 1))


def convblock_forward(x_nchw, skip_nchw, supports, layer_params, *, kernel_size, dilation):
    """ConvBlock.forward (eval): per layer x = gelu(x); x, skip = SamePadConv(...)."""
    V = x_nchw.shape[2]
    x = _nchw_to_lvc(x_nchw)
    skip = _nchw_to_lvc(skip_nchw)
    d = dilation
    for p in layer_params:
        x, skip = samepad_conv_layer(x, skip, supports, p, V, kernel_size, d)
        d *= 2
    return _lvc_to_nchw(x, V), _lvc_to_nchw(skip, V)


# ------------------------- deterministic parameter init ----------------------

def init_samepad_conv_params(key, in_channels, out_channels, skip_channels,
                             supports_len, kernel_size):
    assert out_channels % in_channels == 0
    nh = 64
    chunk_in_d = out_channels * kernel_size          # conv.weight.numel() // in_channels
    chunk_out_d = kernel_size
    c_in_gcn = (ORDER * supports_len + 1) * out_channels
    std = 0.1
    ks = jax.random.split(key, 13)
    p = dict(
        conv_w=std * jax.random.normal(ks[0], (out_channels, in_channels, 1, kernel_size), jnp.float32),
        conv_bias=jnp.zeros((out_channels,), jnp.float32),   # nn.Parameter(torch.zeros([out_channels]))
        ctrl_w=std * jax.random.normal(ks[1], (nh, chunk_in_d), jnp.float32),  # unused: controller input is 0
        ctrl_b=std * jax.random.normal(ks[2], (nh,), jnp.float32),
        calw_w=std * jax.random.normal(ks[3], (chunk_out_d, nh), jnp.float32),
        calw_b=std * jax.random.normal(ks[4], (chunk_out_d,), jnp.float32),
        calb_w=std * jax.random.normal(ks[5], (out_channels // in_channels, nh), jnp.float32),
        calb_b=std * jax.random.normal(ks[6], (out_channels // in_channels,), jnp.float32),
        calf_w=std * jax.random.normal(ks[7], (out_channels // in_channels, nh), jnp.float32),
        calf_b=std * jax.random.normal(ks[8], (out_channels // in_channels,), jnp.float32),
        skip_w=std * jax.random.normal(ks[9], (skip_channels, in_channels, 1, 1), jnp.float32),
        skip_b=std * jax.random.normal(ks[10], (skip_channels,), jnp.float32),
        mlp_w=std * jax.random.normal(ks[11], (in_channels, c_in_gcn, 1, 1), jnp.float32),
        mlp_b=std * jax.random.normal(ks[12], (in_channels,), jnp.float32),
        bn_w=jnp.ones((in_channels,), jnp.float32),
        bn_b=jnp.zeros((in_channels,), jnp.float32),
        bn_mean=jnp.zeros((in_channels,), jnp.float32),
        bn_var=jnp.ones((in_channels,), jnp.float32),
    )
    # TODO(synk): the memory-bank self.W / grad-EMA buffers / trigger branch are
    # training-time state that never affects this eval forward (grads==0, trigger==0).
    return p


# ----------------------------------- main ------------------------------------

if __name__ == "__main__":
    key = jax.random.PRNGKey(0)

    # ConvBlock hyper-parameters (out_channels == in_channels required by skip/residual).
    in_channels = out_channels = 32
    skip_channels = 32
    layers = 2
    supports_len = 2
    kernel_size = 2
    dilation = 1

    N, V, L = 2, 8, 16                         # batch, graph nodes, time steps

    k_x, k_sup, k_layers = jax.random.split(key, 3)
    # PyTorch-layout inputs (NCHW = [N, C, V, L]).
    x_nchw = jax.random.normal(k_x, (N, in_channels, V, L), jnp.float32)
    skip_nchw = jnp.zeros((N, skip_channels, V, L), jnp.float32)
    sup_keys = jax.random.split(k_sup, supports_len)
    supports = [jax.nn.softmax(jax.random.normal(k, (V, V), jnp.float32), axis=-1) for k in sup_keys]

    layer_keys = jax.random.split(k_layers, layers)
    layer_params = [
        init_samepad_conv_params(k, in_channels, out_channels, skip_channels,
                                 supports_len, kernel_size)
        for k in layer_keys
    ]

    fwd = jax.jit(convblock_forward, static_argnames=("kernel_size", "dilation"))
    x_out, skip_out = fwd(x_nchw, skip_nchw, supports, layer_params,
                          kernel_size=kernel_size, dilation=dilation)
    x_out = jax.block_until_ready(x_out)
    skip_out = jax.block_until_ready(skip_out)

    # L shrinks by (K-1)*d per layer = 1 + 2 = 3.
    assert x_out.shape == (N, in_channels, V, L - 3)
    assert skip_out.shape == (N, skip_channels, V, L - 3)
    assert bool(jnp.all(jnp.isfinite(x_out))) and bool(jnp.all(jnp.isfinite(skip_out)))
    print("KERNEL_OK")
</pallas_src>

<mosaic_0001>
module attributes {stable_mosaic.version = 11 : i64} {
  func.func @_layer_kernel(%arg0: i32, %arg1: memref<1x16x256xf32, #tpu.memory_space<vmem>>, %arg2: memref<1x16x256xf32, #tpu.memory_space<vmem>>, %arg3: memref<2x256x256xf32, #tpu.memory_space<vmem>>, %arg4: memref<1x256xf32, #tpu.memory_space<vmem>>, %arg5: memref<256x256xf32, #tpu.memory_space<vmem>>, %arg6: memref<1x256xf32, #tpu.memory_space<vmem>>, %arg7: memref<256x1024xf32, #tpu.memory_space<vmem>>, %arg8: memref<256x256xf32, #tpu.memory_space<vmem>>, %arg9: memref<1024x256xf32, #tpu.memory_space<vmem>>, %arg10: memref<1x256xf32, #tpu.memory_space<vmem>>, %arg11: memref<1x256xf32, #tpu.memory_space<vmem>>, %arg12: memref<1x256xf32, #tpu.memory_space<vmem>>, %arg13: memref<1x15x256xf32, #tpu.memory_space<vmem>>, %arg14: memref<1x15x256xf32, #tpu.memory_space<vmem>>) attributes {dimension_semantics = [#tpu.dimension_semantics<parallel>], iteration_bounds = array<i64: 2>, scalar_prefetch = 0 : i64, scratch_operands = 0 : i64, tpu.core_type = #tpu.core_type<tc>, window_params = [{transform_indices = @transform_0, window_bounds = array<i64: 1, 16, 256>}, {transform_indices = @transform_1, window_bounds = array<i64: 1, 16, 256>}, {pipeline_mode = #tpu.pipeline_mode<synchronous>, transform_indices = @transform_2, window_bounds = array<i64: 2, 256, 256>}, {pipeline_mode = #tpu.pipeline_mode<synchronous>, transform_indices = @transform_3, window_bounds = array<i64: 1, 256>}, {pipeline_mode = #tpu.pipeline_mode<synchronous>, transform_indices = @transform_4, window_bounds = array<i64: 256, 256>}, {pipeline_mode = #tpu.pipeline_mode<synchronous>, transform_indices = @transform_5, window_bounds = array<i64: 1, 256>}, {pipeline_mode = #tpu.pipeline_mode<synchronous>, transform_indices = @transform_6, window_bounds = array<i64: 256, 1024>}, {pipeline_mode = #tpu.pipeline_mode<synchronous>, transform_indices = @transform_7, window_bounds = array<i64: 256, 256>}, {pipeline_mode = #tpu.pipeline_mode<synchronous>, transform_indices = @transform_8, window_bounds = array<i64: 1024, 256>}, {pipeline_mode = #tpu.pipeline_mode<synchronous>, transform_indices = @transform_9, window_bounds = array<i64: 1, 256>}, {pipeline_mode = #tpu.pipeline_mode<synchronous>, transform_indices = @transform_10, window_bounds = array<i64: 1, 256>}, {pipeline_mode = #tpu.pipeline_mode<synchronous>, transform_indices = @transform_11, window_bounds = array<i64: 1, 256>}, {transform_indices = @transform_12, window_bounds = array<i64: 1, 15, 256>}, {transform_indices = @transform_13, window_bounds = array<i64: 1, 15, 256>}]} {
    %c0 = arith.constant 0 : index
    %c0_0 = arith.constant 0 : index
    %c0_1 = arith.constant 0 : index
    %0 = vector.load %arg1[%c0, %c0_0, %c0_1] : memref<1x16x256xf32, #tpu.memory_space<vmem>>, vector<1x15x256xf32>
    %1 = vector.shape_cast %0 : vector<1x15x256xf32> to vector<15x256xf32>
    %cst = arith.constant 0.707106769 : f32
    %2 = vector.broadcast %cst : f32 to vector<15x256xf32>
    %3 = arith.mulf %1, %2 : vector<15x256xf32>
    %4 = math.absf %3 : vector<15x256xf32>
    %cst_2 = arith.constant 0.327591091 : f32
    %5 = vector.broadcast %cst_2 : f32 to vector<15x256xf32>
    %6 = arith.mulf %5, %4 : vector<15x256xf32>
    %cst_3 = arith.constant 1.000000e+00 : f32
    %7 = vector.broadcast %cst_3 : f32 to vector<15x256xf32>
    %8 = arith.addf %7, %6 : vector<15x256xf32>
    %9 = tpu.reciprocal %8 {approx = true} : vector<15x256xf32> -> vector<15x256xf32>
    %cst_4 = arith.constant 1.06140542 : f32
    %10 = vector.broadcast %cst_4 : f32 to vector<15x256xf32>
    %11 = arith.mulf %10, %9 : vector<15x256xf32>
    %cst_5 = arith.constant -1.45315206 : f32
    %12 = vector.broadcast %cst_5 : f32 to vector<15x256xf32>
    %13 = arith.addf %11, %12 : vector<15x256xf32>
    %14 = arith.mulf %13, %9 : vector<15x256xf32>
    %cst_6 = arith.constant 1.42141378 : f32
    %15 = vector.broadcast %cst_6 : f32 to vector<15x256xf32>
    %16 = arith.addf %14, %15 : vector<15x256xf32>
    %17 = arith.mulf %16, %9 : vector<15x256xf32>
    %cst_7 = arith.constant -0.284496725 : f32
    %18 = vector.broadcast %cst_7 : f32 to vector<15x256xf32>
    %19 = arith.addf %17, %18 : vector<15x256xf32>
    %20 = arith.mulf %19, %9 : vector<15x256xf32>
    %cst_8 = arith.constant 0.254829586 : f32
    %21 = vector.broadcast %cst_8 : f32 to vector<15x256xf32>
    %22 = arith.addf %20, %21 : vector<15x256xf32>
    %23 = arith.mulf %22, %9 : vector<15x256xf32>
    %cst_9 = arith.constant 0.000000e+00 : f32
    %24 = vector.broadcast %cst_9 : f32 to vector<15x256xf32>
    %25 = arith.subf %24, %4 : vector<15x256xf32>
    %26 = arith.mulf %25, %4 : vector<15x256xf32>
    %27 = math.exp %26 : vector<15x256xf32>
    %28 = arith.mulf %23, %27 : vector<15x256xf32>
    %cst_10 = arith.constant 1.000000e+00 : f32
    %29 = vector.broadcast %cst_10 : f32 to vector<15x256xf32>
    %30 = arith.subf %29, %28 : vector<15x256xf32>
    %cst_11 = arith.constant 0.000000e+00 : f32
    %31 = vector.broadcast %cst_11 : f32 to vector<15x256xf32>
    %32 = arith.cmpf oge, %3, %31 : vector<15x256xf32>
    %cst_12 = arith.constant 0.000000e+00 : f32
    %33 = vector.broadcast %cst_12 : f32 to vector<15x256xf32>
    %34 = arith.subf %33, %30 : vector<15x256xf32>
    %35 = arith.select %32, %30, %34 : vector<15x256xi1>, vector<15x256xf32>
    %cst_13 = arith.constant 5.000000e-01 : f32
    %36 = vector.broadcast %cst_13 : f32 to vector<15x256xf32>
    %37 = arith.mulf %36, %1 : vector<15x256xf32>
    %cst_14 = arith.constant 1.000000e+00 : f32
    %38 = vector.broadcast %cst_14 : f32 to vector<15x256xf32>
    %39 = arith.addf %38, %35 : vector<15x256xf32>
    %40 = arith.mulf %37, %39 : vector<15x256xf32>
    %c0_15 = arith.constant 0 : index
    %c1 = arith.constant 1 : index
    %c0_16 = arith.constant 0 : index
    %41 = vector.load %arg1[%c0_15, %c1, %c0_16] : memref<1x16x256xf32, #tpu.memory_space<vmem>>, vector<1x15x256xf32>
    %42 = vector.shape_cast %41 : vector<1x15x256xf32> to vector<15x256xf32>
    %cst_17 = arith.constant 0.707106769 : f32
    %43 = vector.broadcast %cst_17 : f32 to vector<15x256xf32>
    %44 = arith.mulf %42, %43 : vector<15x256xf32>
    %45 = math.absf %44 : vector<15x256xf32>
    %cst_18 = arith.constant 0.327591091 : f32
    %46 = vector.broadcast %cst_18 : f32 to vector<15x256xf32>
    %47 = arith.mulf %46, %45 : vector<15x256xf32>
    %cst_19 = arith.constant 1.000000e+00 : f32
    %48 = vector.broadcast %cst_19 : f32 to vector<15x256xf32>
    %49 = arith.addf %48, %47 : vector<15x256xf32>
    %50 = tpu.reciprocal %49 {approx = true} : vector<15x256xf32> -> vector<15x256xf32>
    %cst_20 = arith.constant 1.06140542 : f32
    %51 = vector.broadcast %cst_20 : f32 to vector<15x256xf32>
    %52 = arith.mulf %51, %50 : vector<15x256xf32>
    %cst_21 = arith.constant -1.45315206 : f32
    %53 = vector.broadcast %cst_21 : f32 to vector<15x256xf32>
    %54 = arith.addf %52, %53 : vector<15x256xf32>
    %55 = arith.mulf %54, %50 : vector<15x256xf32>
    %cst_22 = arith.constant 1.42141378 : f32
    %56 = vector.broadcast %cst_22 : f32 to vector<15x256xf32>
    %57 = arith.addf %55, %56 : vector<15x256xf32>
    %58 = arith.mulf %57, %50 : vector<15x256xf32>
    %cst_23 = arith.constant -0.284496725 : f32
    %59 = vector.broadcast %cst_23 : f32 to vector<15x256xf32>
    %60 = arith.addf %58, %59 : vector<15x256xf32>
    %61 = arith.mulf %60, %50 : vector<15x256xf32>
    %cst_24 = arith.constant 0.254829586 : f32
    %62 = vector.broadcast %cst_24 : f32 to vector<15x256xf32>
    %63 = arith.addf %61, %62 : vector<15x256xf32>
    %64 = arith.mulf %63, %50 : vector<15x256xf32>
    %cst_25 = arith.constant 0.000000e+00 : f32
    %65 = vector.broadcast %cst_25 : f32 to vector<15x256xf32>
    %66 = arith.subf %65, %45 : vector<15x256xf32>
    %67 = arith.mulf %66, %45 : vector<15x256xf32>
    %68 = math.exp %67 : vector<15x256xf32>
    %69 = arith.mulf %64, %68 : vector<15x256xf32>
    %cst_26 = arith.constant 1.000000e+00 : f32
    %70 = vector.broadcast %cst_26 : f32 to vector<15x256xf32>
    %71 = arith.subf %70, %69 : vector<15x256xf32>
    %cst_27 = arith.constant 0.000000e+00 : f32
    %72 = vector.broadcast %cst_27 : f32 to vector<15x256xf32>
    %73 = arith.cmpf oge, %44, %72 : vector<15x256xf32>
    %cst_28 = arith.constant 0.000000e+00 : f32
    %74 = vector.broadcast %cst_28 : f32 to vector<15x256xf32>
    %75 = arith.subf %74, %71 : vector<15x256xf32>
    %76 = arith.select %73, %71, %75 : vector<15x256xi1>, vector<15x256xf32>
    %cst_29 = arith.constant 5.000000e-01 : f32
    %77 = vector.broadcast %cst_29 : f32 to vector<15x256xf32>
    %78 = arith.mulf %77, %42 : vector<15x256xf32>
    %cst_30 = arith.constant 1.000000e+00 : f32
    %79 = vector.broadcast %cst_30 : f32 to vector<15x256xf32>
    %80 = arith.addf %79, %76 : vector<15x256xf32>
    %81 = arith.mulf %78, %80 : vector<15x256xf32>
    %c0_31 = arith.constant 0 : index
    %c0_32 = arith.constant 0 : index
    %82 = vector.load %arg4[%c0_31, %c0_32] : memref<1x256xf32, #tpu.memory_space<vmem>>, vector<1x256xf32>
    %c0_33 = arith.constant 0 : index
    %c0_34 = arith.constant 0 : index
    %c0_35 = arith.constant 0 : index
    %83 = vector.load %arg3[%c0_33, %c0_34, %c0_35] : memref<2x256x256xf32, #tpu.memory_space<vmem>>, vector<1x256x256xf32>
    %84 = vector.shape_cast %83 : vector<1x256x256xf32> to vector<256x256xf32>
    %cst_36 = arith.constant dense<0.000000e+00> : vector<15x256xf32>
    %85 = tpu.matmul %40, %84, %cst_36 {dimension_numbers = #tpu.dot_dimension_numbers<[1], [0], [0], [1], [0, 0, 1, 1], [], []>} : vector<15x256xf32>, vector<256x256xf32>, vector<15x256xf32> -> vector<15x256xf32>
    %86 = vector.broadcast %82 : vector<1x256xf32> to vector<15x256xf32>
    %87 = arith.addf %86, %85 : vector<15x256xf32>
    %c1_37 = arith.constant 1 : index
    %c0_38 = arith.constant 0 : index
    %c0_39 = arith.constant 0 : index
    %88 = vector.load %arg3[%c1_37, %c0_38, %c0_39] : memref<2x256x256xf32, #tpu.memory_space<vmem>>, vector<1x256x256xf32>
    %89 = vector.shape_cast %88 : vector<1x256x256xf32> to vector<256x256xf32>
    %cst_40 = arith.constant dense<0.000000e+00> : vector<15x256xf32>
    %90 = tpu.matmul %81, %89, %cst_40 {dimension_numbers = #tpu.dot_dimension_numbers<[1], [0], [0], [1], [0, 0, 1, 1], [], []>} : vector<15x256xf32>, vector<256x256xf32>, vector<15x256xf32> -> vector<15x256xf32>
    %91 = arith.addf %87, %90 : vector<15x256xf32>
    %c0_41 = arith.constant 0 : index
    %c0_42 = arith.constant 0 : index
    %92 = vector.load %arg5[%c0_41, %c0_42] : memref<256x256xf32, #tpu.memory_space<vmem>>, vector<256x256xf32>
    %cst_43 = arith.constant dense<0.000000e+00> : vector<15x256xf32>
    %93 = tpu.matmul %91, %92, %cst_43 {dimension_numbers = #tpu.dot_dimension_numbers<[1], [0], [0], [1], [0, 0, 1, 1], [], []>} : vector<15x256xf32>, vector<256x256xf32>, vector<15x256xf32> -> vector<15x256xf32>
    %c0_44 = arith.constant 0 : index
    %c0_45 = arith.constant 0 : index
    %94 = vector.load %arg6[%c0_44, %c0_45] : memref<1x256xf32, #tpu.memory_space<vmem>>, vector<1x256xf32>
    %95 = vector.broadcast %94 : vector<1x256xf32> to vector<15x256xf32>
    %96 = arith.addf %93, %95 : vector<15x256xf32>
    %c0_46 = arith.constant 0 : index
    %c1_47 = arith.constant 1 : index
    %c0_48 = arith.constant 0 : index
    %97 = vector.load %arg2[%c0_46, %c1_47, %c0_48] : memref<1x16x256xf32, #tpu.memory_space<vmem>>, vector<1x15x256xf32>
    %98 = vector.shape_cast %97 : vector<1x15x256xf32> to vector<15x256xf32>
    %99 = arith.addf %96, %98 : vector<15x256xf32>
    %c0_49 = arith.constant 0 : index
    %c0_50 = arith.constant 0 : index
    %c0_51 = arith.constant 0 : index
    %100 = vector.load %arg14[%c0_49, %c0_50, %c0_51] : memref<1x15x256xf32, #tpu.memory_space<vmem>>, vector<1x15x256xf32>
    %101 = vector.shape_cast %100 : vector<1x15x256xf32> to vector<15x256xf32>
    %102 = vector.shape_cast %99 : vector<15x256xf32> to vector<1x15x256xf32>
    tpu.vector_store %arg14[%c0_49, %c0_50, %c0_51], %102 {strides = array<i32>} : memref<1x15x256xf32, #tpu.memory_space<vmem>>, vector<1x15x256xf32>,
    %c0_52 = arith.constant 0 : index
    %c0_53 = arith.constant 0 : index
    %103 = vector.load %arg7[%c0_52, %c0_53] : memref<256x1024xf32, #tpu.memory_space<vmem>>, vector<256x1024xf32>
    %cst_54 = arith.constant dense<0.000000e+00> : vector<15x1024xf32>
    %104 = tpu.matmul %91, %103, %cst_54 {dimension_numbers = #tpu.dot_dimension_numbers<[1], [0], [0], [1], [0, 0, 1, 1], [], []>} : vector<15x256xf32>, vector<256x1024xf32>, vector<15x1024xf32> -> vector<15x1024xf32>
    %c0_55 = arith.constant 0 : index
    %c0_56 = arith.constant 0 : index
    %105 = vector.load %arg8[%c0_55, %c0_56] : memref<256x256xf32, #tpu.memory_space<vmem>>, vector<256x256xf32>
    %cst_57 = arith.constant dense<0.000000e+00> : vector<15x256xf32>
    %106 = tpu.matmul %91, %105, %cst_57 {dimension_numbers = #tpu.dot_dimension_numbers<[1], [0], [0], [1], [0, 0, 1, 1], [], []>} : vector<15x256xf32>, vector<256x256xf32>, vector<15x256xf32> -> vector<15x256xf32>
    %c0_58 = arith.constant 0 : index
    %c0_59 = arith.constant 0 : index
    %107 = vector.load %arg9[%c0_58, %c0_59] : memref<1024x256xf32, #tpu.memory_space<vmem>>, vector<1024x256xf32>
    %cst_60 = arith.constant dense<0.000000e+00> : vector<15x256xf32>
    %108 = tpu.matmul %104, %107, %cst_60 {dimension_numbers = #tpu.dot_dimension_numbers<[1], [0], [0], [1], [0, 0, 1, 1], [], []>} : vector<15x1024xf32>, vector<1024x256xf32>, vector<15x256xf32> -> vector<15x256xf32>
    %109 = arith.addf %106, %108 : vector<15x256xf32>
    %c0_61 = arith.constant 0 : index
    %c0_62 = arith.constant 0 : index
    %110 = vector.load %arg10[%c0_61, %c0_62] : memref<1x256xf32, #tpu.memory_space<vmem>>, vector<1x256xf32>
    %111 = vector.broadcast %110 : vector<1x256xf32> to vector<15x256xf32>
    %112 = arith.addf %109, %111 : vector<15x256xf32>
    %113 = arith.addf %112, %81 : vector<15x256xf32>
    %c0_63 = arith.constant 0 : index
    %c0_64 = arith.constant 0 : index
    %114 = vector.load %arg11[%c0_63, %c0_64] : memref<1x256xf32, #tpu.memory_space<vmem>>, vector<1x256xf32>
    %115 = vector.broadcast %114 : vector<1x256xf32> to vector<15x256xf32>
    %116 = arith.mulf %113, %115 : vector<15x256xf32>
    %c0_65 = arith.constant 0 : index
    %c0_66 = arith.constant 0 : index
    %117 = vector.load %arg12[%c0_65, %c0_66] : memref<1x256xf32, #tpu.memory_space<vmem>>, vector<1x256xf32>
    %118 = vector.broadcast %117 : vector<1x256xf32> to vector<15x256xf32>
    %119 = arith.addf %116, %118 : vector<15x256xf32>
    %c0_67 = arith.constant 0 : index
    %c0_68 = arith.constant 0 : index
    %c0_69 = arith.constant 0 : index
    %120 = vector.load %arg13[%c0_67, %c0_68, %c0_69] : memref<1x15x256xf32, #tpu.memory_space<vmem>>, vector<1x15x256xf32>
    %121 = vector.shape_cast %120 : vector<1x15x256xf32> to vector<15x256xf32>
    %122 = vector.shape_cast %119 : vector<15x256xf32> to vector<1x15x256xf32>
    tpu.vector_store %arg13[%c0_67, %c0_68, %c0_69], %122 {strides = array<i32>} : memref<1x15x256xf32, #tpu.memory_space<vmem>>, vector<1x15x256xf32>,
    return
  }
  func.func @transform_0(%arg0: i32) -> (i32, i32, i32) {
    %c0_i32 = arith.constant 0 : i32
    %c0_i32_0 = arith.constant 0 : i32
    %c0_i32_1 = arith.constant 0 : i32
    return %arg0, %c0_i32, %c0_i32_0 : i32, i32, i32
  }
  func.func @transform_1(%arg0: i32) -> (i32, i32, i32) {
    %c0_i32 = arith.constant 0 : i32
    %c0_i32_0 = arith.constant 0 : i32
    %c0_i32_1 = arith.constant 0 : i32
    return %arg0, %c0_i32, %c0_i32_0 : i32, i32, i32
  }
  func.func @transform_2(%arg0: i32) -> (i32, i32, i32) {
    %c0_i32 = arith.constant 0 : i32
    %c0_i32_0 = arith.constant 0 : i32
    %c0_i32_1 = arith.constant 0 : i32
    %c0_i32_2 = arith.constant 0 : i32
    return %c0_i32, %c0_i32_0, %c0_i32_1 : i32, i32, i32
  }
  func.func @transform_3(%arg0: i32) -> (i32, i32) {
    %c0_i32 = arith.constant 0 : i32
    %c0_i32_0 = arith.constant 0 : i32
    %c0_i32_1 = arith.constant 0 : i32
    return %c0_i32, %c0_i32_0 : i32, i32
  }
  func.func @transform_4(%arg0: i32) -> (i32, i32) {
    %c0_i32 = arith.constant 0 : i32
    %c0_i32_0 = arith.constant 0 : i32
    %c0_i32_1 = arith.constant 0 : i32
    return %c0_i32, %c0_i32_0 : i32, i32
  }
  func.func @transform_5(%arg0: i32) -> (i32, i32) {
    %c0_i32 = arith.constant 0 : i32
    %c0_i32_0 = arith.constant 0 : i32
    %c0_i32_1 = arith.constant 0 : i32
    return %c0_i32, %c0_i32_0 : i32, i32
  }
  func.func @transform_6(%arg0: i32) -> (i32, i32) {
    %c0_i32 = arith.constant 0 : i32
    %c0_i32_0 = arith.constant 0 : i32
    %c0_i32_1 = arith.constant 0 : i32
    return %c0_i32, %c0_i32_0 : i32, i32
  }
  func.func @transform_7(%arg0: i32) -> (i32, i32) {
    %c0_i32 = arith.constant 0 : i32
    %c0_i32_0 = arith.constant 0 : i32
    %c0_i32_1 = arith.constant 0 : i32
    return %c0_i32, %c0_i32_0 : i32, i32
  }
  func.func @transform_8(%arg0: i32) -> (i32, i32) {
    %c0_i32 = arith.constant 0 : i32
    %c0_i32_0 = arith.constant 0 : i32
    %c0_i32_1 = arith.constant 0 : i32
    return %c0_i32, %c0_i32_0 : i32, i32
  }
  func.func @transform_9(%arg0: i32) -> (i32, i32) {
    %c0_i32 = arith.constant 0 : i32
    %c0_i32_0 = arith.constant 0 : i32
    %c0_i32_1 = arith.constant 0 : i32
    return %c0_i32, %c0_i32_0 : i32, i32
  }
  func.func @transform_10(%arg0: i32) -> (i32, i32) {
    %c0_i32 = arith.constant 0 : i32
    %c0_i32_0 = arith.constant 0 : i32
    %c0_i32_1 = arith.constant 0 : i32
    return %c0_i32, %c0_i32_0 : i32, i32
  }
  func.func @transform_11(%arg0: i32) -> (i32, i32) {
    %c0_i32 = arith.constant 0 : i32
    %c0_i32_0 = arith.constant 0 : i32
    %c0_i32_1 = arith.constant 0 : i32
    return %c0_i32, %c0_i32_0 : i32, i32
  }
  func.func @transform_12(%arg0: i32) -> (i32, i32, i32) {
    %c0_i32 = arith.constant 0 : i32
    %c0_i32_0 = arith.constant 0 : i32
    %c0_i32_1 = arith.constant 0 : i32
    return %arg0, %c0_i32, %c0_i32_0 : i32, i32, i32
  }
  func.func @transform_13(%arg0: i32) -> (i32, i32, i32) {
    %c0_i32 = arith.constant 0 : i32
    %c0_i32_0 = arith.constant 0 : i32
    %c0_i32_1 = arith.constant 0 : i32
    return %arg0, %c0_i32, %c0_i32_0 : i32, i32, i32
  }
}

module attributes {stable_mosaic.version = 11 : i64} {
  func.func @_layer_kernel(%arg0: i32, %arg1: memref<1x15x256xf32, #tpu.memory_space<vmem>>, %arg2: memref<1x15x256xf32, #tpu.memory_space<vmem>>, %arg3: memref<2x256x256xf32, #tpu.memory_space<vmem>>, %arg4: memref<1x256xf32, #tpu.memory_space<vmem>>, %arg5: memref<256x256xf32, #tpu.memory_space<vmem>>, %arg6: memref<1x256xf32, #tpu.memory_space<vmem>>, %arg7: memref<256x1024xf32, #tpu.memory_space<vmem>>, %arg8: memref<256x256xf32, #tpu.memory_space<vmem>>, %arg9: memref<1024x256xf32, #tpu.memory_space<vmem>>, %arg10: memref<1x256xf32, #tpu.memory_space<vmem>>, %arg11: memref<1x256xf32, #tpu.memory_space<vmem>>, %arg12: memref<1x256xf32, #tpu.memory_space<vmem>>, %arg13: memref<1x13x256xf32, #tpu.memory_space<vmem>>, %arg14: memref<1x13x256xf32, #tpu.memory_space<vmem>>) attributes {dimension_semantics = [#tpu.dimension_semantics<parallel>], iteration_bounds = array<i64: 2>, scalar_prefetch = 0 : i64, scratch_operands = 0 : i64, tpu.core_type = #tpu.core_type<tc>, window_params = [{transform_indices = @transform_0, window_bounds = array<i64: 1, 15, 256>}, {transform_indices = @transform_1, window_bounds = array<i64: 1, 15, 256>}, {pipeline_mode = #tpu.pipeline_mode<synchronous>, transform_indices = @transform_2, window_bounds = array<i64: 2, 256, 256>}, {pipeline_mode = #tpu.pipeline_mode<synchronous>, transform_indices = @transform_3, window_bounds = array<i64: 1, 256>}, {pipeline_mode = #tpu.pipeline_mode<synchronous>, transform_indices = @transform_4, window_bounds = array<i64: 256, 256>}, {pipeline_mode = #tpu.pipeline_mode<synchronous>, transform_indices = @transform_5, window_bounds = array<i64: 1, 256>}, {pipeline_mode = #tpu.pipeline_mode<synchronous>, transform_indices = @transform_6, window_bounds = array<i64: 256, 1024>}, {pipeline_mode = #tpu.pipeline_mode<synchronous>, transform_indices = @transform_7, window_bounds = array<i64: 256, 256>}, {pipeline_mode = #tpu.pipeline_mode<synchronous>, transform_indices = @transform_8, window_bounds = array<i64: 1024, 256>}, {pipeline_mode = #tpu.pipeline_mode<synchronous>, transform_indices = @transform_9, window_bounds = array<i64: 1, 256>}, {pipeline_mode = #tpu.pipeline_mode<synchronous>, transform_indices = @transform_10, window_bounds = array<i64: 1, 256>}, {pipeline_mode = #tpu.pipeline_mode<synchronous>, transform_indices = @transform_11, window_bounds = array<i64: 1, 256>}, {transform_indices = @transform_12, window_bounds = array<i64: 1, 13, 256>}, {transform_indices = @transform_13, window_bounds = array<i64: 1, 13, 256>}]} {
    %c0 = arith.constant 0 : index
    %c0_0 = arith.constant 0 : index
    %c0_1 = arith.constant 0 : index
    %0 = vector.load %arg1[%c0, %c0_0, %c0_1] : memref<1x15x256xf32, #tpu.memory_space<vmem>>, vector<1x13x256xf32>
    %1 = vector.shape_cast %0 : vector<1x13x256xf32> to vector<13x256xf32>
    %cst = arith.constant 0.707106769 : f32
    %2 = vector.broadcast %cst : f32 to vector<13x256xf32>
    %3 = arith.mulf %1, %2 : vector<13x256xf32>
    %4 = math.absf %3 : vector<13x256xf32>
    %cst_2 = arith.constant 0.327591091 : f32
    %5 = vector.broadcast %cst_2 : f32 to vector<13x256xf32>
    %6 = arith.mulf %5, %4 : vector<13x256xf32>
    %cst_3 = arith.constant 1.000000e+00 : f32
    %7 = vector.broadcast %cst_3 : f32 to vector<13x256xf32>
    %8 = arith.addf %7, %6 : vector<13x256xf32>
    %9 = tpu.reciprocal %8 {approx = true} : vector<13x256xf32> -> vector<13x256xf32>
    %cst_4 = arith.constant 1.06140542 : f32
    %10 = vector.broadcast %cst_4 : f32 to vector<13x256xf32>
    %11 = arith.mulf %10, %9 : vector<13x256xf32>
    %cst_5 = arith.constant -1.45315206 : f32
    %12 = vector.broadcast %cst_5 : f32 to vector<13x256xf32>
    %13 = arith.addf %11, %12 : vector<13x256xf32>
    %14 = arith.mulf %13, %9 : vector<13x256xf32>
    %cst_6 = arith.constant 1.42141378 : f32
    %15 = vector.broadcast %cst_6 : f32 to vector<13x256xf32>
    %16 = arith.addf %14, %15 : vector<13x256xf32>
    %17 = arith.mulf %16, %9 : vector<13x256xf32>
    %cst_7 = arith.constant -0.284496725 : f32
    %18 = vector.broadcast %cst_7 : f32 to vector<13x256xf32>
    %19 = arith.addf %17, %18 : vector<13x256xf32>
    %20 = arith.mulf %19, %9 : vector<13x256xf32>
    %cst_8 = arith.constant 0.254829586 : f32
    %21 = vector.broadcast %cst_8 : f32 to vector<13x256xf32>
    %22 = arith.addf %20, %21 : vector<13x256xf32>
    %23 = arith.mulf %22, %9 : vector<13x256xf32>
    %cst_9 = arith.constant 0.000000e+00 : f32
    %24 = vector.broadcast %cst_9 : f32 to vector<13x256xf32>
    %25 = arith.subf %24, %4 : vector<13x256xf32>
    %26 = arith.mulf %25, %4 : vector<13x256xf32>
    %27 = math.exp %26 : vector<13x256xf32>
    %28 = arith.mulf %23, %27 : vector<13x256xf32>
    %cst_10 = arith.constant 1.000000e+00 : f32
    %29 = vector.broadcast %cst_10 : f32 to vector<13x256xf32>
    %30 = arith.subf %29, %28 : vector<13x256xf32>
    %cst_11 = arith.constant 0.000000e+00 : f32
    %31 = vector.broadcast %cst_11 : f32 to vector<13x256xf32>
    %32 = arith.cmpf oge, %3, %31 : vector<13x256xf32>
    %cst_12 = arith.constant 0.000000e+00 : f32
    %33 = vector.broadcast %cst_12 : f32 to vector<13x256xf32>
    %34 = arith.subf %33, %30 : vector<13x256xf32>
    %35 = arith.select %32, %30, %34 : vector<13x256xi1>, vector<13x256xf32>
    %cst_13 = arith.constant 5.000000e-01 : f32
    %36 = vector.broadcast %cst_13 : f32 to vector<13x256xf32>
    %37 = arith.mulf %36, %1 : vector<13x256xf32>
    %cst_14 = arith.constant 1.000000e+00 : f32
    %38 = vector.broadcast %cst_14 : f32 to vector<13x256xf32>
    %39 = arith.addf %38, %35 : vector<13x256xf32>
    %40 = arith.mulf %37, %39 : vector<13x256xf32>
    %c0_15 = arith.constant 0 : index
    %c2 = arith.constant 2 : index
    %c0_16 = arith.constant 0 : index
    %41 = vector.load %arg1[%c0_15, %c2, %c0_16] : memref<1x15x256xf32, #tpu.memory_space<vmem>>, vector<1x13x256xf32>
    %42 = vector.shape_cast %41 : vector<1x13x256xf32> to vector<13x256xf32>
    %cst_17 = arith.constant 0.707106769 : f32
    %43 = vector.broadcast %cst_17 : f32 to vector<13x256xf32>
    %44 = arith.mulf %42, %43 : vector<13x256xf32>
    %45 = math.absf %44 : vector<13x256xf32>
    %cst_18 = arith.constant 0.327591091 : f32
    %46 = vector.broadcast %cst_18 : f32 to vector<13x256xf32>
    %47 = arith.mulf %46, %45 : vector<13x256xf32>
    %cst_19 = arith.constant 1.000000e+00 : f32
    %48 = vector.broadcast %cst_19 : f32 to vector<13x256xf32>
    %49 = arith.addf %48, %47 : vector<13x256xf32>
    %50 = tpu.reciprocal %49 {approx = true} : vector<13x256xf32> -> vector<13x256xf32>
    %cst_20 = arith.constant 1.06140542 : f32
    %51 = vector.broadcast %cst_20 : f32 to vector<13x256xf32>
    %52 = arith.mulf %51, %50 : vector<13x256xf32>
    %cst_21 = arith.constant -1.45315206 : f32
    %53 = vector.broadcast %cst_21 : f32 to vector<13x256xf32>
    %54 = arith.addf %52, %53 : vector<13x256xf32>
    %55 = arith.mulf %54, %50 : vector<13x256xf32>
    %cst_22 = arith.constant 1.42141378 : f32
    %56 = vector.broadcast %cst_22 : f32 to vector<13x256xf32>
    %57 = arith.addf %55, %56 : vector<13x256xf32>
    %58 = arith.mulf %57, %50 : vector<13x256xf32>
    %cst_23 = arith.constant -0.284496725 : f32
    %59 = vector.broadcast %cst_23 : f32 to vector<13x256xf32>
    %60 = arith.addf %58, %59 : vector<13x256xf32>
    %61 = arith.mulf %60, %50 : vector<13x256xf32>
    %cst_24 = arith.constant 0.254829586 : f32
    %62 = vector.broadcast %cst_24 : f32 to vector<13x256xf32>
    %63 = arith.addf %61, %62 : vector<13x256xf32>
    %64 = arith.mulf %63, %50 : vector<13x256xf32>
    %cst_25 = arith.constant 0.000000e+00 : f32
    %65 = vector.broadcast %cst_25 : f32 to vector<13x256xf32>
    %66 = arith.subf %65, %45 : vector<13x256xf32>
    %67 = arith.mulf %66, %45 : vector<13x256xf32>
    %68 = math.exp %67 : vector<13x256xf32>
    %69 = arith.mulf %64, %68 : vector<13x256xf32>
    %cst_26 = arith.constant 1.000000e+00 : f32
    %70 = vector.broadcast %cst_26 : f32 to vector<13x256xf32>
    %71 = arith.subf %70, %69 : vector<13x256xf32>
    %cst_27 = arith.constant 0.000000e+00 : f32
    %72 = vector.broadcast %cst_27 : f32 to vector<13x256xf32>
    %73 = arith.cmpf oge, %44, %72 : vector<13x256xf32>
    %cst_28 = arith.constant 0.000000e+00 : f32
    %74 = vector.broadcast %cst_28 : f32 to vector<13x256xf32>
    %75 = arith.subf %74, %71 : vector<13x256xf32>
    %76 = arith.select %73, %71, %75 : vector<13x256xi1>, vector<13x256xf32>
    %cst_29 = arith.constant 5.000000e-01 : f32
    %77 = vector.broadcast %cst_29 : f32 to vector<13x256xf32>
    %78 = arith.mulf %77, %42 : vector<13x256xf32>
    %cst_30 = arith.constant 1.000000e+00 : f32
    %79 = vector.broadcast %cst_30 : f32 to vector<13x256xf32>
    %80 = arith.addf %79, %76 : vector<13x256xf32>
    %81 = arith.mulf %78, %80 : vector<13x256xf32>
    %c0_31 = arith.constant 0 : index
    %c0_32 = arith.constant 0 : index
    %82 = vector.load %arg4[%c0_31, %c0_32] : memref<1x256xf32, #tpu.memory_space<vmem>>, vector<1x256xf32>
    %c0_33 = arith.constant 0 : index
    %c0_34 = arith.constant 0 : index
    %c0_35 = arith.constant 0 : index
    %83 = vector.load %arg3[%c0_33, %c0_34, %c0_35] : memref<2x256x256xf32, #tpu.memory_space<vmem>>, vector<1x256x256xf32>
    %84 = vector.shape_cast %83 : vector<1x256x256xf32> to vector<256x256xf32>
    %cst_36 = arith.constant dense<0.000000e+00> : vector<13x256xf32>
    %85 = tpu.matmul %40, %84, %cst_36 {dimension_numbers = #tpu.dot_dimension_numbers<[1], [0], [0], [1], [0, 0, 1, 1], [], []>} : vector<13x256xf32>, vector<256x256xf32>, vector<13x256xf32> -> vector<13x256xf32>
    %86 = vector.broadcast %82 : vector<1x256xf32> to vector<13x256xf32>
    %87 = arith.addf %86, %85 : vector<13x256xf32>
    %c1 = arith.constant 1 : index
    %c0_37 = arith.constant 0 : index
    %c0_38 = arith.constant 0 : index
    %88 = vector.load %arg3[%c1, %c0_37, %c0_38] : memref<2x256x256xf32, #tpu.memory_space<vmem>>, vector<1x256x256xf32>
    %89 = vector.shape_cast %88 : vector<1x256x256xf32> to vector<256x256xf32>
    %cst_39 = arith.constant dense<0.000000e+00> : vector<13x256xf32>
    %90 = tpu.matmul %81, %89, %cst_39 {dimension_numbers = #tpu.dot_dimension_numbers<[1], [0], [0], [1], [0, 0, 1, 1], [], []>} : vector<13x256xf32>, vector<256x256xf32>, vector<13x256xf32> -> vector<13x256xf32>
    %91 = arith.addf %87, %90 : vector<13x256xf32>
    %c0_40 = arith.constant 0 : index
    %c0_41 = arith.constant 0 : index
    %92 = vector.load %arg5[%c0_40, %c0_41] : memref<256x256xf32, #tpu.memory_space<vmem>>, vector<256x256xf32>
    %cst_42 = arith.constant dense<0.000000e+00> : vector<13x256xf32>
    %93 = tpu.matmul %91, %92, %cst_42 {dimension_numbers = #tpu.dot_dimension_numbers<[1], [0], [0], [1], [0, 0, 1, 1], [], []>} : vector<13x256xf32>, vector<256x256xf32>, vector<13x256xf32> -> vector<13x256xf32>
    %c0_43 = arith.constant 0 : index
    %c0_44 = arith.constant 0 : index
    %94 = vector.load %arg6[%c0_43, %c0_44] : memref<1x256xf32, #tpu.memory_space<vmem>>, vector<1x256xf32>
    %95 = vector.broadcast %94 : vector<1x256xf32> to vector<13x256xf32>
    %96 = arith.addf %93, %95 : vector<13x256xf32>
    %c0_45 = arith.constant 0 : index
    %c2_46 = arith.constant 2 : index
    %c0_47 = arith.constant 0 : index
    %97 = vector.load %arg2[%c0_45, %c2_46, %c0_47] : memref<1x15x256xf32, #tpu.memory_space<vmem>>, vector<1x13x256xf32>
    %98 = vector.shape_cast %97 : vector<1x13x256xf32> to vector<13x256xf32>
    %99 = arith.addf %96, %98 : vector<13x256xf32>
    %c0_48 = arith.constant 0 : index
    %c0_49 = arith.constant 0 : index
    %c0_50 = arith.constant 0 : index
    %100 = vector.load %arg14[%c0_48, %c0_49, %c0_50] : memref<1x13x256xf32, #tpu.memory_space<vmem>>, vector<1x13x256xf32>
    %101 = vector.shape_cast %100 : vector<1x13x256xf32> to vector<13x256xf32>
    %102 = vector.shape_cast %99 : vector<13x256xf32> to vector<1x13x256xf32>
    tpu.vector_store %arg14[%c0_48, %c0_49, %c0_50], %102 {strides = array<i32>} : memref<1x13x256xf32, #tpu.memory_space<vmem>>, vector<1x13x256xf32>,
    %c0_51 = arith.constant 0 : index
    %c0_52 = arith.constant 0 : index
    %103 = vector.load %arg7[%c0_51, %c0_52] : memref<256x1024xf32, #tpu.memory_space<vmem>>, vector<256x1024xf32>
    %cst_53 = arith.constant dense<0.000000e+00> : vector<13x1024xf32>
    %104 = tpu.matmul %91, %103, %cst_53 {dimension_numbers = #tpu.dot_dimension_numbers<[1], [0], [0], [1], [0, 0, 1, 1], [], []>} : vector<13x256xf32>, vector<256x1024xf32>, vector<13x1024xf32> -> vector<13x1024xf32>
    %c0_54 = arith.constant 0 : index
    %c0_55 = arith.constant 0 : index
    %105 = vector.load %arg8[%c0_54, %c0_55] : memref<256x256xf32, #tpu.memory_space<vmem>>, vector<256x256xf32>
    %cst_56 = arith.constant dense<0.000000e+00> : vector<13x256xf32>
    %106 = tpu.matmul %91, %105, %cst_56 {dimension_numbers = #tpu.dot_dimension_numbers<[1], [0], [0], [1], [0, 0, 1, 1], [], []>} : vector<13x256xf32>, vector<256x256xf32>, vector<13x256xf32> -> vector<13x256xf32>
    %c0_57 = arith.constant 0 : index
    %c0_58 = arith.constant 0 : index
    %107 = vector.load %arg9[%c0_57, %c0_58] : memref<1024x256xf32, #tpu.memory_space<vmem>>, vector<1024x256xf32>
    %cst_59 = arith.constant dense<0.000000e+00> : vector<13x256xf32>
    %108 = tpu.matmul %104, %107, %cst_59 {dimension_numbers = #tpu.dot_dimension_numbers<[1], [0], [0], [1], [0, 0, 1, 1], [], []>} : vector<13x1024xf32>, vector<1024x256xf32>, vector<13x256xf32> -> vector<13x256xf32>
    %109 = arith.addf %106, %108 : vector<13x256xf32>
    %c0_60 = arith.constant 0 : index
    %c0_61 = arith.constant 0 : index
    %110 = vector.load %arg10[%c0_60, %c0_61] : memref<1x256xf32, #tpu.memory_space<vmem>>, vector<1x256xf32>
    %111 = vector.broadcast %110 : vector<1x256xf32> to vector<13x256xf32>
    %112 = arith.addf %109, %111 : vector<13x256xf32>
    %113 = arith.addf %112, %81 : vector<13x256xf32>
    %c0_62 = arith.constant 0 : index
    %c0_63 = arith.constant 0 : index
    %114 = vector.load %arg11[%c0_62, %c0_63] : memref<1x256xf32, #tpu.memory_space<vmem>>, vector<1x256xf32>
    %115 = vector.broadcast %114 : vector<1x256xf32> to vector<13x256xf32>
    %116 = arith.mulf %113, %115 : vector<13x256xf32>
    %c0_64 = arith.constant 0 : index
    %c0_65 = arith.constant 0 : index
    %117 = vector.load %arg12[%c0_64, %c0_65] : memref<1x256xf32, #tpu.memory_space<vmem>>, vector<1x256xf32>
    %118 = vector.broadcast %117 : vector<1x256xf32> to vector<13x256xf32>
    %119 = arith.addf %116, %118 : vector<13x256xf32>
    %c0_66 = arith.constant 0 : index
    %c0_67 = arith.constant 0 : index
    %c0_68 = arith.constant 0 : index
    %120 = vector.load %arg13[%c0_66, %c0_67, %c0_68] : memref<1x13x256xf32, #tpu.memory_space<vmem>>, vector<1x13x256xf32>
    %121 = vector.shape_cast %120 : vector<1x13x256xf32> to vector<13x256xf32>
    %122 = vector.shape_cast %119 : vector<13x256xf32> to vector<1x13x256xf32>
    tpu.vector_store %arg13[%c0_66, %c0_67, %c0_68], %122 {strides = array<i32>} : memref<1x13x256xf32, #tpu.memory_space<vmem>>, vector<1x13x256xf32>,
    return
  }
  func.func @transform_0(%arg0: i32) -> (i32, i32, i32) {
    %c0_i32 = arith.constant 0 : i32
    %c0_i32_0 = arith.constant 0 : i32
    %c0_i32_1 = arith.constant 0 : i32
    return %arg0, %c0_i32, %c0_i32_0 : i32, i32, i32
  }
  func.func @transform_1(%arg0: i32) -> (i32, i32, i32) {
    %c0_i32 = arith.constant 0 : i32
    %c0_i32_0 = arith.constant 0 : i32
    %c0_i32_1 = arith.constant 0 : i32
    return %arg0, %c0_i32, %c0_i32_0 : i32, i32, i32
  }
  func.func @transform_2(%arg0: i32) -> (i32, i32, i32) {
    %c0_i32 = arith.constant 0 : i32
    %c0_i32_0 = arith.constant 0 : i32
    %c0_i32_1 = arith.constant 0 : i32
    %c0_i32_2 = arith.constant 0 : i32
    return %c0_i32, %c0_i32_0, %c0_i32_1 : i32, i32, i32
  }
  func.func @transform_3(%arg0: i32) -> (i32, i32) {
    %c0_i32 = arith.constant 0 : i32
    %c0_i32_0 = arith.constant 0 : i32
    %c0_i32_1 = arith.constant 0 : i32
    return %c0_i32, %c0_i32_0 : i32, i32
  }
  func.func @transform_4(%arg0: i32) -> (i32, i32) {
    %c0_i32 = arith.constant 0 : i32
    %c0_i32_0 = arith.constant 0 : i32
    %c0_i32_1 = arith.constant 0 : i32
    return %c0_i32, %c0_i32_0 : i32, i32
  }
  func.func @transform_5(%arg0: i32) -> (i32, i32) {
    %c0_i32 = arith.constant 0 : i32
    %c0_i32_0 = arith.constant 0 : i32
    %c0_i32_1 = arith.constant 0 : i32
    return %c0_i32, %c0_i32_0 : i32, i32
  }
  func.func @transform_6(%arg0: i32) -> (i32, i32) {
    %c0_i32 = arith.constant 0 : i32
    %c0_i32_0 = arith.constant 0 : i32
    %c0_i32_1 = arith.constant 0 : i32
    return %c0_i32, %c0_i32_0 : i32, i32
  }
  func.func @transform_7(%arg0: i32) -> (i32, i32) {
    %c0_i32 = arith.constant 0 : i32
    %c0_i32_0 = arith.constant 0 : i32
    %c0_i32_1 = arith.constant 0 : i32
    return %c0_i32, %c0_i32_0 : i32, i32
  }
  func.func @transform_8(%arg0: i32) -> (i32, i32) {
    %c0_i32 = arith.constant 0 : i32
    %c0_i32_0 = arith.constant 0 : i32
    %c0_i32_1 = arith.constant 0 : i32
    return %c0_i32, %c0_i32_0 : i32, i32
  }
  func.func @transform_9(%arg0: i32) -> (i32, i32) {
    %c0_i32 = arith.constant 0 : i32
    %c0_i32_0 = arith.constant 0 : i32
    %c0_i32_1 = arith.constant 0 : i32
    return %c0_i32, %c0_i32_0 : i32, i32
  }
  func.func @transform_10(%arg0: i32) -> (i32, i32) {
    %c0_i32 = arith.constant 0 : i32
    %c0_i32_0 = arith.constant 0 : i32
    %c0_i32_1 = arith.constant 0 : i32
    return %c0_i32, %c0_i32_0 : i32, i32
  }
  func.func @transform_11(%arg0: i32) -> (i32, i32) {
    %c0_i32 = arith.constant 0 : i32
    %c0_i32_0 = arith.constant 0 : i32
    %c0_i32_1 = arith.constant 0 : i32
    return %c0_i32, %c0_i32_0 : i32, i32
  }
  func.func @transform_12(%arg0: i32) -> (i32, i32, i32) {
    %c0_i32 = arith.constant 0 : i32
    %c0_i32_0 = arith.constant 0 : i32
    %c0_i32_1 = arith.constant 0 : i32
    return %arg0, %c0_i32, %c0_i32_0 : i32, i32, i32
  }
  func.func @transform_13(%arg0: i32) -> (i32, i32, i32) {
    %c0_i32 = arith.constant 0 : i32
    %c0_i32_0 = arith.constant 0 : i32
    %c0_i32_1 = arith.constant 0 : i32
    return %arg0, %c0_i32, %c0_i32_0 : i32, i32, i32
  }
}

</mosaic_0001>

<bundles_post_ra>
// kernel: tile.53
= control target key start
LH: loop header
LB: loop body
LE: loop exit
PB: predicated region body
PF: predicated region fallthrough
CT: control target
= control target key end

     0   :  { %s22_s0 = inlined_call_operand.vmem [shape: f32[32], index: 0, kind: input, shape index: {}]   ;;  %s23_s1 = inlined_call_operand.vmem [shape: f32[8,32], index: 1, kind: output, shape index: {}]  }
   0x1   :  { %v4_v0 = vld [vmem:[%s22_s0] ss:$0 sm:$0xff] }
   0x2   :  { %5 = vst [vmem:[%s23_s1] sm:$0xff] %v4_v0 }

// kernel: tile.54
= control target key start
LH: loop header
LB: loop body
LE: loop exit
PB: predicated region body
PF: predicated region fallthrough
CT: control target
= control target key end

     0   :  { %s7_s6 = smov 3  ;;  %s46_s9 = smov 96   ;;  %vm4_vm0 = vcmask 261120   ;;  %vm11_vm1 = vcmask 1048320   ;;  %vm18_vm2 = vcmask 785920   ;;  %vm25_vm3 = vcmask 523520   ;;  %s77_s0 = inlined_call_operand.vmem [shape: f32[8,32], index: 0, kind: input, shape index: {}]   ;;  %s78_s1 = inlined_call_operand.vmem [shape: f32[1,256], index: 1, kind: output, shape index: {}]  }
   0x1   :  { %v39_v0 = vld [vmem:[%s77_s0 + $0x3] ss:$4 sm:%s7_s6]   ;;  %s21_s10 = smov 3  ;;  %s14_s13 = smov 3 }
   0x2   :  { %9 = vrot.lane.b32.xlu0 %v39_v0, %s46_s9  ;;  %v41_v1 = vld [vmem:[%s77_s0 + $0x1] ss:$4 sm:%s21_s10]   ;;  %s47_s14 = smov 32   ;;  %s48_s17 = smov 64  }
   0x3   :  { %23 = vrot.lane.b32.xlu1 %v41_v1, %s47_s14  ;;  %v40_v2 = vld [vmem:[%s77_s0 + $0x2] ss:$4 sm:%s14_s13]   ;;  %s2_s18 = smov 3 }
   0x4   :  { %v3_v3 = vld [vmem:[%s77_s0] ss:$4 sm:%s2_s18]  }
   0x5   :  { %5 = vst.msk [vmem:[#allocation0] ss:$8 sm:$0x3] %vm4_vm0, %v3_v3  }
   0xa   :  { %16 = vrot.lane.b32.xlu0 %v40_v2, %s48_s17 }
  0x74   :  { %v10_v4 = vpop.permute.xlu0 %9  }
  0x75   :  { %12 = vst.msk [vmem:[#allocation0] ss:$8 sm:$0x3] %vm11_vm1, %v10_v4   ;;  %v24_v5 = vpop.permute.xlu1 %23  }
  0x7c   :  { %v17_v6 = vpop.permute.xlu0 %16  }
  0x7d   :  { %19 = vst.msk [vmem:[#allocation0] ss:$8 sm:$0x3] %vm18_vm2, %v17_v6  }
  0x7e   :  { %26 = vst.msk [vmem:[#allocation0] ss:$8 sm:$0x3] %vm25_vm3, %v24_v5  }
  0x85   :  { %v29_v7 = vld [vmem:[#allocation0] sm:$0x1]  ;;  %v34_v8 = vld [vmem:[#allocation0 + $0x8] sm:$0x1] }
  0x86   :  { %32 = vst [vmem:[%s78_s1] sm:$0x1] %v29_v7 }
  0x87   :  { %42 = vst [vmem:[%s78_s1 + $0x1] sm:$0x1] %v34_v8 }

// kernel: convblock_forward.2
= control target key start
LH: loop header
LB: loop body
LE: loop exit
PB: predicated region body
PF: predicated region fallthrough
CT: control target
= control target key end

     0   :  { %s2963_s25 = smov 0   ;;  %s5690_s0 = inlined_call_operand.vmem [shape: f32[2,16,256], index: 0, kind: input, shape index: {}]   ;;  %s5691_s1 = inlined_call_operand.vmem [shape: f32[2,16,256], index: 1, kind: input, shape index: {}]   ;;  %s5692_s2 = inlined_call_operand.vmem [shape: f32[2,256,256], index: 2, kind: input, shape index: {}]   ;;  %s5693_s3 = inlined_call_operand.vmem [shape: f32[1,256], index: 3, kind: input, shape index: {}]   ;;  %s5694_s4 = inlined_call_operand.vmem [shape: f32[256,256], index: 4, kind: input, shape index: {}]   ;;  %s5695_s5 = inlined_call_operand.vmem [shape: f32[1,256], index: 5, kind: input, shape index: {}]   ;;  %s5696_s6 = inlined_call_operand.vmem [shape: f32[256,1024], index: 6, kind: input, shape index: {}]   ;;  %s5697_s7 = inlined_call_operand.vmem [shape: f32[256,256], index: 7, kind: input, shape index: {}]   ;;  %s5698_s8 = inlined_call_operand.vmem [shape: f32[1024,256], index: 8, kind: input, shape index: {}]   ;;  %s5699_s9 = inlined_call_operand.vmem [shape: f32[1,256], index: 9, kind: input, shape index: {}]   ;;  %s5700_s10 = inlined_call_operand.vmem [shape: f32[1,256], index: 10, kind: input, shape index: {}]   ;;  %s5701_s11 = inlined_call_operand.vmem [shape: f32[1,256], index: 11, kind: input, shape index: {}]   ;;  %s5702_s12 = inlined_call_operand.vmem [shape: f32[2,15,256], index: 12, kind: output, shape index: {0}]   ;;  %s5703_s13 = inlined_call_operand.vmem [shape: f32[2,15,256], index: 13, kind: output, shape index: {1}]  }
   0x1 LB: > { %s2762_s26 = sadd.s32 4294967295, %s2891_s25   ;;  %p2766_p0 = scmp.ge.s32.totalorder %s2891_s25, 1  ;;  %s2891_s25 = sphi %s2963_s25, %s24_s25  }
   0x2   : > { %p400_p1 = scmp.lt.s32.totalorder %s2891_s25, 3 }
   0x4   : > { %p401_p2 = pnand %p2766_p0, %p400_p1 }
   0x5   : > { %p3099_p3 = scmp.lt.s32.totalorder (!%p401_p2), %s2762_s26, 1 }
   0x6   : > { %404 = sbr.rel (%p401_p2) target bundleno = 714 (0x2ca), region = 68 }
   0xb   : > { %v721_v0 = vld [vmem:[%s5692_s2 + $0xf0] sm:$0xff]  ;;  %v722_v2 = vld [vmem:[%s5692_s2 + $0xf8] sm:$0xff]  ;;  %v719_v4 = vld [vmem:[%s5692_s2 + $0xe0] sm:$0xff]  ;;  %s5706_s26 = smov (!%p3099_p3, %s2762_s26), 1  ;;  %vm925_vm6 = vcmask 1046528  }
   0xc   : > { %v753_v1 = vld [vmem:[%s5692_s2 + $0x1f0] sm:$0xff]  ;;  %755 = vmatpush.msra.mxu0 %v721_v0  ;;  %v754_v3 = vld [vmem:[%s5692_s2 + $0x1f8] sm:$0xff]  ;;  %v751_v5 = vld [vmem:[%s5692_s2 + $0x1e0] sm:$0xff]  ;;  %801 = vmatpush.msra.mxu2 %v722_v2  ;;  %s3155_s23 = sshll.u32 %s5706_s26, 5 }
   0xd   : > { %778 = vmatpush.msra.mxu1 %v753_v1  ;;  %824 = vmatpush.msra.mxu3 %v754_v3  ;;  %v720_v6 = vld [vmem:[%s5692_s2 + $0xe8] sm:$0xff]  ;;  %v717_v8 = vld [vmem:[%s5692_s2 + $0xd0] sm:$0xff]  ;;  %v718_v10 = vld [vmem:[%s5692_s2 + $0xd8] sm:$0xff]  ;;  %s3185_s29 = scalar_lea.vmem %s5690_s0, %s3155_s23  ;;  %s4615_s14 = scalar_lea.vmem %s5691_s1, %s3155_s23 }
   0xe   : > { %v752_v7 = vld [vmem:[%s5692_s2 + $0x1e8] sm:$0xff]  ;;  %756 = vmatpush.msra.mxu0 %v719_v4  ;;  %v749_v9 = vld [vmem:[%s5692_s2 + $0x1d0] sm:$0xff]  ;;  %v750_v11 = vld [vmem:[%s5692_s2 + $0x1d8] sm:$0xff]  ;;  %802 = vmatpush.msra.mxu2 %v720_v6  ;;  %s4722_s30 = scalar_lea.vmem %s5703_s13, %s3155_s23 }
   0xf   : > { %779 = vmatpush.msra.mxu1 %v751_v5  ;;  %825 = vmatpush.msra.mxu3 %v752_v7  ;;  %v715_v12 = vld [vmem:[%s5692_s2 + $0xc0] sm:$0xff]  ;;  %v716_v14 = vld [vmem:[%s5692_s2 + $0xc8] sm:$0xff]  ;;  %v713_v16 = vld [vmem:[%s5692_s2 + $0xb0] sm:$0xff] }
  0x10   : > { %v747_v13 = vld [vmem:[%s5692_s2 + $0x1c0] sm:$0xff]  ;;  %757 = vmatpush.msra.mxu0 %v717_v8  ;;  %v748_v15 = vld [vmem:[%s5692_s2 + $0x1c8] sm:$0xff]  ;;  %803 = vmatpush.msra.mxu2 %v718_v10  ;;  %v745_v17 = vld [vmem:[%s5692_s2 + $0x1b0] sm:$0xff] }
  0x11   : > { %780 = vmatpush.msra.mxu1 %v749_v9  ;;  %826 = vmatpush.msra.mxu3 %v750_v11  ;;  %v714_v18 = vld [vmem:[%s5692_s2 + $0xb8] sm:$0xff]  ;;  %v711_v20 = vld [vmem:[%s5692_s2 + $0xa0] sm:$0xff]  ;;  %v712_v22 = vld [vmem:[%s5692_s2 + $0xa8] sm:$0xff] }
  0x12   : > { %758 = vmatpush.msra.mxu0 %v715_v12  ;;  %v746_v19 = vld [vmem:[%s5692_s2 + $0x1b8] sm:$0xff]  ;;  %804 = vmatpush.msra.mxu2 %v716_v14  ;;  %v743_v21 = vld [vmem:[%s5692_s2 + $0x1a0] sm:$0xff]  ;;  %v744_v23 = vld [vmem:[%s5692_s2 + $0x1a8] sm:$0xff] }
  0x13   : > { %781 = vmatpush.msra.mxu1 %v747_v13  ;;  %827 = vmatpush.msra.mxu3 %v748_v15  ;;  %v709_v24 = vld [vmem:[%s5692_s2 + $0x90] sm:$0xff]  ;;  %v710_v26 = vld [vmem:[%s5692_s2 + $0x98] sm:$0xff]  ;;  %v707_v28 = vld [vmem:[%s5692_s2 + $0x80] sm:$0xff] }
  0x14   : > { %759 = vmatpush.msra.mxu0 %v713_v16  ;;  %805 = vmatpush.msra.mxu2 %v714_v18  ;;  %v741_v25 = vld [vmem:[%s5692_s2 + $0x190] sm:$0xff]  ;;  %v742_v27 = vld [vmem:[%s5692_s2 + $0x198] sm:$0xff]  ;;  %v739_v29 = vld [vmem:[%s5692_s2 + $0x180] sm:$0xff] }
  0x15   : > { %782 = vmatpush.msra.mxu1 %v745_v17  ;;  %828 = vmatpush.msra.mxu3 %v746_v19  ;;  %v708_v30 = vld [vmem:[%s5692_s2 + $0x88] sm:$0xff]  ;;  %v705_v32 = vld [vmem:[%s5692_s2 + $0x70] sm:$0xff]  ;;  %v706_v34 = vld [vmem:[%s5692_s2 + $0x78] sm:$0xff] }
  0x16   : > { %760 = vmatpush.msra.mxu0 %v711_v20  ;;  %806 = vmatpush.msra.mxu2 %v712_v22  ;;  %v740_v31 = vld [vmem:[%s5692_s2 + $0x188] sm:$0xff]  ;;  %v737_v33 = vld [vmem:[%s5692_s2 + $0x170] sm:$0xff]  ;;  %v738_v35 = vld [vmem:[%s5692_s2 + $0x178] sm:$0xff] }
  0x17   : > { %783 = vmatpush.msra.mxu1 %v743_v21  ;;  %829 = vmatpush.msra.mxu3 %v744_v23  ;;  %v703_v36 = vld [vmem:[%s5692_s2 + $0x60] sm:$0xff]  ;;  %v704_v38 = vld [vmem:[%s5692_s2 + $0x68] sm:$0xff]  ;;  %v701_v40 = vld [vmem:[%s5692_s2 + $0x50] sm:$0xff] }
  0x18   : > { %761 = vmatpush.msra.mxu0 %v709_v24  ;;  %807 = vmatpush.msra.mxu2 %v710_v26  ;;  %v735_v37 = vld [vmem:[%s5692_s2 + $0x160] sm:$0xff]  ;;  %v736_v39 = vld [vmem:[%s5692_s2 + $0x168] sm:$0xff]  ;;  %v733_v41 = vld [vmem:[%s5692_s2 + $0x150] sm:$0xff] }
  0x19   : > { %784 = vmatpush.msra.mxu1 %v741_v25  ;;  %830 = vmatpush.msra.mxu3 %v742_v27  ;;  %v702_v42 = vld [vmem:[%s5692_s2 + $0x58] sm:$0xff]  ;;  %v699_v44 = vld [vmem:[%s5692_s2 + $0x40] sm:$0xff]  ;;  %v700_v46 = vld [vmem:[%s5692_s2 + $0x48] sm:$0xff] }
  0x1a   : > { %762 = vmatpush.msra.mxu0 %v707_v28  ;;  %808 = vmatpush.msra.mxu2 %v708_v30  ;;  %v734_v43 = vld [vmem:[%s5692_s2 + $0x158] sm:$0xff]  ;;  %v731_v45 = vld [vmem:[%s5692_s2 + $0x140] sm:$0xff]  ;;  %v732_v47 = vld [vmem:[%s5692_s2 + $0x148] sm:$0xff] }
  0x1b   : > { %785 = vmatpush.msra.mxu1 %v739_v29  ;;  %831 = vmatpush.msra.mxu3 %v740_v31  ;;  %v697_v48 = vld [vmem:[%s5692_s2 + $0x30] sm:$0xff]  ;;  %v698_v50 = vld [vmem:[%s5692_s2 + $0x38] sm:$0xff]  ;;  %v695_v52 = vld [vmem:[%s5692_s2 + $0x20] sm:$0xff] }
  0x1c   : > { %763 = vmatpush.msra.mxu0 %v705_v32  ;;  %809 = vmatpush.msra.mxu2 %v706_v34  ;;  %v729_v49 = vld [vmem:[%s5692_s2 + $0x130] sm:$0xff]  ;;  %v730_v51 = vld [vmem:[%s5692_s2 + $0x138] sm:$0xff]  ;;  %v727_v53 = vld [vmem:[%s5692_s2 + $0x120] sm:$0xff] }
  0x1d   : > { %786 = vmatpush.msra.mxu1 %v737_v33  ;;  %832 = vmatpush.msra.mxu3 %v738_v35  ;;  %v696_v54 = vld [vmem:[%s5692_s2 + $0x28] sm:$0xff]  ;;  %v693_v56 = vld [vmem:[%s5692_s2 + $0x10] sm:$0xff]  ;;  %v694_v58 = vld [vmem:[%s5692_s2 + $0x18] sm:$0xff] }
  0x1e   : > { %764 = vmatpush.msra.mxu0 %v703_v36  ;;  %810 = vmatpush.msra.mxu2 %v704_v38  ;;  %v728_v55 = vld [vmem:[%s5692_s2 + $0x128] sm:$0xff]  ;;  %v725_v57 = vld [vmem:[%s5692_s2 + $0x110] sm:$0xff]  ;;  %v726_v59 = vld [vmem:[%s5692_s2 + $0x118] sm:$0xff] }
  0x1f   : > { %787 = vmatpush.msra.mxu1 %v735_v37  ;;  %833 = vmatpush.msra.mxu3 %v736_v39  ;;  %v691_v60 = vld [vmem:[%s5692_s2] sm:$0xff]  ;;  %v692_v62 = vld [vmem:[%s5692_s2 + $0x8] sm:$0xff]  ;;  %v2805_v0 = vld [vmem:[%s5692_s2 + $0x2f0] sm:$0xff] }
  0x20   : > { %765 = vmatpush.msra.mxu0 %v701_v40  ;;  %811 = vmatpush.msra.mxu2 %v702_v42  ;;  %v723_v61 = vld [vmem:[%s5692_s2 + $0x100] sm:$0xff]  ;;  %v724_v63 = vld [vmem:[%s5692_s2 + $0x108] sm:$0xff]  ;;  %v2837_v1 = vld [vmem:[%s5692_s2 + $0x3f0] sm:$0xff] }
  0x21   : > { %788 = vmatpush.msra.mxu1 %v733_v41  ;;  %834 = vmatpush.msra.mxu3 %v734_v43  ;;  %v2806_v2 = vld [vmem:[%s5692_s2 + $0x2f8] sm:$0xff]  ;;  %v2803_v4 = vld [vmem:[%s5692_s2 + $0x2e0] sm:$0xff]  ;;  %v2804_v6 = vld [vmem:[%s5692_s2 + $0x2e8] sm:$0xff] }
  0x22   : > { %766 = vmatpush.msra.mxu0 %v699_v44  ;;  %812 = vmatpush.msra.mxu2 %v700_v46  ;;  %v2838_v3 = vld [vmem:[%s5692_s2 + $0x3f8] sm:$0xff]  ;;  %v2835_v5 = vld [vmem:[%s5692_s2 + $0x3e0] sm:$0xff]  ;;  %v2836_v7 = vld [vmem:[%s5692_s2 + $0x3e8] sm:$0xff] }
  0x23   : > { %789 = vmatpush.msra.mxu1 %v731_v45  ;;  %835 = vmatpush.msra.mxu3 %v732_v47  ;;  %v2801_v8 = vld [vmem:[%s5692_s2 + $0x2d0] sm:$0xff]  ;;  %v3212_v10 = vld [vmem:[%s3185_s29] sm:$0xff]  ;;  %v3215_v11 = vld [vmem:[%s3185_s29 + $0x8] sm:$0xff] }
  0x24   : > { %767 = vmatpush.msra.mxu0 %v697_v48  ;;  %813 = vmatpush.msra.mxu2 %v698_v50  ;;  %v2833_v9 = vld [vmem:[%s5692_s2 + $0x3d0] sm:$0xff]  ;;  %v2802_v13 = vld [vmem:[%s5692_s2 + $0x2d8] sm:$0xff]  ;;  %v3227_v15 = vmul.f32 0.70710677, %v3212_v10  ;;  %v3230_v16 = vmul.f32 0.70710677, %v3215_v11 }
  0x25   : > { %790 = vmatpush.msra.mxu1 %v729_v49  ;;  %836 = vmatpush.msra.mxu3 %v730_v51  ;;  %v3218_v12 = vld [vmem:[%s3185_s29 + $0x10] sm:$0x7f]  ;;  %v2834_v14 = vld [vmem:[%s5692_s2 + $0x3d8] sm:$0xff]  ;;  %v2799_v18 = vld [vmem:[%s5692_s2 + $0x2c0] sm:$0xff] }
  0x26   : > { %768 = vmatpush.msra.mxu0 %v695_v52  ;;  %814 = vmatpush.msra.mxu2 %v696_v54  ;;  %v3233_v17 = vmul.f32 0.70710677, %v3218_v12  ;;  %v2831_v19 = vld [vmem:[%s5692_s2 + $0x3c0] sm:$0xff]  ;;  %v3242_v20 = vld [vmem:[%s3185_s29 + $0x18] sm:$0x7f]  ;;  %v2800_v21 = vld [vmem:[%s5692_s2 + $0x2c8] sm:$0xff] }
  0x27   : > { %791 = vmatpush.msra.mxu1 %v727_v53  ;;  %837 = vmatpush.msra.mxu3 %v728_v55  ;;  %v2832_v22 = vld [vmem:[%s5692_s2 + $0x3c8] sm:$0xff]  ;;  %v482_v23 = vand.u32 2147483647, %v3227_v15  ;;  %v483_v24 = vand.u32 2147483647, %v3230_v16  ;;  %v2797_v26 = vld [vmem:[%s5692_s2 + $0x2b0] sm:$0xff] }
  0x28   : > { %769 = vmatpush.msra.mxu0 %v693_v56  ;;  %815 = vmatpush.msra.mxu2 %v694_v58  ;;  %v484_v25 = vand.u32 2147483647, %v3233_v17  ;;  %v2829_v27 = vld [vmem:[%s5692_s2 + $0x3b0] sm:$0xff]  ;;  %v3260_v28 = vmul.f32 0.70710677, %v3242_v20  ;;  %v2798_v30 = vld [vmem:[%s5692_s2 + $0x2b8] sm:$0xff] }
  0x29   : > { %792 = vmatpush.msra.mxu1 %v725_v57  ;;  %838 = vmatpush.msra.mxu3 %v726_v59  ;;  %v3263_v29 = vld [vmem:[%s3185_s29] sm:$0xfe]  ;;  %v486_v31 = vmul.f32 0.3275911, %v482_v23  ;;  %v534_v32 = vsub.f32 0.0, %v482_v23  ;;  %v535_v34 = vsub.f32 0.0, %v483_v24 }
  0x2a   : > { %770 = vmatpush.msra.mxu0 %v691_v60  ;;  %816 = vmatpush.msra.mxu2 %v692_v62  ;;  %v487_v33 = vmul.f32 0.3275911, %v483_v24  ;;  %v488_v35 = vmul.f32 0.3275911, %v484_v25  ;;  %v536_v36 = vsub.f32 0.0, %v484_v25  ;;  %v2830_v38 = vld [vmem:[%s5692_s2 + $0x3b8] sm:$0xff] }
  0x2b   : > { %793 = vmatpush.msra.mxu1 %v723_v61  ;;  %839 = vmatpush.msra.mxu3 %v724_v63  ;;  %v3269_v37 = vand.u32 2147483647, %v3260_v28  ;;  %v2795_v39 = vld [vmem:[%s5692_s2 + $0x2a0] sm:$0xff]  ;;  %v490_v40 = vadd.f32 1.0, %v486_v31  ;;  %v3278_v42 = vmul.f32 0.70710677, %v3263_v29  ;;  %v538_v49 = vmul.f32 %v534_v32, %v482_v23 }
  0x2c   : > { %936 = vmatpush.msrb.mxu0 %v2805_v0  ;;  %982 = vmatpush.msrb.mxu2 %v2806_v2  ;;  %v491_v41 = vadd.f32 1.0, %v487_v33  ;;  %v2827_v43 = vld [vmem:[%s5692_s2 + $0x3a0] sm:$0xff]  ;;  %v2796_v44 = vld [vmem:[%s5692_s2 + $0x2a8] sm:$0xff]  ;;  %v3287_v45 = vld [vmem:[%s3185_s29 + $0x10] sm:$0xff]  ;;  %v492_v50 = vadd.f32 1.0, %v488_v35  ;;  %v539_v55 = vmul.f32 %v535_v34, %v483_v24  ;;  %v540_v56 = vmul.f32 %v536_v36, %v484_v25 }
  0x2d   : > { %959 = vmatpush.msrb.mxu1 %v2837_v1  ;;  %1005 = vmatpush.msrb.mxu3 %v2838_v3  ;;  %v2828_v46 = vld [vmem:[%s5692_s2 + $0x3a8] sm:$0xff]  ;;  %v2793_v47 = vld [vmem:[%s5692_s2 + $0x290] sm:$0xff]  ;;  %2853 = vrcp.f32 %v490_v40  ;;  %v489_v51 = vmul.f32 0.3275911, %v3269_v37  ;;  %v2794_v52 = vld [vmem:[%s5692_s2 + $0x298] sm:$0xff]  ;;  %v537_v63 = vsub.f32 0.0, %v3269_v37 }
  0x2e   : > { %937 = vmatpush.msrb.mxu0 %v2803_v4  ;;  %983 = vmatpush.msrb.mxu2 %v2804_v6  ;;  %v2825_v48 = vld [vmem:[%s5692_s2 + $0x390] sm:$0xff]  ;;  %v2826_v53 = vld [vmem:[%s5692_s2 + $0x398] sm:$0xff]  ;;  %v2791_v54 = vld [vmem:[%s5692_s2 + $0x280] sm:$0xff]  ;;  %2855 = vrcp.f32 %v491_v41  ;;  %v3312_v59 = vmul.f32 0.70710677, %v3287_v45  ;;  %vm558_vm0 = vcmp.ge.f32.partialorder %v3227_v15, 0.0 }
  0x2f   : > { %960 = vmatpush.msrb.mxu1 %v2835_v5  ;;  %1006 = vmatpush.msrb.mxu3 %v2836_v7  ;;  %v2823_v57 = vld [vmem:[%s5692_s2 + $0x380] sm:$0xff]  ;;  %v493_v58 = vadd.f32 1.0, %v489_v51  ;;  %v590_v60 = vand.u32 2147483647, %v3278_v42  ;;  %v2792_v61 = vld [vmem:[%s5692_s2 + $0x288] sm:$0xff]  ;;  %2857 = vrcp.f32 %v492_v50  ;;  %v3328_v4 = vld [vmem:[%s3185_s29 + $0x18] sm:$0xff]  ;;  %v541_v25 = vmul.f32 %v537_v63, %v3269_v37 }
  0x30   : > { %938 = vmatpush.msrb.mxu0 %v2801_v8  ;;  %984 = vmatpush.msrb.mxu2 %v2802_v13  ;;  %v2824_v62 = vld [vmem:[%s5692_s2 + $0x388] sm:$0xff]  ;;  %v3325_v1 = vmul.f32 1.442695, %v538_v49  ;;  %v3330_v5 = vmul.f32 1.442695, %v539_v55  ;;  %v2789_v6 = vld [vmem:[%s5692_s2 + $0x270] sm:$0xff] }
  0x31   : > { %961 = vmatpush.msrb.mxu1 %v2833_v9  ;;  %1007 = vmatpush.msrb.mxu3 %v2834_v14  ;;  %v3323_v0 = vld [vmem:[%s3185_s29 + $0x8] sm:$0xfe]  ;;  %v594_v2 = vmul.f32 0.3275911, %v590_v60  ;;  %v642_v3 = vsub.f32 0.0, %v590_v60  ;;  %v2821_v7 = vld [vmem:[%s5692_s2 + $0x370] sm:$0xff]  ;;  %2859 = vrcp.f32 %v493_v58  ;;  %s5677_s29 = scalar_lea.vmem %s5702_s12, %s3155_s23 }
  0x32   : > { %939 = vmatpush.msrb.mxu0 %v2799_v18  ;;  %985 = vmatpush.msrb.mxu2 %v2800_v21  ;;  %v3338_v8 = vmul.f32 1.442695, %v540_v56  ;;  %v2790_v13 = vld [vmem:[%s5692_s2 + $0x278] sm:$0xff]  ;;  %v592_v18 = vand.u32 2147483647, %v3312_v59  ;;  %v2787_v23 = vld [vmem:[%s5692_s2 + $0x260] sm:$0xff] }
  0x33   : > { %962 = vmatpush.msrb.mxu1 %v2831_v19  ;;  %1008 = vmatpush.msrb.mxu3 %v2832_v22  ;;  %v3340_v9 = vpop.eup %2853  ;;  %v2822_v14 = vld [vmem:[%s5692_s2 + $0x378] sm:$0xff]  ;;  %v598_v19 = vadd.f32 1.0, %v594_v2  ;;  %v2819_v24 = vld [vmem:[%s5692_s2 + $0x360] sm:$0xff]  ;;  %v2820_v31 = vld [vmem:[%s5692_s2 + $0x368] sm:$0xff]  ;;  %v646_v32 = vmul.f32 %v642_v3, %v590_v60  ;;  %v3370_v33 = vmul.f32 0.70710677, %v3328_v4 }
  0x34   : > { %940 = vmatpush.msrb.mxu0 %v2797_v26  ;;  %986 = vmatpush.msrb.mxu2 %v2798_v30  ;;  %v3349_v21 = vpop.eup %2855  ;;  %v498_v22 = vmul.f32 1.0614054, %v3340_v9  ;;  %v3360_v26 = vmul.f32 0.70710677, %v3323_v0  ;;  %v2788_v30 = vld [vmem:[%s5692_s2 + $0x268] sm:$0xff]  ;;  %v2785_v35 = vld [vmem:[%s5692_s2 + $0x250] sm:$0xff] }
  0x35   : > { %963 = vmatpush.msrb.mxu1 %v2829_v27  ;;  %1009 = vmatpush.msrb.mxu3 %v2830_v38  ;;  %v499_v27 = vmul.f32 1.0614054, %v3349_v21  ;;  %v2817_v36 = vld [vmem:[%s5692_s2 + $0x350] sm:$0xff]  ;;  %v2786_v37 = vld [vmem:[%s5692_s2 + $0x258] sm:$0xff]  ;;  %2861 = vrcp.f32 %v598_v19  ;;  %v3381_v38 = vpop.eup %2857  ;;  %v596_v41 = vmul.f32 0.3275911, %v592_v18 }
  0x36   : > { %941 = vmatpush.msrb.mxu0 %v2795_v39  ;;  %987 = vmatpush.msrb.mxu2 %v2796_v44  ;;  %v502_v34 = vadd.f32 -1.4531521, %v498_v22  ;;  %v2818_v40 = vld [vmem:[%s5692_s2 + $0x358] sm:$0xff]  ;;  %v548_v49 = vmul.f32 1.442695, %v541_v25  ;;  %v3397_v51 = vmul.f32 0.5, %v3212_v10  ;;  %2863 = vpow2.f32 %v3325_v1 }
  0x37   : > { %964 = vmatpush.msrb.mxu1 %v2827_v43  ;;  %1010 = vmatpush.msrb.mxu3 %v2828_v46  ;;  %v503_v39 = vadd.f32 -1.4531521, %v499_v27  ;;  %v644_v43 = vsub.f32 0.0, %v592_v18  ;;  %v2783_v46 = vld [vmem:[%s5692_s2 + $0x240] sm:$0xff]  ;;  %v3394_v50 = vpop.eup %2859  ;;  %v600_v55 = vadd.f32 1.0, %v596_v41  ;;  %v2813_v63 = vld [vmem:[%s5692_s2 + $0x330] sm:$0xff] }
  0x38   : > { %942 = vmatpush.msrb.mxu0 %v2793_v47  ;;  %988 = vmatpush.msrb.mxu2 %v2794_v52  ;;  %v506_v44 = vmul.f32 %v3340_v9, %v502_v34  ;;  %v2815_v47 = vld [vmem:[%s5692_s2 + $0x340] sm:$0xff]  ;;  %v3406_v56 = vmul.f32 1.442695, %v646_v32  ;;  %v501_v58 = vmul.f32 1.0614054, %v3394_v50  ;;  %v2782_v1 = vld [vmem:[%s5692_s2 + $0x238] sm:$0xff] }
  0x39   : > { %965 = vmatpush.msrb.mxu1 %v2825_v48  ;;  %1011 = vmatpush.msrb.mxu3 %v2826_v53  ;;  %v500_v48 = vmul.f32 1.0614054, %v3381_v38  ;;  %v507_v52 = vmul.f32 %v3349_v21, %v503_v39  ;;  %v2784_v53 = vld [vmem:[%s5692_s2 + $0x248] sm:$0xff]  ;;  %2865 = vrcp.f32 %v600_v55  ;;  %v648_v2 = vmul.f32 %v644_v43, %v592_v18  ;;  %v2779_v18 = vld [vmem:[%s5692_s2 + $0x220] sm:$0xff]  ;;  %v2809_v32 = vld [vmem:[%s5692_s2 + $0x310] sm:$0xff] }
  0x3a   : > { %943 = vmatpush.msrb.mxu0 %v2791_v54  ;;  %989 = vmatpush.msrb.mxu2 %v2792_v61  ;;  %v2816_v54 = vld [vmem:[%s5692_s2 + $0x348] sm:$0xff]  ;;  %v3411_v61 = vmul.f32 0.5, %v3215_v11  ;;  %v2811_v19 = vld [vmem:[%s5692_s2 + $0x320] sm:$0xff]  ;;  %2867 = vpow2.f32 %v3330_v5  ;;  %v3448_v25 = vand.u32 2147483647, %v3360_v26  ;;  %vm559_vm1 = vcmp.ge.f32.partialorder %v3230_v16, 0.0 }
  0x3b   : > { %966 = vmatpush.msrb.mxu1 %v2823_v57  ;;  %1012 = vmatpush.msrb.mxu3 %v2824_v62  ;;  %v510_v57 = vadd.f32 1.4214138, %v506_v44  ;;  %v504_v10 = vadd.f32 -1.4531521, %v500_v48  ;;  %v511_v60 = vadd.f32 1.4214138, %v507_v52  ;;  %v3422_v3 = vpop.eup %2861  ;;  %2869 = vpow2.f32 %v3338_v8 }
  0x3c   : > { %944 = vmatpush.msrb.mxu0 %v2789_v6  ;;  %990 = vmatpush.msrb.mxu2 %v2790_v13  ;;  %v2781_v62 = vld [vmem:[%s5692_s2 + $0x230] sm:$0xff]  ;;  %v505_v13 = vadd.f32 -1.4531521, %v501_v58  ;;  %2871 = vpow2.f32 %v548_v49  ;;  %v2778_v8 = vld [vmem:[%s5692_s2 + $0x218] sm:$0xff]  ;;  %v2775_v43 = vld [vmem:[%s5692_s2 + $0x200] sm:$0xff]  ;;  %vm560_vm2 = vcmp.ge.f32.partialorder %v3233_v17, 0.0 }
  0x3d   : > { %967 = vmatpush.msrb.mxu1 %v2821_v7  ;;  %1013 = vmatpush.msrb.mxu3 %v2822_v14  ;;  %v514_v11 = vmul.f32 %v3340_v9, %v510_v57  ;;  %v508_v6 = vmul.f32 %v3381_v38, %v504_v10  ;;  %v3427_v7 = vmul.f32 0.5, %v3218_v12  ;;  %v2814_v14 = vld [vmem:[%s5692_s2 + $0x338] sm:$0xff]  ;;  %v515_v22 = vmul.f32 %v3349_v21, %v511_v60  ;;  %v2780_v12 = vld [vmem:[%s5692_s2 + $0x228] sm:$0xff]  ;;  %v2807_v44 = vld [vmem:[%s5692_s2 + $0x300] sm:$0xff] }
  0x3e   : > { %945 = vmatpush.msrb.mxu0 %v2787_v23  ;;  %991 = vmatpush.msrb.mxu2 %v2788_v30  ;;  %v2812_v23 = vld [vmem:[%s5692_s2 + $0x328] sm:$0xff]  ;;  %v509_v5 = vmul.f32 %v3394_v50, %v505_v13  ;;  %2873 = vpow2.f32 %v3406_v56  ;;  %vm561_vm3 = vcmp.ge.f32.partialorder %v3260_v28, 0.0  ;;  %vm666_vm4 = vcmp.ge.f32.partialorder %v3278_v42, 0.0  ;;  %v1062_v42 = vld [vmem:[%s5694_s4 + $0xf0] sm:$0xff] }
  0x3f   : > { %968 = vmatpush.msrb.mxu1 %v2819_v24  ;;  %1014 = vmatpush.msrb.mxu3 %v2820_v31  ;;  %v606_v24 = vmul.f32 1.0614054, %v3422_v3  ;;  %v518_v27 = vadd.f32 -0.28449672, %v514_v11  ;;  %v512_v30 = vadd.f32 1.4214138, %v508_v6 }
  0x40   : > { %946 = vmatpush.msrb.mxu0 %v2785_v35  ;;  %992 = vmatpush.msrb.mxu2 %v2786_v37  ;;  %v2777_v31 = vld [vmem:[%s5692_s2 + $0x210] sm:$0xff]  ;;  %v519_v34 = vadd.f32 -0.28449672, %v515_v22  ;;  %v2810_v35 = vld [vmem:[%s5692_s2 + $0x318] sm:$0xff]  ;;  %v2864_v37 = vpop.eup %2863  ;;  %v513_v41 = vadd.f32 1.4214138, %v509_v5 }
  0x41   : > { %969 = vmatpush.msrb.mxu1 %v2817_v36  ;;  %1015 = vmatpush.msrb.mxu3 %v2818_v40  ;;  %v654_v36 = vmul.f32 1.442695, %v648_v2  ;;  %v522_v39 = vmul.f32 %v3340_v9, %v518_v27  ;;  %v516_v40 = vmul.f32 %v3381_v38, %v512_v30  ;;  %v2776_v49 = vld [vmem:[%s5692_s2 + $0x208] sm:$0xff]  ;;  %vm668_vm5 = vcmp.ge.f32.partialorder %v3312_v59, 0.0  ;;  %v1092_v59 = vld [vmem:[%s5694_s4 + $0x1e0] sm:$0xff] }
  0x42   : > { %947 = vmatpush.msrb.mxu0 %v2783_v46  ;;  %993 = vmatpush.msrb.mxu2 %v2784_v53  ;;  %v610_v46 = vadd.f32 -1.4531521, %v606_v24  ;;  %v523_v48 = vmul.f32 %v3349_v21, %v519_v34  ;;  %v2808_v52 = vld [vmem:[%s5692_s2 + $0x308] sm:$0xff]  ;;  %v593_v53 = vand.u32 2147483647, %v3370_v33  ;;  %v517_v10 = vmul.f32 %v3394_v50, %v513_v41 }
  0x43   : > { %970 = vmatpush.msrb.mxu1 %v2815_v47  ;;  %1016 = vmatpush.msrb.mxu3 %v2816_v54  ;;  %v3472_v47 = vpop.eup %2865  ;;  %v595_v54 = vmul.f32 0.3275911, %v3448_v25  ;;  %v526_v55 = vadd.f32 0.2548296, %v522_v39  ;;  %v520_v57 = vadd.f32 -0.28449672, %v516_v40 }
  0x44   : > { %948 = vmatpush.msrb.mxu0 %v2781_v62  ;;  %994 = vmatpush.msrb.mxu2 %v2782_v1  ;;  %v608_v58 = vmul.f32 1.0614054, %v3472_v47  ;;  %v2868_v60 = vpop.eup %2867  ;;  %v527_v62 = vadd.f32 0.2548296, %v523_v48  ;;  %v614_v56 = vmul.f32 %v3422_v3, %v610_v46  ;;  %v521_v13 = vadd.f32 -0.28449672, %v517_v10 }
  0x45   : > { %971 = vmatpush.msrb.mxu1 %v2813_v63  ;;  %1017 = vmatpush.msrb.mxu3 %v2814_v14  ;;  %v597_v63 = vmul.f32 0.3275911, %v593_v53  ;;  %v599_v1 = vadd.f32 1.0, %v595_v54  ;;  %v2870_v2 = vpop.eup %2869  ;;  %v530_v11 = vmul.f32 %v3340_v9, %v526_v55  ;;  %v524_v6 = vmul.f32 %v3381_v38, %v520_v57 }
  0x46   : > { %949 = vmatpush.msrb.mxu0 %v2779_v18  ;;  %995 = vmatpush.msrb.mxu2 %v2780_v12  ;;  %v612_v14 = vadd.f32 -1.4531521, %v608_v58  ;;  %v2872_v18 = vpop.eup %2871  ;;  %v618_v22 = vadd.f32 1.4214138, %v614_v56  ;;  %v525_v27 = vmul.f32 %v3394_v50, %v521_v13  ;;  %v645_v40 = vsub.f32 0.0, %v593_v53 }
  0x47   : > { %972 = vmatpush.msrb.mxu1 %v2811_v19  ;;  %1018 = vmatpush.msrb.mxu3 %v2812_v23  ;;  %v531_v19 = vmul.f32 %v3349_v21, %v527_v62  ;;  %v601_v12 = vadd.f32 1.0, %v597_v63  ;;  %2875 = vrcp.f32 %v599_v1  ;;  %v550_v23 = vmul.f32 %v2864_v37, %v530_v11  ;;  %v2874_v30 = vpop.eup %2873 }
  0x48   : > { %950 = vmatpush.msrb.mxu0 %v2777_v31  ;;  %996 = vmatpush.msrb.mxu2 %v2778_v8  ;;  %v528_v24 = vadd.f32 0.2548296, %v524_v6  ;;  %v616_v9 = vmul.f32 %v3472_v47, %v612_v14  ;;  %v622_v31 = vmul.f32 %v3422_v3, %v618_v22  ;;  %v643_v21 = vsub.f32 0.0, %v3448_v25 }
  0x49   : > { %973 = vmatpush.msrb.mxu1 %v2809_v32  ;;  %1019 = vmatpush.msrb.mxu3 %v2810_v35  ;;  %v551_v5 = vmul.f32 %v2868_v60, %v531_v19  ;;  %2877 = vrcp.f32 %v601_v12  ;;  %v554_v32 = vsub.f32 1.0, %v550_v23  ;;  %v529_v8 = vadd.f32 0.2548296, %v525_v27 }
  0x4a   : > { %951 = vmatpush.msrb.mxu0 %v2775_v43  ;;  %997 = vmatpush.msrb.mxu2 %v2776_v49  ;;  %v532_v34 = vmul.f32 %v3381_v38, %v528_v24  ;;  %v620_v35 = vadd.f32 1.4214138, %v616_v9  ;;  %v626_v39 = vadd.f32 -0.28449672, %v622_v31  ;;  %2879 = vpow2.f32 %v654_v36 }
  0x4b   : > { %974 = vmatpush.msrb.mxu1 %v2807_v44  ;;  %1020 = vmatpush.msrb.mxu3 %v2808_v52  ;;  %v555_v37 = vsub.f32 1.0, %v551_v5  ;;  %v562_v41 = vsub.f32 0.0, %v554_v32  ;;  %v533_v44 = vmul.f32 %v3394_v50, %v529_v8  ;;  %v647_v54 = vmul.f32 %v643_v21, %v3448_v25 }
  0x4c   : > { %v552_v43 = vmul.f32 %v2870_v2, %v532_v34  ;;  %v624_v46 = vmul.f32 %v3472_v47, %v620_v35  ;;  %v630_v52 = vmul.f32 %v3422_v3, %v626_v39  ;;  %v649_v38 = vmul.f32 %v645_v40, %v593_v53 }
  0x4d   : > { %v3501_v48 = vpop.eup %2875  ;;  %v563_v49 = vsub.f32 0.0, %v555_v37  ;;  %v566_v55 = vsel %vm558_vm0, %v554_v32, %v562_v41  ;;  %v553_v36 = vmul.f32 %v2872_v18, %v533_v44  ;;  %v652_v5 = vmul.f32 1.442695, %v647_v54  ;;  %v1061_v44 = vld [vmem:[%s5694_s4 + $0xe8] sm:$0xff] }
  0x4e   : > { %v556_v57 = vsub.f32 1.0, %v552_v43  ;;  %v628_v10 = vadd.f32 -0.28449672, %v624_v46  ;;  %v574_v60 = vadd.f32 1.0, %v566_v55  ;;  %v634_v62 = vadd.f32 0.2548296, %v630_v52 }
  0x4f   : > { %v3507_v58 = vpop.eup %2877  ;;  %v567_v50 = vsel %vm559_vm1, %v555_v37, %v563_v49  ;;  %v607_v56 = vmul.f32 1.0614054, %v3501_v48  ;;  %v557_v2 = vsub.f32 1.0, %v553_v36  ;;  %v656_v21 = vmul.f32 1.442695, %v649_v38  ;;  %v1094_v52 = vld [vmem:[%s5694_s4 + $0x1f0] sm:$0xff] }
  0x50   : > { %v575_v63 = vadd.f32 1.0, %v567_v50  ;;  %v564_v1 = vsub.f32 0.0, %v556_v57  ;;  %v632_v25 = vmul.f32 %v3472_v47, %v628_v10  ;;  %v2880_v53 = vpop.eup %2879  ;;  %v578_v15 = vmul.f32 %v574_v60, %v3397_v51  ;;  %v1095_v36 = vld [vmem:[%s5694_s4 + $0x1f8] sm:$0xff]  ;;  %v1093_v50 = vld [vmem:[%s5694_s4 + $0x1e8] sm:$0xff] }
  0x51   : > { %v638_v11 = vmul.f32 %v3422_v3, %v634_v62  ;;  %v609_v6 = vmul.f32 1.0614054, %v3507_v58  ;;  %v611_v13 = vadd.f32 -1.4531521, %v607_v56  ;;  %v565_v18 = vsub.f32 0.0, %v557_v2  ;;  %v1056_v56 = vld [vmem:[%s5694_s4 + $0xc0] sm:$0xff] }
  0x52   : > { %v579_v14 = vmul.f32 %v575_v63, %v3411_v61  ;;  %v568_v16 = vsel %vm560_vm2, %v556_v57, %v564_v1  ;;  %v636_v19 = vadd.f32 0.2548296, %v632_v25  ;;  %771 = vmatmul.f32.vlgmr.msra.gmra.mxu0 %v578_v15  ;;  %817 = vmatmul.f32.vlgmr.msra.gmra.mxu2 %v578_v15  ;;  %v573_v3 = vmul.f32 0.5, %v3242_v20  ;;  %v1058_v57 = vld [vmem:[%s5694_s4 + $0xd0] sm:$0xff]  ;;  %v1057_v63 = vld [vmem:[%s5694_s4 + $0xc8] sm:$0xff] }
  0x53   : > { %v576_v22 = vadd.f32 1.0, %v568_v16  ;;  %v658_v12 = vmul.f32 %v2874_v30, %v638_v11  ;;  %v613_v23 = vadd.f32 -1.4531521, %v609_v6  ;;  %v615_v24 = vmul.f32 %v3501_v48, %v611_v13  ;;  %1102 = vmatpush.msra.mxu0 %v1062_v42  ;;  %v1090_v15 = vld [vmem:[%s5694_s4 + $0x1d0] sm:$0xff]  ;;  %v1091_v11 = vld [vmem:[%s5694_s4 + $0x1d8] sm:$0xff] }
  0x54   : > { %794 = vmatmul.f32.vlgmr.msra.gmra.mxu1 %v579_v14  ;;  %840 = vmatmul.f32.vlgmr.msra.gmra.mxu3 %v579_v14  ;;  %v569_v51 = vsel %vm561_vm3, %v557_v2, %v565_v18  ;;  %v640_v61 = vmul.f32 %v3472_v47, %v636_v19  ;;  %v678_v20 = vmul.f32 0.5, %v3263_v29  ;;  %2881 = vpow2.f32 %v652_v5  ;;  %v1060_v29 = vld [vmem:[%s5694_s4 + $0xe0] sm:$0xff]  ;;  %v1054_v14 = vld [vmem:[%s5694_s4 + $0xb0] sm:$0xff]  ;;  %v1055_v16 = vld [vmem:[%s5694_s4 + $0xb8] sm:$0xff] }
  0x55   : > { %v577_v17 = vadd.f32 1.0, %v569_v51  ;;  %v662_v27 = vsub.f32 1.0, %v658_v12  ;;  %v617_v9 = vmul.f32 %v3507_v58, %v613_v23  ;;  %v619_v30 = vadd.f32 1.4214138, %v615_v24  ;;  %1103 = vmatpush.msra.mxu0 %v1060_v29  ;;  %1125 = vmatpush.msra.mxu1 %v1094_v52  ;;  %v1053_v12 = vld [vmem:[%s5694_s4 + $0xa8] sm:$0xff]  ;;  %v1087_v5 = vld [vmem:[%s5694_s4 + $0x1b8] sm:$0xff] }
  0x56   : > { %v660_v31 = vmul.f32 %v2880_v53, %v640_v61  ;;  %v580_v32 = vmul.f32 %v576_v22, %v3427_v7  ;;  %v1063_v7 = vld [vmem:[%s5694_s4 + $0xf8] sm:$0xff]  ;;  %2883 = vpow2.f32 %v656_v21  ;;  %v680_v46 = vmul.f32 0.5, %v3287_v45  ;;  %1171 = vmatpush.msra.mxu3 %v1095_v36  ;;  %v1089_v51 = vld [vmem:[%s5694_s4 + $0x1c8] sm:$0xff]  ;;  %v1050_v61 = vld [vmem:[%s5694_s4 + $0x90] sm:$0xff] }
  0x57   : > { %v670_v34 = vsub.f32 0.0, %v662_v27  ;;  %v621_v8 = vadd.f32 1.4214138, %v617_v9  ;;  %v581_v28 = vmul.f32 %v577_v17, %v573_v3  ;;  %v623_v47 = vmul.f32 %v3501_v48, %v619_v30  ;;  %1148 = vmatpush.msra.mxu2 %v1063_v7  ;;  %v1059_v45 = vld [vmem:[%s5694_s4 + $0xd8] sm:$0xff]  ;;  %1104 = vmatpush.msra.mxu0 %v1058_v57  ;;  %v1086_v9 = vld [vmem:[%s5694_s4 + $0x1b0] sm:$0xff]  ;;  %v1048_v30 = vld [vmem:[%s5694_s4 + $0x80] sm:$0xff] }
  0x58   : > { %v664_v35 = vsub.f32 1.0, %v660_v31  ;;  %1126 = vmatpush.msra.mxu1 %v1092_v59  ;;  %1172 = vmatpush.msra.mxu3 %v1093_v50  ;;  %v1051_v17 = vld [vmem:[%s5694_s4 + $0x98] sm:$0xff]  ;;  %vm667_vm7 = vcmp.ge.f32.partialorder %v3360_v26, 0.0  ;;  %vm669_vm8 = vcmp.ge.f32.partialorder %v3370_v33, 0.0  ;;  %v1049_v21 = vld [vmem:[%s5694_s4 + $0x88] sm:$0xff]  ;;  %v1082_v42 = vld [vmem:[%s5694_s4 + $0x190] sm:$0xff] }
  0x59   : > { %v674_v37 = vsel %vm666_vm4, %v662_v27, %v670_v34  ;;  %v625_v39 = vmul.f32 %v3507_v58, %v621_v8  ;;  %v627_v43 = vadd.f32 -0.28449672, %v623_v47  ;;  %1149 = vmatpush.msra.mxu2 %v1061_v44  ;;  %1105 = vmatpush.msra.mxu0 %v1056_v56  ;;  %v679_v34 = vmul.f32 0.5, %v3323_v0  ;;  %v1084_v8 = vld [vmem:[%s5694_s4 + $0x1a0] sm:$0xff]  ;;  %v1046_v0 = vld [vmem:[%s5694_s4 + $0x70] sm:$0xff]  ;;  %v1047_v47 = vld [vmem:[%s5694_s4 + $0x78] sm:$0xff] }
  0x5a   : > { %v672_v40 = vsub.f32 0.0, %v664_v35  ;;  %v682_v41 = vadd.f32 1.0, %v674_v37  ;;  %774 = vmatmul.f32.gmra.mxu0 %v580_v32  ;;  %820 = vmatmul.f32.gmra.mxu2 %v580_v32  ;;  %v2882_v1 = vpop.eup %2881  ;;  %v1045_v33 = vld [vmem:[%s5694_s4 + $0x68] sm:$0xff]  ;;  %v1080_v29 = vld [vmem:[%s5694_s4 + $0x180] sm:$0xff]  ;;  %v1038_v36 = vld [vmem:[%s5694_s4 + $0x30] sm:$0xff] }
  0x5b   : > { %v629_v49 = vadd.f32 -0.28449672, %v625_v39  ;;  %v631_v55 = vmul.f32 %v3501_v48, %v627_v43  ;;  %1150 = vmatpush.msra.mxu2 %v1059_v45  ;;  %1127 = vmatpush.msra.mxu1 %v1090_v15  ;;  %v1042_v43 = vld [vmem:[%s5694_s4 + $0x50] sm:$0xff]  ;;  %v1041_v57 = vld [vmem:[%s5694_s4 + $0x48] sm:$0xff]  ;;  %v1079_v45 = vld [vmem:[%s5694_s4 + $0x178] sm:$0xff] }
  0x5c   : > { %797 = vmatmul.f32.gmra.mxu1 %v581_v28  ;;  %843 = vmatmul.f32.gmra.mxu3 %v581_v28  ;;  %v676_v54 = vsel %vm668_vm5, %v664_v35, %v672_v40  ;;  %v686_v38 = vmul.f32 %v682_v41, %v678_v20  ;;  %v2884_v6 = vpop.eup %2883  ;;  %v1085_v28 = vld [vmem:[%s5694_s4 + $0x1a8] sm:$0xff]  ;;  %v681_v20 = vmul.f32 0.5, %v3328_v4  ;;  %v1044_v4 = vld [vmem:[%s5694_s4 + $0x60] sm:$0xff]  ;;  %v1083_v40 = vld [vmem:[%s5694_s4 + $0x198] sm:$0xff] }
  0x5d   : > { %v684_v10 = vadd.f32 1.0, %v676_v54  ;;  %v633_v60 = vmul.f32 %v3507_v58, %v629_v49  ;;  %v635_v62 = vadd.f32 0.2548296, %v631_v55  ;;  %1151 = vmatpush.msra.mxu2 %v1057_v63  ;;  %1173 = vmatpush.msra.mxu3 %v1091_v11  ;;  %v1081_v49 = vld [vmem:[%s5694_s4 + $0x188] sm:$0xff]  ;;  %v1040_v54 = vld [vmem:[%s5694_s4 + $0x40] sm:$0xff]  ;;  %v1075_v63 = vld [vmem:[%s5694_s4 + $0x158] sm:$0xff] }
  0x5e   : > { %v926_v25 = vrot.slane %v686_v38, 1  ;;  %1106 = vmatpush.msra.mxu0 %v1054_v14  ;;  %v1078_v38 = vld [vmem:[%s5694_s4 + $0x170] sm:$0xff]  ;;  %v1077_v59 = vld [vmem:[%s5694_s4 + $0x168] sm:$0xff]  ;;  %v1036_v50 = vld [vmem:[%s5694_s4 + $0x20] sm:$0xff] }
  0x5f   : > { %v688_v2 = vmul.f32 %v684_v10, %v680_v46  ;;  %v637_v53 = vadd.f32 0.2548296, %v633_v60  ;;  %v639_v13 = vmul.f32 %v3501_v48, %v635_v62  ;;  %v1052_v48 = vld [vmem:[%s5694_s4 + $0xa0] sm:$0xff]  ;;  %1152 = vmatpush.msra.mxu2 %v1055_v16  ;;  %1174 = vmatpush.msra.mxu3 %v1089_v51  ;;  %v1043_v46 = vld [vmem:[%s5694_s4 + $0x58] sm:$0xff]  ;;  %v1074_v62 = vld [vmem:[%s5694_s4 + $0x150] sm:$0xff] }
  0x60   : > { %1107 = vmatpush.msra.mxu0 %v1052_v48  ;;  %v1076_v10 = vld [vmem:[%s5694_s4 + $0x160] sm:$0xff]  ;;  %v1039_v60 = vld [vmem:[%s5694_s4 + $0x38] sm:$0xff]  ;;  %v1037_v56 = vld [vmem:[%s5694_s4 + $0x28] sm:$0xff] }
  0x61   : > { %v3585_v18 = vrot.slane %v688_v2, 1  ;;  %v641_v19 = vmul.f32 %v3507_v58, %v637_v53  ;;  %v659_v22 = vmul.f32 %v2882_v1, %v639_v13  ;;  %v1088_v58 = vld [vmem:[%s5694_s4 + $0x1c0] sm:$0xff]  ;;  %1153 = vmatpush.msra.mxu2 %v1053_v12  ;;  %1175 = vmatpush.msra.mxu3 %v1087_v5  ;;  %v1034_v1 = vld [vmem:[%s5694_s4 + $0x10] sm:$0xff]  ;;  %v1073_v53 = vld [vmem:[%s5694_s4 + $0x148] sm:$0xff] }
  0x62   : > { %1128 = vmatpush.msra.mxu1 %v1088_v58  ;;  %1108 = vmatpush.msra.mxu0 %v1050_v61  ;;  %v1072_v2 = vld [vmem:[%s5694_s4 + $0x140] sm:$0xff]  ;;  %v1070_v11 = vld [vmem:[%s5694_s4 + $0x130] sm:$0xff]  ;;  %v1071_v13 = vld [vmem:[%s5694_s4 + $0x138] sm:$0xff] }
  0x63   : > { %v3596_v23 = vsel %vm925_vm6, %v926_v25, %v3585_v18  ;;  %v661_v24 = vmul.f32 %v2884_v6, %v641_v19  ;;  %v663_v3 = vsub.f32 1.0, %v659_v22  ;;  %1154 = vmatpush.msra.mxu2 %v1051_v17  ;;  %1176 = vmatpush.msra.mxu3 %v1085_v28  ;;  %v1035_v25 = vld [vmem:[%s5694_s4 + $0x18] sm:$0xff]  ;;  %v1032_v15 = vld [vmem:[%s5694_s4] sm:$0xff]  ;;  %v1033_v6 = vld [vmem:[%s5694_s4 + $0x8] sm:$0xff] }
  0x64   : > { %952 = vmatmul.f32.vlgmr.msrb.gmra.mxu0 %v3596_v23  ;;  %998 = vmatmul.f32.vlgmr.msrb.gmra.mxu2 %v3596_v23  ;;  %v1340_v14 = vld [vmem:[%s5696_s6 + $0x3c0] sm:$0xff]  ;;  %v1341_v16 = vld [vmem:[%s5696_s6 + $0x3c8] sm:$0xff]  ;;  %v1067_v58 = vld [vmem:[%s5694_s4 + $0x118] sm:$0xff] }
  0x65   : > { %v665_v27 = vsub.f32 1.0, %v661_v24  ;;  %v671_v31 = vsub.f32 0.0, %v663_v3  ;;  %1129 = vmatpush.msra.mxu1 %v1086_v9  ;;  %1109 = vmatpush.msra.mxu0 %v1048_v30  ;;  %v1068_v19 = vld [vmem:[%s5694_s4 + $0x120] sm:$0xff]  ;;  %v1069_v22 = vld [vmem:[%s5694_s4 + $0x128] sm:$0xff]  ;;  %v1066_v24 = vld [vmem:[%s5694_s4 + $0x110] sm:$0xff] }
  0x66   : > { %1155 = vmatpush.msra.mxu2 %v1049_v21  ;;  %1177 = vmatpush.msra.mxu3 %v1083_v40  ;;  %v1332_v48 = vld [vmem:[%s5696_s6 + $0x380] sm:$0xff]  ;;  %v1333_v12 = vld [vmem:[%s5696_s6 + $0x388] sm:$0xff] }
  0x67   : > { %v673_v32 = vsub.f32 0.0, %v665_v27  ;;  %v675_v35 = vsel %vm667_vm7, %v663_v3, %v671_v31  ;;  %1130 = vmatpush.msra.mxu1 %v1084_v8  ;;  %1110 = vmatpush.msra.mxu0 %v1046_v0  ;;  %v1324_v51 = vld [vmem:[%s5696_s6 + $0x340] sm:$0xff]  ;;  %v1325_v3 = vld [vmem:[%s5696_s6 + $0x348] sm:$0xff] }
  0x68   : > { %v683_v39 = vadd.f32 1.0, %v675_v35  ;;  %1156 = vmatpush.msra.mxu2 %v1047_v47  ;;  %1178 = vmatpush.msra.mxu3 %v1081_v49  ;;  %v1064_v61 = vld [vmem:[%s5694_s4 + $0x100] sm:$0xff]  ;;  %v1065_v17 = vld [vmem:[%s5694_s4 + $0x108] sm:$0xff] }
  0x69   : > { %v677_v37 = vsel %vm669_vm8, %v665_v27, %v673_v32  ;;  %1111 = vmatpush.msra.mxu0 %v1044_v4  ;;  %1131 = vmatpush.msra.mxu1 %v1082_v42  ;;  %v1316_v27 = vld [vmem:[%s5696_s6 + $0x300] sm:$0xff]  ;;  %v1317_v5 = vld [vmem:[%s5696_s6 + $0x308] sm:$0xff] }
  0x6a   : > { %v685_v26 = vadd.f32 1.0, %v677_v37  ;;  %v687_v7 = vmul.f32 %v683_v39, %v679_v34  ;;  %1157 = vmatpush.msra.mxu2 %v1045_v33  ;;  %1179 = vmatpush.msra.mxu3 %v1079_v45  ;;  %v1468_v9 = vld [vmem:[%s5696_s6 + $0x7c0] sm:$0xff]  ;;  %v1469_v31 = vld [vmem:[%s5696_s6 + $0x7c8] sm:$0xff] }
  0x6b   : > { %1112 = vmatpush.msra.mxu0 %v1042_v43  ;;  %1132 = vmatpush.msra.mxu1 %v1080_v29  ;;  %v1308_v30 = vld [vmem:[%s5696_s6 + $0x2c0] sm:$0xff]  ;;  %v1309_v32 = vld [vmem:[%s5696_s6 + $0x2c8] sm:$0xff] }
  0x6c   : > { %v689_v41 = vmul.f32 %v685_v26, %v681_v20  ;;  %955 = vmatmul.f32.gmra.mxu0 %v3585_v18  ;;  %1001 = vmatmul.f32.gmra.mxu2 %v3585_v18  ;;  %v929_v44 = vrot.slane %v687_v7, 1  ;;  %v1460_v21 = vld [vmem:[%s5696_s6 + $0x780] sm:$0xff]  ;;  %v1461_v34 = vld [vmem:[%s5696_s6 + $0x788] sm:$0xff] }
  0x6d   : > { %1158 = vmatpush.msra.mxu2 %v1043_v46  ;;  %1113 = vmatpush.msra.mxu0 %v1040_v54  ;;  %v1300_v8 = vld [vmem:[%s5696_s6 + $0x280] sm:$0xff]  ;;  %v1301_v35 = vld [vmem:[%s5696_s6 + $0x288] sm:$0xff] }
  0x6e   : > { %v3670_v52 = vrot.slane %v689_v41, 1  ;;  %1133 = vmatpush.msra.mxu1 %v1078_v38  ;;  %1180 = vmatpush.msra.mxu3 %v1077_v59  ;;  %v1452_v28 = vld [vmem:[%s5696_s6 + $0x740] sm:$0xff]  ;;  %v1453_v20 = vld [vmem:[%s5696_s6 + $0x748] sm:$0xff] }
  0x6f   : > { %1159 = vmatpush.msra.mxu2 %v1041_v57  ;;  %1114 = vmatpush.msra.mxu0 %v1038_v36  ;;  %v1292_v0 = vld [vmem:[%s5696_s6 + $0x240] sm:$0xff]  ;;  %v1293_v37 = vld [vmem:[%s5696_s6 + $0x248] sm:$0xff] }
  0x70   : > { %v3680_v55 = vsel %vm925_vm6, %v929_v44, %v3670_v52  ;;  %1134 = vmatpush.msra.mxu1 %v1076_v10  ;;  %1181 = vmatpush.msra.mxu3 %v1075_v63  ;;  %v1444_v47 = vld [vmem:[%s5696_s6 + $0x700] sm:$0xff]  ;;  %v1445_v39 = vld [vmem:[%s5696_s6 + $0x708] sm:$0xff] }
  0x71   : > { %975 = vmatmul.f32.vlgmr.msrb.gmra.mxu1 %v3680_v55  ;;  %1021 = vmatmul.f32.vlgmr.msrb.gmra.mxu3 %v3680_v55  ;;  %v1284_v26 = vld [vmem:[%s5696_s6 + $0x200] sm:$0xff]  ;;  %v1285_v42 = vld [vmem:[%s5696_s6 + $0x208] sm:$0xff] }
  0x72   : > { %1160 = vmatpush.msra.mxu2 %v1039_v60  ;;  %1115 = vmatpush.msra.mxu0 %v1036_v50  ;;  %v1436_v4 = vld [vmem:[%s5696_s6 + $0x6c0] sm:$0xff]  ;;  %v1437_v7 = vld [vmem:[%s5696_s6 + $0x6c8] sm:$0xff] }
  0x73   : > { %1135 = vmatpush.msra.mxu1 %v1074_v62  ;;  %1182 = vmatpush.msra.mxu3 %v1073_v53  ;;  %v1276_v33 = vld [vmem:[%s5696_s6 + $0x1c0] sm:$0xff]  ;;  %v1277_v41 = vld [vmem:[%s5696_s6 + $0x1c8] sm:$0xff] }
  0x74   : > { %1161 = vmatpush.msra.mxu2 %v1037_v56  ;;  %1116 = vmatpush.msra.mxu0 %v1034_v1  ;;  %v1428_v40 = vld [vmem:[%s5696_s6 + $0x680] sm:$0xff]  ;;  %v1429_v43 = vld [vmem:[%s5696_s6 + $0x688] sm:$0xff] }
  0x75   : > { %1136 = vmatpush.msra.mxu1 %v1072_v2  ;;  %1183 = vmatpush.msra.mxu3 %v1071_v13  ;;  %v1268_v29 = vld [vmem:[%s5696_s6 + $0x180] sm:$0xff]  ;;  %v1269_v46 = vld [vmem:[%s5696_s6 + $0x188] sm:$0xff] }
  0x76   : > { %1162 = vmatpush.msra.mxu2 %v1035_v25  ;;  %1117 = vmatpush.msra.mxu0 %v1032_v15  ;;  %v1420_v44 = vld [vmem:[%s5696_s6 + $0x640] sm:$0xff]  ;;  %v1421_v49 = vld [vmem:[%s5696_s6 + $0x648] sm:$0xff] }
  0x77   : > { %1137 = vmatpush.msra.mxu1 %v1070_v11  ;;  %1184 = vmatpush.msra.mxu3 %v1069_v22  ;;  %v1260_v54 = vld [vmem:[%s5696_s6 + $0x140] sm:$0xff]  ;;  %v1261_v57 = vld [vmem:[%s5696_s6 + $0x148] sm:$0xff] }
  0x78   : > { %1163 = vmatpush.msra.mxu2 %v1033_v6  ;;  %1476 = vmatpush.msrb.mxu0 %v1340_v14  ;;  %v1412_v38 = vld [vmem:[%s5696_s6 + $0x600] sm:$0xff]  ;;  %v1413_v45 = vld [vmem:[%s5696_s6 + $0x608] sm:$0xff] }
  0x79   : > { %978 = vmatmul.f32.gmra.mxu1 %v3670_v52  ;;  %1024 = vmatmul.f32.gmra.mxu3 %v3670_v52  ;;  %v1252_v36 = vld [vmem:[%s5696_s6 + $0x100] sm:$0xff]  ;;  %v1253_v60 = vld [vmem:[%s5696_s6 + $0x108] sm:$0xff] }
  0x7a   : > { %1522 = vmatpush.msrb.mxu2 %v1341_v16  ;;  %1138 = vmatpush.msra.mxu1 %v1068_v19  ;;  %v1404_v10 = vld [vmem:[%s5696_s6 + $0x5c0] sm:$0xff]  ;;  %v1405_v59 = vld [vmem:[%s5696_s6 + $0x5c8] sm:$0xff] }
  0x7b   : > { %1477 = vmatpush.msrb.mxu0 %v1332_v48  ;;  %1185 = vmatpush.msra.mxu3 %v1067_v58  ;;  %v1244_v50 = vld [vmem:[%s5696_s6 + $0xc0] sm:$0xff]  ;;  %v1245_v56 = vld [vmem:[%s5696_s6 + $0xc8] sm:$0xff] }
  0x7c   : > { %1523 = vmatpush.msrb.mxu2 %v1333_v12  ;;  %1139 = vmatpush.msra.mxu1 %v1066_v24  ;;  %v1396_v62 = vld [vmem:[%s5696_s6 + $0x580] sm:$0xff]  ;;  %v1397_v63 = vld [vmem:[%s5696_s6 + $0x588] sm:$0xff] }
  0x7d   : > { %1478 = vmatpush.msrb.mxu0 %v1324_v51  ;;  %1186 = vmatpush.msra.mxu3 %v1065_v17  ;;  %v1236_v1 = vld [vmem:[%s5696_s6 + $0x80] sm:$0xff]  ;;  %v1237_v25 = vld [vmem:[%s5696_s6 + $0x88] sm:$0xff] }
  0x7e   : > { %1524 = vmatpush.msrb.mxu2 %v1325_v3  ;;  %1140 = vmatpush.msra.mxu1 %v1064_v61  ;;  %v1388_v2 = vld [vmem:[%s5696_s6 + $0x540] sm:$0xff]  ;;  %v1389_v53 = vld [vmem:[%s5696_s6 + $0x548] sm:$0xff] }
  0x7f   : > { %1479 = vmatpush.msrb.mxu0 %v1316_v27  ;;  %1545 = vmatpush.msrb.mxu3 %v1469_v31  ;;  %v1228_v15 = vld [vmem:[%s5696_s6 + $0x40] sm:$0xff]  ;;  %v1229_v6 = vld [vmem:[%s5696_s6 + $0x48] sm:$0xff] }
  0x80   : > { %1499 = vmatpush.msrb.mxu1 %v1468_v9  ;;  %1525 = vmatpush.msrb.mxu2 %v1317_v5  ;;  %v1380_v11 = vld [vmem:[%s5696_s6 + $0x500] sm:$0xff]  ;;  %v1381_v13 = vld [vmem:[%s5696_s6 + $0x508] sm:$0xff] }
  0x81   : > { %1480 = vmatpush.msrb.mxu0 %v1308_v30  ;;  %1546 = vmatpush.msrb.mxu3 %v1461_v34  ;;  %v1220_v14 = vld [vmem:[%s5696_s6] sm:$0xff]  ;;  %v1221_v19 = vld [vmem:[%s5696_s6 + $0x8] sm:$0xff] }
  0x82   : > { %1500 = vmatpush.msrb.mxu1 %v1460_v21  ;;  %1526 = vmatpush.msrb.mxu2 %v1309_v32  ;;  %v1372_v16 = vld [vmem:[%s5696_s6 + $0x4c0] sm:$0xff]  ;;  %v1373_v22 = vld [vmem:[%s5696_s6 + $0x4c8] sm:$0xff] }
  0x83   : > { %1481 = vmatpush.msrb.mxu0 %v1300_v8  ;;  %1547 = vmatpush.msrb.mxu3 %v1453_v20  ;;  %v1364_v48 = vld [vmem:[%s5696_s6 + $0x480] sm:$0xff]  ;;  %v1365_v12 = vld [vmem:[%s5696_s6 + $0x488] sm:$0xff] }
  0x84   : > { %1501 = vmatpush.msrb.mxu1 %v1452_v28  ;;  %1527 = vmatpush.msrb.mxu2 %v1301_v35  ;;  %v1356_v58 = vld [vmem:[%s5696_s6 + $0x440] sm:$0xff]  ;;  %v1357_v51 = vld [vmem:[%s5696_s6 + $0x448] sm:$0xff] }
  0x85   : > { %1482 = vmatpush.msrb.mxu0 %v1292_v0  ;;  %1548 = vmatpush.msrb.mxu3 %v1445_v39  ;;  %v1348_v3 = vld [vmem:[%s5696_s6 + $0x400] sm:$0xff]  ;;  %v1349_v61 = vld [vmem:[%s5696_s6 + $0x408] sm:$0xff] }
  0x86   : > { %1502 = vmatpush.msrb.mxu1 %v1444_v47  ;;  %1528 = vmatpush.msrb.mxu2 %v1293_v37  ;;  %v690_v21 = vld [vmem:[%s5693_s3] sm:$0x3] }
  0x87   : > { %1483 = vmatpush.msrb.mxu0 %v1284_v26  ;;  %1549 = vmatpush.msrb.mxu3 %v1437_v7  ;;  %v848_v28 = vperm.slane %v690_v21, 0  ;;  %v849_v39 = vperm.slane %v690_v21, 1  ;;  %v1271_v21 = vld [vmem:[%s5696_s6 + $0x198] sm:$0xff] }
  0x88   : > { %1503 = vmatpush.msrb.mxu1 %v1436_v4  ;;  %1529 = vmatpush.msrb.mxu2 %v1285_v42  ;;  %v1342_v4 = vld [vmem:[%s5696_s6 + $0x3d0] sm:$0xff]  ;;  %v1343_v42 = vld [vmem:[%s5696_s6 + $0x3d8] sm:$0xff] }
  0x89   : > { %1484 = vmatpush.msrb.mxu0 %v1276_v33  ;;  %1550 = vmatpush.msrb.mxu3 %v1429_v43  ;;  %v1334_v33 = vld [vmem:[%s5696_s6 + $0x390] sm:$0xff] }
  0x8a   : > { %1504 = vmatpush.msrb.mxu1 %v1428_v40  ;;  %1530 = vmatpush.msrb.mxu2 %v1277_v41  ;;  %v1335_v40 = vld [vmem:[%s5696_s6 + $0x398] sm:$0xff] }
  0x8b   : > { %1485 = vmatpush.msrb.mxu0 %v1268_v29  ;;  %1551 = vmatpush.msrb.mxu3 %v1421_v49  ;;  %v1327_v49 = vld [vmem:[%s5696_s6 + $0x358] sm:$0xff] }
  0x8c   : > { %1505 = vmatpush.msrb.mxu1 %v1420_v44  ;;  %1531 = vmatpush.msrb.mxu2 %v1269_v46  ;;  %v1326_v46 = vld [vmem:[%s5696_s6 + $0x350] sm:$0xff] }
  0x8d   : > { %1486 = vmatpush.msrb.mxu0 %v1260_v54  ;;  %1552 = vmatpush.msrb.mxu3 %v1413_v45 }
  0x8e   : > { %1506 = vmatpush.msrb.mxu1 %v1412_v38  ;;  %1532 = vmatpush.msrb.mxu2 %v1261_v57 }
  0x8f   : > { %1487 = vmatpush.msrb.mxu0 %v1252_v36  ;;  %1553 = vmatpush.msrb.mxu3 %v1405_v59  ;;  %v1318_v36 = vld [vmem:[%s5696_s6 + $0x310] sm:$0xff]  ;;  %v1471_v59 = vld [vmem:[%s5696_s6 + $0x7d8] sm:$0xff] }
  0x90   : > { %1507 = vmatpush.msrb.mxu1 %v1404_v10  ;;  %1533 = vmatpush.msrb.mxu2 %v1253_v60  ;;  %v1470_v10 = vld [vmem:[%s5696_s6 + $0x7d0] sm:$0xff]  ;;  %v1319_v60 = vld [vmem:[%s5696_s6 + $0x318] sm:$0xff] }
  0x91   : > { %1488 = vmatpush.msrb.mxu0 %v1244_v50  ;;  %1554 = vmatpush.msrb.mxu3 %v1397_v63  ;;  %v1462_v63 = vld [vmem:[%s5696_s6 + $0x790] sm:$0xff] }
  0x92   : > { %1508 = vmatpush.msrb.mxu1 %v1396_v62  ;;  %1534 = vmatpush.msrb.mxu2 %v1245_v56  ;;  %v1310_v56 = vld [vmem:[%s5696_s6 + $0x2d0] sm:$0xff] }
  0x93   : > { %1489 = vmatpush.msrb.mxu0 %v1236_v1  ;;  %1555 = vmatpush.msrb.mxu3 %v1389_v53 }
  0x94   : > { %1509 = vmatpush.msrb.mxu1 %v1388_v2  ;;  %1535 = vmatpush.msrb.mxu2 %v1237_v25  ;;  %v1311_v2 = vld [vmem:[%s5696_s6 + $0x2d8] sm:$0xff] }
  0x95   : > { %1490 = vmatpush.msrb.mxu0 %v1228_v15  ;;  %1556 = vmatpush.msrb.mxu3 %v1381_v13  ;;  %v1463_v25 = vld [vmem:[%s5696_s6 + $0x798] sm:$0xff]  ;;  %v1302_v15 = vld [vmem:[%s5696_s6 + $0x290] sm:$0xff] }
  0x96   : > { %1510 = vmatpush.msrb.mxu1 %v1380_v11  ;;  %1536 = vmatpush.msrb.mxu2 %v1229_v6  ;;  %v1454_v11 = vld [vmem:[%s5696_s6 + $0x750] sm:$0xff] }
  0x97   : > { %1491 = vmatpush.msrb.mxu0 %v1220_v14  ;;  %1557 = vmatpush.msrb.mxu3 %v1373_v22  ;;  %v1303_v14 = vld [vmem:[%s5696_s6 + $0x298] sm:$0xff]  ;;  %v1446_v22 = vld [vmem:[%s5696_s6 + $0x710] sm:$0xff] }
  0x98   : > { %1511 = vmatpush.msrb.mxu1 %v1372_v16  ;;  %1537 = vmatpush.msrb.mxu2 %v1221_v19  ;;  %v1455_v16 = vld [vmem:[%s5696_s6 + $0x758] sm:$0xff]  ;;  %v1294_v19 = vld [vmem:[%s5696_s6 + $0x250] sm:$0xff] }
  0x99   : > { %1558 = vmatpush.msrb.mxu3 %v1365_v12  ;;  %v1295_v12 = vld [vmem:[%s5696_s6 + $0x258] sm:$0xff] }
  0x9a   : > { %1512 = vmatpush.msrb.mxu1 %v1364_v48 }
  0x9b   : > { %1559 = vmatpush.msrb.mxu3 %v1357_v51  ;;  %v1438_v51 = vld [vmem:[%s5696_s6 + $0x6d0] sm:$0xff] }
  0x9c   : > { %1513 = vmatpush.msrb.mxu1 %v1356_v58  ;;  %v1286_v58 = vld [vmem:[%s5696_s6 + $0x210] sm:$0xff] }
  0x9d   : > { %1560 = vmatpush.msrb.mxu3 %v1349_v61  ;;  %v1439_v61 = vld [vmem:[%s5696_s6 + $0x6d8] sm:$0xff] }
  0x9e   : > { %1514 = vmatpush.msrb.mxu1 %v1348_v3  ;;  %v1287_v3 = vld [vmem:[%s5696_s6 + $0x218] sm:$0xff] }
  0xcf   : > { %v772_v24 = vpop.f32.mrf.mxu0 }
  0xd1   : > { %v795_v17 = vpop.f32.mrf.mxu1 }
  0xd2   : > { %v796_v8 = vadd.f32 %v795_v17, %v772_v24  ;;  %v1447_v24 = vld [vmem:[%s5696_s6 + $0x718] sm:$0xff]  ;;  %v1278_v17 = vld [vmem:[%s5696_s6 + $0x1d0] sm:$0xff] }
  0xd4   : > { %v852_v20 = vadd.f32 %v848_v28, %v796_v8  ;;  %v1414_v8 = vld [vmem:[%s5696_s6 + $0x610] sm:$0xff] }
  0xd5   : > { %v818_v27 = vpop.f32.mrf.mxu2 }
  0xd7   : > { %v841_v9 = vpop.f32.mrf.mxu3  ;;  %v775_v5 = vpop.f32.mrf.mxu0 }
  0xd8   : > { %v842_v37 = vadd.f32 %v841_v9, %v818_v27  ;;  %v1430_v27 = vld [vmem:[%s5696_s6 + $0x690] sm:$0xff]  ;;  %v1279_v9 = vld [vmem:[%s5696_s6 + $0x1d8] sm:$0xff] }
  0xd9   : > { %v798_v31 = vpop.f32.mrf.mxu1 }
  0xda   : > { %v799_v7 = vadd.f32 %v798_v31, %v775_v5  ;;  %v853_v29 = vadd.f32 %v849_v39, %v842_v37  ;;  %v1431_v5 = vld [vmem:[%s5696_s6 + $0x698] sm:$0xff]  ;;  %v1270_v31 = vld [vmem:[%s5696_s6 + $0x190] sm:$0xff] }
  0xdb   : > { %v1407_v37 = vld [vmem:[%s5696_s6 + $0x5d8] sm:$0xff] }
  0xdc   : > { %v854_v38 = vadd.f32 %v848_v28, %v799_v7  ;;  %v1263_v28 = vld [vmem:[%s5696_s6 + $0x158] sm:$0xff] }
  0xdd   : > { %v821_v30 = vpop.f32.mrf.mxu2  ;;  %v1399_v7 = vld [vmem:[%s5696_s6 + $0x598] sm:$0xff] }
  0xdf   : > { %v844_v32 = vpop.f32.mrf.mxu3 }
  0xe0   : > { %v845_v50 = vadd.f32 %v844_v32, %v821_v30  ;;  %v1422_v30 = vld [vmem:[%s5696_s6 + $0x650] sm:$0xff]  ;;  %v1423_v32 = vld [vmem:[%s5696_s6 + $0x658] sm:$0xff] }
  0xe1   : > { %v953_v34 = vpop.f32.mrf.mxu0 }
  0xe2   : > { %v855_v6 = vadd.f32 %v849_v39, %v845_v50  ;;  %v1246_v39 = vld [vmem:[%s5696_s6 + $0xd0] sm:$0xff]  ;;  %v1367_v50 = vld [vmem:[%s5696_s6 + $0x498] sm:$0xff] }
  0xe7   : > { %v999_v47 = vpop.f32.mrf.mxu2 }
  0xe9   : > { %v956_v43 = vpop.f32.mrf.mxu0 }
  0xee   : > { %v976_v35 = vpop.f32.mrf.mxu1 }
  0xef   : > { %v977_v0 = vadd.f32 %v976_v35, %v953_v34  ;;  %v1002_v1 = vpop.f32.mrf.mxu2  ;;  %v1262_v34 = vld [vmem:[%s5696_s6 + $0x150] sm:$0xff]  ;;  %v1415_v35 = vld [vmem:[%s5696_s6 + $0x618] sm:$0xff] }
  0xf1   : > { %v3953_v26 = vadd.f32 %v977_v0, %v852_v20  ;;  %v1254_v20 = vld [vmem:[%s5696_s6 + $0x110] sm:$0xff] }
  0xf2   : > { %v1406_v0 = vld [vmem:[%s5696_s6 + $0x5d0] sm:$0xff] }
  0xf3   : > { %1118 = vmatmul.f32.vlgmr.msra.gmra.mxu0 %v3953_v26  ;;  %1164 = vmatmul.f32.vlgmr.msra.gmra.mxu2 %v3953_v26 }
  0xf4   : > { %1568 = vmatpush.msra.mxu0 %v1342_v4  ;;  %1614 = vmatpush.msra.mxu2 %v1343_v42  ;;  %v1022_v41 = vpop.f32.mrf.mxu3  ;;  %v1398_v4 = vld [vmem:[%s5696_s6 + $0x590] sm:$0xff]  ;;  %v1247_v42 = vld [vmem:[%s5696_s6 + $0xd8] sm:$0xff] }
  0xf5   : > { %v1023_v44 = vadd.f32 %v1022_v41, %v999_v47  ;;  %v1255_v47 = vld [vmem:[%s5696_s6 + $0x118] sm:$0xff] }
  0xf6   : > { %1569 = vmatpush.msra.mxu0 %v1334_v33  ;;  %1615 = vmatpush.msra.mxu2 %v1335_v40  ;;  %v979_v54 = vpop.f32.mrf.mxu1  ;;  %v1238_v33 = vld [vmem:[%s5696_s6 + $0x90] sm:$0xff]  ;;  %v1239_v41 = vld [vmem:[%s5696_s6 + $0x98] sm:$0xff] }
  0xf7   : > { %v3975_v57 = vadd.f32 %v1023_v44, %v853_v29  ;;  %v980_v45 = vadd.f32 %v979_v54, %v956_v43  ;;  %v1390_v40 = vld [vmem:[%s5696_s6 + $0x550] sm:$0xff]  ;;  %v1391_v43 = vld [vmem:[%s5696_s6 + $0x558] sm:$0xff] }
  0xf8   : > { %1570 = vmatpush.msra.mxu0 %v1326_v46  ;;  %1616 = vmatpush.msra.mxu2 %v1327_v49  ;;  %v1230_v29 = vld [vmem:[%s5696_s6 + $0x50] sm:$0xff]  ;;  %v1231_v46 = vld [vmem:[%s5696_s6 + $0x58] sm:$0xff] }
  0xf9   : > { %v3989_v62 = vadd.f32 %v980_v45, %v854_v38  ;;  %1141 = vmatmul.f32.vlgmr.msra.gmra.mxu1 %v3975_v57  ;;  %1187 = vmatmul.f32.vlgmr.msra.gmra.mxu3 %v3975_v57  ;;  %v1382_v44 = vld [vmem:[%s5696_s6 + $0x510] sm:$0xff]  ;;  %v1383_v49 = vld [vmem:[%s5696_s6 + $0x518] sm:$0xff] }
  0xfa   : > { %1571 = vmatpush.msra.mxu0 %v1318_v36  ;;  %1591 = vmatpush.msra.mxu1 %v1470_v10  ;;  %v1222_v54 = vld [vmem:[%s5696_s6 + $0x10] sm:$0xff]  ;;  %v1223_v45 = vld [vmem:[%s5696_s6 + $0x18] sm:$0xff]  ;;  %v1344_v10 = vld [vmem:[%s5696_s6 + $0x3e0] sm:$0xff] }
  0xfb   : > { %1617 = vmatpush.msra.mxu2 %v1319_v60  ;;  %1637 = vmatpush.msra.mxu3 %v1471_v59  ;;  %v1374_v38 = vld [vmem:[%s5696_s6 + $0x4d0] sm:$0xff]  ;;  %v1375_v36 = vld [vmem:[%s5696_s6 + $0x4d8] sm:$0xff]  ;;  %v1345_v60 = vld [vmem:[%s5696_s6 + $0x3e8] sm:$0xff] }
  0xfc   : > { %1121 = vmatmul.f32.gmra.mxu0 %v3989_v62  ;;  %1167 = vmatmul.f32.gmra.mxu2 %v3989_v62  ;;  %v1025_v53 = vpop.f32.mrf.mxu3  ;;  %v1366_v59 = vld [vmem:[%s5696_s6 + $0x490] sm:$0xff] }
  0xfd   : > { %1572 = vmatpush.msra.mxu0 %v1310_v56  ;;  %1592 = vmatpush.msra.mxu1 %v1462_v63  ;;  %v1026_v13 = vadd.f32 %v1025_v53, %v1002_v1  ;;  %v1336_v56 = vld [vmem:[%s5696_s6 + $0x3a0] sm:$0xff]  ;;  %v1337_v63 = vld [vmem:[%s5696_s6 + $0x3a8] sm:$0xff]  ;;  %v1358_v1 = vld [vmem:[%s5696_s6 + $0x450] sm:$0xff] }
  0xfe   : > { %1618 = vmatpush.msra.mxu2 %v1311_v2  ;;  %1638 = vmatpush.msra.mxu3 %v1463_v25  ;;  %v1359_v2 = vld [vmem:[%s5696_s6 + $0x458] sm:$0xff]  ;;  %v1328_v25 = vld [vmem:[%s5696_s6 + $0x360] sm:$0xff]  ;;  %v1329_v53 = vld [vmem:[%s5696_s6 + $0x368] sm:$0xff] }
  0xff   : > { %v4025_v48 = vadd.f32 %v1026_v13, %v855_v6  ;;  %1573 = vmatpush.msra.mxu0 %v1302_v15  ;;  %1593 = vmatpush.msra.mxu1 %v1454_v11  ;;  %v1350_v15 = vld [vmem:[%s5696_s6 + $0x410] sm:$0xff]  ;;  %v1351_v11 = vld [vmem:[%s5696_s6 + $0x418] sm:$0xff]  ;;  %v1320_v6 = vld [vmem:[%s5696_s6 + $0x320] sm:$0xff] }
 0x100   : > { %1619 = vmatpush.msra.mxu2 %v1303_v14  ;;  %1639 = vmatpush.msra.mxu3 %v1455_v16  ;;  %v1472_v13 = vld [vmem:[%s5696_s6 + $0x7e0] sm:$0xff]  ;;  %v1321_v14 = vld [vmem:[%s5696_s6 + $0x328] sm:$0xff] }
 0x101   : > { %1574 = vmatpush.msra.mxu0 %v1294_v19  ;;  %1594 = vmatpush.msra.mxu1 %v1446_v22  ;;  %v1473_v16 = vld [vmem:[%s5696_s6 + $0x7e8] sm:$0xff]  ;;  %v1312_v19 = vld [vmem:[%s5696_s6 + $0x2e0] sm:$0xff] }
 0x102   : > { %1620 = vmatpush.msra.mxu2 %v1295_v12  ;;  %1640 = vmatpush.msra.mxu3 %v1447_v24  ;;  %v1464_v22 = vld [vmem:[%s5696_s6 + $0x7a0] sm:$0xff]  ;;  %v1313_v12 = vld [vmem:[%s5696_s6 + $0x2e8] sm:$0xff] }
 0x103   : > { %1144 = vmatmul.f32.gmra.mxu1 %v4025_v48  ;;  %1190 = vmatmul.f32.gmra.mxu3 %v4025_v48  ;;  %v1465_v24 = vld [vmem:[%s5696_s6 + $0x7a8] sm:$0xff] }
 0x104   : > { %1575 = vmatpush.msra.mxu0 %v1286_v58  ;;  %1595 = vmatpush.msra.mxu1 %v1438_v51  ;;  %v1304_v58 = vld [vmem:[%s5696_s6 + $0x2a0] sm:$0xff] }
 0x105   : > { %1621 = vmatpush.msra.mxu2 %v1287_v3  ;;  %1641 = vmatpush.msra.mxu3 %v1439_v61  ;;  %v1456_v51 = vld [vmem:[%s5696_s6 + $0x760] sm:$0xff]  ;;  %v1305_v3 = vld [vmem:[%s5696_s6 + $0x2a8] sm:$0xff] }
 0x106   : > { %1492 = vmatmul.f32.vlgmr.msrb.gmra.mxu0 %v3953_v26  ;;  %1538 = vmatmul.f32.vlgmr.msrb.gmra.mxu2 %v3953_v26  ;;  %v1457_v61 = vld [vmem:[%s5696_s6 + $0x768] sm:$0xff] }
 0x107   : > { %1576 = vmatpush.msra.mxu0 %v1278_v17  ;;  %1596 = vmatpush.msra.mxu1 %v1430_v27  ;;  %v1296_v17 = vld [vmem:[%s5696_s6 + $0x260] sm:$0xff] }
 0x108   : > { %1622 = vmatpush.msra.mxu2 %v1279_v9  ;;  %1642 = vmatpush.msra.mxu3 %v1431_v5  ;;  %v1448_v27 = vld [vmem:[%s5696_s6 + $0x720] sm:$0xff]  ;;  %v1297_v9 = vld [vmem:[%s5696_s6 + $0x268] sm:$0xff] }
 0x109   : > { %1577 = vmatpush.msra.mxu0 %v1270_v31  ;;  %1597 = vmatpush.msra.mxu1 %v1422_v30  ;;  %v1449_v5 = vld [vmem:[%s5696_s6 + $0x728] sm:$0xff]  ;;  %v1288_v31 = vld [vmem:[%s5696_s6 + $0x220] sm:$0xff] }
 0x10a   : > { %1623 = vmatpush.msra.mxu2 %v1271_v21  ;;  %1643 = vmatpush.msra.mxu3 %v1423_v32  ;;  %v1440_v30 = vld [vmem:[%s5696_s6 + $0x6e0] sm:$0xff]  ;;  %v1289_v21 = vld [vmem:[%s5696_s6 + $0x228] sm:$0xff] }
 0x10b   : > { %1578 = vmatpush.msra.mxu0 %v1262_v34  ;;  %1598 = vmatpush.msra.mxu1 %v1414_v8  ;;  %v1441_v32 = vld [vmem:[%s5696_s6 + $0x6e8] sm:$0xff]  ;;  %v1280_v34 = vld [vmem:[%s5696_s6 + $0x1e0] sm:$0xff] }
 0x10c   : > { %1624 = vmatpush.msra.mxu2 %v1263_v28  ;;  %1644 = vmatpush.msra.mxu3 %v1415_v35  ;;  %v1432_v8 = vld [vmem:[%s5696_s6 + $0x6a0] sm:$0xff]  ;;  %v1281_v28 = vld [vmem:[%s5696_s6 + $0x1e8] sm:$0xff] }
 0x10d   : > { %1515 = vmatmul.f32.vlgmr.msrb.gmra.mxu1 %v3975_v57  ;;  %1561 = vmatmul.f32.vlgmr.msrb.gmra.mxu3 %v3975_v57  ;;  %v1433_v35 = vld [vmem:[%s5696_s6 + $0x6a8] sm:$0xff] }
 0x10e   : > { %1579 = vmatpush.msra.mxu0 %v1254_v20  ;;  %1599 = vmatpush.msra.mxu1 %v1406_v0  ;;  %v1272_v20 = vld [vmem:[%s5696_s6 + $0x1a0] sm:$0xff] }
 0x10f   : > { %1625 = vmatpush.msra.mxu2 %v1255_v47  ;;  %1645 = vmatpush.msra.mxu3 %v1407_v37  ;;  %v1424_v0 = vld [vmem:[%s5696_s6 + $0x660] sm:$0xff]  ;;  %v1273_v47 = vld [vmem:[%s5696_s6 + $0x1a8] sm:$0xff] }
 0x110   : > { %1495 = vmatmul.f32.gmra.mxu0 %v3989_v62  ;;  %1541 = vmatmul.f32.gmra.mxu2 %v3989_v62  ;;  %v1425_v37 = vld [vmem:[%s5696_s6 + $0x668] sm:$0xff] }
 0x111   : > { %1580 = vmatpush.msra.mxu0 %v1246_v39  ;;  %1600 = vmatpush.msra.mxu1 %v1398_v4  ;;  %v1264_v39 = vld [vmem:[%s5696_s6 + $0x160] sm:$0xff] }
 0x112   : > { %1626 = vmatpush.msra.mxu2 %v1247_v42  ;;  %1646 = vmatpush.msra.mxu3 %v1399_v7  ;;  %v1416_v4 = vld [vmem:[%s5696_s6 + $0x620] sm:$0xff]  ;;  %v1265_v42 = vld [vmem:[%s5696_s6 + $0x168] sm:$0xff] }
 0x113   : > { %1581 = vmatpush.msra.mxu0 %v1238_v33  ;;  %1601 = vmatpush.msra.mxu1 %v1390_v40  ;;  %v1417_v7 = vld [vmem:[%s5696_s6 + $0x628] sm:$0xff]  ;;  %v1256_v33 = vld [vmem:[%s5696_s6 + $0x120] sm:$0xff] }
 0x114   : > { %1627 = vmatpush.msra.mxu2 %v1239_v41  ;;  %1647 = vmatpush.msra.mxu3 %v1391_v43  ;;  %v1408_v40 = vld [vmem:[%s5696_s6 + $0x5e0] sm:$0xff]  ;;  %v1257_v41 = vld [vmem:[%s5696_s6 + $0x128] sm:$0xff] }
 0x115   : > { %1582 = vmatpush.msra.mxu0 %v1230_v29  ;;  %1602 = vmatpush.msra.mxu1 %v1382_v44  ;;  %v1409_v43 = vld [vmem:[%s5696_s6 + $0x5e8] sm:$0xff]  ;;  %v1248_v29 = vld [vmem:[%s5696_s6 + $0xe0] sm:$0xff] }
 0x116   : > { %1628 = vmatpush.msra.mxu2 %v1231_v46  ;;  %1648 = vmatpush.msra.mxu3 %v1383_v49  ;;  %v1400_v44 = vld [vmem:[%s5696_s6 + $0x5a0] sm:$0xff]  ;;  %v1249_v46 = vld [vmem:[%s5696_s6 + $0xe8] sm:$0xff] }
 0x117   : > { %1518 = vmatmul.f32.gmra.mxu1 %v4025_v48  ;;  %1564 = vmatmul.f32.gmra.mxu3 %v4025_v48  ;;  %v1401_v49 = vld [vmem:[%s5696_s6 + $0x5a8] sm:$0xff] }
 0x118   : > { %1583 = vmatpush.msra.mxu0 %v1222_v54  ;;  %1603 = vmatpush.msra.mxu1 %v1374_v38  ;;  %v1240_v54 = vld [vmem:[%s5696_s6 + $0xa0] sm:$0xff] }
 0x119   : > { %1629 = vmatpush.msra.mxu2 %v1223_v45  ;;  %1649 = vmatpush.msra.mxu3 %v1375_v36  ;;  %v1392_v38 = vld [vmem:[%s5696_s6 + $0x560] sm:$0xff]  ;;  %v1241_v45 = vld [vmem:[%s5696_s6 + $0xa8] sm:$0xff] }
 0x11a   : > { %1660 = vmatpush.msrb.mxu0 %v1344_v10  ;;  %1604 = vmatpush.msra.mxu1 %v1366_v59  ;;  %v1393_v36 = vld [vmem:[%s5696_s6 + $0x568] sm:$0xff]  ;;  %v1232_v10 = vld [vmem:[%s5696_s6 + $0x60] sm:$0xff] }
 0x11b   : > { %1706 = vmatpush.msrb.mxu2 %v1345_v60  ;;  %1584 = vmatmul.f32.vlgmr.msra.gmra.mxu0 %v3953_v26  ;;  %v1384_v60 = vld [vmem:[%s5696_s6 + $0x520] sm:$0xff]  ;;  %v1233_v59 = vld [vmem:[%s5696_s6 + $0x68] sm:$0xff] }
 0x11c   : > { %1630 = vmatmul.f32.vlgmr.msra.gmra.mxu2 %v3953_v26  ;;  %1650 = vmatpush.msra.mxu3 %v1367_v50  ;;  %v1385_v50 = vld [vmem:[%s5696_s6 + $0x528] sm:$0xff] }
 0x11d   : > { %1661 = vmatpush.msrb.mxu0 %v1336_v56  ;;  %1707 = vmatpush.msrb.mxu2 %v1337_v63  ;;  %v1224_v56 = vld [vmem:[%s5696_s6 + $0x20] sm:$0xff] }
 0x11e   : > { %1605 = vmatpush.msra.mxu1 %v1358_v1  ;;  %1651 = vmatpush.msra.mxu3 %v1359_v2  ;;  %v1376_v63 = vld [vmem:[%s5696_s6 + $0x4e0] sm:$0xff]  ;;  %v1225_v1 = vld [vmem:[%s5696_s6 + $0x28] sm:$0xff] }
 0x11f   : > { %1662 = vmatpush.msrb.mxu0 %v1328_v25  ;;  %1708 = vmatpush.msrb.mxu2 %v1329_v53  ;;  %v1377_v2 = vld [vmem:[%s5696_s6 + $0x4e8] sm:$0xff]  ;;  %v1346_v25 = vld [vmem:[%s5696_s6 + $0x3f0] sm:$0xff]  ;;  %v1347_v53 = vld [vmem:[%s5696_s6 + $0x3f8] sm:$0xff] }
 0x120   : > { %1606 = vmatpush.msra.mxu1 %v1350_v15  ;;  %1652 = vmatpush.msra.mxu3 %v1351_v11  ;;  %v1368_v15 = vld [vmem:[%s5696_s6 + $0x4a0] sm:$0xff]  ;;  %v1369_v11 = vld [vmem:[%s5696_s6 + $0x4a8] sm:$0xff] }
 0x121   : > { %1663 = vmatpush.msrb.mxu0 %v1320_v6  ;;  %1709 = vmatpush.msrb.mxu2 %v1321_v14  ;;  %v1338_v6 = vld [vmem:[%s5696_s6 + $0x3b0] sm:$0xff]  ;;  %v1360_v14 = vld [vmem:[%s5696_s6 + $0x460] sm:$0xff] }
 0x122   : > { %1683 = vmatpush.msrb.mxu1 %v1472_v13  ;;  %1729 = vmatpush.msrb.mxu3 %v1473_v16  ;;  %v1339_v13 = vld [vmem:[%s5696_s6 + $0x3b8] sm:$0xff]  ;;  %v1361_v16 = vld [vmem:[%s5696_s6 + $0x468] sm:$0xff] }
 0x123   : > { %1607 = vmatmul.f32.vlgmr.msra.gmra.mxu1 %v3975_v57  ;;  %1653 = vmatmul.f32.vlgmr.msra.gmra.mxu3 %v3975_v57 }
 0x124   : > { %1664 = vmatpush.msrb.mxu0 %v1312_v19  ;;  %1684 = vmatpush.msrb.mxu1 %v1464_v22  ;;  %v1330_v19 = vld [vmem:[%s5696_s6 + $0x370] sm:$0xff]  ;;  %v1331_v22 = vld [vmem:[%s5696_s6 + $0x378] sm:$0xff] }
 0x125   : > { %1710 = vmatpush.msrb.mxu2 %v1313_v12  ;;  %1730 = vmatpush.msrb.mxu3 %v1465_v24  ;;  %v1352_v12 = vld [vmem:[%s5696_s6 + $0x420] sm:$0xff]  ;;  %v1353_v24 = vld [vmem:[%s5696_s6 + $0x428] sm:$0xff] }
 0x126   : > { %1587 = vmatmul.f32.gmra.mxu0 %v3989_v62  ;;  %1633 = vmatmul.f32.gmra.mxu2 %v3989_v62 }
 0x127   : > { %1665 = vmatpush.msrb.mxu0 %v1304_v58  ;;  %1685 = vmatpush.msrb.mxu1 %v1456_v51  ;;  %v1322_v58 = vld [vmem:[%s5696_s6 + $0x330] sm:$0xff] }
 0x128   : > { %1711 = vmatpush.msrb.mxu2 %v1305_v3  ;;  %1731 = vmatpush.msrb.mxu3 %v1457_v61  ;;  %v1474_v51 = vld [vmem:[%s5696_s6 + $0x7f0] sm:$0xff]  ;;  %v1323_v3 = vld [vmem:[%s5696_s6 + $0x338] sm:$0xff] }
 0x129   : > { %1666 = vmatpush.msrb.mxu0 %v1296_v17  ;;  %1686 = vmatpush.msrb.mxu1 %v1448_v27  ;;  %v1475_v61 = vld [vmem:[%s5696_s6 + $0x7f8] sm:$0xff]  ;;  %v1314_v17 = vld [vmem:[%s5696_s6 + $0x2f0] sm:$0xff] }
 0x12a   : > { %1712 = vmatpush.msrb.mxu2 %v1297_v9  ;;  %1732 = vmatpush.msrb.mxu3 %v1449_v5  ;;  %v1466_v27 = vld [vmem:[%s5696_s6 + $0x7b0] sm:$0xff]  ;;  %v1315_v9 = vld [vmem:[%s5696_s6 + $0x2f8] sm:$0xff] }
 0x12b   : > { %1667 = vmatpush.msrb.mxu0 %v1288_v31  ;;  %1687 = vmatpush.msrb.mxu1 %v1440_v30  ;;  %v1467_v5 = vld [vmem:[%s5696_s6 + $0x7b8] sm:$0xff]  ;;  %v1306_v31 = vld [vmem:[%s5696_s6 + $0x2b0] sm:$0xff] }
 0x12c   : > { %1713 = vmatpush.msrb.mxu2 %v1289_v21  ;;  %1733 = vmatpush.msrb.mxu3 %v1441_v32  ;;  %v1458_v30 = vld [vmem:[%s5696_s6 + $0x770] sm:$0xff]  ;;  %v1307_v21 = vld [vmem:[%s5696_s6 + $0x2b8] sm:$0xff] }
 0x12d   : > { %1610 = vmatmul.f32.gmra.mxu1 %v4025_v48  ;;  %1656 = vmatmul.f32.gmra.mxu3 %v4025_v48  ;;  %v1459_v32 = vld [vmem:[%s5696_s6 + $0x778] sm:$0xff] }
 0x12e   : > { %1668 = vmatpush.msrb.mxu0 %v1280_v34  ;;  %1688 = vmatpush.msrb.mxu1 %v1432_v8  ;;  %v1298_v34 = vld [vmem:[%s5696_s6 + $0x270] sm:$0xff] }
 0x12f   : > { %1714 = vmatpush.msrb.mxu2 %v1281_v28  ;;  %1734 = vmatpush.msrb.mxu3 %v1433_v35  ;;  %v1450_v8 = vld [vmem:[%s5696_s6 + $0x730] sm:$0xff]  ;;  %v1299_v28 = vld [vmem:[%s5696_s6 + $0x278] sm:$0xff] }
 0x130   : > { %1669 = vmatpush.msrb.mxu0 %v1272_v20  ;;  %1689 = vmatpush.msrb.mxu1 %v1424_v0  ;;  %v1451_v35 = vld [vmem:[%s5696_s6 + $0x738] sm:$0xff]  ;;  %v1290_v20 = vld [vmem:[%s5696_s6 + $0x230] sm:$0xff] }
 0x131   : > { %1715 = vmatpush.msrb.mxu2 %v1273_v47  ;;  %1735 = vmatpush.msrb.mxu3 %v1425_v37  ;;  %v1442_v0 = vld [vmem:[%s5696_s6 + $0x6f0] sm:$0xff]  ;;  %v1291_v47 = vld [vmem:[%s5696_s6 + $0x238] sm:$0xff] }
 0x132   : > { %1670 = vmatpush.msrb.mxu0 %v1264_v39  ;;  %1690 = vmatpush.msrb.mxu1 %v1416_v4  ;;  %v1443_v37 = vld [vmem:[%s5696_s6 + $0x6f8] sm:$0xff]  ;;  %v1282_v39 = vld [vmem:[%s5696_s6 + $0x1f0] sm:$0xff] }
 0x133   : > { %1716 = vmatpush.msrb.mxu2 %v1265_v42  ;;  %1736 = vmatpush.msrb.mxu3 %v1417_v7  ;;  %v1434_v4 = vld [vmem:[%s5696_s6 + $0x6b0] sm:$0xff]  ;;  %v1283_v42 = vld [vmem:[%s5696_s6 + $0x1f8] sm:$0xff] }
 0x134   : > { %1671 = vmatpush.msrb.mxu0 %v1256_v33  ;;  %1691 = vmatpush.msrb.mxu1 %v1408_v40  ;;  %v1435_v7 = vld [vmem:[%s5696_s6 + $0x6b8] sm:$0xff]  ;;  %v1274_v33 = vld [vmem:[%s5696_s6 + $0x1b0] sm:$0xff] }
 0x135   : > { %1717 = vmatpush.msrb.mxu2 %v1257_v41  ;;  %1737 = vmatpush.msrb.mxu3 %v1409_v43  ;;  %v1426_v40 = vld [vmem:[%s5696_s6 + $0x670] sm:$0xff]  ;;  %v1275_v41 = vld [vmem:[%s5696_s6 + $0x1b8] sm:$0xff] }
 0x136   : > { %1672 = vmatpush.msrb.mxu0 %v1248_v29  ;;  %1692 = vmatpush.msrb.mxu1 %v1400_v44  ;;  %v1427_v43 = vld [vmem:[%s5696_s6 + $0x678] sm:$0xff]  ;;  %v1266_v29 = vld [vmem:[%s5696_s6 + $0x170] sm:$0xff] }
 0x137   : > { %1718 = vmatpush.msrb.mxu2 %v1249_v46  ;;  %1738 = vmatpush.msrb.mxu3 %v1401_v49  ;;  %v1418_v44 = vld [vmem:[%s5696_s6 + $0x630] sm:$0xff]  ;;  %v1267_v46 = vld [vmem:[%s5696_s6 + $0x178] sm:$0xff] }
 0x138   : > { %1673 = vmatpush.msrb.mxu0 %v1240_v54  ;;  %1693 = vmatpush.msrb.mxu1 %v1392_v38  ;;  %v1419_v49 = vld [vmem:[%s5696_s6 + $0x638] sm:$0xff]  ;;  %v1258_v54 = vld [vmem:[%s5696_s6 + $0x130] sm:$0xff] }
 0x139   : > { %1719 = vmatpush.msrb.mxu2 %v1241_v45  ;;  %1739 = vmatpush.msrb.mxu3 %v1393_v36  ;;  %v1410_v38 = vld [vmem:[%s5696_s6 + $0x5f0] sm:$0xff]  ;;  %v1259_v45 = vld [vmem:[%s5696_s6 + $0x138] sm:$0xff] }
 0x13a   : > { %1674 = vmatpush.msrb.mxu0 %v1232_v10  ;;  %1694 = vmatpush.msrb.mxu1 %v1384_v60  ;;  %v1411_v36 = vld [vmem:[%s5696_s6 + $0x5f8] sm:$0xff]  ;;  %v1250_v10 = vld [vmem:[%s5696_s6 + $0xf0] sm:$0xff] }
 0x13b   : > { %1720 = vmatpush.msrb.mxu2 %v1233_v59  ;;  %1740 = vmatpush.msrb.mxu3 %v1385_v50  ;;  %v1402_v60 = vld [vmem:[%s5696_s6 + $0x5b0] sm:$0xff]  ;;  %v1251_v59 = vld [vmem:[%s5696_s6 + $0xf8] sm:$0xff] }
 0x13c   : > { %1675 = vmatpush.msrb.mxu0 %v1224_v56  ;;  %1695 = vmatpush.msrb.mxu1 %v1376_v63  ;;  %v1403_v50 = vld [vmem:[%s5696_s6 + $0x5b8] sm:$0xff]  ;;  %v1242_v56 = vld [vmem:[%s5696_s6 + $0xb0] sm:$0xff] }
 0x13d   : > { %1721 = vmatpush.msrb.mxu2 %v1225_v1  ;;  %1741 = vmatpush.msrb.mxu3 %v1377_v2  ;;  %v1394_v63 = vld [vmem:[%s5696_s6 + $0x570] sm:$0xff]  ;;  %v1243_v1 = vld [vmem:[%s5696_s6 + $0xb8] sm:$0xff] }
 0x13e   : > { %1676 = vmatmul.f32.vlgmr.msrb.gmra.mxu0 %v3953_v26  ;;  %1722 = vmatmul.f32.vlgmr.msrb.gmra.mxu2 %v3953_v26  ;;  %v1395_v2 = vld [vmem:[%s5696_s6 + $0x578] sm:$0xff] }
 0x13f   : > { %1752 = vmatpush.msra.mxu0 %v1346_v25  ;;  %1798 = vmatpush.msra.mxu2 %v1347_v53  ;;  %v1234_v25 = vld [vmem:[%s5696_s6 + $0x70] sm:$0xff] }
 0x140   : > { %1696 = vmatpush.msrb.mxu1 %v1368_v15  ;;  %1742 = vmatpush.msrb.mxu3 %v1369_v11  ;;  %v1386_v53 = vld [vmem:[%s5696_s6 + $0x530] sm:$0xff]  ;;  %v1235_v15 = vld [vmem:[%s5696_s6 + $0x78] sm:$0xff] }
 0x141   : > { %1753 = vmatpush.msra.mxu0 %v1338_v6  ;;  %1799 = vmatpush.msra.mxu2 %v1339_v13  ;;  %v1387_v11 = vld [vmem:[%s5696_s6 + $0x538] sm:$0xff]  ;;  %v1226_v6 = vld [vmem:[%s5696_s6 + $0x30] sm:$0xff] }
 0x142   : > { %1697 = vmatpush.msrb.mxu1 %v1360_v14  ;;  %1743 = vmatpush.msrb.mxu3 %v1361_v16  ;;  %v1378_v13 = vld [vmem:[%s5696_s6 + $0x4f0] sm:$0xff]  ;;  %v1227_v14 = vld [vmem:[%s5696_s6 + $0x38] sm:$0xff] }
 0x143   : > { %1754 = vmatpush.msra.mxu0 %v1330_v19  ;;  %1800 = vmatpush.msra.mxu2 %v1331_v22  ;;  %v1379_v16 = vld [vmem:[%s5696_s6 + $0x4f8] sm:$0xff]  ;;  %v1370_v19 = vld [vmem:[%s5696_s6 + $0x4b0] sm:$0xff] }
 0x144   : > { %1698 = vmatpush.msrb.mxu1 %v1352_v12  ;;  %1744 = vmatpush.msrb.mxu3 %v1353_v24  ;;  %v1371_v22 = vld [vmem:[%s5696_s6 + $0x4b8] sm:$0xff]  ;;  %v1938_v12 = vld [vmem:[%s5698_s8 + $0xf0] sm:$0xff] }
 0x145   : > { %1699 = vmatmul.f32.vlgmr.msrb.gmra.mxu1 %v3975_v57  ;;  %1745 = vmatmul.f32.vlgmr.msrb.gmra.mxu3 %v3975_v57  ;;  %v1362_v24 = vld [vmem:[%s5696_s6 + $0x470] sm:$0xff] }
 0x146   : > { %1755 = vmatpush.msra.mxu0 %v1322_v58  ;;  %1775 = vmatpush.msra.mxu1 %v1474_v51  ;;  %v1363_v58 = vld [vmem:[%s5696_s6 + $0x478] sm:$0xff]  ;;  %v1936_v51 = vld [vmem:[%s5698_s8 + $0xe0] sm:$0xff] }
 0x147   : > { %1801 = vmatpush.msra.mxu2 %v1323_v3  ;;  %1821 = vmatpush.msra.mxu3 %v1475_v61  ;;  %v2002_v3 = vld [vmem:[%s5698_s8 + $0x2f0] sm:$0xff] }
 0x148   : > { %1679 = vmatmul.f32.gmra.mxu0 %v3989_v62  ;;  %1725 = vmatmul.f32.gmra.mxu2 %v3989_v62  ;;  %v1354_v61 = vld [vmem:[%s5696_s6 + $0x430] sm:$0xff] }
 0x149   : > { %1756 = vmatpush.msra.mxu0 %v1314_v17  ;;  %1776 = vmatpush.msra.mxu1 %v1466_v27  ;;  %v1355_v17 = vld [vmem:[%s5696_s6 + $0x438] sm:$0xff]  ;;  %v2000_v27 = vld [vmem:[%s5698_s8 + $0x2e0] sm:$0xff] }
 0x14a   : > { %1802 = vmatpush.msra.mxu2 %v1315_v9  ;;  %1822 = vmatpush.msra.mxu3 %v1467_v5  ;;  %v1934_v9 = vld [vmem:[%s5698_s8 + $0xd0] sm:$0xff] }
 0x14b   : > { %1757 = vmatpush.msra.mxu0 %v1306_v31  ;;  %1777 = vmatpush.msra.mxu1 %v1458_v30  ;;  %v1970_v5 = vld [vmem:[%s5698_s8 + $0x1f0] sm:$0xff]  ;;  %v1932_v31 = vld [vmem:[%s5698_s8 + $0xc0] sm:$0xff] }
 0x14c   : > { %1803 = vmatpush.msra.mxu2 %v1307_v21  ;;  %1823 = vmatpush.msra.mxu3 %v1459_v32  ;;  %v1968_v30 = vld [vmem:[%s5698_s8 + $0x1e0] sm:$0xff]  ;;  %v1998_v21 = vld [vmem:[%s5698_s8 + $0x2d0] sm:$0xff] }
 0x14d   : > { %1758 = vmatpush.msra.mxu0 %v1298_v34  ;;  %1778 = vmatpush.msra.mxu1 %v1450_v8  ;;  %v2034_v32 = vld [vmem:[%s5698_s8 + $0x3f0] sm:$0xff] }
 0x14e   : > { %1804 = vmatpush.msra.mxu2 %v1299_v28  ;;  %1824 = vmatpush.msra.mxu3 %v1451_v35  ;;  %v1930_v34 = vld [vmem:[%s5698_s8 + $0xb0] sm:$0xff]  ;;  %v1996_v28 = vld [vmem:[%s5698_s8 + $0x2c0] sm:$0xff] }
 0x14f   : > { %1702 = vmatmul.f32.gmra.mxu1 %v4025_v48  ;;  %1748 = vmatmul.f32.gmra.mxu3 %v4025_v48  ;;  %v1966_v8 = vld [vmem:[%s5698_s8 + $0x1d0] sm:$0xff]  ;;  %v2032_v35 = vld [vmem:[%s5698_s8 + $0x3e0] sm:$0xff] }
 0x150   : > { %1759 = vmatpush.msra.mxu0 %v1290_v20  ;;  %1779 = vmatpush.msra.mxu1 %v1442_v0  ;;  %v1928_v20 = vld [vmem:[%s5698_s8 + $0xa0] sm:$0xff] }
 0x151   : > { %1805 = vmatpush.msra.mxu2 %v1291_v47  ;;  %1825 = vmatpush.msra.mxu3 %v1443_v37  ;;  %v1964_v0 = vld [vmem:[%s5698_s8 + $0x1c0] sm:$0xff]  ;;  %v1926_v47 = vld [vmem:[%s5698_s8 + $0x90] sm:$0xff] }
 0x152   : > { %1760 = vmatpush.msra.mxu0 %v1282_v39  ;;  %1780 = vmatpush.msra.mxu1 %v1434_v4  ;;  %v1962_v37 = vld [vmem:[%s5698_s8 + $0x1b0] sm:$0xff]  ;;  %v4638_v39 = vld [vmem:[%s5695_s5] sm:$0x3] }
 0x153   : > { %1806 = vmatpush.msra.mxu2 %v1283_v42  ;;  %1826 = vmatpush.msra.mxu3 %v1435_v7  ;;  %v1194_v4 = vld [vmem:[%s4615_s14] sm:$0xfe]  ;;  %v4642_v42 = vld [vmem:[%s4615_s14 + $0x10] sm:$0xff] }
 0x154   : > { %1761 = vmatpush.msra.mxu0 %v1274_v33  ;;  %1781 = vmatpush.msra.mxu1 %v1426_v40  ;;  %v1994_v7 = vld [vmem:[%s5698_s8 + $0x2b0] sm:$0xff]  ;;  %v1924_v40 = vld [vmem:[%s5698_s8 + $0x80] sm:$0xff] }
 0x155   : > { %1807 = vmatpush.msra.mxu2 %v1275_v41  ;;  %1827 = vmatpush.msra.mxu3 %v1427_v43  ;;  %v2030_v33 = vld [vmem:[%s5698_s8 + $0x3d0] sm:$0xff]  ;;  %v1960_v41 = vld [vmem:[%s5698_s8 + $0x1a0] sm:$0xff]  ;;  %v1098_v43 = vperm.slane %v4638_v39, 0 }
 0x156   : > { %1762 = vmatpush.msra.mxu0 %v1266_v29  ;;  %1782 = vmatpush.msra.mxu1 %v1418_v44  ;;  %v1992_v29 = vld [vmem:[%s5698_s8 + $0x2a0] sm:$0xff] }
 0x157   : > { %1808 = vmatpush.msra.mxu2 %v1267_v46  ;;  %1828 = vmatpush.msra.mxu3 %v1419_v49  ;;  %v2028_v44 = vld [vmem:[%s5698_s8 + $0x3c0] sm:$0xff]  ;;  %v1922_v46 = vld [vmem:[%s5698_s8 + $0x70] sm:$0xff] }
 0x158   : > { %1763 = vmatpush.msra.mxu0 %v1258_v54  ;;  %1783 = vmatpush.msra.mxu1 %v1410_v38  ;;  %v1958_v49 = vld [vmem:[%s5698_s8 + $0x190] sm:$0xff]  ;;  %v1202_v38 = vrot.slane %v1194_v4, 1 }
 0x159   : > { %1809 = vmatpush.msra.mxu2 %v1259_v45  ;;  %1829 = vmatpush.msra.mxu3 %v1411_v36  ;;  %v1203_v45 = vrot.slane %v4642_v42, 1  ;;  %v1990_v36 = vld [vmem:[%s5698_s8 + $0x290] sm:$0xff] }
 0x15a   : > { %1764 = vmatpush.msra.mxu0 %v1250_v10  ;;  %1784 = vmatpush.msra.mxu1 %v1402_v60  ;;  %v2026_v10 = vld [vmem:[%s5698_s8 + $0x3b0] sm:$0xff]  ;;  %v1920_v60 = vld [vmem:[%s5698_s8 + $0x60] sm:$0xff] }
 0x15b   : > { %1810 = vmatpush.msra.mxu2 %v1251_v59  ;;  %1830 = vmatpush.msra.mxu3 %v1403_v50  ;;  %v1956_v59 = vld [vmem:[%s5698_s8 + $0x180] sm:$0xff]  ;;  %v1195_v50 = vld [vmem:[%s4615_s14 + $0x8] sm:$0xfe]  ;;  %v2062_v42 = vld [vmem:[%s5698_s8 + $0x4d0] sm:$0xff] }
 0x15c   : > { %1765 = vmatpush.msra.mxu0 %v1242_v56  ;;  %1785 = vmatpush.msra.mxu1 %v1394_v63  ;;  %v4688_v63 = vld [vmem:[%s4615_s14 + $0x18] sm:$0xff] }
 0x15d   : > { %1811 = vmatpush.msra.mxu2 %v1243_v1  ;;  %1831 = vmatpush.msra.mxu3 %v1395_v2  ;;  %v1988_v1 = vld [vmem:[%s5698_s8 + $0x280] sm:$0xff] }
 0x15e   : > { %1766 = vmatpush.msra.mxu0 %v1234_v25  ;;  %1786 = vmatpush.msra.mxu1 %v1386_v53  ;;  %v2024_v2 = vld [vmem:[%s5698_s8 + $0x3a0] sm:$0xff]  ;;  %v1918_v25 = vld [vmem:[%s5698_s8 + $0x50] sm:$0xff] }
 0x15f   : > { %1812 = vmatpush.msra.mxu2 %v1235_v15  ;;  %1832 = vmatpush.msra.mxu3 %v1387_v11  ;;  %v1954_v53 = vld [vmem:[%s5698_s8 + $0x170] sm:$0xff]  ;;  %v1204_v11 = vsel %vm925_vm6, %v1202_v38, %v1203_v45  ;;  %v2012_v38 = vld [vmem:[%s5698_s8 + $0x340] sm:$0xff] }
 0x160   : > { %1767 = vmatpush.msra.mxu0 %v1226_v6  ;;  %1787 = vmatpush.msra.mxu1 %v1378_v13  ;;  %v1099_v13 = vperm.slane %v4638_v39, 1  ;;  %v2060_v39 = vld [vmem:[%s5698_s8 + $0x4c0] sm:$0xff] }
 0x161   : > { %1813 = vmatpush.msra.mxu2 %v1227_v14  ;;  %1833 = vmatpush.msra.mxu3 %v1379_v16  ;;  %v1986_v14 = vld [vmem:[%s5698_s8 + $0x270] sm:$0xff] }
 0x162   : > { %1768 = vmatmul.f32.vlgmr.msra.gmra.mxu0 %v3953_v26  ;;  %1814 = vmatmul.f32.vlgmr.msra.gmra.mxu2 %v3953_v26  ;;  %v2022_v16 = vld [vmem:[%s5698_s8 + $0x390] sm:$0xff] }
 0x163   : > { %1788 = vmatpush.msra.mxu1 %v1370_v19  ;;  %1834 = vmatpush.msra.mxu3 %v1371_v22  ;;  %v1916_v19 = vld [vmem:[%s5698_s8 + $0x40] sm:$0xff] }
 0x164   : > { %2164 = vmatpush.msrb.mxu0 %v1938_v12  ;;  %2210 = vmatpush.msrb.mxu2 %v2002_v3  ;;  %v1952_v22 = vld [vmem:[%s5698_s8 + $0x160] sm:$0xff] }
 0x165   : > { %1789 = vmatpush.msra.mxu1 %v1362_v24  ;;  %1835 = vmatpush.msra.mxu3 %v1363_v58  ;;  %v1205_v24 = vrot.slane %v1195_v50, 1  ;;  %v1206_v58 = vrot.slane %v4688_v63, 1  ;;  %v1984_v3 = vld [vmem:[%s5698_s8 + $0x260] sm:$0xff]  ;;  %v2010_v50 = vld [vmem:[%s5698_s8 + $0x330] sm:$0xff] }
 0x166   : > { %2165 = vmatpush.msrb.mxu0 %v1936_v51  ;;  %2211 = vmatpush.msrb.mxu2 %v2000_v27  ;;  %v1950_v27 = vld [vmem:[%s5698_s8 + $0x150] sm:$0xff]  ;;  %v2092_v63 = vld [vmem:[%s5698_s8 + $0x5c0] sm:$0xff] }
 0x167   : > { %1790 = vmatpush.msra.mxu1 %v1354_v61  ;;  %1836 = vmatpush.msra.mxu3 %v1355_v17  ;;  %v2020_v61 = vld [vmem:[%s5698_s8 + $0x380] sm:$0xff]  ;;  %v1914_v17 = vld [vmem:[%s5698_s8 + $0x30] sm:$0xff] }
 0x168   : > { %1791 = vmatmul.f32.vlgmr.msra.gmra.mxu1 %v3975_v57  ;;  %1837 = vmatmul.f32.vlgmr.msra.gmra.mxu3 %v3975_v57 }
 0x169   : > { %2166 = vmatpush.msrb.mxu0 %v1934_v9  ;;  %2187 = vmatpush.msrb.mxu1 %v1970_v5  ;;  %v1982_v5 = vld [vmem:[%s5698_s8 + $0x250] sm:$0xff] }
 0x16a   : > { %1771 = vmatmul.f32.gmra.mxu0 %v3989_v62  ;;  %1817 = vmatmul.f32.gmra.mxu2 %v3989_v62 }
 0x16b   : > { %2167 = vmatpush.msrb.mxu0 %v1932_v31  ;;  %2188 = vmatpush.msrb.mxu1 %v1968_v30  ;;  %v2018_v31 = vld [vmem:[%s5698_s8 + $0x370] sm:$0xff]  ;;  %v1912_v30 = vld [vmem:[%s5698_s8 + $0x20] sm:$0xff] }
 0x16c   : > { %2212 = vmatpush.msrb.mxu2 %v1998_v21  ;;  %2233 = vmatpush.msrb.mxu3 %v2034_v32  ;;  %v1948_v21 = vld [vmem:[%s5698_s8 + $0x140] sm:$0xff] }
 0x16d   : > { %2168 = vmatpush.msrb.mxu0 %v1930_v34  ;;  %2189 = vmatpush.msrb.mxu1 %v1966_v8  ;;  %v1207_v8 = vsel %vm925_vm6, %v1205_v24, %v1206_v58  ;;  %v2056_v24 = vld [vmem:[%s5698_s8 + $0x4a0] sm:$0xff] }
 0x16e   : > { %2213 = vmatpush.msrb.mxu2 %v1996_v28  ;;  %2234 = vmatpush.msrb.mxu3 %v2032_v35  ;;  %v1980_v35 = vld [vmem:[%s5698_s8 + $0x240] sm:$0xff] }
 0x16f   : > { %2169 = vmatpush.msrb.mxu0 %v1928_v20  ;;  %2190 = vmatpush.msrb.mxu1 %v1964_v0  ;;  %v2016_v20 = vld [vmem:[%s5698_s8 + $0x360] sm:$0xff]  ;;  %v1910_v0 = vld [vmem:[%s5698_s8 + $0x10] sm:$0xff] }
 0x170   : > { %1794 = vmatmul.f32.gmra.mxu1 %v4025_v48  ;;  %1840 = vmatmul.f32.gmra.mxu3 %v4025_v48  ;;  %v1119_v54 = vpop.f32.mrf.mxu0 }
 0x171   : > { %2170 = vmatpush.msrb.mxu0 %v1926_v47  ;;  %2191 = vmatpush.msrb.mxu1 %v1962_v37  ;;  %v1120_v56 = vadd.f32 %v1119_v54, %v1098_v43  ;;  %v1946_v47 = vld [vmem:[%s5698_s8 + $0x130] sm:$0xff] }
 0x172   : > { %2214 = vmatpush.msrb.mxu2 %v1994_v7  ;;  %2235 = vmatpush.msrb.mxu3 %v2030_v33  ;;  %v1978_v7 = vld [vmem:[%s5698_s8 + $0x230] sm:$0xff] }
 0x173   : > { %2171 = vmatpush.msrb.mxu0 %v1924_v40  ;;  %2192 = vmatpush.msrb.mxu1 %v1960_v41  ;;  %v2014_v33 = vld [vmem:[%s5698_s8 + $0x350] sm:$0xff]  ;;  %v1908_v40 = vld [vmem:[%s5698_s8] sm:$0xff] }
 0x174   : > { %2215 = vmatpush.msrb.mxu2 %v1992_v29  ;;  %2236 = vmatpush.msrb.mxu3 %v2028_v44  ;;  %v1944_v41 = vld [vmem:[%s5698_s8 + $0x120] sm:$0xff] }
 0x175   : > { %2172 = vmatpush.msrb.mxu0 %v1922_v46  ;;  %2193 = vmatpush.msrb.mxu1 %v1958_v49  ;;  %v1976_v46 = vld [vmem:[%s5698_s8 + $0x220] sm:$0xff]  ;;  %v1942_v49 = vld [vmem:[%s5698_s8 + $0x110] sm:$0xff] }
 0x176   : > { %v1142_v15 = vpop.f32.mrf.mxu1  ;;  %2216 = vmatpush.msrb.mxu2 %v1990_v36  ;;  %2237 = vmatpush.msrb.mxu3 %v2026_v10  ;;  %v1165_v12 = vpop.f32.mrf.mxu2  ;;  %v2064_v36 = vld [vmem:[%s5698_s8 + $0x4e0] sm:$0xff] }
 0x177   : > { %2173 = vmatpush.msrb.mxu0 %v1920_v60  ;;  %2194 = vmatpush.msrb.mxu1 %v1956_v59  ;;  %v1143_v6 = vadd.f32 %v1142_v15, %v1120_v56  ;;  %v1166_v9 = vadd.f32 %v1165_v12, %v1099_v13  ;;  %v1974_v60 = vld [vmem:[%s5698_s8 + $0x210] sm:$0xff]  ;;  %v1940_v59 = vld [vmem:[%s5698_s8 + $0x100] sm:$0xff] }
 0x178   : > { %2217 = vmatpush.msrb.mxu2 %v1988_v1  ;;  %2238 = vmatpush.msrb.mxu3 %v2024_v2  ;;  %v2098_v56 = vld [vmem:[%s5698_s8 + $0x5f0] sm:$0xff]  ;;  %v1972_v2 = vld [vmem:[%s5698_s8 + $0x200] sm:$0xff] }
 0x179   : > { %2174 = vmatpush.msrb.mxu0 %v1918_v25  ;;  %2195 = vmatpush.msrb.mxu1 %v1954_v53  ;;  %v1212_v51 = vadd.f32 %v1204_v11, %v1143_v6  ;;  %v1122_v32 = vpop.f32.mrf.mxu0  ;;  %v2008_v25 = vld [vmem:[%s5698_s8 + $0x320] sm:$0xff]  ;;  %v2130_v11 = vld [vmem:[%s5698_s8 + $0x6f0] sm:$0xff] }
 0x17a   : > { %2218 = vmatpush.msrb.mxu2 %v1986_v14  ;;  %2239 = vmatpush.msrb.mxu3 %v2022_v16  ;;  %v1123_v37 = vadd.f32 %v1122_v32, %v1098_v43  ;;  %v2066_v43 = vld [vmem:[%s5698_s8 + $0x4f0] sm:$0xff]  ;;  %v2096_v53 = vld [vmem:[%s5698_s8 + $0x5e0] sm:$0xff] }
 0x17b   : > { %2175 = vmatpush.msrb.mxu0 %v1916_v19  ;;  %2196 = vmatpush.msrb.mxu1 %v1952_v22  ;;  %1216 = vst [vmem:[%s4722_s30] sm:$0xff] %v1212_v51  ;;  %v2006_v6 = vld [vmem:[%s5698_s8 + $0x310] sm:$0xff]  ;;  %v2128_v12 = vld [vmem:[%s5698_s8 + $0x6e0] sm:$0xff] }
 0x17c   : > { %v1188_v34 = vpop.f32.mrf.mxu3  ;;  %2219 = vmatpush.msrb.mxu2 %v1984_v3  ;;  %2240 = vmatpush.msrb.mxu3 %v2020_v61  ;;  %v2094_v14 = vld [vmem:[%s5698_s8 + $0x5d0] sm:$0xff]  ;;  %v2004_v3 = vld [vmem:[%s5698_s8 + $0x300] sm:$0xff] }
 0x17d   : > { %2176 = vmatpush.msrb.mxu0 %v1914_v17  ;;  %2197 = vmatpush.msrb.mxu1 %v1950_v27  ;;  %v1189_v28 = vadd.f32 %v1188_v34, %v1166_v9  ;;  %v2126_v51 = vld [vmem:[%s5698_s8 + $0x6d0] sm:$0xff]  ;;  %v2124_v27 = vld [vmem:[%s5698_s8 + $0x6c0] sm:$0xff] }
 0x17e   : > { %2220 = vmatpush.msrb.mxu2 %v1982_v5  ;;  %2241 = vmatpush.msrb.mxu3 %v2018_v31  ;;  %v2054_v61 = vld [vmem:[%s5698_s8 + $0x490] sm:$0xff]  ;;  %v2052_v5 = vld [vmem:[%s5698_s8 + $0x480] sm:$0xff] }
 0x17f   : > { %2177 = vmatpush.msrb.mxu0 %v1912_v30  ;;  %2198 = vmatpush.msrb.mxu1 %v1948_v21  ;;  %v1213_v4 = vadd.f32 %v1207_v8, %v1189_v28  ;;  %v1168_v54 = vpop.f32.mrf.mxu2  ;;  %v2090_v17 = vld [vmem:[%s5698_s8 + $0x5b0] sm:$0xff]  ;;  %v2088_v31 = vld [vmem:[%s5698_s8 + $0x5a0] sm:$0xff] }
 0x180   : > { %v1145_v29 = vpop.f32.mrf.mxu1  ;;  %2221 = vmatpush.msrb.mxu2 %v1980_v35  ;;  %2242 = vmatpush.msrb.mxu3 %v2016_v20  ;;  %v2162_v9 = vld [vmem:[%s5698_s8 + $0x7f0] sm:$0xff]  ;;  %v2160_v35 = vld [vmem:[%s5698_s8 + $0x7e0] sm:$0xff] }
 0x181   : > { %2178 = vmatpush.msrb.mxu0 %v1910_v0  ;;  %2199 = vmatpush.msrb.mxu1 %v1946_v47  ;;  %1217 = vst [vmem:[%s4722_s30 + $0x8] sm:$0xff] %v1213_v4  ;;  %v1146_v44 = vadd.f32 %v1145_v29, %v1123_v37  ;;  %v2122_v32 = vld [vmem:[%s5698_s8 + $0x6b0] sm:$0xff]  ;;  %v2120_v20 = vld [vmem:[%s5698_s8 + $0x6a0] sm:$0xff] }
 0x182   : > { %2222 = vmatpush.msrb.mxu2 %v1978_v7  ;;  %2243 = vmatpush.msrb.mxu3 %v2014_v33  ;;  %v2050_v34 = vld [vmem:[%s5698_s8 + $0x470] sm:$0xff]  ;;  %v2048_v0 = vld [vmem:[%s5698_s8 + $0x460] sm:$0xff] }
 0x183   : > { %2179 = vmatpush.msrb.mxu0 %v1908_v40  ;;  %2200 = vmatpush.msrb.mxu1 %v1944_v41  ;;  %v1214_v10 = vadd.f32 %v1203_v45, %v1146_v44  ;;  %v1169_v45 = vadd.f32 %v1168_v54, %v1099_v13  ;;  %v2058_v13 = vld [vmem:[%s5698_s8 + $0x4b0] sm:$0xff]  ;;  %v1493_v19 = vpop.f32.mrf.mxu0  ;;  %v2084_v47 = vld [vmem:[%s5698_s8 + $0x580] sm:$0xff] }
 0x184   : > { %2223 = vmatpush.msrb.mxu2 %v1976_v46  ;;  %2244 = vmatpush.msrb.mxu3 %v2012_v38  ;;  %v2086_v8 = vld [vmem:[%s5698_s8 + $0x590] sm:$0xff]  ;;  %v2044_v44 = vld [vmem:[%s5698_s8 + $0x440] sm:$0xff] }
 0x185   : > { %2256 = vmatpush.msra.mxu0 %v2066_v43  ;;  %2201 = vmatpush.msrb.mxu1 %v1942_v49  ;;  %1218 = vst [vmem:[%s4722_s30 + $0x10] sm:$0x7f] %v1214_v10  ;;  %v2158_v7 = vld [vmem:[%s5698_s8 + $0x7d0] sm:$0xff]  ;;  %v2156_v43 = vld [vmem:[%s5698_s8 + $0x7c0] sm:$0xff] }
 0x186   : > { %v1191_v1 = vpop.f32.mrf.mxu3  ;;  %2224 = vmatpush.msrb.mxu2 %v1974_v60  ;;  %2245 = vmatpush.msrb.mxu3 %v2010_v50  ;;  %v2046_v33 = vld [vmem:[%s5698_s8 + $0x450] sm:$0xff]  ;;  %v2080_v46 = vld [vmem:[%s5698_s8 + $0x560] sm:$0xff] }
 0x187   : > { %2257 = vmatpush.msra.mxu0 %v2064_v36  ;;  %2202 = vmatpush.msrb.mxu1 %v1940_v59  ;;  %v1192_v15 = vadd.f32 %v1191_v1, %v1169_v45  ;;  %v2082_v41 = vld [vmem:[%s5698_s8 + $0x570] sm:$0xff]  ;;  %v2116_v49 = vld [vmem:[%s5698_s8 + $0x680] sm:$0xff] }
 0x188   : > { %2225 = vmatpush.msrb.mxu2 %v1972_v2  ;;  %2246 = vmatpush.msrb.mxu3 %v2008_v25  ;;  %v2118_v29 = vld [vmem:[%s5698_s8 + $0x690] sm:$0xff]  ;;  %v2040_v50 = vld [vmem:[%s5698_s8 + $0x420] sm:$0xff] }
 0x189   : > { %2258 = vmatpush.msra.mxu0 %v2062_v42  ;;  %2279 = vmatpush.msra.mxu1 %v2098_v56  ;;  %v1215_v16 = vadd.f32 %v1206_v58, %v1192_v15  ;;  %v1539_v30 = vpop.f32.mrf.mxu2  ;;  %v2154_v54 = vld [vmem:[%s5698_s8 + $0x7b0] sm:$0xff]  ;;  %v2076_v45 = vld [vmem:[%s5698_s8 + $0x540] sm:$0xff] }
 0x18a   : > { %v1516_v22 = vpop.f32.mrf.mxu1  ;;  %2302 = vmatpush.msra.mxu2 %v2130_v11  ;;  %2247 = vmatpush.msrb.mxu3 %v2006_v6  ;;  %v2042_v38 = vld [vmem:[%s5698_s8 + $0x430] sm:$0xff]  ;;  %v2152_v56 = vld [vmem:[%s5698_s8 + $0x7a0] sm:$0xff] }
 0x18b   : > { %2259 = vmatpush.msra.mxu0 %v2060_v39  ;;  %2280 = vmatpush.msra.mxu1 %v2096_v53  ;;  %1219 = vst [vmem:[%s4722_s30 + $0x18] sm:$0x7f] %v1215_v16  ;;  %v4853_v58 = vadd.f32 %v1516_v22, %v1493_v19  ;;  %v2078_v36 = vld [vmem:[%s5698_s8 + $0x550] sm:$0xff]  ;;  %v2112_v1 = vld [vmem:[%s5698_s8 + $0x660] sm:$0xff] }
 0x18c   : > { %2303 = vmatpush.msra.mxu2 %v2128_v12  ;;  %2248 = vmatpush.msrb.mxu3 %v2004_v3  ;;  %v2114_v59 = vld [vmem:[%s5698_s8 + $0x670] sm:$0xff]  ;;  %v2036_v15 = vld [vmem:[%s5698_s8 + $0x400] sm:$0xff]  ;;  %v1937_v12 = vld [vmem:[%s5698_s8 + $0xe8] sm:$0xff] }
 0x18d   : > { %2260 = vmatpush.msra.mxu0 %v2058_v13  ;;  %2281 = vmatpush.msra.mxu1 %v2094_v14  ;;  %v1496_v37 = vpop.f32.mrf.mxu0  ;;  %v2038_v2 = vld [vmem:[%s5698_s8 + $0x410] sm:$0xff]  ;;  %v2072_v11 = vld [vmem:[%s5698_s8 + $0x520] sm:$0xff]  ;;  %v1939_v14 = vld [vmem:[%s5698_s8 + $0xf8] sm:$0xff] }
 0x18e   : > { %2180 = vmatmul.f32.vlgmr.msrb.gmra.mxu0 %v4853_v58  ;;  %2304 = vmatpush.msra.mxu2 %v2126_v51  ;;  %v2074_v25 = vld [vmem:[%s5698_s8 + $0x530] sm:$0xff]  ;;  %v2148_v22 = vld [vmem:[%s5698_s8 + $0x780] sm:$0xff]  ;;  %v1935_v3 = vld [vmem:[%s5698_s8 + $0xd8] sm:$0xff] }
 0x18f   : > { %2261 = vmatpush.msra.mxu0 %v2056_v24  ;;  %2282 = vmatpush.msra.mxu1 %v2092_v63  ;;  %v2150_v39 = vld [vmem:[%s5698_s8 + $0x790] sm:$0xff]  ;;  %v2108_v24 = vld [vmem:[%s5698_s8 + $0x640] sm:$0xff] }
 0x190   : > { %v1562_v21 = vpop.f32.mrf.mxu3  ;;  %2305 = vmatpush.msra.mxu2 %v2124_v27  ;;  %2325 = vmatpush.msra.mxu3 %v2162_v9  ;;  %v2110_v53 = vld [vmem:[%s5698_s8 + $0x650] sm:$0xff]  ;;  %v2068_v63 = vld [vmem:[%s5698_s8 + $0x500] sm:$0xff] }
 0x191   : > { %2262 = vmatpush.msra.mxu0 %v2054_v61  ;;  %2283 = vmatpush.msra.mxu1 %v2090_v17  ;;  %v4889_v28 = vadd.f32 %v1562_v21, %v1539_v30  ;;  %v2070_v19 = vld [vmem:[%s5698_s8 + $0x510] sm:$0xff]  ;;  %v1971_v61 = vld [vmem:[%s5698_s8 + $0x1f8] sm:$0xff]  ;;  %v2144_v27 = vld [vmem:[%s5698_s8 + $0x760] sm:$0xff] }
 0x192   : > { %2306 = vmatpush.msra.mxu2 %v2122_v32  ;;  %2326 = vmatpush.msra.mxu3 %v2160_v35  ;;  %v2146_v51 = vld [vmem:[%s5698_s8 + $0x770] sm:$0xff]  ;;  %v1969_v21 = vld [vmem:[%s5698_s8 + $0x1e8] sm:$0xff]  ;;  %v2104_v32 = vld [vmem:[%s5698_s8 + $0x620] sm:$0xff] }
 0x193   : > { %2263 = vmatpush.msra.mxu0 %v2052_v5  ;;  %2284 = vmatpush.msra.mxu1 %v2088_v31  ;;  %v1542_v10 = vpop.f32.mrf.mxu2  ;;  %v2106_v17 = vld [vmem:[%s5698_s8 + $0x630] sm:$0xff]  ;;  %v1933_v31 = vld [vmem:[%s5698_s8 + $0xc8] sm:$0xff]  ;;  %v1967_v35 = vld [vmem:[%s5698_s8 + $0x1d8] sm:$0xff] }
 0x194   : > { %2203 = vmatmul.f32.vlgmr.msrb.gmra.mxu1 %v4889_v28  ;;  %v1519_v4 = vpop.f32.mrf.mxu1  ;;  %2307 = vmatpush.msra.mxu2 %v2120_v20  ;;  %v2102_v20 = vld [vmem:[%s5698_s8 + $0x610] sm:$0xff] }
 0x195   : > { %2264 = vmatpush.msra.mxu0 %v2050_v34  ;;  %2285 = vmatpush.msra.mxu1 %v2086_v8  ;;  %v4910_v40 = vadd.f32 %v1519_v4, %v1496_v37  ;;  %v1931_v34 = vld [vmem:[%s5698_s8 + $0xb8] sm:$0xff]  ;;  %v2142_v8 = vld [vmem:[%s5698_s8 + $0x750] sm:$0xff]  ;;  %v1929_v37 = vld [vmem:[%s5698_s8 + $0xa8] sm:$0xff] }
 0x196   : > { %2327 = vmatpush.msra.mxu3 %v2158_v7  ;;  %2308 = vmatpush.msra.mxu2 %v2118_v29  ;;  %v1965_v7 = vld [vmem:[%s5698_s8 + $0x1c8] sm:$0xff]  ;;  %v2100_v29 = vld [vmem:[%s5698_s8 + $0x600] sm:$0xff] }
 0x197   : > { %2265 = vmatpush.msra.mxu0 %v2048_v0  ;;  %2286 = vmatpush.msra.mxu1 %v2084_v47 }
 0x198   : > { %2183 = vmatmul.f32.gmra.mxu0 %v4910_v40  ;;  %2328 = vmatpush.msra.mxu3 %v2156_v43  ;;  %v1585_v6 = vpop.f32.mrf.mxu0  ;;  %v1963_v43 = vld [vmem:[%s5698_s8 + $0x1b8] sm:$0xff] }
 0x199   : > { %2266 = vmatpush.msra.mxu0 %v2046_v33  ;;  %2287 = vmatpush.msra.mxu1 %v2082_v41  ;;  %v2140_v33 = vld [vmem:[%s5698_s8 + $0x740] sm:$0xff]  ;;  %v1927_v41 = vld [vmem:[%s5698_s8 + $0x98] sm:$0xff] }
 0x19a   : > { %v1565_v60 = vpop.f32.mrf.mxu3  ;;  %2309 = vmatpush.msra.mxu2 %v2116_v49  ;;  %2329 = vmatpush.msra.mxu3 %v2154_v54  ;;  %v2003_v49 = vld [vmem:[%s5698_s8 + $0x2f8] sm:$0xff]  ;;  %v1961_v54 = vld [vmem:[%s5698_s8 + $0x1a8] sm:$0xff] }
 0x19b   : > { %2267 = vmatpush.msra.mxu0 %v2044_v44  ;;  %2288 = vmatpush.msra.mxu1 %v2080_v46  ;;  %v4946_v42 = vadd.f32 %v1565_v60, %v1542_v10  ;;  %v2138_v44 = vld [vmem:[%s5698_s8 + $0x730] sm:$0xff]  ;;  %v1925_v46 = vld [vmem:[%s5698_s8 + $0x88] sm:$0xff]  ;;  %v1923_v60 = vld [vmem:[%s5698_s8 + $0x78] sm:$0xff] }
 0x19c   : > { %2310 = vmatpush.msra.mxu2 %v2114_v59  ;;  %2330 = vmatpush.msra.mxu3 %v2152_v56  ;;  %v1921_v56 = vld [vmem:[%s5698_s8 + $0x68] sm:$0xff] }
 0x19d   : > { %2268 = vmatpush.msra.mxu0 %v2042_v38  ;;  %2289 = vmatpush.msra.mxu1 %v2078_v36  ;;  %v2136_v38 = vld [vmem:[%s5698_s8 + $0x720] sm:$0xff] }
 0x19e   : > { %2206 = vmatmul.f32.gmra.mxu1 %v4946_v42  ;;  %2311 = vmatpush.msra.mxu2 %v2112_v1  ;;  %v2134_v1 = vld [vmem:[%s5698_s8 + $0x710] sm:$0xff] }
 0x19f   : > { %2269 = vmatpush.msra.mxu0 %v2040_v50  ;;  %2290 = vmatpush.msra.mxu1 %v2076_v45  ;;  %v1631_v9 = vpop.f32.mrf.mxu2  ;;  %v1959_v50 = vld [vmem:[%s5698_s8 + $0x198] sm:$0xff]  ;;  %v2001_v45 = vld [vmem:[%s5698_s8 + $0x2e8] sm:$0xff] }
 0x1a0   : > { %v1608_v13 = vpop.f32.mrf.mxu1  ;;  %2331 = vmatpush.msra.mxu3 %v2150_v39  ;;  %2312 = vmatpush.msra.mxu2 %v2110_v53  ;;  %v1919_v39 = vld [vmem:[%s5698_s8 + $0x58] sm:$0xff]  ;;  %v2132_v53 = vld [vmem:[%s5698_s8 + $0x700] sm:$0xff] }
 0x1a1   : > { %2270 = vmatpush.msra.mxu0 %v2038_v2  ;;  %2291 = vmatpush.msra.mxu1 %v2074_v25  ;;  %v4979_v16 = vadd.f32 %v1608_v13, %v1585_v6  ;;  %v1957_v2 = vld [vmem:[%s5698_s8 + $0x188] sm:$0xff]  ;;  %v1999_v25 = vld [vmem:[%s5698_s8 + $0x2d8] sm:$0xff] }
 0x1a2   : > { %2332 = vmatpush.msra.mxu3 %v2148_v22  ;;  %2313 = vmatpush.msra.mxu2 %v2108_v24  ;;  %v1917_v6 = vld [vmem:[%s5698_s8 + $0x48] sm:$0xff]  ;;  %v2035_v13 = vld [vmem:[%s5698_s8 + $0x3f8] sm:$0xff] }
 0x1a3   : > { %2271 = vmatpush.msra.mxu0 %v2036_v15  ;;  %2292 = vmatpush.msra.mxu1 %v2072_v11  ;;  %v1588_v0 = vpop.f32.mrf.mxu0  ;;  %v1955_v15 = vld [vmem:[%s5698_s8 + $0x178] sm:$0xff]  ;;  %v1997_v11 = vld [vmem:[%s5698_s8 + $0x2c8] sm:$0xff] }
 0x1a4   : > { %2226 = vmatmul.f32.vlgmr.msrb.gmra.mxu2 %v4979_v16  ;;  %2333 = vmatpush.msra.mxu3 %v2146_v51  ;;  %v1915_v22 = vld [vmem:[%s5698_s8 + $0x38] sm:$0xff]  ;;  %v1913_v51 = vld [vmem:[%s5698_s8 + $0x28] sm:$0xff] }
 0x1a5   : > { %2348 = vmatpush.msrb.mxu0 %v1939_v14  ;;  %2293 = vmatpush.msra.mxu1 %v2070_v19  ;;  %v1953_v14 = vld [vmem:[%s5698_s8 + $0x168] sm:$0xff]  ;;  %v1995_v19 = vld [vmem:[%s5698_s8 + $0x2b8] sm:$0xff] }
 0x1a6   : > { %v1654_v5 = vpop.f32.mrf.mxu3  ;;  %2314 = vmatpush.msra.mxu2 %v2106_v17  ;;  %2334 = vmatpush.msra.mxu3 %v2144_v27  ;;  %v1951_v24 = vld [vmem:[%s5698_s8 + $0x158] sm:$0xff] }
 0x1a7   : > { %2349 = vmatpush.msrb.mxu0 %v1937_v12  ;;  %2294 = vmatpush.msra.mxu1 %v2068_v63  ;;  %v5015_v30 = vadd.f32 %v1654_v5, %v1631_v9  ;;  %v2033_v12 = vld [vmem:[%s5698_s8 + $0x3e8] sm:$0xff]  ;;  %v1991_v17 = vld [vmem:[%s5698_s8 + $0x298] sm:$0xff] }
 0x1a8   : > { %2315 = vmatpush.msra.mxu2 %v2104_v32  ;;  %2335 = vmatpush.msra.mxu3 %v2142_v8  ;;  %v1993_v63 = vld [vmem:[%s5698_s8 + $0x2a8] sm:$0xff]  ;;  %v1911_v27 = vld [vmem:[%s5698_s8 + $0x18] sm:$0xff] }
 0x1a9   : > { %2350 = vmatpush.msrb.mxu0 %v1935_v3  ;;  %2371 = vmatpush.msrb.mxu1 %v1971_v61  ;;  %v1634_v36 = vpop.f32.mrf.mxu2  ;;  %v2031_v3 = vld [vmem:[%s5698_s8 + $0x3d8] sm:$0xff]  ;;  %v1949_v61 = vld [vmem:[%s5698_s8 + $0x148] sm:$0xff] }
 0x1aa   : > { %2249 = vmatmul.f32.vlgmr.msrb.gmra.mxu3 %v5015_v30  ;;  %v1611_v47 = vpop.f32.mrf.mxu1  ;;  %2316 = vmatpush.msra.mxu2 %v2102_v20  ;;  %v2029_v9 = vld [vmem:[%s5698_s8 + $0x3c8] sm:$0xff]  ;;  %v1947_v5 = vld [vmem:[%s5698_s8 + $0x138] sm:$0xff] }
 0x1ab   : > { %2351 = vmatpush.msrb.mxu0 %v1933_v31  ;;  %2372 = vmatpush.msrb.mxu1 %v1969_v21  ;;  %v5039_v4 = vadd.f32 %v1611_v47, %v1588_v0  ;;  %v1989_v31 = vld [vmem:[%s5698_s8 + $0x288] sm:$0xff]  ;;  %v2027_v32 = vld [vmem:[%s5698_s8 + $0x3b8] sm:$0xff] }
 0x1ac   : > { %2336 = vmatpush.msra.mxu3 %v2140_v33  ;;  %2317 = vmatpush.msra.mxu2 %v2100_v29  ;;  %v1909_v21 = vld [vmem:[%s5698_s8 + $0x8] sm:$0xff]  ;;  %v1987_v8 = vld [vmem:[%s5698_s8 + $0x278] sm:$0xff] }
 0x1ad   : > { %2352 = vmatpush.msrb.mxu0 %v1931_v34  ;;  %2373 = vmatpush.msrb.mxu1 %v1967_v35  ;;  %v1945_v34 = vld [vmem:[%s5698_s8 + $0x128] sm:$0xff]  ;;  %v1943_v20 = vld [vmem:[%s5698_s8 + $0x118] sm:$0xff] }
 0x1ae   : > { %2229 = vmatmul.f32.gmra.mxu2 %v5039_v4  ;;  %2337 = vmatpush.msra.mxu3 %v2138_v44  ;;  %v2025_v35 = vld [vmem:[%s5698_s8 + $0x3a8] sm:$0xff] }
 0x1af   : > { %2353 = vmatpush.msrb.mxu0 %v1929_v37  ;;  %2374 = vmatpush.msrb.mxu1 %v1965_v7  ;;  %v1985_v0 = vld [vmem:[%s5698_s8 + $0x268] sm:$0xff]  ;;  %v2023_v7 = vld [vmem:[%s5698_s8 + $0x398] sm:$0xff] }
 0x1b0   : > { %v1657_v10 = vpop.f32.mrf.mxu3  ;;  %2394 = vmatpush.msrb.mxu2 %v2003_v49  ;;  %2338 = vmatpush.msra.mxu3 %v2136_v38  ;;  %v1941_v29 = vld [vmem:[%s5698_s8 + $0x108] sm:$0xff]  ;;  %v2063_v38 = vld [vmem:[%s5698_s8 + $0x4d8] sm:$0xff] }
 0x1b1   : > { %2354 = vmatpush.msrb.mxu0 %v1927_v41  ;;  %2375 = vmatpush.msrb.mxu1 %v1963_v43  ;;  %v5075_v59 = vadd.f32 %v1657_v10, %v1634_v36  ;;  %v2067_v41 = vld [vmem:[%s5698_s8 + $0x4f8] sm:$0xff]  ;;  %v2021_v44 = vld [vmem:[%s5698_s8 + $0x388] sm:$0xff] }
 0x1b2   : > { %2395 = vmatpush.msrb.mxu2 %v2001_v45  ;;  %2339 = vmatpush.msra.mxu3 %v2134_v1  ;;  %v1983_v43 = vld [vmem:[%s5698_s8 + $0x258] sm:$0xff]  ;;  %v1981_v49 = vld [vmem:[%s5698_s8 + $0x248] sm:$0xff] }
 0x1b3   : > { %2355 = vmatpush.msrb.mxu0 %v1925_v46  ;;  %2376 = vmatpush.msrb.mxu1 %v1961_v54  ;;  %v2065_v46 = vld [vmem:[%s5698_s8 + $0x4e8] sm:$0xff]  ;;  %v2019_v54 = vld [vmem:[%s5698_s8 + $0x378] sm:$0xff] }
 0x1b4   : > { %2252 = vmatmul.f32.gmra.mxu3 %v5075_v59  ;;  %2396 = vmatpush.msrb.mxu2 %v1999_v25  ;;  %v2061_v45 = vld [vmem:[%s5698_s8 + $0x4c8] sm:$0xff]  ;;  %v2059_v25 = vld [vmem:[%s5698_s8 + $0x4b8] sm:$0xff] }
 0x1b5   : > { %2356 = vmatpush.msrb.mxu0 %v1923_v60  ;;  %2377 = vmatpush.msrb.mxu1 %v1959_v50  ;;  %v1979_v60 = vld [vmem:[%s5698_s8 + $0x238] sm:$0xff]  ;;  %v2017_v1 = vld [vmem:[%s5698_s8 + $0x368] sm:$0xff] }
 0x1b6   : > { %2340 = vmatpush.msra.mxu3 %v2132_v53  ;;  %2397 = vmatpush.msrb.mxu2 %v1997_v11  ;;  %v2015_v11 = vld [vmem:[%s5698_s8 + $0x358] sm:$0xff] }
 0x1b7   : > { %2357 = vmatpush.msrb.mxu0 %v1921_v56  ;;  %2378 = vmatpush.msrb.mxu1 %v1957_v2  ;;  %v2099_v56 = vld [vmem:[%s5698_s8 + $0x5f8] sm:$0xff]  ;;  %v1977_v2 = vld [vmem:[%s5698_s8 + $0x228] sm:$0xff] }
 0x1b8   : > { %2417 = vmatpush.msrb.mxu3 %v2035_v13  ;;  %2398 = vmatpush.msrb.mxu2 %v1995_v19  ;;  %v2057_v13 = vld [vmem:[%s5698_s8 + $0x4a8] sm:$0xff]  ;;  %v1975_v19 = vld [vmem:[%s5698_s8 + $0x218] sm:$0xff] }
 0x1b9   : > { %2358 = vmatpush.msrb.mxu0 %v1919_v39  ;;  %2379 = vmatpush.msrb.mxu1 %v1955_v15  ;;  %v2097_v39 = vld [vmem:[%s5698_s8 + $0x5e8] sm:$0xff] }
 0x1ba   : > { %2418 = vmatpush.msrb.mxu3 %v2033_v12  ;;  %2399 = vmatpush.msrb.mxu2 %v1993_v63  ;;  %v2055_v12 = vld [vmem:[%s5698_s8 + $0x498] sm:$0xff]  ;;  %v1973_v63 = vld [vmem:[%s5698_s8 + $0x208] sm:$0xff] }
 0x1bb   : > { %2359 = vmatpush.msrb.mxu0 %v1917_v6  ;;  %2380 = vmatpush.msrb.mxu1 %v1953_v14  ;;  %v1677_v47 = vpop.f32.mrf.mxu0  ;;  %v2095_v14 = vld [vmem:[%s5698_s8 + $0x5d8] sm:$0xff] }
 0x1bc   : > { %2419 = vmatpush.msrb.mxu3 %v2031_v3  ;;  %2400 = vmatpush.msrb.mxu2 %v1991_v17  ;;  %v2053_v3 = vld [vmem:[%s5698_s8 + $0x488] sm:$0xff] }
 0x1bd   : > { %2360 = vmatpush.msrb.mxu0 %v1915_v22  ;;  %2381 = vmatpush.msrb.mxu1 %v1951_v24  ;;  %v2013_v22 = vld [vmem:[%s5698_s8 + $0x348] sm:$0xff] }
 0x1be   : > { %2420 = vmatpush.msrb.mxu3 %v2029_v9  ;;  %2401 = vmatpush.msrb.mxu2 %v1989_v31  ;;  %v2093_v24 = vld [vmem:[%s5698_s8 + $0x5c8] sm:$0xff]  ;;  %v2051_v31 = vld [vmem:[%s5698_s8 + $0x478] sm:$0xff] }
 0x1bf   : > { %2361 = vmatpush.msrb.mxu0 %v1913_v51  ;;  %2382 = vmatpush.msrb.mxu1 %v1949_v61  ;;  %v2011_v51 = vld [vmem:[%s5698_s8 + $0x338] sm:$0xff]  ;;  %v2009_v9 = vld [vmem:[%s5698_s8 + $0x328] sm:$0xff] }
 0x1c0   : > { %2421 = vmatpush.msrb.mxu3 %v2027_v32  ;;  %2402 = vmatpush.msrb.mxu2 %v1987_v8  ;;  %v2091_v61 = vld [vmem:[%s5698_s8 + $0x5b8] sm:$0xff] }
 0x1c1   : > { %2362 = vmatpush.msrb.mxu0 %v1911_v27  ;;  %2383 = vmatpush.msrb.mxu1 %v1947_v5  ;;  %v1723_v36 = vpop.f32.mrf.mxu2  ;;  %v2007_v32 = vld [vmem:[%s5698_s8 + $0x318] sm:$0xff] }
 0x1c2   : > { %v1700_v37 = vpop.f32.mrf.mxu1  ;;  %2422 = vmatpush.msrb.mxu3 %v2025_v35  ;;  %2403 = vmatpush.msrb.mxu2 %v1985_v0  ;;  %v2087_v8 = vld [vmem:[%s5698_s8 + $0x598] sm:$0xff]  ;;  %v2005_v35 = vld [vmem:[%s5698_s8 + $0x308] sm:$0xff] }
 0x1c3   : > { %2363 = vmatpush.msrb.mxu0 %v1909_v21  ;;  %2384 = vmatpush.msrb.mxu1 %v1945_v34  ;;  %v5180_v33 = vadd.f32 %v1700_v37, %v1677_v47  ;;  %v2089_v21 = vld [vmem:[%s5698_s8 + $0x5a8] sm:$0xff]  ;;  %v2083_v37 = vld [vmem:[%s5698_s8 + $0x578] sm:$0xff] }
 0x1c4   : > { %2423 = vmatpush.msrb.mxu3 %v2023_v7  ;;  %2404 = vmatpush.msrb.mxu2 %v1983_v43  ;;  %v2049_v34 = vld [vmem:[%s5698_s8 + $0x468] sm:$0xff]  ;;  %v2039_v43 = vld [vmem:[%s5698_s8 + $0x418] sm:$0xff] }
 0x1c5   : > { %2385 = vmatpush.msrb.mxu1 %v1943_v20  ;;  %2272 = vmatmul.f32.vlgmr.msra.gmra.mxu0 %v5180_v33  ;;  %v1680_v53 = vpop.f32.mrf.mxu0  ;;  %v2047_v20 = vld [vmem:[%s5698_s8 + $0x458] sm:$0xff]  ;;  %v2085_v0 = vld [vmem:[%s5698_s8 + $0x588] sm:$0xff] }
 0x1c6   : > { %2440 = vmatpush.msra.mxu0 %v2067_v41  ;;  %2424 = vmatpush.msrb.mxu3 %v2021_v44  ;;  %v2045_v47 = vld [vmem:[%s5698_s8 + $0x448] sm:$0xff] }
 0x1c7   : > { %2386 = vmatpush.msrb.mxu1 %v1941_v29  ;;  %2405 = vmatpush.msrb.mxu2 %v1981_v49  ;;  %v2081_v7 = vld [vmem:[%s5698_s8 + $0x568] sm:$0xff]  ;;  %v2079_v29 = vld [vmem:[%s5698_s8 + $0x558] sm:$0xff] }
 0x1c8   : > { %2441 = vmatpush.msra.mxu0 %v2065_v46  ;;  %v1746_v10 = vpop.f32.mrf.mxu3  ;;  %2425 = vmatpush.msrb.mxu3 %v2019_v54  ;;  %v2041_v41 = vld [vmem:[%s5698_s8 + $0x428] sm:$0xff]  ;;  %v2075_v46 = vld [vmem:[%s5698_s8 + $0x538] sm:$0xff] }
 0x1c9   : > { %v5210_v50 = vadd.f32 %v1746_v10, %v1723_v36  ;;  %2406 = vmatpush.msrb.mxu2 %v1979_v60  ;;  %v2037_v44 = vld [vmem:[%s5698_s8 + $0x408] sm:$0xff]  ;;  %v1872_v36 = vld [vmem:[%s5697_s7 + $0xe0] sm:$0xff]  ;;  %v2131_v60 = vld [vmem:[%s5698_s8 + $0x6f8] sm:$0xff] }
 0x1ca   : > { %2442 = vmatpush.msra.mxu0 %v2063_v38  ;;  %2426 = vmatpush.msrb.mxu3 %v2017_v1  ;;  %v2073_v54 = vld [vmem:[%s5698_s8 + $0x528] sm:$0xff] }
 0x1cb   : > { %2295 = vmatmul.f32.vlgmr.msra.gmra.mxu1 %v5210_v50  ;;  %2407 = vmatpush.msrb.mxu2 %v1977_v2  ;;  %v1726_v17 = vpop.f32.mrf.mxu2  ;;  %v2069_v1 = vld [vmem:[%s5698_s8 + $0x508] sm:$0xff] }
 0x1cc   : > { %v1703_v15 = vpop.f32.mrf.mxu1  ;;  %2443 = vmatpush.msra.mxu0 %v2061_v45  ;;  %2463 = vmatpush.msra.mxu1 %v2099_v56  ;;  %v2071_v45 = vld [vmem:[%s5698_s8 + $0x518] sm:$0xff]  ;;  %v2129_v56 = vld [vmem:[%s5698_s8 + $0x6e8] sm:$0xff] }
 0x1cd   : > { %v5234_v6 = vadd.f32 %v1703_v15, %v1680_v53  ;;  %2427 = vmatpush.msrb.mxu3 %v2015_v11  ;;  %2408 = vmatpush.msrb.mxu2 %v1975_v19  ;;  %v1866_v15 = vld [vmem:[%s5697_s7 + $0xb0] sm:$0xff] }
 0x1ce   : > { %2444 = vmatpush.msra.mxu0 %v2059_v25  ;;  %2464 = vmatpush.msra.mxu1 %v2097_v39  ;;  %v1906_v25 = vld [vmem:[%s5697_s7 + $0x1f0] sm:$0xff]  ;;  %v2127_v39 = vld [vmem:[%s5698_s8 + $0x6d8] sm:$0xff] }
 0x1cf   : > { %2275 = vmatmul.f32.gmra.mxu0 %v5234_v6  ;;  %2428 = vmatpush.msrb.mxu3 %v2013_v22 }
 0x1d0   : > { %2445 = vmatpush.msra.mxu0 %v2057_v13  ;;  %2465 = vmatpush.msra.mxu1 %v2095_v14  ;;  %v2125_v13 = vld [vmem:[%s5698_s8 + $0x6c8] sm:$0xff]  ;;  %v2163_v14 = vld [vmem:[%s5698_s8 + $0x7f8] sm:$0xff] }
 0x1d1   : > { %2409 = vmatpush.msrb.mxu2 %v1973_v63  ;;  %2429 = vmatpush.msrb.mxu3 %v2011_v51  ;;  %v2123_v63 = vld [vmem:[%s5698_s8 + $0x6b8] sm:$0xff]  ;;  %v2161_v51 = vld [vmem:[%s5698_s8 + $0x7e8] sm:$0xff] }
 0x1d2   : > { %v1749_v27 = vpop.f32.mrf.mxu3  ;;  %2446 = vmatpush.msra.mxu0 %v2055_v12  ;;  %2466 = vmatpush.msra.mxu1 %v2093_v24  ;;  %v1904_v12 = vld [vmem:[%s5697_s7 + $0x1e0] sm:$0xff] }
 0x1d3   : > { %v5270_v5 = vadd.f32 %v1749_v27, %v1726_v17  ;;  %2430 = vmatpush.msrb.mxu3 %v2009_v9  ;;  %v1864_v17 = vld [vmem:[%s5697_s7 + $0xa0] sm:$0xff]  ;;  %v2119_v9 = vld [vmem:[%s5698_s8 + $0x698] sm:$0xff] }
 0x1d4   : > { %2447 = vmatpush.msra.mxu0 %v2053_v3  ;;  %2467 = vmatpush.msra.mxu1 %v2091_v61  ;;  %v2121_v3 = vld [vmem:[%s5698_s8 + $0x6a8] sm:$0xff]  ;;  %v2159_v61 = vld [vmem:[%s5698_s8 + $0x7d8] sm:$0xff]  ;;  %v1900_v27 = vld [vmem:[%s5697_s7 + $0x1c0] sm:$0xff] }
 0x1d5   : > { %2298 = vmatmul.f32.gmra.mxu1 %v5270_v5  ;;  %2431 = vmatpush.msrb.mxu3 %v2007_v32 }
 0x1d6   : > { %2448 = vmatpush.msra.mxu0 %v2051_v31  ;;  %2468 = vmatpush.msra.mxu1 %v2089_v21  ;;  %v2157_v31 = vld [vmem:[%s5698_s8 + $0x7c8] sm:$0xff] }
 0x1d7   : > { %2364 = vmatmul.f32.vlgmr.msrb.gmra.mxu0 %v4853_v58  ;;  %2432 = vmatpush.msrb.mxu3 %v2005_v35  ;;  %v2043_v58 = vld [vmem:[%s5698_s8 + $0x438] sm:$0xff] }
 0x1d8   : > { %2449 = vmatpush.msra.mxu0 %v2049_v34  ;;  %2469 = vmatpush.msra.mxu1 %v2087_v8  ;;  %v1862_v34 = vld [vmem:[%s5697_s7 + $0x90] sm:$0xff]  ;;  %v2155_v35 = vld [vmem:[%s5698_s8 + $0x7b8] sm:$0xff] }
 0x1da   : > { %2450 = vmatpush.msra.mxu0 %v2047_v20  ;;  %2470 = vmatpush.msra.mxu1 %v2085_v0  ;;  %v1860_v20 = vld [vmem:[%s5697_s7 + $0x80] sm:$0xff]  ;;  %v1898_v0 = vld [vmem:[%s5697_s7 + $0x1b0] sm:$0xff] }
 0x1dc   : > { %2451 = vmatpush.msra.mxu0 %v2045_v47  ;;  %2471 = vmatpush.msra.mxu1 %v2083_v37  ;;  %v2115_v47 = vld [vmem:[%s5698_s8 + $0x678] sm:$0xff]  ;;  %v2153_v37 = vld [vmem:[%s5698_s8 + $0x7a8] sm:$0xff] }
 0x1dd   : > { %2387 = vmatmul.f32.vlgmr.msrb.gmra.mxu1 %v4889_v28  ;;  %v2077_v28 = vld [vmem:[%s5698_s8 + $0x548] sm:$0xff] }
 0x1de   : > { %2452 = vmatpush.msra.mxu0 %v2043_v58  ;;  %2472 = vmatpush.msra.mxu1 %v2081_v7  ;;  %v1858_v58 = vld [vmem:[%s5697_s7 + $0x70] sm:$0xff]  ;;  %v1896_v7 = vld [vmem:[%s5697_s7 + $0x1a0] sm:$0xff] }
 0x1df   : > { %2367 = vmatmul.f32.gmra.mxu0 %v4910_v40  ;;  %v1874_v40 = vld [vmem:[%s5697_s7 + $0xf0] sm:$0xff]  ;;  %v1769_v49 = vpop.f32.mrf.mxu0 }
 0x1e0   : > { %2453 = vmatpush.msra.mxu0 %v2041_v41  ;;  %2473 = vmatpush.msra.mxu1 %v2079_v29  ;;  %v2113_v41 = vld [vmem:[%s5698_s8 + $0x668] sm:$0xff]  ;;  %v2151_v29 = vld [vmem:[%s5698_s8 + $0x798] sm:$0xff] }
 0x1e2   : > { %2454 = vmatpush.msra.mxu0 %v2039_v43  ;;  %2474 = vmatpush.msra.mxu1 %v2077_v28  ;;  %v1856_v43 = vld [vmem:[%s5697_s7 + $0x60] sm:$0xff]  ;;  %v2149_v28 = vld [vmem:[%s5698_s8 + $0x788] sm:$0xff] }
 0x1e4   : > { %2455 = vmatpush.msra.mxu0 %v2037_v44  ;;  %2475 = vmatpush.msra.mxu1 %v2075_v46  ;;  %v1854_v44 = vld [vmem:[%s5697_s7 + $0x50] sm:$0xff]  ;;  %v1892_v46 = vld [vmem:[%s5697_s7 + $0x180] sm:$0xff] }
 0x1e5   : > { %v1792_v38 = vpop.f32.mrf.mxu1  ;;  %2390 = vmatmul.f32.gmra.mxu1 %v4946_v42  ;;  %v1870_v42 = vld [vmem:[%s5697_s7 + $0xd0] sm:$0xff]  ;;  %v1815_v2 = vpop.f32.mrf.mxu2 }
 0x1e6   : > { %2532 = vmatpush.msrb.mxu0 %v1874_v40  ;;  %v5340_v10 = vadd.f32 %v1792_v38, %v1769_v49  ;;  %2476 = vmatpush.msra.mxu1 %v2073_v54  ;;  %v2109_v40 = vld [vmem:[%s5698_s8 + $0x648] sm:$0xff]  ;;  %v2147_v49 = vld [vmem:[%s5698_s8 + $0x778] sm:$0xff]  ;;  %v1852_v54 = vld [vmem:[%s5697_s7 + $0x40] sm:$0xff] }
 0x1e7   : > { %2456 = vmatmul.f32.vlgmr.msra.gmra.mxu0 %v5180_v33  ;;  %v1868_v33 = vld [vmem:[%s5697_s7 + $0xc0] sm:$0xff]  ;;  %v1772_v19 = vpop.f32.mrf.mxu0  ;;  %v1890_v38 = vld [vmem:[%s5697_s7 + $0x170] sm:$0xff] }
 0x1e8   : > { %2318 = vmatmul.f32.vlgmr.msra.gmra.mxu2 %v5340_v10  ;;  %2533 = vmatpush.msrb.mxu0 %v1872_v36  ;;  %v2107_v36 = vld [vmem:[%s5698_s8 + $0x638] sm:$0xff] }
 0x1e9   : > { %2486 = vmatpush.msra.mxu2 %v2131_v60  ;;  %2477 = vmatpush.msra.mxu1 %v2071_v45  ;;  %v2145_v60 = vld [vmem:[%s5698_s8 + $0x768] sm:$0xff]  ;;  %v1850_v45 = vld [vmem:[%s5697_s7 + $0x30] sm:$0xff] }
 0x1ea   : > { %2534 = vmatpush.msrb.mxu0 %v1870_v42  ;;  %v1888_v42 = vld [vmem:[%s5697_s7 + $0x160] sm:$0xff] }
 0x1eb   : > { %2487 = vmatpush.msra.mxu2 %v2129_v56  ;;  %v1838_v53 = vpop.f32.mrf.mxu3  ;;  %2478 = vmatpush.msra.mxu1 %v2069_v1  ;;  %v2143_v56 = vld [vmem:[%s5698_s8 + $0x758] sm:$0xff]  ;;  %v1848_v1 = vld [vmem:[%s5697_s7 + $0x20] sm:$0xff] }
 0x1ec   : > { %v5371_v11 = vadd.f32 %v1838_v53, %v1815_v2  ;;  %2535 = vmatpush.msrb.mxu0 %v1868_v33  ;;  %v1886_v2 = vld [vmem:[%s5697_s7 + $0x150] sm:$0xff]  ;;  %v2141_v33 = vld [vmem:[%s5698_s8 + $0x748] sm:$0xff] }
 0x1ed   : > { %2555 = vmatpush.msrb.mxu1 %v1906_v25  ;;  %2488 = vmatpush.msra.mxu2 %v2127_v39  ;;  %v1795_v22 = vpop.f32.mrf.mxu1  ;;  %v1818_v21 = vpop.f32.mrf.mxu2  ;;  %v1846_v25 = vld [vmem:[%s5697_s7 + $0x10] sm:$0xff]  ;;  %v1884_v39 = vld [vmem:[%s5697_s7 + $0x140] sm:$0xff]  ;;  %v2101_v53 = vld [vmem:[%s5698_s8 + $0x608] sm:$0xff] }
 0x1ee   : > { %2479 = vmatmul.f32.vlgmr.msra.gmra.mxu1 %v5210_v50  ;;  %v5383_v24 = vadd.f32 %v1795_v22, %v1772_v19  ;;  %2341 = vmatmul.f32.vlgmr.msra.gmra.mxu3 %v5371_v11  ;;  %v1902_v50 = vld [vmem:[%s5697_s7 + $0x1d0] sm:$0xff]  ;;  %v1875_v19 = vld [vmem:[%s5697_s7 + $0xf8] sm:$0xff]  ;;  %v2137_v22 = vld [vmem:[%s5698_s8 + $0x728] sm:$0xff] }
 0x1ef   : > { %2536 = vmatpush.msrb.mxu0 %v1866_v15  ;;  %2489 = vmatpush.msra.mxu2 %v2125_v13  ;;  %v2139_v15 = vld [vmem:[%s5698_s8 + $0x738] sm:$0xff]  ;;  %v1844_v13 = vld [vmem:[%s5697_s7] sm:$0xff] }
 0x1f0   : > { %2509 = vmatpush.msra.mxu3 %v2163_v14  ;;  %2321 = vmatmul.f32.gmra.mxu2 %v5383_v24  ;;  %v1882_v14 = vld [vmem:[%s5697_s7 + $0x130] sm:$0xff] }
 0x1f1   : > { %2556 = vmatpush.msrb.mxu1 %v1904_v12  ;;  %2490 = vmatpush.msra.mxu2 %v2123_v63  ;;  %v1880_v12 = vld [vmem:[%s5697_s7 + $0x120] sm:$0xff]  ;;  %v2135_v63 = vld [vmem:[%s5698_s8 + $0x718] sm:$0xff] }
 0x1f2   : > { %2510 = vmatpush.msra.mxu3 %v2161_v51  ;;  %2459 = vmatmul.f32.gmra.mxu0 %v5234_v6  ;;  %v2117_v6 = vld [vmem:[%s5698_s8 + $0x688] sm:$0xff]  ;;  %v1878_v51 = vld [vmem:[%s5697_s7 + $0x110] sm:$0xff] }
 0x1f3   : > { %2557 = vmatpush.msrb.mxu1 %v1902_v50  ;;  %2491 = vmatpush.msra.mxu2 %v2121_v3  ;;  %v1841_v32 = vpop.f32.mrf.mxu3  ;;  %v1871_v50 = vld [vmem:[%s5697_s7 + $0xd8] sm:$0xff]  ;;  %v2133_v3 = vld [vmem:[%s5698_s8 + $0x708] sm:$0xff] }
 0x1f4   : > { %2511 = vmatpush.msra.mxu3 %v2159_v61  ;;  %2537 = vmatpush.msrb.mxu0 %v1864_v17  ;;  %v5418_v8 = vadd.f32 %v1841_v32, %v1818_v21  ;;  %v1876_v61 = vld [vmem:[%s5697_s7 + $0x100] sm:$0xff]  ;;  %v1907_v17 = vld [vmem:[%s5697_s7 + $0x1f8] sm:$0xff] }
 0x1f5   : > { %2558 = vmatpush.msrb.mxu1 %v1900_v27  ;;  %2492 = vmatpush.msra.mxu2 %v2119_v9  ;;  %v1867_v27 = vld [vmem:[%s5697_s7 + $0xb8] sm:$0xff]  ;;  %v1905_v9 = vld [vmem:[%s5697_s7 + $0x1e8] sm:$0xff] }
 0x1f6   : > { %2512 = vmatpush.msra.mxu3 %v2157_v31  ;;  %2538 = vmatpush.msrb.mxu0 %v1862_v34  ;;  %v1865_v31 = vld [vmem:[%s5697_s7 + $0xa8] sm:$0xff]  ;;  %v1903_v21 = vld [vmem:[%s5697_s7 + $0x1d8] sm:$0xff] }
 0x1f7   : > { %2344 = vmatmul.f32.gmra.mxu3 %v5418_v8  ;;  %2493 = vmatpush.msra.mxu2 %v2117_v6  ;;  %v1863_v32 = vld [vmem:[%s5697_s7 + $0x98] sm:$0xff]  ;;  %v1861_v34 = vld [vmem:[%s5697_s7 + $0x88] sm:$0xff] }
 0x1f8   : > { %2513 = vmatpush.msra.mxu3 %v2155_v35  ;;  %2539 = vmatpush.msrb.mxu0 %v1860_v20  ;;  %v1859_v6 = vld [vmem:[%s5697_s7 + $0x78] sm:$0xff]  ;;  %v1897_v35 = vld [vmem:[%s5697_s7 + $0x1a8] sm:$0xff] }
 0x1f9   : > { %2559 = vmatpush.msrb.mxu1 %v1898_v0  ;;  %2410 = vmatmul.f32.vlgmr.msrb.gmra.mxu2 %v4979_v16  ;;  %v2111_v16 = vld [vmem:[%s5698_s8 + $0x658] sm:$0xff]  ;;  %v1857_v20 = vld [vmem:[%s5697_s7 + $0x68] sm:$0xff] }
 0x1fa   : > { %2482 = vmatmul.f32.gmra.mxu1 %v5270_v5  ;;  %2494 = vmatpush.msra.mxu2 %v2115_v47  ;;  %v1894_v5 = vld [vmem:[%s5697_s7 + $0x190] sm:$0xff]  ;;  %v1895_v0 = vld [vmem:[%s5697_s7 + $0x198] sm:$0xff] }
 0x1fb   : > { %2514 = vmatpush.msra.mxu3 %v2153_v37  ;;  %2540 = vmatpush.msrb.mxu0 %v1858_v58  ;;  %v1855_v47 = vld [vmem:[%s5697_s7 + $0x58] sm:$0xff]  ;;  %v1893_v37 = vld [vmem:[%s5697_s7 + $0x188] sm:$0xff] }
 0x1fc   : > { %2560 = vmatpush.msrb.mxu1 %v1896_v7  ;;  %2495 = vmatpush.msra.mxu2 %v2113_v41  ;;  %v1891_v58 = vld [vmem:[%s5697_s7 + $0x178] sm:$0xff]  ;;  %v1889_v41 = vld [vmem:[%s5697_s7 + $0x168] sm:$0xff] }
 0x1fd   : > { %2515 = vmatpush.msra.mxu3 %v2151_v29  ;;  %2541 = vmatpush.msrb.mxu0 %v1856_v43  ;;  %v1851_v7 = vld [vmem:[%s5697_s7 + $0x38] sm:$0xff]  ;;  %v1849_v29 = vld [vmem:[%s5697_s7 + $0x28] sm:$0xff] }
 0x1fe   : > { %2561 = vmatpush.msrb.mxu1 %v1894_v5  ;;  %2496 = vmatpush.msra.mxu2 %v2111_v16  ;;  %v1887_v43 = vld [vmem:[%s5697_s7 + $0x158] sm:$0xff]  ;;  %v1885_v16 = vld [vmem:[%s5697_s7 + $0x148] sm:$0xff] }
 0x1ff   : > { %2516 = vmatpush.msra.mxu3 %v2149_v28  ;;  %2542 = vmatpush.msrb.mxu0 %v1854_v44  ;;  %v1847_v5 = vld [vmem:[%s5697_s7 + $0x18] sm:$0xff]  ;;  %v1845_v28 = vld [vmem:[%s5697_s7 + $0x8] sm:$0xff] }
 0x200   : > { %2562 = vmatpush.msrb.mxu1 %v1892_v46  ;;  %2433 = vmatmul.f32.vlgmr.msrb.gmra.mxu3 %v5015_v30  ;;  %v2105_v30 = vld [vmem:[%s5698_s8 + $0x628] sm:$0xff]  ;;  %v1883_v44 = vld [vmem:[%s5697_s7 + $0x138] sm:$0xff] }
 0x201   : > { %2497 = vmatpush.msra.mxu2 %v2109_v40  ;;  %2517 = vmatpush.msra.mxu3 %v2147_v49  ;;  %v1881_v46 = vld [vmem:[%s5697_s7 + $0x128] sm:$0xff]  ;;  %v1879_v40 = vld [vmem:[%s5697_s7 + $0x118] sm:$0xff] }
 0x202   : > { %2543 = vmatpush.msrb.mxu0 %v1852_v54  ;;  %2563 = vmatpush.msrb.mxu1 %v1890_v38  ;;  %v1877_v49 = vld [vmem:[%s5697_s7 + $0x108] sm:$0xff] }
 0x203   : > { %2413 = vmatmul.f32.gmra.mxu2 %v5039_v4  ;;  %2518 = vmatpush.msra.mxu3 %v2145_v60  ;;  %v2103_v4 = vld [vmem:[%s5698_s8 + $0x618] sm:$0xff] }
 0x204   : > { %2498 = vmatpush.msra.mxu2 %v2107_v36  ;;  %2544 = vmatpush.msrb.mxu0 %v1850_v45 }
 0x205   : > { %2564 = vmatpush.msrb.mxu1 %v1888_v42  ;;  %2519 = vmatpush.msra.mxu3 %v2143_v56 }
 0x206   : > { %2499 = vmatpush.msra.mxu2 %v2105_v30  ;;  %2545 = vmatpush.msrb.mxu0 %v1848_v1 }
 0x207   : > { %2565 = vmatpush.msrb.mxu1 %v1886_v2  ;;  %2520 = vmatpush.msra.mxu3 %v2141_v33 }
 0x208   : > { %2500 = vmatpush.msra.mxu2 %v2103_v4  ;;  %2546 = vmatpush.msrb.mxu0 %v1846_v25 }
 0x209   : > { %2566 = vmatpush.msrb.mxu1 %v1884_v39  ;;  %2436 = vmatmul.f32.gmra.mxu3 %v5075_v59  ;;  %v1873_v59 = vld [vmem:[%s5697_s7 + $0xe8] sm:$0xff] }
 0x20a   : > { %2501 = vmatpush.msra.mxu2 %v2101_v53  ;;  %2521 = vmatpush.msra.mxu3 %v2139_v15 }
 0x20b   : > { %2547 = vmatpush.msrb.mxu0 %v1844_v13  ;;  %2567 = vmatpush.msrb.mxu1 %v1882_v14  ;;  %v2181_v54 = vpop.f32.mrf.mxu0 }
 0x20c   : > { %2548 = vmatmul.f32.vlgmr.msrb.gmra.mxu0 %v3953_v26  ;;  %2578 = vmatpush.msrb.mxu2 %v1875_v19 }
 0x20d   : > { %2522 = vmatpush.msra.mxu3 %v2137_v22  ;;  %2502 = vmatmul.f32.vlgmr.msra.gmra.mxu2 %v5340_v10  ;;  %v1869_v10 = vld [vmem:[%s5697_s7 + $0xc8] sm:$0xff] }
 0x20e   : > { %2568 = vmatpush.msrb.mxu1 %v1880_v12  ;;  %2579 = vmatpush.msrb.mxu2 %v1873_v59 }
 0x20f   : > { %2523 = vmatpush.msra.mxu3 %v2135_v63 }
 0x210   : > { %2569 = vmatpush.msrb.mxu1 %v1878_v51  ;;  %2580 = vmatpush.msrb.mxu2 %v1871_v50 }
 0x211   : > { %2524 = vmatpush.msra.mxu3 %v2133_v3  ;;  %v2204_v38 = vpop.f32.mrf.mxu1 }
 0x212   : > { %2570 = vmatpush.msrb.mxu1 %v1876_v61  ;;  %2581 = vmatpush.msrb.mxu2 %v1869_v10  ;;  %v2205_v14 = vadd.f32 %v2204_v38, %v2181_v54 }
 0x213   : > { %2601 = vmatpush.msrb.mxu3 %v1907_v17  ;;  %2571 = vmatmul.f32.vlgmr.msrb.gmra.mxu1 %v3975_v57 }
 0x214   : > { %2525 = vmatmul.f32.vlgmr.msra.gmra.mxu3 %v5371_v11  ;;  %2551 = vmatmul.f32.gmra.mxu0 %v3989_v62  ;;  %v1901_v11 = vld [vmem:[%s5697_s7 + $0x1c8] sm:$0xff] }
 0x215   : > { %2582 = vmatpush.msrb.mxu2 %v1867_v27  ;;  %2602 = vmatpush.msrb.mxu3 %v1905_v9  ;;  %v5663_v9 = vld [vmem:[%s5699_s9] sm:$0x3] }
 0x216   : > { %2505 = vmatmul.f32.gmra.mxu2 %v5383_v24  ;;  %v1899_v24 = vld [vmem:[%s5697_s7 + $0x1b8] sm:$0xff] }
 0x217   : > { %2583 = vmatpush.msrb.mxu2 %v1865_v31  ;;  %2603 = vmatpush.msrb.mxu3 %v1903_v21 }
 0x219   : > { %2584 = vmatpush.msrb.mxu2 %v1863_v32  ;;  %2604 = vmatpush.msrb.mxu3 %v1901_v11 }
 0x21b   : > { %2574 = vmatmul.f32.gmra.mxu1 %v4025_v48  ;;  %2585 = vmatpush.msrb.mxu2 %v1861_v34  ;;  %v2207_v36 = vpop.f32.mrf.mxu1  ;;  %v2626_v34 = vperm.slane %v5663_v9, 0 }
 0x21c   : > { %2605 = vmatpush.msrb.mxu3 %v1899_v24 }
 0x21d   : > { %2528 = vmatmul.f32.gmra.mxu3 %v5418_v8  ;;  %2586 = vmatpush.msrb.mxu2 %v1859_v6  ;;  %v1853_v8 = vld [vmem:[%s5697_s7 + $0x48] sm:$0xff] }
 0x21e   : > { %2606 = vmatpush.msrb.mxu3 %v1897_v35  ;;  %v2638_v35 = vld [vmem:[%s5700_s10] sm:$0x3] }
 0x21f   : > { %2587 = vmatpush.msrb.mxu2 %v1857_v20 }
 0x220   : > { %2607 = vmatpush.msrb.mxu3 %v1895_v0 }
 0x221   : > { %2588 = vmatpush.msrb.mxu2 %v1855_v47  ;;  %v2648_v47 = vld [vmem:[%s5701_s11] sm:$0x3] }
 0x222   : > { %2608 = vmatpush.msrb.mxu3 %v1893_v37 }
 0x223   : > { %2589 = vmatpush.msrb.mxu2 %v1853_v8 }
 0x224   : > { %2609 = vmatpush.msrb.mxu3 %v1891_v58  ;;  %v2640_v58 = vperm.slane %v2638_v35, 0 }
 0x225   : > { %2590 = vmatpush.msrb.mxu2 %v1851_v7 }
 0x226   : > { %2610 = vmatpush.msrb.mxu3 %v1889_v41 }
 0x227   : > { %2591 = vmatpush.msrb.mxu2 %v1849_v29  ;;  %v2227_v56 = vpop.f32.mrf.mxu2 }
 0x228   : > { %2611 = vmatpush.msrb.mxu3 %v1887_v43  ;;  %v2228_v22 = vadd.f32 %v2227_v56, %v2205_v14 }
 0x229   : > { %2592 = vmatpush.msrb.mxu2 %v1847_v5  ;;  %v2650_v5 = vperm.slane %v2648_v47, 0 }
 0x22a   : > { %2612 = vmatpush.msrb.mxu3 %v1885_v16 }
 0x22b   : > { %2593 = vmatpush.msrb.mxu2 %v1845_v28 }
 0x22c   : > { %2613 = vmatpush.msrb.mxu3 %v1883_v44  ;;  %2594 = vmatmul.f32.vlgmr.msrb.gmra.mxu2 %v3953_v26  ;;  %v2184_v26 = vpop.f32.mrf.mxu0 }
 0x22d   : > { %v2250_v2 = vpop.f32.mrf.mxu3  ;;  %v2208_v50 = vadd.f32 %v2207_v36, %v2184_v26 }
 0x22e   : > { %2614 = vmatpush.msrb.mxu3 %v1881_v46  ;;  %v2251_v12 = vadd.f32 %v2250_v2, %v2228_v22 }
 0x230   : > { %2615 = vmatpush.msrb.mxu3 %v1879_v40 }
 0x231   : > { %v2230_v33 = vpop.f32.mrf.mxu2 }
 0x232   : > { %2616 = vmatpush.msrb.mxu3 %v1877_v49  ;;  %v2231_v10 = vadd.f32 %v2230_v33, %v2208_v50 }
 0x233   : > { %2617 = vmatmul.f32.vlgmr.msrb.gmra.mxu3 %v3975_v57 }
 0x234   : > { %2597 = vmatmul.f32.gmra.mxu2 %v3989_v62 }
 0x237   : > { %v2253_v39 = vpop.f32.mrf.mxu3 }
 0x238   : > { %v2254_v31 = vadd.f32 %v2253_v39, %v2231_v10 }
 0x23b   : > { %2620 = vmatmul.f32.gmra.mxu3 %v4025_v48 }
 0x242   : > { %v2273_v60 = vpop.f32.mrf.mxu0 }
 0x243   : > { %v2274_v63 = vadd.f32 %v2273_v60, %v2251_v12 }
 0x248   : > { %v2296_v45 = vpop.f32.mrf.mxu1 }
 0x249   : > { %v2297_v3 = vadd.f32 %v2296_v45, %v2274_v63  ;;  %v2627_v63 = vperm.slane %v5663_v9, 1 }
 0x24c   : > { %v2276_v42 = vpop.f32.mrf.mxu0 }
 0x24d   : > { %v2277_v32 = vadd.f32 %v2276_v42, %v2254_v31 }
 0x252   : > { %v2299_v30 = vpop.f32.mrf.mxu1 }
 0x253   : > { %v2300_v20 = vadd.f32 %v2299_v30, %v2277_v32 }
 0x254   : > { %v2365_v1 = vpop.f32.mrf.mxu0 }
 0x25a   : > { %v2388_v4 = vpop.f32.mrf.mxu1 }
 0x25b   : > { %v2389_v60 = vadd.f32 %v2388_v4, %v2365_v1 }
 0x25c   : > { %v2368_v25 = vpop.f32.mrf.mxu0 }
 0x262   : > { %v2391_v57 = vpop.f32.mrf.mxu1 }
 0x263   : > { %v2392_v2 = vadd.f32 %v2391_v57, %v2368_v25  ;;  %v2641_v25 = vperm.slane %v2638_v35, 1 }
 0x264   : > { %v2457_v62 = vpop.f32.mrf.mxu0 }
 0x26b   : > { %v2319_v53 = vpop.f32.mrf.mxu2  ;;  %v2480_v48 = vpop.f32.mrf.mxu1 }
 0x26c   : > { %v2320_v27 = vadd.f32 %v2319_v53, %v2297_v3 }
 0x26f   : > { %v2460_v19 = vpop.f32.mrf.mxu0 }
 0x271   : > { %v2342_v15 = vpop.f32.mrf.mxu3 }
 0x272   : > { %v2343_v21 = vadd.f32 %v2342_v15, %v2320_v27 }
 0x273   : > { %v2322_v13 = vpop.f32.mrf.mxu2 }
 0x274   : > { %v2323_v37 = vadd.f32 %v2322_v13, %v2300_v20 }
 0x277   : > { %v2483_v51 = vpop.f32.mrf.mxu1 }
 0x27a   : > { %v2345_v59 = vpop.f32.mrf.mxu3 }
 0x27b   : > { %v2346_v29 = vadd.f32 %v2345_v59, %v2323_v37 }
 0x27c   : > { %v2411_v61 = vpop.f32.mrf.mxu2 }
 0x27d   : > { %v2412_v42 = vadd.f32 %v2411_v61, %v2389_v60 }
 0x283   : > { %v2434_v24 = vpop.f32.mrf.mxu3 }
 0x284   : > { %v2435_v30 = vadd.f32 %v2434_v24, %v2412_v42 }
 0x286   : > { %v2414_v7 = vpop.f32.mrf.mxu2  ;;  %v2458_v33 = vadd.f32 %v2457_v62, %v2435_v30 }
 0x287   : > { %v2415_v39 = vadd.f32 %v2414_v7, %v2392_v2 }
 0x288   : > { %v2481_v13 = vadd.f32 %v2480_v48, %v2458_v33  ;;  %v2651_v48 = vperm.slane %v2648_v47, 1 }
 0x289   : > { %v2549_v17 = vpop.f32.mrf.mxu0 }
 0x28a   : > { %v2550_v11 = vadd.f32 %v2549_v17, %v2343_v21 }
 0x28c   : > { %v2437_v49 = vpop.f32.mrf.mxu3 }
 0x28d   : > { %v2438_v15 = vadd.f32 %v2437_v49, %v2415_v39 }
 0x28f   : > { %v2461_v12 = vadd.f32 %v2460_v19, %v2438_v15 }
 0x290   : > { %v2572_v6 = vpop.f32.mrf.mxu1  ;;  %v2503_v26 = vpop.f32.mrf.mxu2 }
 0x291   : > { %v2573_v0 = vadd.f32 %v2572_v6, %v2550_v11  ;;  %v2552_v41 = vpop.f32.mrf.mxu0  ;;  %v2504_v22 = vadd.f32 %v2503_v26, %v2481_v13  ;;  %v2484_v4 = vadd.f32 %v2483_v51, %v2461_v12 }
 0x292   : > { %v2553_v28 = vadd.f32 %v2552_v41, %v2346_v29 }
 0x293   : > { %v2630_v8 = vadd.f32 %v2626_v34, %v2573_v0 }
 0x295   : > { %v2634_v43 = vadd.f32 %v2630_v8, %v3596_v23 }
 0x297   : > { %v2644_v16 = vmul.f32 %v2640_v58, %v2634_v43  ;;  %v2526_v45 = vpop.f32.mrf.mxu3 }
 0x298   : > { %v2575_v44 = vpop.f32.mrf.mxu1  ;;  %v2527_v59 = vadd.f32 %v2526_v45, %v2504_v22 }
 0x299   : > { %v2654_v46 = vadd.f32 %v2650_v5, %v2644_v16  ;;  %v2576_v40 = vadd.f32 %v2575_v44, %v2553_v28  ;;  %v2506_v56 = vpop.f32.mrf.mxu2 }
 0x29a   : > { %v2507_v3 = vadd.f32 %v2506_v56, %v2484_v4 }
 0x29b   : > { %2658 = vst [vmem:[%s5677_s29] sm:$0xff] %v2654_v46  ;;  %v2632_v54 = vadd.f32 %v2626_v34, %v2576_v40 }
 0x29d   : > { %v2636_v38 = vadd.f32 %v2632_v54, %v3585_v18 }
 0x29f   : > { %v2646_v23 = vmul.f32 %v2640_v58, %v2636_v38 }
 0x2a0   : > { %v2529_v53 = vpop.f32.mrf.mxu3 }
 0x2a1   : > { %v2656_v36 = vadd.f32 %v2650_v5, %v2646_v23  ;;  %v2530_v62 = vadd.f32 %v2529_v53, %v2507_v3 }
 0x2a3   : > { %2660 = vst [vmem:[%s5677_s29 + $0x10] sm:$0x7f] %v2656_v36 }
 0x2af   : > { %v2595_v14 = vpop.f32.mrf.mxu2 }
 0x2b0   : > { %v2596_v18 = vadd.f32 %v2595_v14, %v2527_v59 }
 0x2b6   : > { %v2618_v1 = vpop.f32.mrf.mxu3 }
 0x2b7   : > { %v2619_v50 = vadd.f32 %v2618_v1, %v2596_v18  ;;  %v2598_v57 = vpop.f32.mrf.mxu2 }
 0x2b8   : > { %v2599_v27 = vadd.f32 %v2598_v57, %v2530_v62 }
 0x2b9   : > { %v2631_v61 = vadd.f32 %v2627_v63, %v2619_v50 }
 0x2bb   : > { %v2635_v17 = vadd.f32 %v2631_v61, %v3680_v55 }
 0x2bd   : > { %v2645_v10 = vmul.f32 %v2641_v25, %v2635_v17 }
 0x2be   : > { %v2621_v19 = vpop.f32.mrf.mxu3 }
 0x2bf   : > { %v2655_v31 = vadd.f32 %v2651_v48, %v2645_v10  ;;  %v2622_v21 = vadd.f32 %v2621_v19, %v2599_v27 }
 0x2c1   : > { %2659 = vst [vmem:[%s5677_s29 + $0x8] sm:$0xff] %v2655_v31  ;;  %v2633_v9 = vadd.f32 %v2627_v63, %v2622_v21 }
 0x2c3   : > { %v2637_v32 = vadd.f32 %v2633_v9, %v3670_v52 }
 0x2c5   : > { %v2647_v51 = vmul.f32 %v2641_v25, %v2637_v32 }
 0x2c7   : > { %v2657_v11 = vadd.f32 %v2651_v48, %v2647_v51 }
 0x2c9   : > { %2661 = vst [vmem:[%s5677_s29 + $0x18] sm:$0x7f] %v2657_v11 }
 0x2ca PF: > { %s24_s25 = sadd.s32 1, %s2891_s25  }
 0x2cb   : > { %p21_p4 = scmp.ge.s32.totalorder %s24_s25, 4  }
 0x2cd   :  { %23 = sbr.rel (!%p21_p4) target bundleno = 1 (0x1), region = 114 }

// kernel: convblock_forward.3
= control target key start
LH: loop header
LB: loop body
LE: loop exit
PB: predicated region body
PF: predicated region fallthrough
CT: control target
= control target key end

     0   :  { %s2963_s25 = smov 0   ;;  %s5690_s0 = inlined_call_operand.vmem [shape: f32[2,15,256], index: 0, kind: input, shape index: {}]   ;;  %s5691_s1 = inlined_call_operand.vmem [shape: f32[2,15,256], index: 1, kind: input, shape index: {}]   ;;  %s5692_s2 = inlined_call_operand.vmem [shape: f32[2,256,256], index: 2, kind: input, shape index: {}]   ;;  %s5693_s3 = inlined_call_operand.vmem [shape: f32[1,256], index: 3, kind: input, shape index: {}]   ;;  %s5694_s4 = inlined_call_operand.vmem [shape: f32[256,256], index: 4, kind: input, shape index: {}]   ;;  %s5695_s5 = inlined_call_operand.vmem [shape: f32[1,256], index: 5, kind: input, shape index: {}]   ;;  %s5696_s6 = inlined_call_operand.vmem [shape: f32[256,1024], index: 6, kind: input, shape index: {}]   ;;  %s5697_s7 = inlined_call_operand.vmem [shape: f32[256,256], index: 7, kind: input, shape index: {}]   ;;  %s5698_s8 = inlined_call_operand.vmem [shape: f32[1024,256], index: 8, kind: input, shape index: {}]   ;;  %s5699_s9 = inlined_call_operand.vmem [shape: f32[1,256], index: 9, kind: input, shape index: {}]   ;;  %s5700_s10 = inlined_call_operand.vmem [shape: f32[1,256], index: 10, kind: input, shape index: {}]   ;;  %s5701_s11 = inlined_call_operand.vmem [shape: f32[1,256], index: 11, kind: input, shape index: {}]   ;;  %s5702_s12 = inlined_call_operand.vmem [shape: f32[2,13,256], index: 12, kind: output, shape index: {0}]   ;;  %s5703_s13 = inlined_call_operand.vmem [shape: f32[2,13,256], index: 13, kind: output, shape index: {1}]  }
   0x1 LB: > { %s2762_s26 = sadd.s32 4294967295, %s2891_s25   ;;  %p2766_p0 = scmp.ge.s32.totalorder %s2891_s25, 1  ;;  %s2891_s25 = sphi %s2963_s25, %s24_s25  }
   0x2   : > { %p400_p1 = scmp.lt.s32.totalorder %s2891_s25, 3 }
   0x4   : > { %p401_p2 = pnand %p2766_p0, %p400_p1 }
   0x5   : > { %p3099_p3 = scmp.lt.s32.totalorder (!%p401_p2), %s2762_s26, 1 }
   0x6   : > { %404 = sbr.rel (%p401_p2) target bundleno = 714 (0x2ca), region = 68 }
   0xb   : > { %v721_v0 = vld [vmem:[%s5692_s2 + $0xf0] sm:$0xff]  ;;  %v722_v2 = vld [vmem:[%s5692_s2 + $0xf8] sm:$0xff]  ;;  %v719_v4 = vld [vmem:[%s5692_s2 + $0xe0] sm:$0xff]  ;;  %s5706_s26 = smov (!%p3099_p3, %s2762_s26), 1  ;;  %vm925_vm6 = vcmask 1045504  }
   0xc   : > { %v753_v1 = vld [vmem:[%s5692_s2 + $0x1f0] sm:$0xff]  ;;  %755 = vmatpush.msra.mxu0 %v721_v0  ;;  %v754_v3 = vld [vmem:[%s5692_s2 + $0x1f8] sm:$0xff]  ;;  %v751_v5 = vld [vmem:[%s5692_s2 + $0x1e0] sm:$0xff]  ;;  %801 = vmatpush.msra.mxu2 %v722_v2  ;;  %s3155_s23 = sshll.u32 %s5706_s26, 5 }
   0xd   : > { %778 = vmatpush.msra.mxu1 %v753_v1  ;;  %824 = vmatpush.msra.mxu3 %v754_v3  ;;  %v720_v6 = vld [vmem:[%s5692_s2 + $0xe8] sm:$0xff]  ;;  %v717_v8 = vld [vmem:[%s5692_s2 + $0xd0] sm:$0xff]  ;;  %v718_v10 = vld [vmem:[%s5692_s2 + $0xd8] sm:$0xff]  ;;  %s3185_s29 = scalar_lea.vmem %s5690_s0, %s3155_s23  ;;  %s4615_s14 = scalar_lea.vmem %s5691_s1, %s3155_s23 }
   0xe   : > { %v752_v7 = vld [vmem:[%s5692_s2 + $0x1e8] sm:$0xff]  ;;  %756 = vmatpush.msra.mxu0 %v719_v4  ;;  %v749_v9 = vld [vmem:[%s5692_s2 + $0x1d0] sm:$0xff]  ;;  %v750_v11 = vld [vmem:[%s5692_s2 + $0x1d8] sm:$0xff]  ;;  %802 = vmatpush.msra.mxu2 %v720_v6  ;;  %s4722_s30 = scalar_lea.vmem %s5703_s13, %s3155_s23  ;;  %s5677_s18 = scalar_lea.vmem %s5702_s12, %s3155_s23 }
   0xf   : > { %779 = vmatpush.msra.mxu1 %v751_v5  ;;  %825 = vmatpush.msra.mxu3 %v752_v7  ;;  %v715_v12 = vld [vmem:[%s5692_s2 + $0xc0] sm:$0xff]  ;;  %v716_v14 = vld [vmem:[%s5692_s2 + $0xc8] sm:$0xff]  ;;  %v713_v16 = vld [vmem:[%s5692_s2 + $0xb0] sm:$0xff] }
  0x10   : > { %v747_v13 = vld [vmem:[%s5692_s2 + $0x1c0] sm:$0xff]  ;;  %757 = vmatpush.msra.mxu0 %v717_v8  ;;  %v748_v15 = vld [vmem:[%s5692_s2 + $0x1c8] sm:$0xff]  ;;  %803 = vmatpush.msra.mxu2 %v718_v10  ;;  %v745_v17 = vld [vmem:[%s5692_s2 + $0x1b0] sm:$0xff] }
  0x11   : > { %780 = vmatpush.msra.mxu1 %v749_v9  ;;  %826 = vmatpush.msra.mxu3 %v750_v11  ;;  %v714_v18 = vld [vmem:[%s5692_s2 + $0xb8] sm:$0xff]  ;;  %v711_v20 = vld [vmem:[%s5692_s2 + $0xa0] sm:$0xff]  ;;  %v712_v22 = vld [vmem:[%s5692_s2 + $0xa8] sm:$0xff] }
  0x12   : > { %758 = vmatpush.msra.mxu0 %v715_v12  ;;  %v746_v19 = vld [vmem:[%s5692_s2 + $0x1b8] sm:$0xff]  ;;  %804 = vmatpush.msra.mxu2 %v716_v14  ;;  %v743_v21 = vld [vmem:[%s5692_s2 + $0x1a0] sm:$0xff]  ;;  %v744_v23 = vld [vmem:[%s5692_s2 + $0x1a8] sm:$0xff] }
  0x13   : > { %781 = vmatpush.msra.mxu1 %v747_v13  ;;  %827 = vmatpush.msra.mxu3 %v748_v15  ;;  %v709_v24 = vld [vmem:[%s5692_s2 + $0x90] sm:$0xff]  ;;  %v710_v26 = vld [vmem:[%s5692_s2 + $0x98] sm:$0xff]  ;;  %v707_v28 = vld [vmem:[%s5692_s2 + $0x80] sm:$0xff] }
  0x14   : > { %759 = vmatpush.msra.mxu0 %v713_v16  ;;  %805 = vmatpush.msra.mxu2 %v714_v18  ;;  %v741_v25 = vld [vmem:[%s5692_s2 + $0x190] sm:$0xff]  ;;  %v742_v27 = vld [vmem:[%s5692_s2 + $0x198] sm:$0xff]  ;;  %v739_v29 = vld [vmem:[%s5692_s2 + $0x180] sm:$0xff] }
  0x15   : > { %782 = vmatpush.msra.mxu1 %v745_v17  ;;  %828 = vmatpush.msra.mxu3 %v746_v19  ;;  %v708_v30 = vld [vmem:[%s5692_s2 + $0x88] sm:$0xff]  ;;  %v705_v32 = vld [vmem:[%s5692_s2 + $0x70] sm:$0xff]  ;;  %v706_v34 = vld [vmem:[%s5692_s2 + $0x78] sm:$0xff] }
  0x16   : > { %760 = vmatpush.msra.mxu0 %v711_v20  ;;  %806 = vmatpush.msra.mxu2 %v712_v22  ;;  %v740_v31 = vld [vmem:[%s5692_s2 + $0x188] sm:$0xff]  ;;  %v737_v33 = vld [vmem:[%s5692_s2 + $0x170] sm:$0xff]  ;;  %v738_v35 = vld [vmem:[%s5692_s2 + $0x178] sm:$0xff] }
  0x17   : > { %783 = vmatpush.msra.mxu1 %v743_v21  ;;  %829 = vmatpush.msra.mxu3 %v744_v23  ;;  %v703_v36 = vld [vmem:[%s5692_s2 + $0x60] sm:$0xff]  ;;  %v704_v38 = vld [vmem:[%s5692_s2 + $0x68] sm:$0xff]  ;;  %v701_v40 = vld [vmem:[%s5692_s2 + $0x50] sm:$0xff] }
  0x18   : > { %761 = vmatpush.msra.mxu0 %v709_v24  ;;  %807 = vmatpush.msra.mxu2 %v710_v26  ;;  %v735_v37 = vld [vmem:[%s5692_s2 + $0x160] sm:$0xff]  ;;  %v736_v39 = vld [vmem:[%s5692_s2 + $0x168] sm:$0xff]  ;;  %v733_v41 = vld [vmem:[%s5692_s2 + $0x150] sm:$0xff] }
  0x19   : > { %784 = vmatpush.msra.mxu1 %v741_v25  ;;  %830 = vmatpush.msra.mxu3 %v742_v27  ;;  %v702_v42 = vld [vmem:[%s5692_s2 + $0x58] sm:$0xff]  ;;  %v699_v44 = vld [vmem:[%s5692_s2 + $0x40] sm:$0xff]  ;;  %v700_v46 = vld [vmem:[%s5692_s2 + $0x48] sm:$0xff] }
  0x1a   : > { %762 = vmatpush.msra.mxu0 %v707_v28  ;;  %808 = vmatpush.msra.mxu2 %v708_v30  ;;  %v734_v43 = vld [vmem:[%s5692_s2 + $0x158] sm:$0xff]  ;;  %v731_v45 = vld [vmem:[%s5692_s2 + $0x140] sm:$0xff]  ;;  %v732_v47 = vld [vmem:[%s5692_s2 + $0x148] sm:$0xff] }
  0x1b   : > { %785 = vmatpush.msra.mxu1 %v739_v29  ;;  %831 = vmatpush.msra.mxu3 %v740_v31  ;;  %v697_v48 = vld [vmem:[%s5692_s2 + $0x30] sm:$0xff]  ;;  %v698_v50 = vld [vmem:[%s5692_s2 + $0x38] sm:$0xff]  ;;  %v695_v52 = vld [vmem:[%s5692_s2 + $0x20] sm:$0xff] }
  0x1c   : > { %763 = vmatpush.msra.mxu0 %v705_v32  ;;  %809 = vmatpush.msra.mxu2 %v706_v34  ;;  %v729_v49 = vld [vmem:[%s5692_s2 + $0x130] sm:$0xff]  ;;  %v730_v51 = vld [vmem:[%s5692_s2 + $0x138] sm:$0xff]  ;;  %v727_v53 = vld [vmem:[%s5692_s2 + $0x120] sm:$0xff] }
  0x1d   : > { %786 = vmatpush.msra.mxu1 %v737_v33  ;;  %832 = vmatpush.msra.mxu3 %v738_v35  ;;  %v696_v54 = vld [vmem:[%s5692_s2 + $0x28] sm:$0xff]  ;;  %v693_v56 = vld [vmem:[%s5692_s2 + $0x10] sm:$0xff]  ;;  %v694_v58 = vld [vmem:[%s5692_s2 + $0x18] sm:$0xff] }
  0x1e   : > { %764 = vmatpush.msra.mxu0 %v703_v36  ;;  %810 = vmatpush.msra.mxu2 %v704_v38  ;;  %v728_v55 = vld [vmem:[%s5692_s2 + $0x128] sm:$0xff]  ;;  %v725_v57 = vld [vmem:[%s5692_s2 + $0x110] sm:$0xff]  ;;  %v726_v59 = vld [vmem:[%s5692_s2 + $0x118] sm:$0xff] }
  0x1f   : > { %787 = vmatpush.msra.mxu1 %v735_v37  ;;  %833 = vmatpush.msra.mxu3 %v736_v39  ;;  %v691_v60 = vld [vmem:[%s5692_s2] sm:$0xff]  ;;  %v692_v62 = vld [vmem:[%s5692_s2 + $0x8] sm:$0xff]  ;;  %v2805_v0 = vld [vmem:[%s5692_s2 + $0x2f0] sm:$0xff] }
  0x20   : > { %765 = vmatpush.msra.mxu0 %v701_v40  ;;  %811 = vmatpush.msra.mxu2 %v702_v42  ;;  %v723_v61 = vld [vmem:[%s5692_s2 + $0x100] sm:$0xff]  ;;  %v724_v63 = vld [vmem:[%s5692_s2 + $0x108] sm:$0xff]  ;;  %v2837_v1 = vld [vmem:[%s5692_s2 + $0x3f0] sm:$0xff] }
  0x21   : > { %788 = vmatpush.msra.mxu1 %v733_v41  ;;  %834 = vmatpush.msra.mxu3 %v734_v43  ;;  %v2806_v2 = vld [vmem:[%s5692_s2 + $0x2f8] sm:$0xff]  ;;  %v2803_v4 = vld [vmem:[%s5692_s2 + $0x2e0] sm:$0xff]  ;;  %v2804_v6 = vld [vmem:[%s5692_s2 + $0x2e8] sm:$0xff] }
  0x22   : > { %766 = vmatpush.msra.mxu0 %v699_v44  ;;  %812 = vmatpush.msra.mxu2 %v700_v46  ;;  %v2838_v3 = vld [vmem:[%s5692_s2 + $0x3f8] sm:$0xff]  ;;  %v2835_v5 = vld [vmem:[%s5692_s2 + $0x3e0] sm:$0xff]  ;;  %v2836_v7 = vld [vmem:[%s5692_s2 + $0x3e8] sm:$0xff] }
  0x23   : > { %789 = vmatpush.msra.mxu1 %v731_v45  ;;  %835 = vmatpush.msra.mxu3 %v732_v47  ;;  %v2801_v8 = vld [vmem:[%s5692_s2 + $0x2d0] sm:$0xff]  ;;  %v3212_v10 = vld [vmem:[%s3185_s29] sm:$0xff]  ;;  %v3215_v11 = vld [vmem:[%s3185_s29 + $0x8] sm:$0xff] }
  0x24   : > { %767 = vmatpush.msra.mxu0 %v697_v48  ;;  %813 = vmatpush.msra.mxu2 %v698_v50  ;;  %v2833_v9 = vld [vmem:[%s5692_s2 + $0x3d0] sm:$0xff]  ;;  %v2802_v13 = vld [vmem:[%s5692_s2 + $0x2d8] sm:$0xff]  ;;  %v3227_v15 = vmul.f32 0.70710677, %v3212_v10  ;;  %v3230_v16 = vmul.f32 0.70710677, %v3215_v11 }
  0x25   : > { %790 = vmatpush.msra.mxu1 %v729_v49  ;;  %836 = vmatpush.msra.mxu3 %v730_v51  ;;  %v3218_v12 = vld [vmem:[%s3185_s29 + $0x10] sm:$0x1f]  ;;  %v2834_v14 = vld [vmem:[%s5692_s2 + $0x3d8] sm:$0xff]  ;;  %v2799_v18 = vld [vmem:[%s5692_s2 + $0x2c0] sm:$0xff] }
  0x26   : > { %768 = vmatpush.msra.mxu0 %v695_v52  ;;  %814 = vmatpush.msra.mxu2 %v696_v54  ;;  %v3233_v17 = vmul.f32 0.70710677, %v3218_v12  ;;  %v2831_v19 = vld [vmem:[%s5692_s2 + $0x3c0] sm:$0xff]  ;;  %v3242_v20 = vld [vmem:[%s3185_s29 + $0x18] sm:$0x1f]  ;;  %v2800_v21 = vld [vmem:[%s5692_s2 + $0x2c8] sm:$0xff] }
  0x27   : > { %791 = vmatpush.msra.mxu1 %v727_v53  ;;  %837 = vmatpush.msra.mxu3 %v728_v55  ;;  %v2832_v22 = vld [vmem:[%s5692_s2 + $0x3c8] sm:$0xff]  ;;  %v482_v23 = vand.u32 2147483647, %v3227_v15  ;;  %v483_v24 = vand.u32 2147483647, %v3230_v16  ;;  %v2797_v26 = vld [vmem:[%s5692_s2 + $0x2b0] sm:$0xff] }
  0x28   : > { %769 = vmatpush.msra.mxu0 %v693_v56  ;;  %815 = vmatpush.msra.mxu2 %v694_v58  ;;  %v484_v25 = vand.u32 2147483647, %v3233_v17  ;;  %v2829_v27 = vld [vmem:[%s5692_s2 + $0x3b0] sm:$0xff]  ;;  %v3260_v28 = vmul.f32 0.70710677, %v3242_v20  ;;  %v2798_v30 = vld [vmem:[%s5692_s2 + $0x2b8] sm:$0xff] }
  0x29   : > { %792 = vmatpush.msra.mxu1 %v725_v57  ;;  %838 = vmatpush.msra.mxu3 %v726_v59  ;;  %v3263_v29 = vld [vmem:[%s3185_s29] sm:$0xfc]  ;;  %v486_v31 = vmul.f32 0.3275911, %v482_v23  ;;  %v534_v32 = vsub.f32 0.0, %v482_v23  ;;  %v535_v34 = vsub.f32 0.0, %v483_v24 }
  0x2a   : > { %770 = vmatpush.msra.mxu0 %v691_v60  ;;  %816 = vmatpush.msra.mxu2 %v692_v62  ;;  %v487_v33 = vmul.f32 0.3275911, %v483_v24  ;;  %v488_v35 = vmul.f32 0.3275911, %v484_v25  ;;  %v536_v36 = vsub.f32 0.0, %v484_v25  ;;  %v2830_v38 = vld [vmem:[%s5692_s2 + $0x3b8] sm:$0xff] }
  0x2b   : > { %793 = vmatpush.msra.mxu1 %v723_v61  ;;  %839 = vmatpush.msra.mxu3 %v724_v63  ;;  %v3269_v37 = vand.u32 2147483647, %v3260_v28  ;;  %v2795_v39 = vld [vmem:[%s5692_s2 + $0x2a0] sm:$0xff]  ;;  %v490_v40 = vadd.f32 1.0, %v486_v31  ;;  %v3278_v42 = vmul.f32 0.70710677, %v3263_v29  ;;  %v538_v49 = vmul.f32 %v534_v32, %v482_v23 }
  0x2c   : > { %936 = vmatpush.msrb.mxu0 %v2805_v0  ;;  %982 = vmatpush.msrb.mxu2 %v2806_v2  ;;  %v491_v41 = vadd.f32 1.0, %v487_v33  ;;  %v2827_v43 = vld [vmem:[%s5692_s2 + $0x3a0] sm:$0xff]  ;;  %v2796_v44 = vld [vmem:[%s5692_s2 + $0x2a8] sm:$0xff]  ;;  %v3287_v45 = vld [vmem:[%s3185_s29 + $0x10] sm:$0x7f]  ;;  %v492_v50 = vadd.f32 1.0, %v488_v35  ;;  %v539_v55 = vmul.f32 %v535_v34, %v483_v24  ;;  %v540_v56 = vmul.f32 %v536_v36, %v484_v25 }
  0x2d   : > { %959 = vmatpush.msrb.mxu1 %v2837_v1  ;;  %1005 = vmatpush.msrb.mxu3 %v2838_v3  ;;  %v2828_v46 = vld [vmem:[%s5692_s2 + $0x3a8] sm:$0xff]  ;;  %v2793_v47 = vld [vmem:[%s5692_s2 + $0x290] sm:$0xff]  ;;  %2853 = vrcp.f32 %v490_v40  ;;  %v489_v51 = vmul.f32 0.3275911, %v3269_v37  ;;  %v2794_v52 = vld [vmem:[%s5692_s2 + $0x298] sm:$0xff]  ;;  %v537_v62 = vsub.f32 0.0, %v3269_v37 }
  0x2e   : > { %937 = vmatpush.msrb.mxu0 %v2803_v4  ;;  %983 = vmatpush.msrb.mxu2 %v2804_v6  ;;  %v2825_v48 = vld [vmem:[%s5692_s2 + $0x390] sm:$0xff]  ;;  %v2826_v53 = vld [vmem:[%s5692_s2 + $0x398] sm:$0xff]  ;;  %v2791_v54 = vld [vmem:[%s5692_s2 + $0x280] sm:$0xff]  ;;  %2855 = vrcp.f32 %v491_v41  ;;  %v3312_v59 = vmul.f32 0.70710677, %v3287_v45  ;;  %vm558_vm0 = vcmp.ge.f32.partialorder %v3227_v15, 0.0 }
  0x2f   : > { %960 = vmatpush.msrb.mxu1 %v2835_v5  ;;  %1006 = vmatpush.msrb.mxu3 %v2836_v7  ;;  %v2823_v57 = vld [vmem:[%s5692_s2 + $0x380] sm:$0xff]  ;;  %v493_v58 = vadd.f32 1.0, %v489_v51  ;;  %v590_v60 = vand.u32 2147483647, %v3278_v42  ;;  %v2792_v61 = vld [vmem:[%s5692_s2 + $0x288] sm:$0xff]  ;;  %2857 = vrcp.f32 %v492_v50  ;;  %v2789_v6 = vld [vmem:[%s5692_s2 + $0x270] sm:$0xff]  ;;  %v541_v25 = vmul.f32 %v537_v62, %v3269_v37 }
  0x30   : > { %938 = vmatpush.msrb.mxu0 %v2801_v8  ;;  %984 = vmatpush.msrb.mxu2 %v2802_v13  ;;  %v3320_v63 = vld [vmem:[%s3185_s29 + $0x8] sm:$0xfc]  ;;  %v3323_v0 = vld [vmem:[%s3185_s29 + $0x18] sm:$0x7f]  ;;  %v3328_v2 = vmul.f32 1.442695, %v538_v49 }
  0x31   : > { %961 = vmatpush.msrb.mxu1 %v2833_v9  ;;  %1007 = vmatpush.msrb.mxu3 %v2834_v14  ;;  %v2824_v1 = vld [vmem:[%s5692_s2 + $0x388] sm:$0xff]  ;;  %v594_v3 = vmul.f32 0.3275911, %v590_v60  ;;  %v642_v4 = vsub.f32 0.0, %v590_v60  ;;  %v3330_v5 = vmul.f32 1.442695, %v539_v55  ;;  %2859 = vrcp.f32 %v493_v58 }
  0x32   : > { %939 = vmatpush.msrb.mxu0 %v2799_v18  ;;  %985 = vmatpush.msrb.mxu2 %v2800_v21  ;;  %v2821_v7 = vld [vmem:[%s5692_s2 + $0x370] sm:$0xff]  ;;  %v3338_v8 = vmul.f32 1.442695, %v540_v56  ;;  %v2790_v13 = vld [vmem:[%s5692_s2 + $0x278] sm:$0xff]  ;;  %v592_v18 = vand.u32 2147483647, %v3312_v59 }
  0x33   : > { %962 = vmatpush.msrb.mxu1 %v2831_v19  ;;  %1008 = vmatpush.msrb.mxu3 %v2832_v22  ;;  %v3340_v9 = vpop.eup %2853  ;;  %v2822_v14 = vld [vmem:[%s5692_s2 + $0x378] sm:$0xff]  ;;  %v598_v19 = vadd.f32 1.0, %v594_v3  ;;  %v2787_v23 = vld [vmem:[%s5692_s2 + $0x260] sm:$0xff]  ;;  %v2820_v31 = vld [vmem:[%s5692_s2 + $0x368] sm:$0xff]  ;;  %v646_v32 = vmul.f32 %v642_v4, %v590_v60  ;;  %v3370_v33 = vmul.f32 0.70710677, %v3323_v0 }
  0x34   : > { %940 = vmatpush.msrb.mxu0 %v2797_v26  ;;  %986 = vmatpush.msrb.mxu2 %v2798_v30  ;;  %v3349_v21 = vpop.eup %2855  ;;  %v498_v22 = vmul.f32 1.0614054, %v3340_v9  ;;  %v2819_v24 = vld [vmem:[%s5692_s2 + $0x360] sm:$0xff]  ;;  %v3360_v26 = vmul.f32 0.70710677, %v3320_v63  ;;  %v2788_v30 = vld [vmem:[%s5692_s2 + $0x268] sm:$0xff] }
  0x35   : > { %963 = vmatpush.msrb.mxu1 %v2829_v27  ;;  %1009 = vmatpush.msrb.mxu3 %v2830_v38  ;;  %v499_v27 = vmul.f32 1.0614054, %v3349_v21  ;;  %v2785_v35 = vld [vmem:[%s5692_s2 + $0x250] sm:$0xff]  ;;  %v2786_v37 = vld [vmem:[%s5692_s2 + $0x258] sm:$0xff]  ;;  %2861 = vrcp.f32 %v598_v19  ;;  %v3381_v38 = vpop.eup %2857  ;;  %v596_v41 = vmul.f32 0.3275911, %v592_v18 }
  0x36   : > { %941 = vmatpush.msrb.mxu0 %v2795_v39  ;;  %987 = vmatpush.msrb.mxu2 %v2796_v44  ;;  %v502_v34 = vadd.f32 -1.4531521, %v498_v22  ;;  %v2817_v36 = vld [vmem:[%s5692_s2 + $0x350] sm:$0xff]  ;;  %v2818_v40 = vld [vmem:[%s5692_s2 + $0x358] sm:$0xff]  ;;  %v548_v49 = vmul.f32 1.442695, %v541_v25  ;;  %2863 = vpow2.f32 %v3328_v2 }
  0x37   : > { %964 = vmatpush.msrb.mxu1 %v2827_v43  ;;  %1010 = vmatpush.msrb.mxu3 %v2828_v46  ;;  %v503_v39 = vadd.f32 -1.4531521, %v499_v27  ;;  %v644_v43 = vsub.f32 0.0, %v592_v18  ;;  %v2783_v46 = vld [vmem:[%s5692_s2 + $0x240] sm:$0xff]  ;;  %v3394_v50 = vpop.eup %2859  ;;  %v3397_v51 = vmul.f32 0.5, %v3212_v10  ;;  %v600_v55 = vadd.f32 1.0, %v596_v41 }
  0x38   : > { %942 = vmatpush.msrb.mxu0 %v2793_v47  ;;  %988 = vmatpush.msrb.mxu2 %v2794_v52  ;;  %v506_v44 = vmul.f32 %v3340_v9, %v502_v34  ;;  %v2815_v47 = vld [vmem:[%s5692_s2 + $0x340] sm:$0xff]  ;;  %v3406_v56 = vmul.f32 1.442695, %v646_v32  ;;  %v501_v58 = vmul.f32 1.0614054, %v3394_v50  ;;  %v2781_v62 = vld [vmem:[%s5692_s2 + $0x230] sm:$0xff] }
  0x39   : > { %965 = vmatpush.msrb.mxu1 %v2825_v48  ;;  %1011 = vmatpush.msrb.mxu3 %v2826_v53  ;;  %v500_v48 = vmul.f32 1.0614054, %v3381_v38  ;;  %v507_v52 = vmul.f32 %v3349_v21, %v503_v39  ;;  %v2784_v53 = vld [vmem:[%s5692_s2 + $0x248] sm:$0xff]  ;;  %v2782_v2 = vld [vmem:[%s5692_s2 + $0x238] sm:$0xff]  ;;  %2865 = vrcp.f32 %v600_v55  ;;  %v648_v3 = vmul.f32 %v644_v43, %v592_v18  ;;  %v2779_v18 = vld [vmem:[%s5692_s2 + $0x220] sm:$0xff] }
  0x3a   : > { %943 = vmatpush.msrb.mxu0 %v2791_v54  ;;  %989 = vmatpush.msrb.mxu2 %v2792_v61  ;;  %v2816_v54 = vld [vmem:[%s5692_s2 + $0x348] sm:$0xff]  ;;  %v3411_v61 = vmul.f32 0.5, %v3215_v11  ;;  %v2811_v19 = vld [vmem:[%s5692_s2 + $0x320] sm:$0xff]  ;;  %2867 = vpow2.f32 %v3330_v5  ;;  %v3448_v25 = vand.u32 2147483647, %v3360_v26  ;;  %v2809_v32 = vld [vmem:[%s5692_s2 + $0x310] sm:$0xff] }
  0x3b   : > { %966 = vmatpush.msrb.mxu1 %v2823_v57  ;;  %1012 = vmatpush.msrb.mxu3 %v2824_v1  ;;  %v510_v57 = vadd.f32 1.4214138, %v506_v44  ;;  %v504_v10 = vadd.f32 -1.4531521, %v500_v48  ;;  %v511_v60 = vadd.f32 1.4214138, %v507_v52  ;;  %v3422_v4 = vpop.eup %2861  ;;  %2869 = vpow2.f32 %v3338_v8 }
  0x3c   : > { %944 = vmatpush.msrb.mxu0 %v2789_v6  ;;  %990 = vmatpush.msrb.mxu2 %v2790_v13  ;;  %v2813_v1 = vld [vmem:[%s5692_s2 + $0x330] sm:$0xff]  ;;  %v505_v13 = vadd.f32 -1.4531521, %v501_v58  ;;  %2871 = vpow2.f32 %v548_v49  ;;  %v2778_v8 = vld [vmem:[%s5692_s2 + $0x218] sm:$0xff]  ;;  %v2775_v43 = vld [vmem:[%s5692_s2 + $0x200] sm:$0xff]  ;;  %vm559_vm1 = vcmp.ge.f32.partialorder %v3230_v16, 0.0 }
  0x3d   : > { %967 = vmatpush.msrb.mxu1 %v2821_v7  ;;  %1013 = vmatpush.msrb.mxu3 %v2822_v14  ;;  %v514_v11 = vmul.f32 %v3340_v9, %v510_v57  ;;  %v508_v6 = vmul.f32 %v3381_v38, %v504_v10  ;;  %v3427_v7 = vmul.f32 0.5, %v3218_v12  ;;  %v2814_v14 = vld [vmem:[%s5692_s2 + $0x338] sm:$0xff]  ;;  %v515_v22 = vmul.f32 %v3349_v21, %v511_v60  ;;  %v2780_v12 = vld [vmem:[%s5692_s2 + $0x228] sm:$0xff]  ;;  %v2807_v44 = vld [vmem:[%s5692_s2 + $0x300] sm:$0xff] }
  0x3e   : > { %945 = vmatpush.msrb.mxu0 %v2787_v23  ;;  %991 = vmatpush.msrb.mxu2 %v2788_v30  ;;  %v2812_v23 = vld [vmem:[%s5692_s2 + $0x328] sm:$0xff]  ;;  %v509_v5 = vmul.f32 %v3394_v50, %v505_v13  ;;  %2873 = vpow2.f32 %v3406_v56  ;;  %vm560_vm2 = vcmp.ge.f32.partialorder %v3233_v17, 0.0  ;;  %vm561_vm3 = vcmp.ge.f32.partialorder %v3260_v28, 0.0 }
  0x3f   : > { %968 = vmatpush.msrb.mxu1 %v2819_v24  ;;  %1014 = vmatpush.msrb.mxu3 %v2820_v31  ;;  %v606_v24 = vmul.f32 1.0614054, %v3422_v4  ;;  %v518_v27 = vadd.f32 -0.28449672, %v514_v11  ;;  %v512_v30 = vadd.f32 1.4214138, %v508_v6 }
  0x40   : > { %946 = vmatpush.msrb.mxu0 %v2785_v35  ;;  %992 = vmatpush.msrb.mxu2 %v2786_v37  ;;  %v2777_v31 = vld [vmem:[%s5692_s2 + $0x210] sm:$0xff]  ;;  %v519_v34 = vadd.f32 -0.28449672, %v515_v22  ;;  %v2810_v35 = vld [vmem:[%s5692_s2 + $0x318] sm:$0xff]  ;;  %v2864_v37 = vpop.eup %2863  ;;  %v513_v41 = vadd.f32 1.4214138, %v509_v5 }
  0x41   : > { %969 = vmatpush.msrb.mxu1 %v2817_v36  ;;  %1015 = vmatpush.msrb.mxu3 %v2818_v40  ;;  %v654_v36 = vmul.f32 1.442695, %v648_v3  ;;  %v522_v39 = vmul.f32 %v3340_v9, %v518_v27  ;;  %v516_v40 = vmul.f32 %v3381_v38, %v512_v30  ;;  %v2776_v49 = vld [vmem:[%s5692_s2 + $0x208] sm:$0xff]  ;;  %vm666_vm4 = vcmp.ge.f32.partialorder %v3278_v42, 0.0  ;;  %v1062_v42 = vld [vmem:[%s5694_s4 + $0xf0] sm:$0xff] }
  0x42   : > { %947 = vmatpush.msrb.mxu0 %v2783_v46  ;;  %993 = vmatpush.msrb.mxu2 %v2784_v53  ;;  %v610_v46 = vadd.f32 -1.4531521, %v606_v24  ;;  %v523_v48 = vmul.f32 %v3349_v21, %v519_v34  ;;  %v2808_v52 = vld [vmem:[%s5692_s2 + $0x308] sm:$0xff]  ;;  %v593_v53 = vand.u32 2147483647, %v3370_v33  ;;  %v517_v10 = vmul.f32 %v3394_v50, %v513_v41 }
  0x43   : > { %970 = vmatpush.msrb.mxu1 %v2815_v47  ;;  %1016 = vmatpush.msrb.mxu3 %v2816_v54  ;;  %v3472_v47 = vpop.eup %2865  ;;  %v595_v54 = vmul.f32 0.3275911, %v3448_v25  ;;  %v526_v55 = vadd.f32 0.2548296, %v522_v39  ;;  %v520_v57 = vadd.f32 -0.28449672, %v516_v40 }
  0x44   : > { %948 = vmatpush.msrb.mxu0 %v2781_v62  ;;  %994 = vmatpush.msrb.mxu2 %v2782_v2  ;;  %v608_v58 = vmul.f32 1.0614054, %v3472_v47  ;;  %v2868_v60 = vpop.eup %2867  ;;  %v527_v62 = vadd.f32 0.2548296, %v523_v48  ;;  %v614_v56 = vmul.f32 %v3422_v4, %v610_v46  ;;  %v521_v13 = vadd.f32 -0.28449672, %v517_v10 }
  0x45   : > { %971 = vmatpush.msrb.mxu1 %v2813_v1  ;;  %1017 = vmatpush.msrb.mxu3 %v2814_v14  ;;  %v597_v1 = vmul.f32 0.3275911, %v593_v53  ;;  %v599_v2 = vadd.f32 1.0, %v595_v54  ;;  %v2870_v3 = vpop.eup %2869  ;;  %v530_v11 = vmul.f32 %v3340_v9, %v526_v55  ;;  %v524_v6 = vmul.f32 %v3381_v38, %v520_v57 }
  0x46   : > { %949 = vmatpush.msrb.mxu0 %v2779_v18  ;;  %995 = vmatpush.msrb.mxu2 %v2780_v12  ;;  %v612_v14 = vadd.f32 -1.4531521, %v608_v58  ;;  %v2872_v18 = vpop.eup %2871  ;;  %v618_v22 = vadd.f32 1.4214138, %v614_v56  ;;  %v525_v27 = vmul.f32 %v3394_v50, %v521_v13  ;;  %v645_v40 = vsub.f32 0.0, %v593_v53 }
  0x47   : > { %972 = vmatpush.msrb.mxu1 %v2811_v19  ;;  %1018 = vmatpush.msrb.mxu3 %v2812_v23  ;;  %v531_v19 = vmul.f32 %v3349_v21, %v527_v62  ;;  %v601_v12 = vadd.f32 1.0, %v597_v1  ;;  %2875 = vrcp.f32 %v599_v2  ;;  %v550_v23 = vmul.f32 %v2864_v37, %v530_v11  ;;  %v2874_v30 = vpop.eup %2873 }
  0x48   : > { %950 = vmatpush.msrb.mxu0 %v2777_v31  ;;  %996 = vmatpush.msrb.mxu2 %v2778_v8  ;;  %v528_v24 = vadd.f32 0.2548296, %v524_v6  ;;  %v616_v9 = vmul.f32 %v3472_v47, %v612_v14  ;;  %v622_v31 = vmul.f32 %v3422_v4, %v618_v22  ;;  %v643_v21 = vsub.f32 0.0, %v3448_v25 }
  0x49   : > { %973 = vmatpush.msrb.mxu1 %v2809_v32  ;;  %1019 = vmatpush.msrb.mxu3 %v2810_v35  ;;  %v551_v5 = vmul.f32 %v2868_v60, %v531_v19  ;;  %2877 = vrcp.f32 %v601_v12  ;;  %v554_v32 = vsub.f32 1.0, %v550_v23  ;;  %v529_v8 = vadd.f32 0.2548296, %v525_v27 }
  0x4a   : > { %951 = vmatpush.msrb.mxu0 %v2775_v43  ;;  %997 = vmatpush.msrb.mxu2 %v2776_v49  ;;  %v532_v34 = vmul.f32 %v3381_v38, %v528_v24  ;;  %v620_v35 = vadd.f32 1.4214138, %v616_v9  ;;  %v626_v39 = vadd.f32 -0.28449672, %v622_v31  ;;  %2879 = vpow2.f32 %v654_v36 }
  0x4b   : > { %974 = vmatpush.msrb.mxu1 %v2807_v44  ;;  %1020 = vmatpush.msrb.mxu3 %v2808_v52  ;;  %v555_v37 = vsub.f32 1.0, %v551_v5  ;;  %v562_v41 = vsub.f32 0.0, %v554_v32  ;;  %v533_v44 = vmul.f32 %v3394_v50, %v529_v8  ;;  %v647_v54 = vmul.f32 %v643_v21, %v3448_v25 }
  0x4c   : > { %v552_v43 = vmul.f32 %v2870_v3, %v532_v34  ;;  %v624_v46 = vmul.f32 %v3472_v47, %v620_v35  ;;  %v630_v52 = vmul.f32 %v3422_v4, %v626_v39  ;;  %v649_v38 = vmul.f32 %v645_v40, %v593_v53 }
  0x4d   : > { %v3501_v48 = vpop.eup %2875  ;;  %v563_v49 = vsub.f32 0.0, %v555_v37  ;;  %v566_v55 = vsel %vm558_vm0, %v554_v32, %v562_v41  ;;  %v553_v36 = vmul.f32 %v2872_v18, %v533_v44  ;;  %v652_v5 = vmul.f32 1.442695, %v647_v54  ;;  %v1061_v44 = vld [vmem:[%s5694_s4 + $0xe8] sm:$0xff] }
  0x4e   : > { %v556_v57 = vsub.f32 1.0, %v552_v43  ;;  %v628_v10 = vadd.f32 -0.28449672, %v624_v46  ;;  %v574_v60 = vadd.f32 1.0, %v566_v55  ;;  %v634_v62 = vadd.f32 0.2548296, %v630_v52 }
  0x4f   : > { %v3507_v58 = vpop.eup %2877  ;;  %v567_v50 = vsel %vm559_vm1, %v555_v37, %v563_v49  ;;  %v607_v56 = vmul.f32 1.0614054, %v3501_v48  ;;  %v557_v3 = vsub.f32 1.0, %v553_v36  ;;  %v656_v21 = vmul.f32 1.442695, %v649_v38  ;;  %v1094_v52 = vld [vmem:[%s5694_s4 + $0x1f0] sm:$0xff] }
  0x50   : > { %v575_v1 = vadd.f32 1.0, %v567_v50  ;;  %v564_v2 = vsub.f32 0.0, %v556_v57  ;;  %v632_v25 = vmul.f32 %v3472_v47, %v628_v10  ;;  %v2880_v53 = vpop.eup %2879  ;;  %v578_v15 = vmul.f32 %v574_v60, %v3397_v51  ;;  %v1095_v36 = vld [vmem:[%s5694_s4 + $0x1f8] sm:$0xff]  ;;  %v1093_v50 = vld [vmem:[%s5694_s4 + $0x1e8] sm:$0xff] }
  0x51   : > { %v638_v11 = vmul.f32 %v3422_v4, %v634_v62  ;;  %v609_v6 = vmul.f32 1.0614054, %v3507_v58  ;;  %v611_v13 = vadd.f32 -1.4531521, %v607_v56  ;;  %v565_v18 = vsub.f32 0.0, %v557_v3  ;;  %v1056_v56 = vld [vmem:[%s5694_s4 + $0xc0] sm:$0xff] }
  0x52   : > { %v579_v14 = vmul.f32 %v575_v1, %v3411_v61  ;;  %v568_v16 = vsel %vm560_vm2, %v556_v57, %v564_v2  ;;  %v636_v19 = vadd.f32 0.2548296, %v632_v25  ;;  %771 = vmatmul.f32.vlgmr.msra.gmra.mxu0 %v578_v15  ;;  %817 = vmatmul.f32.vlgmr.msra.gmra.mxu2 %v578_v15  ;;  %v573_v4 = vmul.f32 0.5, %v3242_v20  ;;  %v1058_v57 = vld [vmem:[%s5694_s4 + $0xd0] sm:$0xff]  ;;  %v1057_v1 = vld [vmem:[%s5694_s4 + $0xc8] sm:$0xff] }
  0x53   : > { %v576_v22 = vadd.f32 1.0, %v568_v16  ;;  %v658_v12 = vmul.f32 %v2874_v30, %v638_v11  ;;  %v613_v23 = vadd.f32 -1.4531521, %v609_v6  ;;  %v615_v24 = vmul.f32 %v3501_v48, %v611_v13  ;;  %1102 = vmatpush.msra.mxu0 %v1062_v42  ;;  %v1090_v15 = vld [vmem:[%s5694_s4 + $0x1d0] sm:$0xff]  ;;  %v1091_v11 = vld [vmem:[%s5694_s4 + $0x1d8] sm:$0xff] }
  0x54   : > { %794 = vmatmul.f32.vlgmr.msra.gmra.mxu1 %v579_v14  ;;  %840 = vmatmul.f32.vlgmr.msra.gmra.mxu3 %v579_v14  ;;  %v569_v51 = vsel %vm561_vm3, %v557_v3, %v565_v18  ;;  %v640_v61 = vmul.f32 %v3472_v47, %v636_v19  ;;  %v678_v20 = vmul.f32 0.5, %v3263_v29  ;;  %vm668_vm5 = vcmp.ge.f32.partialorder %v3312_v59, 0.0  ;;  %v1060_v29 = vld [vmem:[%s5694_s4 + $0xe0] sm:$0xff]  ;;  %v1054_v14 = vld [vmem:[%s5694_s4 + $0xb0] sm:$0xff]  ;;  %v1055_v16 = vld [vmem:[%s5694_s4 + $0xb8] sm:$0xff] }
  0x55   : > { %v577_v17 = vadd.f32 1.0, %v569_v51  ;;  %v662_v27 = vsub.f32 1.0, %v658_v12  ;;  %v617_v9 = vmul.f32 %v3507_v58, %v613_v23  ;;  %v619_v30 = vadd.f32 1.4214138, %v615_v24  ;;  %1103 = vmatpush.msra.mxu0 %v1060_v29  ;;  %v1092_v59 = vld [vmem:[%s5694_s4 + $0x1e0] sm:$0xff]  ;;  %1125 = vmatpush.msra.mxu1 %v1094_v52  ;;  %v1053_v12 = vld [vmem:[%s5694_s4 + $0xa8] sm:$0xff] }
  0x56   : > { %v660_v31 = vmul.f32 %v2880_v53, %v640_v61  ;;  %v580_v32 = vmul.f32 %v576_v22, %v3427_v7  ;;  %2881 = vpow2.f32 %v652_v5  ;;  %v1063_v7 = vld [vmem:[%s5694_s4 + $0xf8] sm:$0xff]  ;;  %v680_v46 = vmul.f32 0.5, %v3287_v45  ;;  %1171 = vmatpush.msra.mxu3 %v1095_v36  ;;  %v1089_v51 = vld [vmem:[%s5694_s4 + $0x1c8] sm:$0xff]  ;;  %v1050_v61 = vld [vmem:[%s5694_s4 + $0x90] sm:$0xff] }
  0x57   : > { %v670_v34 = vsub.f32 0.0, %v662_v27  ;;  %v621_v8 = vadd.f32 1.4214138, %v617_v9  ;;  %v581_v28 = vmul.f32 %v577_v17, %v573_v4  ;;  %v623_v47 = vmul.f32 %v3501_v48, %v619_v30  ;;  %1148 = vmatpush.msra.mxu2 %v1063_v7  ;;  %v1059_v45 = vld [vmem:[%s5694_s4 + $0xd8] sm:$0xff]  ;;  %1104 = vmatpush.msra.mxu0 %v1058_v57  ;;  %v1086_v9 = vld [vmem:[%s5694_s4 + $0x1b0] sm:$0xff]  ;;  %v1048_v30 = vld [vmem:[%s5694_s4 + $0x80] sm:$0xff] }
  0x58   : > { %v664_v35 = vsub.f32 1.0, %v660_v31  ;;  %2883 = vpow2.f32 %v656_v21  ;;  %1126 = vmatpush.msra.mxu1 %v1092_v59  ;;  %1172 = vmatpush.msra.mxu3 %v1093_v50  ;;  %v1051_v17 = vld [vmem:[%s5694_s4 + $0x98] sm:$0xff]  ;;  %vm667_vm7 = vcmp.ge.f32.partialorder %v3360_v26, 0.0  ;;  %vm669_vm8 = vcmp.ge.f32.partialorder %v3370_v33, 0.0  ;;  %v1049_v21 = vld [vmem:[%s5694_s4 + $0x88] sm:$0xff]  ;;  %v1082_v42 = vld [vmem:[%s5694_s4 + $0x190] sm:$0xff] }
  0x59   : > { %v674_v37 = vsel %vm666_vm4, %v662_v27, %v670_v34  ;;  %v625_v39 = vmul.f32 %v3507_v58, %v621_v8  ;;  %v627_v43 = vadd.f32 -0.28449672, %v623_v47  ;;  %1149 = vmatpush.msra.mxu2 %v1061_v44  ;;  %1105 = vmatpush.msra.mxu0 %v1056_v56  ;;  %v1087_v5 = vld [vmem:[%s5694_s4 + $0x1b8] sm:$0xff]  ;;  %v679_v34 = vmul.f32 0.5, %v3320_v63  ;;  %v1084_v8 = vld [vmem:[%s5694_s4 + $0x1a0] sm:$0xff]  ;;  %v1046_v63 = vld [vmem:[%s5694_s4 + $0x70] sm:$0xff] }
  0x5a   : > { %v672_v40 = vsub.f32 0.0, %v664_v35  ;;  %v682_v41 = vadd.f32 1.0, %v674_v37  ;;  %774 = vmatmul.f32.gmra.mxu0 %v580_v32  ;;  %820 = vmatmul.f32.gmra.mxu2 %v580_v32  ;;  %v1047_v47 = vld [vmem:[%s5694_s4 + $0x78] sm:$0xff]  ;;  %v1045_v33 = vld [vmem:[%s5694_s4 + $0x68] sm:$0xff]  ;;  %v1080_v29 = vld [vmem:[%s5694_s4 + $0x180] sm:$0xff] }
  0x5b   : > { %v629_v49 = vadd.f32 -0.28449672, %v625_v39  ;;  %v631_v55 = vmul.f32 %v3501_v48, %v627_v43  ;;  %1150 = vmatpush.msra.mxu2 %v1059_v45  ;;  %1127 = vmatpush.msra.mxu1 %v1090_v15  ;;  %v1042_v43 = vld [vmem:[%s5694_s4 + $0x50] sm:$0xff]  ;;  %v1041_v57 = vld [vmem:[%s5694_s4 + $0x48] sm:$0xff]  ;;  %v1079_v45 = vld [vmem:[%s5694_s4 + $0x178] sm:$0xff] }
  0x5c   : > { %797 = vmatmul.f32.gmra.mxu1 %v581_v28  ;;  %843 = vmatmul.f32.gmra.mxu3 %v581_v28  ;;  %v676_v54 = vsel %vm668_vm5, %v664_v35, %v672_v40  ;;  %v686_v38 = vmul.f32 %v682_v41, %v678_v20  ;;  %v2882_v2 = vpop.eup %2881  ;;  %v1085_v28 = vld [vmem:[%s5694_s4 + $0x1a8] sm:$0xff]  ;;  %v681_v20 = vmul.f32 0.5, %v3323_v0  ;;  %v1044_v0 = vld [vmem:[%s5694_s4 + $0x60] sm:$0xff]  ;;  %v1083_v40 = vld [vmem:[%s5694_s4 + $0x198] sm:$0xff] }
  0x5d   : > { %v684_v10 = vadd.f32 1.0, %v676_v54  ;;  %v633_v60 = vmul.f32 %v3507_v58, %v629_v49  ;;  %v635_v62 = vadd.f32 0.2548296, %v631_v55  ;;  %1151 = vmatpush.msra.mxu2 %v1057_v1  ;;  %1173 = vmatpush.msra.mxu3 %v1091_v11  ;;  %v1081_v49 = vld [vmem:[%s5694_s4 + $0x188] sm:$0xff]  ;;  %v1040_v54 = vld [vmem:[%s5694_s4 + $0x40] sm:$0xff]  ;;  %v1038_v36 = vld [vmem:[%s5694_s4 + $0x30] sm:$0xff] }
  0x5e   : > { %v926_v25 = vrot.slane %v686_v38, 2  ;;  %v2884_v6 = vpop.eup %2883  ;;  %1106 = vmatpush.msra.mxu0 %v1054_v14  ;;  %v1078_v38 = vld [vmem:[%s5694_s4 + $0x170] sm:$0xff]  ;;  %v1077_v59 = vld [vmem:[%s5694_s4 + $0x168] sm:$0xff]  ;;  %v1036_v50 = vld [vmem:[%s5694_s4 + $0x20] sm:$0xff] }
  0x5f   : > { %v688_v3 = vmul.f32 %v684_v10, %v680_v46  ;;  %v637_v53 = vadd.f32 0.2548296, %v633_v60  ;;  %v639_v13 = vmul.f32 %v3501_v48, %v635_v62  ;;  %v1052_v48 = vld [vmem:[%s5694_s4 + $0xa0] sm:$0xff]  ;;  %1152 = vmatpush.msra.mxu2 %v1055_v16  ;;  %1174 = vmatpush.msra.mxu3 %v1089_v51  ;;  %v1043_v46 = vld [vmem:[%s5694_s4 + $0x58] sm:$0xff]  ;;  %v1074_v62 = vld [vmem:[%s5694_s4 + $0x150] sm:$0xff] }
  0x60   : > { %1107 = vmatpush.msra.mxu0 %v1052_v48  ;;  %v1076_v10 = vld [vmem:[%s5694_s4 + $0x160] sm:$0xff]  ;;  %v1039_v60 = vld [vmem:[%s5694_s4 + $0x38] sm:$0xff]  ;;  %v1037_v56 = vld [vmem:[%s5694_s4 + $0x28] sm:$0xff] }
  0x61   : > { %v3585_v18 = vrot.slane %v688_v3, 2  ;;  %v641_v19 = vmul.f32 %v3507_v58, %v637_v53  ;;  %v659_v22 = vmul.f32 %v2882_v2, %v639_v13  ;;  %v1088_v58 = vld [vmem:[%s5694_s4 + $0x1c0] sm:$0xff]  ;;  %1153 = vmatpush.msra.mxu2 %v1053_v12  ;;  %1175 = vmatpush.msra.mxu3 %v1087_v5  ;;  %v1075_v1 = vld [vmem:[%s5694_s4 + $0x158] sm:$0xff]  ;;  %v1034_v2 = vld [vmem:[%s5694_s4 + $0x10] sm:$0xff] }
  0x62   : > { %1128 = vmatpush.msra.mxu1 %v1088_v58  ;;  %1108 = vmatpush.msra.mxu0 %v1050_v61  ;;  %v1072_v3 = vld [vmem:[%s5694_s4 + $0x140] sm:$0xff]  ;;  %v1073_v53 = vld [vmem:[%s5694_s4 + $0x148] sm:$0xff]  ;;  %v1070_v11 = vld [vmem:[%s5694_s4 + $0x130] sm:$0xff] }
  0x63   : > { %v3596_v23 = vsel %vm925_vm6, %v926_v25, %v3585_v18  ;;  %v661_v24 = vmul.f32 %v2884_v6, %v641_v19  ;;  %v663_v4 = vsub.f32 1.0, %v659_v22  ;;  %1154 = vmatpush.msra.mxu2 %v1051_v17  ;;  %1176 = vmatpush.msra.mxu3 %v1085_v28  ;;  %v1035_v25 = vld [vmem:[%s5694_s4 + $0x18] sm:$0xff]  ;;  %v1032_v15 = vld [vmem:[%s5694_s4] sm:$0xff]  ;;  %v1033_v6 = vld [vmem:[%s5694_s4 + $0x8] sm:$0xff] }
  0x64   : > { %952 = vmatmul.f32.vlgmr.msrb.gmra.mxu0 %v3596_v23  ;;  %998 = vmatmul.f32.vlgmr.msrb.gmra.mxu2 %v3596_v23  ;;  %v1071_v13 = vld [vmem:[%s5694_s4 + $0x138] sm:$0xff]  ;;  %v1340_v14 = vld [vmem:[%s5696_s6 + $0x3c0] sm:$0xff]  ;;  %v1341_v16 = vld [vmem:[%s5696_s6 + $0x3c8] sm:$0xff] }
  0x65   : > { %v665_v27 = vsub.f32 1.0, %v661_v24  ;;  %v671_v31 = vsub.f32 0.0, %v663_v4  ;;  %1129 = vmatpush.msra.mxu1 %v1086_v9  ;;  %1109 = vmatpush.msra.mxu0 %v1048_v30  ;;  %v1068_v19 = vld [vmem:[%s5694_s4 + $0x120] sm:$0xff]  ;;  %v1069_v22 = vld [vmem:[%s5694_s4 + $0x128] sm:$0xff]  ;;  %v1066_v24 = vld [vmem:[%s5694_s4 + $0x110] sm:$0xff] }
  0x66   : > { %1155 = vmatpush.msra.mxu2 %v1049_v21  ;;  %1177 = vmatpush.msra.mxu3 %v1083_v40  ;;  %v1332_v48 = vld [vmem:[%s5696_s6 + $0x380] sm:$0xff]  ;;  %v1333_v12 = vld [vmem:[%s5696_s6 + $0x388] sm:$0xff]  ;;  %v1067_v58 = vld [vmem:[%s5694_s4 + $0x118] sm:$0xff] }
  0x67   : > { %v673_v32 = vsub.f32 0.0, %v665_v27  ;;  %v675_v35 = vsel %vm667_vm7, %v663_v4, %v671_v31  ;;  %1130 = vmatpush.msra.mxu1 %v1084_v8  ;;  %1110 = vmatpush.msra.mxu0 %v1046_v63  ;;  %v1324_v51 = vld [vmem:[%s5696_s6 + $0x340] sm:$0xff]  ;;  %v1325_v4 = vld [vmem:[%s5696_s6 + $0x348] sm:$0xff] }
  0x68   : > { %v683_v39 = vadd.f32 1.0, %v675_v35  ;;  %1156 = vmatpush.msra.mxu2 %v1047_v47  ;;  %1178 = vmatpush.msra.mxu3 %v1081_v49  ;;  %v1064_v61 = vld [vmem:[%s5694_s4 + $0x100] sm:$0xff]  ;;  %v1065_v17 = vld [vmem:[%s5694_s4 + $0x108] sm:$0xff] }
  0x69   : > { %v677_v37 = vsel %vm669_vm8, %v665_v27, %v673_v32  ;;  %1111 = vmatpush.msra.mxu0 %v1044_v0  ;;  %1131 = vmatpush.msra.mxu1 %v1082_v42  ;;  %v1316_v27 = vld [vmem:[%s5696_s6 + $0x300] sm:$0xff]  ;;  %v1317_v5 = vld [vmem:[%s5696_s6 + $0x308] sm:$0xff] }
  0x6a   : > { %v685_v26 = vadd.f32 1.0, %v677_v37  ;;  %v687_v7 = vmul.f32 %v683_v39, %v679_v34  ;;  %1157 = vmatpush.msra.mxu2 %v1045_v33  ;;  %1179 = vmatpush.msra.mxu3 %v1079_v45  ;;  %v1468_v9 = vld [vmem:[%s5696_s6 + $0x7c0] sm:$0xff]  ;;  %v1469_v31 = vld [vmem:[%s5696_s6 + $0x7c8] sm:$0xff] }
  0x6b   : > { %1112 = vmatpush.msra.mxu0 %v1042_v43  ;;  %1132 = vmatpush.msra.mxu1 %v1080_v29  ;;  %v1308_v30 = vld [vmem:[%s5696_s6 + $0x2c0] sm:$0xff]  ;;  %v1309_v32 = vld [vmem:[%s5696_s6 + $0x2c8] sm:$0xff] }
  0x6c   : > { %v689_v41 = vmul.f32 %v685_v26, %v681_v20  ;;  %955 = vmatmul.f32.gmra.mxu0 %v3585_v18  ;;  %1001 = vmatmul.f32.gmra.mxu2 %v3585_v18  ;;  %v929_v44 = vrot.slane %v687_v7, 2  ;;  %v1460_v21 = vld [vmem:[%s5696_s6 + $0x780] sm:$0xff]  ;;  %v1461_v34 = vld [vmem:[%s5696_s6 + $0x788] sm:$0xff] }
  0x6d   : > { %1158 = vmatpush.msra.mxu2 %v1043_v46  ;;  %1113 = vmatpush.msra.mxu0 %v1040_v54  ;;  %v1300_v8 = vld [vmem:[%s5696_s6 + $0x280] sm:$0xff]  ;;  %v1301_v35 = vld [vmem:[%s5696_s6 + $0x288] sm:$0xff] }
  0x6e   : > { %v3670_v52 = vrot.slane %v689_v41, 2  ;;  %1133 = vmatpush.msra.mxu1 %v1078_v38  ;;  %1180 = vmatpush.msra.mxu3 %v1077_v59  ;;  %v1452_v28 = vld [vmem:[%s5696_s6 + $0x740] sm:$0xff]  ;;  %v1453_v20 = vld [vmem:[%s5696_s6 + $0x748] sm:$0xff] }
  0x6f   : > { %1159 = vmatpush.msra.mxu2 %v1041_v57  ;;  %1114 = vmatpush.msra.mxu0 %v1038_v36  ;;  %v1292_v63 = vld [vmem:[%s5696_s6 + $0x240] sm:$0xff]  ;;  %v1293_v37 = vld [vmem:[%s5696_s6 + $0x248] sm:$0xff] }
  0x70   : > { %v3680_v55 = vsel %vm925_vm6, %v929_v44, %v3670_v52  ;;  %1134 = vmatpush.msra.mxu1 %v1076_v10  ;;  %1181 = vmatpush.msra.mxu3 %v1075_v1  ;;  %v1444_v47 = vld [vmem:[%s5696_s6 + $0x700] sm:$0xff]  ;;  %v1445_v39 = vld [vmem:[%s5696_s6 + $0x708] sm:$0xff] }
  0x71   : > { %975 = vmatmul.f32.vlgmr.msrb.gmra.mxu1 %v3680_v55  ;;  %1021 = vmatmul.f32.vlgmr.msrb.gmra.mxu3 %v3680_v55  ;;  %v1284_v26 = vld [vmem:[%s5696_s6 + $0x200] sm:$0xff]  ;;  %v1285_v42 = vld [vmem:[%s5696_s6 + $0x208] sm:$0xff] }
  0x72   : > { %1160 = vmatpush.msra.mxu2 %v1039_v60  ;;  %1115 = vmatpush.msra.mxu0 %v1036_v50  ;;  %v1436_v0 = vld [vmem:[%s5696_s6 + $0x6c0] sm:$0xff]  ;;  %v1437_v7 = vld [vmem:[%s5696_s6 + $0x6c8] sm:$0xff] }
  0x73   : > { %1135 = vmatpush.msra.mxu1 %v1074_v62  ;;  %1182 = vmatpush.msra.mxu3 %v1073_v53  ;;  %v1276_v33 = vld [vmem:[%s5696_s6 + $0x1c0] sm:$0xff]  ;;  %v1277_v41 = vld [vmem:[%s5696_s6 + $0x1c8] sm:$0xff] }
  0x74   : > { %1161 = vmatpush.msra.mxu2 %v1037_v56  ;;  %1116 = vmatpush.msra.mxu0 %v1034_v2  ;;  %v1428_v40 = vld [vmem:[%s5696_s6 + $0x680] sm:$0xff]  ;;  %v1429_v43 = vld [vmem:[%s5696_s6 + $0x688] sm:$0xff] }
  0x75   : > { %1136 = vmatpush.msra.mxu1 %v1072_v3  ;;  %1183 = vmatpush.msra.mxu3 %v1071_v13  ;;  %v1268_v29 = vld [vmem:[%s5696_s6 + $0x180] sm:$0xff]  ;;  %v1269_v46 = vld [vmem:[%s5696_s6 + $0x188] sm:$0xff] }
  0x76   : > { %1162 = vmatpush.msra.mxu2 %v1035_v25  ;;  %1117 = vmatpush.msra.mxu0 %v1032_v15  ;;  %v1420_v44 = vld [vmem:[%s5696_s6 + $0x640] sm:$0xff]  ;;  %v1421_v49 = vld [vmem:[%s5696_s6 + $0x648] sm:$0xff] }
  0x77   : > { %1137 = vmatpush.msra.mxu1 %v1070_v11  ;;  %1184 = vmatpush.msra.mxu3 %v1069_v22  ;;  %v1260_v54 = vld [vmem:[%s5696_s6 + $0x140] sm:$0xff]  ;;  %v1261_v57 = vld [vmem:[%s5696_s6 + $0x148] sm:$0xff] }
  0x78   : > { %1163 = vmatpush.msra.mxu2 %v1033_v6  ;;  %1476 = vmatpush.msrb.mxu0 %v1340_v14  ;;  %v1412_v38 = vld [vmem:[%s5696_s6 + $0x600] sm:$0xff]  ;;  %v1413_v45 = vld [vmem:[%s5696_s6 + $0x608] sm:$0xff] }
  0x79   : > { %978 = vmatmul.f32.gmra.mxu1 %v3670_v52  ;;  %1024 = vmatmul.f32.gmra.mxu3 %v3670_v52  ;;  %v1252_v36 = vld [vmem:[%s5696_s6 + $0x100] sm:$0xff]  ;;  %v1253_v60 = vld [vmem:[%s5696_s6 + $0x108] sm:$0xff] }
  0x7a   : > { %1522 = vmatpush.msrb.mxu2 %v1341_v16  ;;  %1138 = vmatpush.msra.mxu1 %v1068_v19  ;;  %v1404_v10 = vld [vmem:[%s5696_s6 + $0x5c0] sm:$0xff]  ;;  %v1405_v59 = vld [vmem:[%s5696_s6 + $0x5c8] sm:$0xff] }
  0x7b   : > { %1477 = vmatpush.msrb.mxu0 %v1332_v48  ;;  %1185 = vmatpush.msra.mxu3 %v1067_v58  ;;  %v1244_v50 = vld [vmem:[%s5696_s6 + $0xc0] sm:$0xff]  ;;  %v1245_v56 = vld [vmem:[%s5696_s6 + $0xc8] sm:$0xff] }
  0x7c   : > { %1523 = vmatpush.msrb.mxu2 %v1333_v12  ;;  %1139 = vmatpush.msra.mxu1 %v1066_v24  ;;  %v1396_v62 = vld [vmem:[%s5696_s6 + $0x580] sm:$0xff]  ;;  %v1397_v1 = vld [vmem:[%s5696_s6 + $0x588] sm:$0xff] }
  0x7d   : > { %1478 = vmatpush.msrb.mxu0 %v1324_v51  ;;  %1186 = vmatpush.msra.mxu3 %v1065_v17  ;;  %v1236_v2 = vld [vmem:[%s5696_s6 + $0x80] sm:$0xff]  ;;  %v1237_v25 = vld [vmem:[%s5696_s6 + $0x88] sm:$0xff] }
  0x7e   : > { %1524 = vmatpush.msrb.mxu2 %v1325_v4  ;;  %1140 = vmatpush.msra.mxu1 %v1064_v61  ;;  %v1388_v3 = vld [vmem:[%s5696_s6 + $0x540] sm:$0xff]  ;;  %v1389_v53 = vld [vmem:[%s5696_s6 + $0x548] sm:$0xff] }
  0x7f   : > { %1479 = vmatpush.msrb.mxu0 %v1316_v27  ;;  %1545 = vmatpush.msrb.mxu3 %v1469_v31  ;;  %v1228_v15 = vld [vmem:[%s5696_s6 + $0x40] sm:$0xff]  ;;  %v1229_v6 = vld [vmem:[%s5696_s6 + $0x48] sm:$0xff] }
  0x80   : > { %1499 = vmatpush.msrb.mxu1 %v1468_v9  ;;  %1525 = vmatpush.msrb.mxu2 %v1317_v5  ;;  %v1380_v11 = vld [vmem:[%s5696_s6 + $0x500] sm:$0xff]  ;;  %v1381_v13 = vld [vmem:[%s5696_s6 + $0x508] sm:$0xff] }
  0x81   : > { %1480 = vmatpush.msrb.mxu0 %v1308_v30  ;;  %1546 = vmatpush.msrb.mxu3 %v1461_v34  ;;  %v1220_v14 = vld [vmem:[%s5696_s6] sm:$0xff]  ;;  %v1221_v19 = vld [vmem:[%s5696_s6 + $0x8] sm:$0xff] }
  0x82   : > { %1500 = vmatpush.msrb.mxu1 %v1460_v21  ;;  %1526 = vmatpush.msrb.mxu2 %v1309_v32  ;;  %v1372_v16 = vld [vmem:[%s5696_s6 + $0x4c0] sm:$0xff]  ;;  %v1373_v22 = vld [vmem:[%s5696_s6 + $0x4c8] sm:$0xff] }
  0x83   : > { %1481 = vmatpush.msrb.mxu0 %v1300_v8  ;;  %1547 = vmatpush.msrb.mxu3 %v1453_v20  ;;  %v1364_v48 = vld [vmem:[%s5696_s6 + $0x480] sm:$0xff]  ;;  %v1365_v12 = vld [vmem:[%s5696_s6 + $0x488] sm:$0xff] }
  0x84   : > { %1501 = vmatpush.msrb.mxu1 %v1452_v28  ;;  %1527 = vmatpush.msrb.mxu2 %v1301_v35  ;;  %v1356_v58 = vld [vmem:[%s5696_s6 + $0x440] sm:$0xff]  ;;  %v1357_v51 = vld [vmem:[%s5696_s6 + $0x448] sm:$0xff] }
  0x85   : > { %1482 = vmatpush.msrb.mxu0 %v1292_v63  ;;  %1548 = vmatpush.msrb.mxu3 %v1445_v39  ;;  %v1348_v4 = vld [vmem:[%s5696_s6 + $0x400] sm:$0xff]  ;;  %v1349_v61 = vld [vmem:[%s5696_s6 + $0x408] sm:$0xff] }
  0x86   : > { %1502 = vmatpush.msrb.mxu1 %v1444_v47  ;;  %1528 = vmatpush.msrb.mxu2 %v1293_v37  ;;  %v690_v21 = vld [vmem:[%s5693_s3] sm:$0x3] }
  0x87   : > { %1483 = vmatpush.msrb.mxu0 %v1284_v26  ;;  %1549 = vmatpush.msrb.mxu3 %v1437_v7  ;;  %v848_v28 = vperm.slane %v690_v21, 0  ;;  %v849_v39 = vperm.slane %v690_v21, 1  ;;  %v1271_v21 = vld [vmem:[%s5696_s6 + $0x198] sm:$0xff] }
  0x88   : > { %1503 = vmatpush.msrb.mxu1 %v1436_v0  ;;  %1529 = vmatpush.msrb.mxu2 %v1285_v42  ;;  %v1342_v0 = vld [vmem:[%s5696_s6 + $0x3d0] sm:$0xff]  ;;  %v1343_v42 = vld [vmem:[%s5696_s6 + $0x3d8] sm:$0xff] }
  0x89   : > { %1484 = vmatpush.msrb.mxu0 %v1276_v33  ;;  %1550 = vmatpush.msrb.mxu3 %v1429_v43  ;;  %v1334_v33 = vld [vmem:[%s5696_s6 + $0x390] sm:$0xff] }
  0x8a   : > { %1504 = vmatpush.msrb.mxu1 %v1428_v40  ;;  %1530 = vmatpush.msrb.mxu2 %v1277_v41  ;;  %v1335_v40 = vld [vmem:[%s5696_s6 + $0x398] sm:$0xff] }
  0x8b   : > { %1485 = vmatpush.msrb.mxu0 %v1268_v29  ;;  %1551 = vmatpush.msrb.mxu3 %v1421_v49  ;;  %v1327_v49 = vld [vmem:[%s5696_s6 + $0x358] sm:$0xff] }
  0x8c   : > { %1505 = vmatpush.msrb.mxu1 %v1420_v44  ;;  %1531 = vmatpush.msrb.mxu2 %v1269_v46  ;;  %v1326_v46 = vld [vmem:[%s5696_s6 + $0x350] sm:$0xff] }
  0x8d   : > { %1486 = vmatpush.msrb.mxu0 %v1260_v54  ;;  %1552 = vmatpush.msrb.mxu3 %v1413_v45 }
  0x8e   : > { %1506 = vmatpush.msrb.mxu1 %v1412_v38  ;;  %1532 = vmatpush.msrb.mxu2 %v1261_v57 }
  0x8f   : > { %1487 = vmatpush.msrb.mxu0 %v1252_v36  ;;  %1553 = vmatpush.msrb.mxu3 %v1405_v59  ;;  %v1318_v36 = vld [vmem:[%s5696_s6 + $0x310] sm:$0xff]  ;;  %v1471_v59 = vld [vmem:[%s5696_s6 + $0x7d8] sm:$0xff] }
  0x90   : > { %1507 = vmatpush.msrb.mxu1 %v1404_v10  ;;  %1533 = vmatpush.msrb.mxu2 %v1253_v60  ;;  %v1470_v10 = vld [vmem:[%s5696_s6 + $0x7d0] sm:$0xff]  ;;  %v1319_v60 = vld [vmem:[%s5696_s6 + $0x318] sm:$0xff] }
  0x91   : > { %1488 = vmatpush.msrb.mxu0 %v1244_v50  ;;  %1554 = vmatpush.msrb.mxu3 %v1397_v1  ;;  %v1462_v1 = vld [vmem:[%s5696_s6 + $0x790] sm:$0xff] }
  0x92   : > { %1508 = vmatpush.msrb.mxu1 %v1396_v62  ;;  %1534 = vmatpush.msrb.mxu2 %v1245_v56  ;;  %v1310_v56 = vld [vmem:[%s5696_s6 + $0x2d0] sm:$0xff] }
  0x93   : > { %1489 = vmatpush.msrb.mxu0 %v1236_v2  ;;  %1555 = vmatpush.msrb.mxu3 %v1389_v53 }
  0x94   : > { %1509 = vmatpush.msrb.mxu1 %v1388_v3  ;;  %1535 = vmatpush.msrb.mxu2 %v1237_v25  ;;  %v1311_v3 = vld [vmem:[%s5696_s6 + $0x2d8] sm:$0xff] }
  0x95   : > { %1490 = vmatpush.msrb.mxu0 %v1228_v15  ;;  %1556 = vmatpush.msrb.mxu3 %v1381_v13  ;;  %v1463_v25 = vld [vmem:[%s5696_s6 + $0x798] sm:$0xff]  ;;  %v1302_v15 = vld [vmem:[%s5696_s6 + $0x290] sm:$0xff] }
  0x96   : > { %1510 = vmatpush.msrb.mxu1 %v1380_v11  ;;  %1536 = vmatpush.msrb.mxu2 %v1229_v6  ;;  %v1454_v11 = vld [vmem:[%s5696_s6 + $0x750] sm:$0xff] }
  0x97   : > { %1491 = vmatpush.msrb.mxu0 %v1220_v14  ;;  %1557 = vmatpush.msrb.mxu3 %v1373_v22  ;;  %v1303_v14 = vld [vmem:[%s5696_s6 + $0x298] sm:$0xff]  ;;  %v1446_v22 = vld [vmem:[%s5696_s6 + $0x710] sm:$0xff] }
  0x98   : > { %1511 = vmatpush.msrb.mxu1 %v1372_v16  ;;  %1537 = vmatpush.msrb.mxu2 %v1221_v19  ;;  %v1455_v16 = vld [vmem:[%s5696_s6 + $0x758] sm:$0xff]  ;;  %v1294_v19 = vld [vmem:[%s5696_s6 + $0x250] sm:$0xff] }
  0x99   : > { %1558 = vmatpush.msrb.mxu3 %v1365_v12  ;;  %v1295_v12 = vld [vmem:[%s5696_s6 + $0x258] sm:$0xff] }
  0x9a   : > { %1512 = vmatpush.msrb.mxu1 %v1364_v48 }
  0x9b   : > { %1559 = vmatpush.msrb.mxu3 %v1357_v51  ;;  %v1438_v51 = vld [vmem:[%s5696_s6 + $0x6d0] sm:$0xff] }
  0x9c   : > { %1513 = vmatpush.msrb.mxu1 %v1356_v58  ;;  %v1286_v58 = vld [vmem:[%s5696_s6 + $0x210] sm:$0xff] }
  0x9d   : > { %1560 = vmatpush.msrb.mxu3 %v1349_v61  ;;  %v1439_v61 = vld [vmem:[%s5696_s6 + $0x6d8] sm:$0xff] }
  0x9e   : > { %1514 = vmatpush.msrb.mxu1 %v1348_v4  ;;  %v1287_v4 = vld [vmem:[%s5696_s6 + $0x218] sm:$0xff] }
  0xcf   : > { %v772_v24 = vpop.f32.mrf.mxu0 }
  0xd1   : > { %v795_v17 = vpop.f32.mrf.mxu1 }
  0xd2   : > { %v796_v8 = vadd.f32 %v795_v17, %v772_v24  ;;  %v1447_v24 = vld [vmem:[%s5696_s6 + $0x718] sm:$0xff]  ;;  %v1278_v17 = vld [vmem:[%s5696_s6 + $0x1d0] sm:$0xff] }
  0xd4   : > { %v852_v20 = vadd.f32 %v848_v28, %v796_v8  ;;  %v1414_v8 = vld [vmem:[%s5696_s6 + $0x610] sm:$0xff] }
  0xd5   : > { %v818_v27 = vpop.f32.mrf.mxu2 }
  0xd7   : > { %v841_v9 = vpop.f32.mrf.mxu3  ;;  %v775_v5 = vpop.f32.mrf.mxu0 }
  0xd8   : > { %v842_v37 = vadd.f32 %v841_v9, %v818_v27  ;;  %v1430_v27 = vld [vmem:[%s5696_s6 + $0x690] sm:$0xff]  ;;  %v1279_v9 = vld [vmem:[%s5696_s6 + $0x1d8] sm:$0xff] }
  0xd9   : > { %v798_v31 = vpop.f32.mrf.mxu1 }
  0xda   : > { %v799_v7 = vadd.f32 %v798_v31, %v775_v5  ;;  %v853_v29 = vadd.f32 %v849_v39, %v842_v37  ;;  %v1431_v5 = vld [vmem:[%s5696_s6 + $0x698] sm:$0xff]  ;;  %v1270_v31 = vld [vmem:[%s5696_s6 + $0x190] sm:$0xff] }
  0xdb   : > { %v1407_v37 = vld [vmem:[%s5696_s6 + $0x5d8] sm:$0xff] }
  0xdc   : > { %v854_v38 = vadd.f32 %v848_v28, %v799_v7  ;;  %v1263_v28 = vld [vmem:[%s5696_s6 + $0x158] sm:$0xff] }
  0xdd   : > { %v821_v30 = vpop.f32.mrf.mxu2  ;;  %v1399_v7 = vld [vmem:[%s5696_s6 + $0x598] sm:$0xff] }
  0xdf   : > { %v844_v32 = vpop.f32.mrf.mxu3 }
  0xe0   : > { %v845_v50 = vadd.f32 %v844_v32, %v821_v30  ;;  %v1422_v30 = vld [vmem:[%s5696_s6 + $0x650] sm:$0xff]  ;;  %v1423_v32 = vld [vmem:[%s5696_s6 + $0x658] sm:$0xff] }
  0xe1   : > { %v953_v34 = vpop.f32.mrf.mxu0 }
  0xe2   : > { %v855_v6 = vadd.f32 %v849_v39, %v845_v50  ;;  %v1246_v39 = vld [vmem:[%s5696_s6 + $0xd0] sm:$0xff]  ;;  %v1367_v50 = vld [vmem:[%s5696_s6 + $0x498] sm:$0xff] }
  0xe7   : > { %v999_v47 = vpop.f32.mrf.mxu2 }
  0xe9   : > { %v956_v43 = vpop.f32.mrf.mxu0 }
  0xee   : > { %v976_v35 = vpop.f32.mrf.mxu1 }
  0xef   : > { %v977_v63 = vadd.f32 %v976_v35, %v953_v34  ;;  %v1002_v2 = vpop.f32.mrf.mxu2  ;;  %v1262_v34 = vld [vmem:[%s5696_s6 + $0x150] sm:$0xff]  ;;  %v1415_v35 = vld [vmem:[%s5696_s6 + $0x618] sm:$0xff] }
  0xf1   : > { %v3953_v26 = vadd.f32 %v977_v63, %v852_v20  ;;  %v1254_v20 = vld [vmem:[%s5696_s6 + $0x110] sm:$0xff] }
  0xf2   : > { %v1406_v63 = vld [vmem:[%s5696_s6 + $0x5d0] sm:$0xff] }
  0xf3   : > { %1118 = vmatmul.f32.vlgmr.msra.gmra.mxu0 %v3953_v26  ;;  %1164 = vmatmul.f32.vlgmr.msra.gmra.mxu2 %v3953_v26 }
  0xf4   : > { %1568 = vmatpush.msra.mxu0 %v1342_v0  ;;  %1614 = vmatpush.msra.mxu2 %v1343_v42  ;;  %v1022_v41 = vpop.f32.mrf.mxu3  ;;  %v1398_v0 = vld [vmem:[%s5696_s6 + $0x590] sm:$0xff]  ;;  %v1247_v42 = vld [vmem:[%s5696_s6 + $0xd8] sm:$0xff] }
  0xf5   : > { %v1023_v44 = vadd.f32 %v1022_v41, %v999_v47  ;;  %v1255_v47 = vld [vmem:[%s5696_s6 + $0x118] sm:$0xff] }
  0xf6   : > { %1569 = vmatpush.msra.mxu0 %v1334_v33  ;;  %1615 = vmatpush.msra.mxu2 %v1335_v40  ;;  %v979_v54 = vpop.f32.mrf.mxu1  ;;  %v1238_v33 = vld [vmem:[%s5696_s6 + $0x90] sm:$0xff]  ;;  %v1239_v41 = vld [vmem:[%s5696_s6 + $0x98] sm:$0xff] }
  0xf7   : > { %v3975_v57 = vadd.f32 %v1023_v44, %v853_v29  ;;  %v980_v45 = vadd.f32 %v979_v54, %v956_v43  ;;  %v1390_v40 = vld [vmem:[%s5696_s6 + $0x550] sm:$0xff]  ;;  %v1391_v43 = vld [vmem:[%s5696_s6 + $0x558] sm:$0xff] }
  0xf8   : > { %1570 = vmatpush.msra.mxu0 %v1326_v46  ;;  %1616 = vmatpush.msra.mxu2 %v1327_v49  ;;  %v1230_v29 = vld [vmem:[%s5696_s6 + $0x50] sm:$0xff]  ;;  %v1231_v46 = vld [vmem:[%s5696_s6 + $0x58] sm:$0xff] }
  0xf9   : > { %v3989_v62 = vadd.f32 %v980_v45, %v854_v38  ;;  %1141 = vmatmul.f32.vlgmr.msra.gmra.mxu1 %v3975_v57  ;;  %1187 = vmatmul.f32.vlgmr.msra.gmra.mxu3 %v3975_v57  ;;  %v1382_v44 = vld [vmem:[%s5696_s6 + $0x510] sm:$0xff]  ;;  %v1383_v49 = vld [vmem:[%s5696_s6 + $0x518] sm:$0xff] }
  0xfa   : > { %1571 = vmatpush.msra.mxu0 %v1318_v36  ;;  %1591 = vmatpush.msra.mxu1 %v1470_v10  ;;  %v1222_v54 = vld [vmem:[%s5696_s6 + $0x10] sm:$0xff]  ;;  %v1223_v45 = vld [vmem:[%s5696_s6 + $0x18] sm:$0xff]  ;;  %v1344_v10 = vld [vmem:[%s5696_s6 + $0x3e0] sm:$0xff] }
  0xfb   : > { %1617 = vmatpush.msra.mxu2 %v1319_v60  ;;  %1637 = vmatpush.msra.mxu3 %v1471_v59  ;;  %v1374_v38 = vld [vmem:[%s5696_s6 + $0x4d0] sm:$0xff]  ;;  %v1375_v36 = vld [vmem:[%s5696_s6 + $0x4d8] sm:$0xff]  ;;  %v1345_v60 = vld [vmem:[%s5696_s6 + $0x3e8] sm:$0xff] }
  0xfc   : > { %1121 = vmatmul.f32.gmra.mxu0 %v3989_v62  ;;  %1167 = vmatmul.f32.gmra.mxu2 %v3989_v62  ;;  %v1025_v53 = vpop.f32.mrf.mxu3  ;;  %v1366_v59 = vld [vmem:[%s5696_s6 + $0x490] sm:$0xff] }
  0xfd   : > { %1572 = vmatpush.msra.mxu0 %v1310_v56  ;;  %1592 = vmatpush.msra.mxu1 %v1462_v1  ;;  %v1026_v13 = vadd.f32 %v1025_v53, %v1002_v2  ;;  %v1336_v56 = vld [vmem:[%s5696_s6 + $0x3a0] sm:$0xff]  ;;  %v1337_v1 = vld [vmem:[%s5696_s6 + $0x3a8] sm:$0xff]  ;;  %v1358_v2 = vld [vmem:[%s5696_s6 + $0x450] sm:$0xff] }
  0xfe   : > { %1618 = vmatpush.msra.mxu2 %v1311_v3  ;;  %1638 = vmatpush.msra.mxu3 %v1463_v25  ;;  %v1359_v3 = vld [vmem:[%s5696_s6 + $0x458] sm:$0xff]  ;;  %v1328_v25 = vld [vmem:[%s5696_s6 + $0x360] sm:$0xff]  ;;  %v1329_v53 = vld [vmem:[%s5696_s6 + $0x368] sm:$0xff] }
  0xff   : > { %v4025_v48 = vadd.f32 %v1026_v13, %v855_v6  ;;  %1573 = vmatpush.msra.mxu0 %v1302_v15  ;;  %1593 = vmatpush.msra.mxu1 %v1454_v11  ;;  %v1350_v15 = vld [vmem:[%s5696_s6 + $0x410] sm:$0xff]  ;;  %v1351_v11 = vld [vmem:[%s5696_s6 + $0x418] sm:$0xff]  ;;  %v1320_v6 = vld [vmem:[%s5696_s6 + $0x320] sm:$0xff] }
 0x100   : > { %1619 = vmatpush.msra.mxu2 %v1303_v14  ;;  %1639 = vmatpush.msra.mxu3 %v1455_v16  ;;  %v1472_v13 = vld [vmem:[%s5696_s6 + $0x7e0] sm:$0xff]  ;;  %v1321_v14 = vld [vmem:[%s5696_s6 + $0x328] sm:$0xff] }
 0x101   : > { %1574 = vmatpush.msra.mxu0 %v1294_v19  ;;  %1594 = vmatpush.msra.mxu1 %v1446_v22  ;;  %v1473_v16 = vld [vmem:[%s5696_s6 + $0x7e8] sm:$0xff]  ;;  %v1312_v19 = vld [vmem:[%s5696_s6 + $0x2e0] sm:$0xff] }
 0x102   : > { %1620 = vmatpush.msra.mxu2 %v1295_v12  ;;  %1640 = vmatpush.msra.mxu3 %v1447_v24  ;;  %v1464_v22 = vld [vmem:[%s5696_s6 + $0x7a0] sm:$0xff]  ;;  %v1313_v12 = vld [vmem:[%s5696_s6 + $0x2e8] sm:$0xff] }
 0x103   : > { %1144 = vmatmul.f32.gmra.mxu1 %v4025_v48  ;;  %1190 = vmatmul.f32.gmra.mxu3 %v4025_v48  ;;  %v1465_v24 = vld [vmem:[%s5696_s6 + $0x7a8] sm:$0xff] }
 0x104   : > { %1575 = vmatpush.msra.mxu0 %v1286_v58  ;;  %1595 = vmatpush.msra.mxu1 %v1438_v51  ;;  %v1304_v58 = vld [vmem:[%s5696_s6 + $0x2a0] sm:$0xff] }
 0x105   : > { %1621 = vmatpush.msra.mxu2 %v1287_v4  ;;  %1641 = vmatpush.msra.mxu3 %v1439_v61  ;;  %v1456_v51 = vld [vmem:[%s5696_s6 + $0x760] sm:$0xff]  ;;  %v1305_v4 = vld [vmem:[%s5696_s6 + $0x2a8] sm:$0xff] }
 0x106   : > { %1492 = vmatmul.f32.vlgmr.msrb.gmra.mxu0 %v3953_v26  ;;  %1538 = vmatmul.f32.vlgmr.msrb.gmra.mxu2 %v3953_v26  ;;  %v1457_v61 = vld [vmem:[%s5696_s6 + $0x768] sm:$0xff] }
 0x107   : > { %1576 = vmatpush.msra.mxu0 %v1278_v17  ;;  %1596 = vmatpush.msra.mxu1 %v1430_v27  ;;  %v1296_v17 = vld [vmem:[%s5696_s6 + $0x260] sm:$0xff] }
 0x108   : > { %1622 = vmatpush.msra.mxu2 %v1279_v9  ;;  %1642 = vmatpush.msra.mxu3 %v1431_v5  ;;  %v1448_v27 = vld [vmem:[%s5696_s6 + $0x720] sm:$0xff]  ;;  %v1297_v9 = vld [vmem:[%s5696_s6 + $0x268] sm:$0xff] }
 0x109   : > { %1577 = vmatpush.msra.mxu0 %v1270_v31  ;;  %1597 = vmatpush.msra.mxu1 %v1422_v30  ;;  %v1449_v5 = vld [vmem:[%s5696_s6 + $0x728] sm:$0xff]  ;;  %v1288_v31 = vld [vmem:[%s5696_s6 + $0x220] sm:$0xff] }
 0x10a   : > { %1623 = vmatpush.msra.mxu2 %v1271_v21  ;;  %1643 = vmatpush.msra.mxu3 %v1423_v32  ;;  %v1440_v30 = vld [vmem:[%s5696_s6 + $0x6e0] sm:$0xff]  ;;  %v1289_v21 = vld [vmem:[%s5696_s6 + $0x228] sm:$0xff] }
 0x10b   : > { %1578 = vmatpush.msra.mxu0 %v1262_v34  ;;  %1598 = vmatpush.msra.mxu1 %v1414_v8  ;;  %v1441_v32 = vld [vmem:[%s5696_s6 + $0x6e8] sm:$0xff]  ;;  %v1280_v34 = vld [vmem:[%s5696_s6 + $0x1e0] sm:$0xff] }
 0x10c   : > { %1624 = vmatpush.msra.mxu2 %v1263_v28  ;;  %1644 = vmatpush.msra.mxu3 %v1415_v35  ;;  %v1432_v8 = vld [vmem:[%s5696_s6 + $0x6a0] sm:$0xff]  ;;  %v1281_v28 = vld [vmem:[%s5696_s6 + $0x1e8] sm:$0xff] }
 0x10d   : > { %1515 = vmatmul.f32.vlgmr.msrb.gmra.mxu1 %v3975_v57  ;;  %1561 = vmatmul.f32.vlgmr.msrb.gmra.mxu3 %v3975_v57  ;;  %v1433_v35 = vld [vmem:[%s5696_s6 + $0x6a8] sm:$0xff] }
 0x10e   : > { %1579 = vmatpush.msra.mxu0 %v1254_v20  ;;  %1599 = vmatpush.msra.mxu1 %v1406_v63  ;;  %v1272_v20 = vld [vmem:[%s5696_s6 + $0x1a0] sm:$0xff] }
 0x10f   : > { %1625 = vmatpush.msra.mxu2 %v1255_v47  ;;  %1645 = vmatpush.msra.mxu3 %v1407_v37  ;;  %v1424_v63 = vld [vmem:[%s5696_s6 + $0x660] sm:$0xff]  ;;  %v1273_v47 = vld [vmem:[%s5696_s6 + $0x1a8] sm:$0xff] }
 0x110   : > { %1495 = vmatmul.f32.gmra.mxu0 %v3989_v62  ;;  %1541 = vmatmul.f32.gmra.mxu2 %v3989_v62  ;;  %v1425_v37 = vld [vmem:[%s5696_s6 + $0x668] sm:$0xff] }
 0x111   : > { %1580 = vmatpush.msra.mxu0 %v1246_v39  ;;  %1600 = vmatpush.msra.mxu1 %v1398_v0  ;;  %v1264_v39 = vld [vmem:[%s5696_s6 + $0x160] sm:$0xff] }
 0x112   : > { %1626 = vmatpush.msra.mxu2 %v1247_v42  ;;  %1646 = vmatpush.msra.mxu3 %v1399_v7  ;;  %v1416_v0 = vld [vmem:[%s5696_s6 + $0x620] sm:$0xff]  ;;  %v1265_v42 = vld [vmem:[%s5696_s6 + $0x168] sm:$0xff] }
 0x113   : > { %1581 = vmatpush.msra.mxu0 %v1238_v33  ;;  %1601 = vmatpush.msra.mxu1 %v1390_v40  ;;  %v1417_v7 = vld [vmem:[%s5696_s6 + $0x628] sm:$0xff]  ;;  %v1256_v33 = vld [vmem:[%s5696_s6 + $0x120] sm:$0xff] }
 0x114   : > { %1627 = vmatpush.msra.mxu2 %v1239_v41  ;;  %1647 = vmatpush.msra.mxu3 %v1391_v43  ;;  %v1408_v40 = vld [vmem:[%s5696_s6 + $0x5e0] sm:$0xff]  ;;  %v1257_v41 = vld [vmem:[%s5696_s6 + $0x128] sm:$0xff] }
 0x115   : > { %1582 = vmatpush.msra.mxu0 %v1230_v29  ;;  %1602 = vmatpush.msra.mxu1 %v1382_v44  ;;  %v1409_v43 = vld [vmem:[%s5696_s6 + $0x5e8] sm:$0xff]  ;;  %v1248_v29 = vld [vmem:[%s5696_s6 + $0xe0] sm:$0xff] }
 0x116   : > { %1628 = vmatpush.msra.mxu2 %v1231_v46  ;;  %1648 = vmatpush.msra.mxu3 %v1383_v49  ;;  %v1400_v44 = vld [vmem:[%s5696_s6 + $0x5a0] sm:$0xff]  ;;  %v1249_v46 = vld [vmem:[%s5696_s6 + $0xe8] sm:$0xff] }
 0x117   : > { %1518 = vmatmul.f32.gmra.mxu1 %v4025_v48  ;;  %1564 = vmatmul.f32.gmra.mxu3 %v4025_v48  ;;  %v1401_v49 = vld [vmem:[%s5696_s6 + $0x5a8] sm:$0xff] }
 0x118   : > { %1583 = vmatpush.msra.mxu0 %v1222_v54  ;;  %1603 = vmatpush.msra.mxu1 %v1374_v38  ;;  %v1240_v54 = vld [vmem:[%s5696_s6 + $0xa0] sm:$0xff] }
 0x119   : > { %1629 = vmatpush.msra.mxu2 %v1223_v45  ;;  %1649 = vmatpush.msra.mxu3 %v1375_v36  ;;  %v1392_v38 = vld [vmem:[%s5696_s6 + $0x560] sm:$0xff]  ;;  %v1241_v45 = vld [vmem:[%s5696_s6 + $0xa8] sm:$0xff] }
 0x11a   : > { %1660 = vmatpush.msrb.mxu0 %v1344_v10  ;;  %1604 = vmatpush.msra.mxu1 %v1366_v59  ;;  %v1393_v36 = vld [vmem:[%s5696_s6 + $0x568] sm:$0xff]  ;;  %v1232_v10 = vld [vmem:[%s5696_s6 + $0x60] sm:$0xff] }
 0x11b   : > { %1706 = vmatpush.msrb.mxu2 %v1345_v60  ;;  %1584 = vmatmul.f32.vlgmr.msra.gmra.mxu0 %v3953_v26  ;;  %v1384_v60 = vld [vmem:[%s5696_s6 + $0x520] sm:$0xff]  ;;  %v1233_v59 = vld [vmem:[%s5696_s6 + $0x68] sm:$0xff] }
 0x11c   : > { %1630 = vmatmul.f32.vlgmr.msra.gmra.mxu2 %v3953_v26  ;;  %1650 = vmatpush.msra.mxu3 %v1367_v50  ;;  %v1385_v50 = vld [vmem:[%s5696_s6 + $0x528] sm:$0xff] }
 0x11d   : > { %1661 = vmatpush.msrb.mxu0 %v1336_v56  ;;  %1707 = vmatpush.msrb.mxu2 %v1337_v1  ;;  %v1224_v56 = vld [vmem:[%s5696_s6 + $0x20] sm:$0xff] }
 0x11e   : > { %1605 = vmatpush.msra.mxu1 %v1358_v2  ;;  %1651 = vmatpush.msra.mxu3 %v1359_v3  ;;  %v1376_v1 = vld [vmem:[%s5696_s6 + $0x4e0] sm:$0xff]  ;;  %v1225_v2 = vld [vmem:[%s5696_s6 + $0x28] sm:$0xff] }
 0x11f   : > { %1662 = vmatpush.msrb.mxu0 %v1328_v25  ;;  %1708 = vmatpush.msrb.mxu2 %v1329_v53  ;;  %v1377_v3 = vld [vmem:[%s5696_s6 + $0x4e8] sm:$0xff]  ;;  %v1346_v25 = vld [vmem:[%s5696_s6 + $0x3f0] sm:$0xff]  ;;  %v1347_v53 = vld [vmem:[%s5696_s6 + $0x3f8] sm:$0xff] }
 0x120   : > { %1606 = vmatpush.msra.mxu1 %v1350_v15  ;;  %1652 = vmatpush.msra.mxu3 %v1351_v11  ;;  %v1368_v15 = vld [vmem:[%s5696_s6 + $0x4a0] sm:$0xff]  ;;  %v1369_v11 = vld [vmem:[%s5696_s6 + $0x4a8] sm:$0xff] }
 0x121   : > { %1663 = vmatpush.msrb.mxu0 %v1320_v6  ;;  %1709 = vmatpush.msrb.mxu2 %v1321_v14  ;;  %v1338_v6 = vld [vmem:[%s5696_s6 + $0x3b0] sm:$0xff]  ;;  %v1360_v14 = vld [vmem:[%s5696_s6 + $0x460] sm:$0xff] }
 0x122   : > { %1683 = vmatpush.msrb.mxu1 %v1472_v13  ;;  %1729 = vmatpush.msrb.mxu3 %v1473_v16  ;;  %v1339_v13 = vld [vmem:[%s5696_s6 + $0x3b8] sm:$0xff]  ;;  %v1361_v16 = vld [vmem:[%s5696_s6 + $0x468] sm:$0xff] }
 0x123   : > { %1607 = vmatmul.f32.vlgmr.msra.gmra.mxu1 %v3975_v57  ;;  %1653 = vmatmul.f32.vlgmr.msra.gmra.mxu3 %v3975_v57 }
 0x124   : > { %1664 = vmatpush.msrb.mxu0 %v1312_v19  ;;  %1684 = vmatpush.msrb.mxu1 %v1464_v22  ;;  %v1330_v19 = vld [vmem:[%s5696_s6 + $0x370] sm:$0xff]  ;;  %v1331_v22 = vld [vmem:[%s5696_s6 + $0x378] sm:$0xff] }
 0x125   : > { %1710 = vmatpush.msrb.mxu2 %v1313_v12  ;;  %1730 = vmatpush.msrb.mxu3 %v1465_v24  ;;  %v1352_v12 = vld [vmem:[%s5696_s6 + $0x420] sm:$0xff]  ;;  %v1353_v24 = vld [vmem:[%s5696_s6 + $0x428] sm:$0xff] }
 0x126   : > { %1587 = vmatmul.f32.gmra.mxu0 %v3989_v62  ;;  %1633 = vmatmul.f32.gmra.mxu2 %v3989_v62 }
 0x127   : > { %1665 = vmatpush.msrb.mxu0 %v1304_v58  ;;  %1685 = vmatpush.msrb.mxu1 %v1456_v51  ;;  %v1322_v58 = vld [vmem:[%s5696_s6 + $0x330] sm:$0xff] }
 0x128   : > { %1711 = vmatpush.msrb.mxu2 %v1305_v4  ;;  %1731 = vmatpush.msrb.mxu3 %v1457_v61  ;;  %v1474_v51 = vld [vmem:[%s5696_s6 + $0x7f0] sm:$0xff]  ;;  %v1323_v4 = vld [vmem:[%s5696_s6 + $0x338] sm:$0xff] }
 0x129   : > { %1666 = vmatpush.msrb.mxu0 %v1296_v17  ;;  %1686 = vmatpush.msrb.mxu1 %v1448_v27  ;;  %v1475_v61 = vld [vmem:[%s5696_s6 + $0x7f8] sm:$0xff]  ;;  %v1314_v17 = vld [vmem:[%s5696_s6 + $0x2f0] sm:$0xff] }
 0x12a   : > { %1712 = vmatpush.msrb.mxu2 %v1297_v9  ;;  %1732 = vmatpush.msrb.mxu3 %v1449_v5  ;;  %v1466_v27 = vld [vmem:[%s5696_s6 + $0x7b0] sm:$0xff]  ;;  %v1315_v9 = vld [vmem:[%s5696_s6 + $0x2f8] sm:$0xff] }
 0x12b   : > { %1667 = vmatpush.msrb.mxu0 %v1288_v31  ;;  %1687 = vmatpush.msrb.mxu1 %v1440_v30  ;;  %v1467_v5 = vld [vmem:[%s5696_s6 + $0x7b8] sm:$0xff]  ;;  %v1306_v31 = vld [vmem:[%s5696_s6 + $0x2b0] sm:$0xff] }
 0x12c   : > { %1713 = vmatpush.msrb.mxu2 %v1289_v21  ;;  %1733 = vmatpush.msrb.mxu3 %v1441_v32  ;;  %v1458_v30 = vld [vmem:[%s5696_s6 + $0x770] sm:$0xff]  ;;  %v1307_v21 = vld [vmem:[%s5696_s6 + $0x2b8] sm:$0xff] }
 0x12d   : > { %1610 = vmatmul.f32.gmra.mxu1 %v4025_v48  ;;  %1656 = vmatmul.f32.gmra.mxu3 %v4025_v48  ;;  %v1459_v32 = vld [vmem:[%s5696_s6 + $0x778] sm:$0xff] }
 0x12e   : > { %1668 = vmatpush.msrb.mxu0 %v1280_v34  ;;  %1688 = vmatpush.msrb.mxu1 %v1432_v8  ;;  %v1298_v34 = vld [vmem:[%s5696_s6 + $0x270] sm:$0xff] }
 0x12f   : > { %1714 = vmatpush.msrb.mxu2 %v1281_v28  ;;  %1734 = vmatpush.msrb.mxu3 %v1433_v35  ;;  %v1450_v8 = vld [vmem:[%s5696_s6 + $0x730] sm:$0xff]  ;;  %v1299_v28 = vld [vmem:[%s5696_s6 + $0x278] sm:$0xff] }
 0x130   : > { %1669 = vmatpush.msrb.mxu0 %v1272_v20  ;;  %1689 = vmatpush.msrb.mxu1 %v1424_v63  ;;  %v1451_v35 = vld [vmem:[%s5696_s6 + $0x738] sm:$0xff]  ;;  %v1290_v20 = vld [vmem:[%s5696_s6 + $0x230] sm:$0xff] }
 0x131   : > { %1715 = vmatpush.msrb.mxu2 %v1273_v47  ;;  %1735 = vmatpush.msrb.mxu3 %v1425_v37  ;;  %v1442_v63 = vld [vmem:[%s5696_s6 + $0x6f0] sm:$0xff]  ;;  %v1291_v47 = vld [vmem:[%s5696_s6 + $0x238] sm:$0xff] }
 0x132   : > { %1670 = vmatpush.msrb.mxu0 %v1264_v39  ;;  %1690 = vmatpush.msrb.mxu1 %v1416_v0  ;;  %v1443_v37 = vld [vmem:[%s5696_s6 + $0x6f8] sm:$0xff]  ;;  %v1282_v39 = vld [vmem:[%s5696_s6 + $0x1f0] sm:$0xff] }
 0x133   : > { %1716 = vmatpush.msrb.mxu2 %v1265_v42  ;;  %1736 = vmatpush.msrb.mxu3 %v1417_v7  ;;  %v1434_v0 = vld [vmem:[%s5696_s6 + $0x6b0] sm:$0xff]  ;;  %v1283_v42 = vld [vmem:[%s5696_s6 + $0x1f8] sm:$0xff] }
 0x134   : > { %1671 = vmatpush.msrb.mxu0 %v1256_v33  ;;  %1691 = vmatpush.msrb.mxu1 %v1408_v40  ;;  %v1435_v7 = vld [vmem:[%s5696_s6 + $0x6b8] sm:$0xff]  ;;  %v1274_v33 = vld [vmem:[%s5696_s6 + $0x1b0] sm:$0xff] }
 0x135   : > { %1717 = vmatpush.msrb.mxu2 %v1257_v41  ;;  %1737 = vmatpush.msrb.mxu3 %v1409_v43  ;;  %v1426_v40 = vld [vmem:[%s5696_s6 + $0x670] sm:$0xff]  ;;  %v1275_v41 = vld [vmem:[%s5696_s6 + $0x1b8] sm:$0xff] }
 0x136   : > { %1672 = vmatpush.msrb.mxu0 %v1248_v29  ;;  %1692 = vmatpush.msrb.mxu1 %v1400_v44  ;;  %v1427_v43 = vld [vmem:[%s5696_s6 + $0x678] sm:$0xff]  ;;  %v1266_v29 = vld [vmem:[%s5696_s6 + $0x170] sm:$0xff] }
 0x137   : > { %1718 = vmatpush.msrb.mxu2 %v1249_v46  ;;  %1738 = vmatpush.msrb.mxu3 %v1401_v49  ;;  %v1418_v44 = vld [vmem:[%s5696_s6 + $0x630] sm:$0xff]  ;;  %v1267_v46 = vld [vmem:[%s5696_s6 + $0x178] sm:$0xff] }
 0x138   : > { %1673 = vmatpush.msrb.mxu0 %v1240_v54  ;;  %1693 = vmatpush.msrb.mxu1 %v1392_v38  ;;  %v1419_v49 = vld [vmem:[%s5696_s6 + $0x638] sm:$0xff]  ;;  %v1258_v54 = vld [vmem:[%s5696_s6 + $0x130] sm:$0xff] }
 0x139   : > { %1719 = vmatpush.msrb.mxu2 %v1241_v45  ;;  %1739 = vmatpush.msrb.mxu3 %v1393_v36  ;;  %v1410_v38 = vld [vmem:[%s5696_s6 + $0x5f0] sm:$0xff]  ;;  %v1259_v45 = vld [vmem:[%s5696_s6 + $0x138] sm:$0xff] }
 0x13a   : > { %1674 = vmatpush.msrb.mxu0 %v1232_v10  ;;  %1694 = vmatpush.msrb.mxu1 %v1384_v60  ;;  %v1411_v36 = vld [vmem:[%s5696_s6 + $0x5f8] sm:$0xff]  ;;  %v1250_v10 = vld [vmem:[%s5696_s6 + $0xf0] sm:$0xff] }
 0x13b   : > { %1720 = vmatpush.msrb.mxu2 %v1233_v59  ;;  %1740 = vmatpush.msrb.mxu3 %v1385_v50  ;;  %v1402_v60 = vld [vmem:[%s5696_s6 + $0x5b0] sm:$0xff]  ;;  %v1251_v59 = vld [vmem:[%s5696_s6 + $0xf8] sm:$0xff] }
 0x13c   : > { %1675 = vmatpush.msrb.mxu0 %v1224_v56  ;;  %1695 = vmatpush.msrb.mxu1 %v1376_v1  ;;  %v1403_v50 = vld [vmem:[%s5696_s6 + $0x5b8] sm:$0xff]  ;;  %v1242_v56 = vld [vmem:[%s5696_s6 + $0xb0] sm:$0xff] }
 0x13d   : > { %1721 = vmatpush.msrb.mxu2 %v1225_v2  ;;  %1741 = vmatpush.msrb.mxu3 %v1377_v3  ;;  %v1394_v1 = vld [vmem:[%s5696_s6 + $0x570] sm:$0xff]  ;;  %v1243_v2 = vld [vmem:[%s5696_s6 + $0xb8] sm:$0xff] }
 0x13e   : > { %1676 = vmatmul.f32.vlgmr.msrb.gmra.mxu0 %v3953_v26  ;;  %1722 = vmatmul.f32.vlgmr.msrb.gmra.mxu2 %v3953_v26  ;;  %v1395_v3 = vld [vmem:[%s5696_s6 + $0x578] sm:$0xff] }
 0x13f   : > { %1752 = vmatpush.msra.mxu0 %v1346_v25  ;;  %1798 = vmatpush.msra.mxu2 %v1347_v53  ;;  %v1234_v25 = vld [vmem:[%s5696_s6 + $0x70] sm:$0xff] }
 0x140   : > { %1696 = vmatpush.msrb.mxu1 %v1368_v15  ;;  %1742 = vmatpush.msrb.mxu3 %v1369_v11  ;;  %v1386_v53 = vld [vmem:[%s5696_s6 + $0x530] sm:$0xff]  ;;  %v1235_v15 = vld [vmem:[%s5696_s6 + $0x78] sm:$0xff] }
 0x141   : > { %1753 = vmatpush.msra.mxu0 %v1338_v6  ;;  %1799 = vmatpush.msra.mxu2 %v1339_v13  ;;  %v1387_v11 = vld [vmem:[%s5696_s6 + $0x538] sm:$0xff]  ;;  %v1226_v6 = vld [vmem:[%s5696_s6 + $0x30] sm:$0xff] }
 0x142   : > { %1697 = vmatpush.msrb.mxu1 %v1360_v14  ;;  %1743 = vmatpush.msrb.mxu3 %v1361_v16  ;;  %v1378_v13 = vld [vmem:[%s5696_s6 + $0x4f0] sm:$0xff]  ;;  %v1227_v14 = vld [vmem:[%s5696_s6 + $0x38] sm:$0xff] }
 0x143   : > { %1754 = vmatpush.msra.mxu0 %v1330_v19  ;;  %1800 = vmatpush.msra.mxu2 %v1331_v22  ;;  %v1379_v16 = vld [vmem:[%s5696_s6 + $0x4f8] sm:$0xff]  ;;  %v1370_v19 = vld [vmem:[%s5696_s6 + $0x4b0] sm:$0xff] }
 0x144   : > { %1698 = vmatpush.msrb.mxu1 %v1352_v12  ;;  %1744 = vmatpush.msrb.mxu3 %v1353_v24  ;;  %v1371_v22 = vld [vmem:[%s5696_s6 + $0x4b8] sm:$0xff]  ;;  %v1938_v12 = vld [vmem:[%s5698_s8 + $0xf0] sm:$0xff] }
 0x145   : > { %1699 = vmatmul.f32.vlgmr.msrb.gmra.mxu1 %v3975_v57  ;;  %1745 = vmatmul.f32.vlgmr.msrb.gmra.mxu3 %v3975_v57  ;;  %v1362_v24 = vld [vmem:[%s5696_s6 + $0x470] sm:$0xff] }
 0x146   : > { %1755 = vmatpush.msra.mxu0 %v1322_v58  ;;  %1775 = vmatpush.msra.mxu1 %v1474_v51  ;;  %v1363_v58 = vld [vmem:[%s5696_s6 + $0x478] sm:$0xff]  ;;  %v1936_v51 = vld [vmem:[%s5698_s8 + $0xe0] sm:$0xff] }
 0x147   : > { %1801 = vmatpush.msra.mxu2 %v1323_v4  ;;  %1821 = vmatpush.msra.mxu3 %v1475_v61  ;;  %v2002_v4 = vld [vmem:[%s5698_s8 + $0x2f0] sm:$0xff] }
 0x148   : > { %1679 = vmatmul.f32.gmra.mxu0 %v3989_v62  ;;  %1725 = vmatmul.f32.gmra.mxu2 %v3989_v62  ;;  %v1354_v61 = vld [vmem:[%s5696_s6 + $0x430] sm:$0xff] }
 0x149   : > { %1756 = vmatpush.msra.mxu0 %v1314_v17  ;;  %1776 = vmatpush.msra.mxu1 %v1466_v27  ;;  %v1355_v17 = vld [vmem:[%s5696_s6 + $0x438] sm:$0xff]  ;;  %v2000_v27 = vld [vmem:[%s5698_s8 + $0x2e0] sm:$0xff] }
 0x14a   : > { %1802 = vmatpush.msra.mxu2 %v1315_v9  ;;  %1822 = vmatpush.msra.mxu3 %v1467_v5  ;;  %v1934_v9 = vld [vmem:[%s5698_s8 + $0xd0] sm:$0xff] }
 0x14b   : > { %1757 = vmatpush.msra.mxu0 %v1306_v31  ;;  %1777 = vmatpush.msra.mxu1 %v1458_v30  ;;  %v1970_v5 = vld [vmem:[%s5698_s8 + $0x1f0] sm:$0xff]  ;;  %v1932_v31 = vld [vmem:[%s5698_s8 + $0xc0] sm:$0xff] }
 0x14c   : > { %1803 = vmatpush.msra.mxu2 %v1307_v21  ;;  %1823 = vmatpush.msra.mxu3 %v1459_v32  ;;  %v1968_v30 = vld [vmem:[%s5698_s8 + $0x1e0] sm:$0xff]  ;;  %v1998_v21 = vld [vmem:[%s5698_s8 + $0x2d0] sm:$0xff] }
 0x14d   : > { %1758 = vmatpush.msra.mxu0 %v1298_v34  ;;  %1778 = vmatpush.msra.mxu1 %v1450_v8  ;;  %v2034_v32 = vld [vmem:[%s5698_s8 + $0x3f0] sm:$0xff] }
 0x14e   : > { %1804 = vmatpush.msra.mxu2 %v1299_v28  ;;  %1824 = vmatpush.msra.mxu3 %v1451_v35  ;;  %v1930_v34 = vld [vmem:[%s5698_s8 + $0xb0] sm:$0xff]  ;;  %v1996_v28 = vld [vmem:[%s5698_s8 + $0x2c0] sm:$0xff] }
 0x14f   : > { %1702 = vmatmul.f32.gmra.mxu1 %v4025_v48  ;;  %1748 = vmatmul.f32.gmra.mxu3 %v4025_v48  ;;  %v1966_v8 = vld [vmem:[%s5698_s8 + $0x1d0] sm:$0xff]  ;;  %v2032_v35 = vld [vmem:[%s5698_s8 + $0x3e0] sm:$0xff] }
 0x150   : > { %1759 = vmatpush.msra.mxu0 %v1290_v20  ;;  %1779 = vmatpush.msra.mxu1 %v1442_v63  ;;  %v1928_v20 = vld [vmem:[%s5698_s8 + $0xa0] sm:$0xff] }
 0x151   : > { %1805 = vmatpush.msra.mxu2 %v1291_v47  ;;  %1825 = vmatpush.msra.mxu3 %v1443_v37  ;;  %v1964_v63 = vld [vmem:[%s5698_s8 + $0x1c0] sm:$0xff]  ;;  %v1926_v47 = vld [vmem:[%s5698_s8 + $0x90] sm:$0xff] }
 0x152   : > { %1760 = vmatpush.msra.mxu0 %v1282_v39  ;;  %1780 = vmatpush.msra.mxu1 %v1434_v0  ;;  %v1962_v37 = vld [vmem:[%s5698_s8 + $0x1b0] sm:$0xff]  ;;  %v4638_v39 = vld [vmem:[%s5695_s5] sm:$0x3]  ;;  %v1194_v0 = vld [vmem:[%s4615_s14] sm:$0xfc] }
 0x153   : > { %1806 = vmatpush.msra.mxu2 %v1283_v42  ;;  %1826 = vmatpush.msra.mxu3 %v1435_v7  ;;  %v4642_v42 = vld [vmem:[%s4615_s14 + $0x10] sm:$0x7f] }
 0x154   : > { %1761 = vmatpush.msra.mxu0 %v1274_v33  ;;  %1781 = vmatpush.msra.mxu1 %v1426_v40  ;;  %v1994_v7 = vld [vmem:[%s5698_s8 + $0x2b0] sm:$0xff]  ;;  %v1924_v40 = vld [vmem:[%s5698_s8 + $0x80] sm:$0xff] }
 0x155   : > { %1807 = vmatpush.msra.mxu2 %v1275_v41  ;;  %1827 = vmatpush.msra.mxu3 %v1427_v43  ;;  %v2030_v33 = vld [vmem:[%s5698_s8 + $0x3d0] sm:$0xff]  ;;  %v1960_v41 = vld [vmem:[%s5698_s8 + $0x1a0] sm:$0xff]  ;;  %v1098_v43 = vperm.slane %v4638_v39, 0 }
 0x156   : > { %1762 = vmatpush.msra.mxu0 %v1266_v29  ;;  %1782 = vmatpush.msra.mxu1 %v1418_v44  ;;  %v1992_v29 = vld [vmem:[%s5698_s8 + $0x2a0] sm:$0xff] }
 0x157   : > { %1808 = vmatpush.msra.mxu2 %v1267_v46  ;;  %1828 = vmatpush.msra.mxu3 %v1419_v49  ;;  %v2028_v44 = vld [vmem:[%s5698_s8 + $0x3c0] sm:$0xff]  ;;  %v1922_v46 = vld [vmem:[%s5698_s8 + $0x70] sm:$0xff] }
 0x158   : > { %1763 = vmatpush.msra.mxu0 %v1258_v54  ;;  %1783 = vmatpush.msra.mxu1 %v1410_v38  ;;  %v1958_v49 = vld [vmem:[%s5698_s8 + $0x190] sm:$0xff]  ;;  %v1202_v38 = vrot.slane %v1194_v0, 2 }
 0x159   : > { %1809 = vmatpush.msra.mxu2 %v1259_v45  ;;  %1829 = vmatpush.msra.mxu3 %v1411_v36  ;;  %v1203_v45 = vrot.slane %v4642_v42, 2  ;;  %v1990_v36 = vld [vmem:[%s5698_s8 + $0x290] sm:$0xff] }
 0x15a   : > { %1764 = vmatpush.msra.mxu0 %v1250_v10  ;;  %1784 = vmatpush.msra.mxu1 %v1402_v60  ;;  %v2026_v10 = vld [vmem:[%s5698_s8 + $0x3b0] sm:$0xff]  ;;  %v1920_v60 = vld [vmem:[%s5698_s8 + $0x60] sm:$0xff] }
 0x15b   : > { %1810 = vmatpush.msra.mxu2 %v1251_v59  ;;  %1830 = vmatpush.msra.mxu3 %v1403_v50  ;;  %v1956_v59 = vld [vmem:[%s5698_s8 + $0x180] sm:$0xff]  ;;  %v1195_v50 = vld [vmem:[%s4615_s14 + $0x8] sm:$0xfc]  ;;  %v2062_v42 = vld [vmem:[%s5698_s8 + $0x4d0] sm:$0xff] }
 0x15c   : > { %1765 = vmatpush.msra.mxu0 %v1242_v56  ;;  %1785 = vmatpush.msra.mxu1 %v1394_v1  ;;  %v4688_v1 = vld [vmem:[%s4615_s14 + $0x18] sm:$0x7f] }
 0x15d   : > { %1811 = vmatpush.msra.mxu2 %v1243_v2  ;;  %1831 = vmatpush.msra.mxu3 %v1395_v3  ;;  %v1988_v2 = vld [vmem:[%s5698_s8 + $0x280] sm:$0xff] }
 0x15e   : > { %1766 = vmatpush.msra.mxu0 %v1234_v25  ;;  %1786 = vmatpush.msra.mxu1 %v1386_v53  ;;  %v2024_v3 = vld [vmem:[%s5698_s8 + $0x3a0] sm:$0xff]  ;;  %v1918_v25 = vld [vmem:[%s5698_s8 + $0x50] sm:$0xff] }
 0x15f   : > { %1812 = vmatpush.msra.mxu2 %v1235_v15  ;;  %1832 = vmatpush.msra.mxu3 %v1387_v11  ;;  %v1954_v53 = vld [vmem:[%s5698_s8 + $0x170] sm:$0xff]  ;;  %v1204_v11 = vsel %vm925_vm6, %v1202_v38, %v1203_v45  ;;  %v2012_v38 = vld [vmem:[%s5698_s8 + $0x340] sm:$0xff] }
 0x160   : > { %1767 = vmatpush.msra.mxu0 %v1226_v6  ;;  %1787 = vmatpush.msra.mxu1 %v1378_v13  ;;  %v1099_v13 = vperm.slane %v4638_v39, 1  ;;  %v2060_v39 = vld [vmem:[%s5698_s8 + $0x4c0] sm:$0xff] }
 0x161   : > { %1813 = vmatpush.msra.mxu2 %v1227_v14  ;;  %1833 = vmatpush.msra.mxu3 %v1379_v16  ;;  %v1986_v14 = vld [vmem:[%s5698_s8 + $0x270] sm:$0xff] }
 0x162   : > { %1768 = vmatmul.f32.vlgmr.msra.gmra.mxu0 %v3953_v26  ;;  %1814 = vmatmul.f32.vlgmr.msra.gmra.mxu2 %v3953_v26  ;;  %v2022_v16 = vld [vmem:[%s5698_s8 + $0x390] sm:$0xff] }
 0x163   : > { %1788 = vmatpush.msra.mxu1 %v1370_v19  ;;  %1834 = vmatpush.msra.mxu3 %v1371_v22  ;;  %v1916_v19 = vld [vmem:[%s5698_s8 + $0x40] sm:$0xff] }
 0x164   : > { %2164 = vmatpush.msrb.mxu0 %v1938_v12  ;;  %2210 = vmatpush.msrb.mxu2 %v2002_v4  ;;  %v1952_v22 = vld [vmem:[%s5698_s8 + $0x160] sm:$0xff] }
 0x165   : > { %1789 = vmatpush.msra.mxu1 %v1362_v24  ;;  %1835 = vmatpush.msra.mxu3 %v1363_v58  ;;  %v1205_v24 = vrot.slane %v1195_v50, 2  ;;  %v1206_v58 = vrot.slane %v4688_v1, 2  ;;  %v1984_v4 = vld [vmem:[%s5698_s8 + $0x260] sm:$0xff]  ;;  %v2010_v50 = vld [vmem:[%s5698_s8 + $0x330] sm:$0xff] }
 0x166   : > { %2165 = vmatpush.msrb.mxu0 %v1936_v51  ;;  %2211 = vmatpush.msrb.mxu2 %v2000_v27  ;;  %v1950_v27 = vld [vmem:[%s5698_s8 + $0x150] sm:$0xff]  ;;  %v2092_v1 = vld [vmem:[%s5698_s8 + $0x5c0] sm:$0xff] }
 0x167   : > { %1790 = vmatpush.msra.mxu1 %v1354_v61  ;;  %1836 = vmatpush.msra.mxu3 %v1355_v17  ;;  %v2020_v61 = vld [vmem:[%s5698_s8 + $0x380] sm:$0xff]  ;;  %v1914_v17 = vld [vmem:[%s5698_s8 + $0x30] sm:$0xff] }
 0x168   : > { %1791 = vmatmul.f32.vlgmr.msra.gmra.mxu1 %v3975_v57  ;;  %1837 = vmatmul.f32.vlgmr.msra.gmra.mxu3 %v3975_v57 }
 0x169   : > { %2166 = vmatpush.msrb.mxu0 %v1934_v9  ;;  %2187 = vmatpush.msrb.mxu1 %v1970_v5  ;;  %v1982_v5 = vld [vmem:[%s5698_s8 + $0x250] sm:$0xff] }
 0x16a   : > { %1771 = vmatmul.f32.gmra.mxu0 %v3989_v62  ;;  %1817 = vmatmul.f32.gmra.mxu2 %v3989_v62 }
 0x16b   : > { %2167 = vmatpush.msrb.mxu0 %v1932_v31  ;;  %2188 = vmatpush.msrb.mxu1 %v1968_v30  ;;  %v2018_v31 = vld [vmem:[%s5698_s8 + $0x370] sm:$0xff]  ;;  %v1912_v30 = vld [vmem:[%s5698_s8 + $0x20] sm:$0xff] }
 0x16c   : > { %2212 = vmatpush.msrb.mxu2 %v1998_v21  ;;  %2233 = vmatpush.msrb.mxu3 %v2034_v32  ;;  %v1948_v21 = vld [vmem:[%s5698_s8 + $0x140] sm:$0xff] }
 0x16d   : > { %2168 = vmatpush.msrb.mxu0 %v1930_v34  ;;  %2189 = vmatpush.msrb.mxu1 %v1966_v8  ;;  %v1207_v8 = vsel %vm925_vm6, %v1205_v24, %v1206_v58  ;;  %v2056_v24 = vld [vmem:[%s5698_s8 + $0x4a0] sm:$0xff] }
 0x16e   : > { %2213 = vmatpush.msrb.mxu2 %v1996_v28  ;;  %2234 = vmatpush.msrb.mxu3 %v2032_v35  ;;  %v1980_v35 = vld [vmem:[%s5698_s8 + $0x240] sm:$0xff] }
 0x16f   : > { %2169 = vmatpush.msrb.mxu0 %v1928_v20  ;;  %2190 = vmatpush.msrb.mxu1 %v1964_v63  ;;  %v2016_v20 = vld [vmem:[%s5698_s8 + $0x360] sm:$0xff]  ;;  %v1910_v63 = vld [vmem:[%s5698_s8 + $0x10] sm:$0xff] }
 0x170   : > { %1794 = vmatmul.f32.gmra.mxu1 %v4025_v48  ;;  %1840 = vmatmul.f32.gmra.mxu3 %v4025_v48  ;;  %v1119_v54 = vpop.f32.mrf.mxu0 }
 0x171   : > { %2170 = vmatpush.msrb.mxu0 %v1926_v47  ;;  %2191 = vmatpush.msrb.mxu1 %v1962_v37  ;;  %v1120_v56 = vadd.f32 %v1119_v54, %v1098_v43  ;;  %v1946_v47 = vld [vmem:[%s5698_s8 + $0x130] sm:$0xff] }
 0x172   : > { %2214 = vmatpush.msrb.mxu2 %v1994_v7  ;;  %2235 = vmatpush.msrb.mxu3 %v2030_v33  ;;  %v1978_v7 = vld [vmem:[%s5698_s8 + $0x230] sm:$0xff] }
 0x173   : > { %2171 = vmatpush.msrb.mxu0 %v1924_v40  ;;  %2192 = vmatpush.msrb.mxu1 %v1960_v41  ;;  %v2014_v33 = vld [vmem:[%s5698_s8 + $0x350] sm:$0xff]  ;;  %v1908_v40 = vld [vmem:[%s5698_s8] sm:$0xff] }
 0x174   : > { %2215 = vmatpush.msrb.mxu2 %v1992_v29  ;;  %2236 = vmatpush.msrb.mxu3 %v2028_v44  ;;  %v1944_v41 = vld [vmem:[%s5698_s8 + $0x120] sm:$0xff] }
 0x175   : > { %2172 = vmatpush.msrb.mxu0 %v1922_v46  ;;  %2193 = vmatpush.msrb.mxu1 %v1958_v49  ;;  %v1976_v46 = vld [vmem:[%s5698_s8 + $0x220] sm:$0xff]  ;;  %v1942_v49 = vld [vmem:[%s5698_s8 + $0x110] sm:$0xff] }
 0x176   : > { %v1142_v15 = vpop.f32.mrf.mxu1  ;;  %2216 = vmatpush.msrb.mxu2 %v1990_v36  ;;  %2237 = vmatpush.msrb.mxu3 %v2026_v10  ;;  %v1165_v12 = vpop.f32.mrf.mxu2  ;;  %v2064_v36 = vld [vmem:[%s5698_s8 + $0x4e0] sm:$0xff] }
 0x177   : > { %2173 = vmatpush.msrb.mxu0 %v1920_v60  ;;  %2194 = vmatpush.msrb.mxu1 %v1956_v59  ;;  %v1143_v6 = vadd.f32 %v1142_v15, %v1120_v56  ;;  %v1166_v9 = vadd.f32 %v1165_v12, %v1099_v13  ;;  %v1974_v60 = vld [vmem:[%s5698_s8 + $0x210] sm:$0xff]  ;;  %v1940_v59 = vld [vmem:[%s5698_s8 + $0x100] sm:$0xff] }
 0x178   : > { %2217 = vmatpush.msrb.mxu2 %v1988_v2  ;;  %2238 = vmatpush.msrb.mxu3 %v2024_v3  ;;  %v2098_v56 = vld [vmem:[%s5698_s8 + $0x5f0] sm:$0xff]  ;;  %v1972_v3 = vld [vmem:[%s5698_s8 + $0x200] sm:$0xff] }
 0x179   : > { %2174 = vmatpush.msrb.mxu0 %v1918_v25  ;;  %2195 = vmatpush.msrb.mxu1 %v1954_v53  ;;  %v1212_v51 = vadd.f32 %v1204_v11, %v1143_v6  ;;  %v1122_v32 = vpop.f32.mrf.mxu0  ;;  %v2008_v25 = vld [vmem:[%s5698_s8 + $0x320] sm:$0xff]  ;;  %v2130_v11 = vld [vmem:[%s5698_s8 + $0x6f0] sm:$0xff] }
 0x17a   : > { %2218 = vmatpush.msrb.mxu2 %v1986_v14  ;;  %2239 = vmatpush.msrb.mxu3 %v2022_v16  ;;  %v1123_v37 = vadd.f32 %v1122_v32, %v1098_v43  ;;  %v2066_v43 = vld [vmem:[%s5698_s8 + $0x4f0] sm:$0xff]  ;;  %v2096_v53 = vld [vmem:[%s5698_s8 + $0x5e0] sm:$0xff] }
 0x17b   : > { %2175 = vmatpush.msrb.mxu0 %v1916_v19  ;;  %2196 = vmatpush.msrb.mxu1 %v1952_v22  ;;  %1216 = vst [vmem:[%s4722_s30] sm:$0xff] %v1212_v51  ;;  %v2006_v6 = vld [vmem:[%s5698_s8 + $0x310] sm:$0xff]  ;;  %v2128_v12 = vld [vmem:[%s5698_s8 + $0x6e0] sm:$0xff] }
 0x17c   : > { %v1188_v34 = vpop.f32.mrf.mxu3  ;;  %2219 = vmatpush.msrb.mxu2 %v1984_v4  ;;  %2240 = vmatpush.msrb.mxu3 %v2020_v61  ;;  %v2094_v14 = vld [vmem:[%s5698_s8 + $0x5d0] sm:$0xff]  ;;  %v2004_v4 = vld [vmem:[%s5698_s8 + $0x300] sm:$0xff] }
 0x17d   : > { %2176 = vmatpush.msrb.mxu0 %v1914_v17  ;;  %2197 = vmatpush.msrb.mxu1 %v1950_v27  ;;  %v1189_v28 = vadd.f32 %v1188_v34, %v1166_v9  ;;  %v2126_v51 = vld [vmem:[%s5698_s8 + $0x6d0] sm:$0xff]  ;;  %v2124_v27 = vld [vmem:[%s5698_s8 + $0x6c0] sm:$0xff] }
 0x17e   : > { %2220 = vmatpush.msrb.mxu2 %v1982_v5  ;;  %2241 = vmatpush.msrb.mxu3 %v2018_v31  ;;  %v2054_v61 = vld [vmem:[%s5698_s8 + $0x490] sm:$0xff]  ;;  %v2052_v5 = vld [vmem:[%s5698_s8 + $0x480] sm:$0xff] }
 0x17f   : > { %2177 = vmatpush.msrb.mxu0 %v1912_v30  ;;  %2198 = vmatpush.msrb.mxu1 %v1948_v21  ;;  %v1213_v0 = vadd.f32 %v1207_v8, %v1189_v28  ;;  %v1168_v54 = vpop.f32.mrf.mxu2  ;;  %v2090_v17 = vld [vmem:[%s5698_s8 + $0x5b0] sm:$0xff]  ;;  %v2088_v31 = vld [vmem:[%s5698_s8 + $0x5a0] sm:$0xff] }
 0x180   : > { %v1145_v29 = vpop.f32.mrf.mxu1  ;;  %2221 = vmatpush.msrb.mxu2 %v1980_v35  ;;  %2242 = vmatpush.msrb.mxu3 %v2016_v20  ;;  %v2162_v9 = vld [vmem:[%s5698_s8 + $0x7f0] sm:$0xff]  ;;  %v2160_v35 = vld [vmem:[%s5698_s8 + $0x7e0] sm:$0xff] }
 0x181   : > { %2178 = vmatpush.msrb.mxu0 %v1910_v63  ;;  %2199 = vmatpush.msrb.mxu1 %v1946_v47  ;;  %1217 = vst [vmem:[%s4722_s30 + $0x8] sm:$0xff] %v1213_v0  ;;  %v1146_v44 = vadd.f32 %v1145_v29, %v1123_v37  ;;  %v2122_v32 = vld [vmem:[%s5698_s8 + $0x6b0] sm:$0xff]  ;;  %v2120_v20 = vld [vmem:[%s5698_s8 + $0x6a0] sm:$0xff] }
 0x182   : > { %2222 = vmatpush.msrb.mxu2 %v1978_v7  ;;  %2243 = vmatpush.msrb.mxu3 %v2014_v33  ;;  %v2050_v34 = vld [vmem:[%s5698_s8 + $0x470] sm:$0xff]  ;;  %v2048_v63 = vld [vmem:[%s5698_s8 + $0x460] sm:$0xff] }
 0x183   : > { %2179 = vmatpush.msrb.mxu0 %v1908_v40  ;;  %2200 = vmatpush.msrb.mxu1 %v1944_v41  ;;  %v1214_v10 = vadd.f32 %v1203_v45, %v1146_v44  ;;  %v1169_v45 = vadd.f32 %v1168_v54, %v1099_v13  ;;  %v2058_v13 = vld [vmem:[%s5698_s8 + $0x4b0] sm:$0xff]  ;;  %v1493_v19 = vpop.f32.mrf.mxu0  ;;  %v2084_v47 = vld [vmem:[%s5698_s8 + $0x580] sm:$0xff] }
 0x184   : > { %2223 = vmatpush.msrb.mxu2 %v1976_v46  ;;  %2244 = vmatpush.msrb.mxu3 %v2012_v38  ;;  %v2086_v8 = vld [vmem:[%s5698_s8 + $0x590] sm:$0xff]  ;;  %v2044_v44 = vld [vmem:[%s5698_s8 + $0x440] sm:$0xff] }
 0x185   : > { %2256 = vmatpush.msra.mxu0 %v2066_v43  ;;  %2201 = vmatpush.msrb.mxu1 %v1942_v49  ;;  %1218 = vst [vmem:[%s4722_s30 + $0x10] sm:$0x1f] %v1214_v10  ;;  %v2158_v7 = vld [vmem:[%s5698_s8 + $0x7d0] sm:$0xff]  ;;  %v2156_v43 = vld [vmem:[%s5698_s8 + $0x7c0] sm:$0xff] }
 0x186   : > { %v1191_v2 = vpop.f32.mrf.mxu3  ;;  %2224 = vmatpush.msrb.mxu2 %v1974_v60  ;;  %2245 = vmatpush.msrb.mxu3 %v2010_v50  ;;  %v2046_v33 = vld [vmem:[%s5698_s8 + $0x450] sm:$0xff]  ;;  %v2080_v46 = vld [vmem:[%s5698_s8 + $0x560] sm:$0xff] }
 0x187   : > { %2257 = vmatpush.msra.mxu0 %v2064_v36  ;;  %2202 = vmatpush.msrb.mxu1 %v1940_v59  ;;  %v1192_v15 = vadd.f32 %v1191_v2, %v1169_v45  ;;  %v2082_v41 = vld [vmem:[%s5698_s8 + $0x570] sm:$0xff]  ;;  %v2116_v49 = vld [vmem:[%s5698_s8 + $0x680] sm:$0xff] }
 0x188   : > { %2225 = vmatpush.msrb.mxu2 %v1972_v3  ;;  %2246 = vmatpush.msrb.mxu3 %v2008_v25  ;;  %v2118_v29 = vld [vmem:[%s5698_s8 + $0x690] sm:$0xff]  ;;  %v2040_v50 = vld [vmem:[%s5698_s8 + $0x420] sm:$0xff] }
 0x189   : > { %2258 = vmatpush.msra.mxu0 %v2062_v42  ;;  %2279 = vmatpush.msra.mxu1 %v2098_v56  ;;  %v1215_v16 = vadd.f32 %v1206_v58, %v1192_v15  ;;  %v1539_v30 = vpop.f32.mrf.mxu2  ;;  %v2154_v54 = vld [vmem:[%s5698_s8 + $0x7b0] sm:$0xff]  ;;  %v2076_v45 = vld [vmem:[%s5698_s8 + $0x540] sm:$0xff] }
 0x18a   : > { %v1516_v22 = vpop.f32.mrf.mxu1  ;;  %2302 = vmatpush.msra.mxu2 %v2130_v11  ;;  %2247 = vmatpush.msrb.mxu3 %v2006_v6  ;;  %v2042_v38 = vld [vmem:[%s5698_s8 + $0x430] sm:$0xff]  ;;  %v2152_v56 = vld [vmem:[%s5698_s8 + $0x7a0] sm:$0xff] }
 0x18b   : > { %2259 = vmatpush.msra.mxu0 %v2060_v39  ;;  %2280 = vmatpush.msra.mxu1 %v2096_v53  ;;  %1219 = vst [vmem:[%s4722_s30 + $0x18] sm:$0x1f] %v1215_v16  ;;  %v4853_v58 = vadd.f32 %v1516_v22, %v1493_v19  ;;  %v2078_v36 = vld [vmem:[%s5698_s8 + $0x550] sm:$0xff]  ;;  %v2112_v2 = vld [vmem:[%s5698_s8 + $0x660] sm:$0xff] }
 0x18c   : > { %2303 = vmatpush.msra.mxu2 %v2128_v12  ;;  %2248 = vmatpush.msrb.mxu3 %v2004_v4  ;;  %v2114_v59 = vld [vmem:[%s5698_s8 + $0x670] sm:$0xff]  ;;  %v2036_v15 = vld [vmem:[%s5698_s8 + $0x400] sm:$0xff]  ;;  %v1937_v12 = vld [vmem:[%s5698_s8 + $0xe8] sm:$0xff] }
 0x18d   : > { %2260 = vmatpush.msra.mxu0 %v2058_v13  ;;  %2281 = vmatpush.msra.mxu1 %v2094_v14  ;;  %v1496_v37 = vpop.f32.mrf.mxu0  ;;  %v2038_v3 = vld [vmem:[%s5698_s8 + $0x410] sm:$0xff]  ;;  %v2072_v11 = vld [vmem:[%s5698_s8 + $0x520] sm:$0xff]  ;;  %v1939_v14 = vld [vmem:[%s5698_s8 + $0xf8] sm:$0xff] }
 0x18e   : > { %2180 = vmatmul.f32.vlgmr.msrb.gmra.mxu0 %v4853_v58  ;;  %2304 = vmatpush.msra.mxu2 %v2126_v51  ;;  %v2074_v25 = vld [vmem:[%s5698_s8 + $0x530] sm:$0xff]  ;;  %v2148_v22 = vld [vmem:[%s5698_s8 + $0x780] sm:$0xff]  ;;  %v1935_v4 = vld [vmem:[%s5698_s8 + $0xd8] sm:$0xff] }
 0x18f   : > { %2261 = vmatpush.msra.mxu0 %v2056_v24  ;;  %2282 = vmatpush.msra.mxu1 %v2092_v1  ;;  %v2150_v39 = vld [vmem:[%s5698_s8 + $0x790] sm:$0xff]  ;;  %v2108_v24 = vld [vmem:[%s5698_s8 + $0x640] sm:$0xff] }
 0x190   : > { %v1562_v21 = vpop.f32.mrf.mxu3  ;;  %2305 = vmatpush.msra.mxu2 %v2124_v27  ;;  %2325 = vmatpush.msra.mxu3 %v2162_v9  ;;  %v2110_v53 = vld [vmem:[%s5698_s8 + $0x650] sm:$0xff]  ;;  %v2068_v1 = vld [vmem:[%s5698_s8 + $0x500] sm:$0xff] }
 0x191   : > { %2262 = vmatpush.msra.mxu0 %v2054_v61  ;;  %2283 = vmatpush.msra.mxu1 %v2090_v17  ;;  %v4889_v28 = vadd.f32 %v1562_v21, %v1539_v30  ;;  %v2070_v19 = vld [vmem:[%s5698_s8 + $0x510] sm:$0xff]  ;;  %v1971_v61 = vld [vmem:[%s5698_s8 + $0x1f8] sm:$0xff]  ;;  %v2144_v27 = vld [vmem:[%s5698_s8 + $0x760] sm:$0xff] }
 0x192   : > { %2306 = vmatpush.msra.mxu2 %v2122_v32  ;;  %2326 = vmatpush.msra.mxu3 %v2160_v35  ;;  %v2146_v51 = vld [vmem:[%s5698_s8 + $0x770] sm:$0xff]  ;;  %v1969_v21 = vld [vmem:[%s5698_s8 + $0x1e8] sm:$0xff]  ;;  %v2104_v32 = vld [vmem:[%s5698_s8 + $0x620] sm:$0xff] }
 0x193   : > { %2263 = vmatpush.msra.mxu0 %v2052_v5  ;;  %2284 = vmatpush.msra.mxu1 %v2088_v31  ;;  %v1542_v10 = vpop.f32.mrf.mxu2  ;;  %v2106_v17 = vld [vmem:[%s5698_s8 + $0x630] sm:$0xff]  ;;  %v1933_v31 = vld [vmem:[%s5698_s8 + $0xc8] sm:$0xff]  ;;  %v1967_v35 = vld [vmem:[%s5698_s8 + $0x1d8] sm:$0xff] }
 0x194   : > { %2203 = vmatmul.f32.vlgmr.msrb.gmra.mxu1 %v4889_v28  ;;  %v1519_v0 = vpop.f32.mrf.mxu1  ;;  %2307 = vmatpush.msra.mxu2 %v2120_v20  ;;  %v2102_v20 = vld [vmem:[%s5698_s8 + $0x610] sm:$0xff] }
 0x195   : > { %2264 = vmatpush.msra.mxu0 %v2050_v34  ;;  %2285 = vmatpush.msra.mxu1 %v2086_v8  ;;  %v4910_v40 = vadd.f32 %v1519_v0, %v1496_v37  ;;  %v1931_v34 = vld [vmem:[%s5698_s8 + $0xb8] sm:$0xff]  ;;  %v2142_v8 = vld [vmem:[%s5698_s8 + $0x750] sm:$0xff]  ;;  %v1929_v37 = vld [vmem:[%s5698_s8 + $0xa8] sm:$0xff] }
 0x196   : > { %2327 = vmatpush.msra.mxu3 %v2158_v7  ;;  %2308 = vmatpush.msra.mxu2 %v2118_v29  ;;  %v1965_v7 = vld [vmem:[%s5698_s8 + $0x1c8] sm:$0xff]  ;;  %v2100_v29 = vld [vmem:[%s5698_s8 + $0x600] sm:$0xff] }
 0x197   : > { %2265 = vmatpush.msra.mxu0 %v2048_v63  ;;  %2286 = vmatpush.msra.mxu1 %v2084_v47 }
 0x198   : > { %2183 = vmatmul.f32.gmra.mxu0 %v4910_v40  ;;  %2328 = vmatpush.msra.mxu3 %v2156_v43  ;;  %v1585_v6 = vpop.f32.mrf.mxu0  ;;  %v1963_v43 = vld [vmem:[%s5698_s8 + $0x1b8] sm:$0xff] }
 0x199   : > { %2266 = vmatpush.msra.mxu0 %v2046_v33  ;;  %2287 = vmatpush.msra.mxu1 %v2082_v41  ;;  %v2140_v33 = vld [vmem:[%s5698_s8 + $0x740] sm:$0xff]  ;;  %v1927_v41 = vld [vmem:[%s5698_s8 + $0x98] sm:$0xff] }
 0x19a   : > { %v1565_v60 = vpop.f32.mrf.mxu3  ;;  %2309 = vmatpush.msra.mxu2 %v2116_v49  ;;  %2329 = vmatpush.msra.mxu3 %v2154_v54  ;;  %v2003_v49 = vld [vmem:[%s5698_s8 + $0x2f8] sm:$0xff]  ;;  %v1961_v54 = vld [vmem:[%s5698_s8 + $0x1a8] sm:$0xff] }
 0x19b   : > { %2267 = vmatpush.msra.mxu0 %v2044_v44  ;;  %2288 = vmatpush.msra.mxu1 %v2080_v46  ;;  %v4946_v42 = vadd.f32 %v1565_v60, %v1542_v10  ;;  %v2138_v44 = vld [vmem:[%s5698_s8 + $0x730] sm:$0xff]  ;;  %v1925_v46 = vld [vmem:[%s5698_s8 + $0x88] sm:$0xff]  ;;  %v1923_v60 = vld [vmem:[%s5698_s8 + $0x78] sm:$0xff] }
 0x19c   : > { %2310 = vmatpush.msra.mxu2 %v2114_v59  ;;  %2330 = vmatpush.msra.mxu3 %v2152_v56  ;;  %v1921_v56 = vld [vmem:[%s5698_s8 + $0x68] sm:$0xff] }
 0x19d   : > { %2268 = vmatpush.msra.mxu0 %v2042_v38  ;;  %2289 = vmatpush.msra.mxu1 %v2078_v36  ;;  %v2136_v38 = vld [vmem:[%s5698_s8 + $0x720] sm:$0xff] }
 0x19e   : > { %2206 = vmatmul.f32.gmra.mxu1 %v4946_v42  ;;  %2311 = vmatpush.msra.mxu2 %v2112_v2  ;;  %v2134_v2 = vld [vmem:[%s5698_s8 + $0x710] sm:$0xff] }
 0x19f   : > { %2269 = vmatpush.msra.mxu0 %v2040_v50  ;;  %2290 = vmatpush.msra.mxu1 %v2076_v45  ;;  %v1631_v9 = vpop.f32.mrf.mxu2  ;;  %v1959_v50 = vld [vmem:[%s5698_s8 + $0x198] sm:$0xff]  ;;  %v2001_v45 = vld [vmem:[%s5698_s8 + $0x2e8] sm:$0xff] }
 0x1a0   : > { %v1608_v13 = vpop.f32.mrf.mxu1  ;;  %2331 = vmatpush.msra.mxu3 %v2150_v39  ;;  %2312 = vmatpush.msra.mxu2 %v2110_v53  ;;  %v1919_v39 = vld [vmem:[%s5698_s8 + $0x58] sm:$0xff]  ;;  %v2132_v53 = vld [vmem:[%s5698_s8 + $0x700] sm:$0xff] }
 0x1a1   : > { %2270 = vmatpush.msra.mxu0 %v2038_v3  ;;  %2291 = vmatpush.msra.mxu1 %v2074_v25  ;;  %v4979_v16 = vadd.f32 %v1608_v13, %v1585_v6  ;;  %v1957_v3 = vld [vmem:[%s5698_s8 + $0x188] sm:$0xff]  ;;  %v1999_v25 = vld [vmem:[%s5698_s8 + $0x2d8] sm:$0xff] }
 0x1a2   : > { %2332 = vmatpush.msra.mxu3 %v2148_v22  ;;  %2313 = vmatpush.msra.mxu2 %v2108_v24  ;;  %v1917_v6 = vld [vmem:[%s5698_s8 + $0x48] sm:$0xff]  ;;  %v2035_v13 = vld [vmem:[%s5698_s8 + $0x3f8] sm:$0xff] }
 0x1a3   : > { %2271 = vmatpush.msra.mxu0 %v2036_v15  ;;  %2292 = vmatpush.msra.mxu1 %v2072_v11  ;;  %v1588_v63 = vpop.f32.mrf.mxu0  ;;  %v1955_v15 = vld [vmem:[%s5698_s8 + $0x178] sm:$0xff]  ;;  %v1997_v11 = vld [vmem:[%s5698_s8 + $0x2c8] sm:$0xff] }
 0x1a4   : > { %2226 = vmatmul.f32.vlgmr.msrb.gmra.mxu2 %v4979_v16  ;;  %2333 = vmatpush.msra.mxu3 %v2146_v51  ;;  %v1915_v22 = vld [vmem:[%s5698_s8 + $0x38] sm:$0xff]  ;;  %v1913_v51 = vld [vmem:[%s5698_s8 + $0x28] sm:$0xff] }
 0x1a5   : > { %2348 = vmatpush.msrb.mxu0 %v1939_v14  ;;  %2293 = vmatpush.msra.mxu1 %v2070_v19  ;;  %v1953_v14 = vld [vmem:[%s5698_s8 + $0x168] sm:$0xff]  ;;  %v1995_v19 = vld [vmem:[%s5698_s8 + $0x2b8] sm:$0xff] }
 0x1a6   : > { %v1654_v5 = vpop.f32.mrf.mxu3  ;;  %2314 = vmatpush.msra.mxu2 %v2106_v17  ;;  %2334 = vmatpush.msra.mxu3 %v2144_v27  ;;  %v1951_v24 = vld [vmem:[%s5698_s8 + $0x158] sm:$0xff] }
 0x1a7   : > { %2349 = vmatpush.msrb.mxu0 %v1937_v12  ;;  %2294 = vmatpush.msra.mxu1 %v2068_v1  ;;  %v5015_v30 = vadd.f32 %v1654_v5, %v1631_v9  ;;  %v2033_v12 = vld [vmem:[%s5698_s8 + $0x3e8] sm:$0xff]  ;;  %v1991_v17 = vld [vmem:[%s5698_s8 + $0x298] sm:$0xff] }
 0x1a8   : > { %2315 = vmatpush.msra.mxu2 %v2104_v32  ;;  %2335 = vmatpush.msra.mxu3 %v2142_v8  ;;  %v1993_v1 = vld [vmem:[%s5698_s8 + $0x2a8] sm:$0xff]  ;;  %v1911_v27 = vld [vmem:[%s5698_s8 + $0x18] sm:$0xff] }
 0x1a9   : > { %2350 = vmatpush.msrb.mxu0 %v1935_v4  ;;  %2371 = vmatpush.msrb.mxu1 %v1971_v61  ;;  %v1634_v36 = vpop.f32.mrf.mxu2  ;;  %v2031_v4 = vld [vmem:[%s5698_s8 + $0x3d8] sm:$0xff]  ;;  %v1949_v61 = vld [vmem:[%s5698_s8 + $0x148] sm:$0xff] }
 0x1aa   : > { %2249 = vmatmul.f32.vlgmr.msrb.gmra.mxu3 %v5015_v30  ;;  %v1611_v47 = vpop.f32.mrf.mxu1  ;;  %2316 = vmatpush.msra.mxu2 %v2102_v20  ;;  %v2029_v9 = vld [vmem:[%s5698_s8 + $0x3c8] sm:$0xff]  ;;  %v1947_v5 = vld [vmem:[%s5698_s8 + $0x138] sm:$0xff] }
 0x1ab   : > { %2351 = vmatpush.msrb.mxu0 %v1933_v31  ;;  %2372 = vmatpush.msrb.mxu1 %v1969_v21  ;;  %v5039_v0 = vadd.f32 %v1611_v47, %v1588_v63  ;;  %v1989_v31 = vld [vmem:[%s5698_s8 + $0x288] sm:$0xff]  ;;  %v2027_v32 = vld [vmem:[%s5698_s8 + $0x3b8] sm:$0xff] }
 0x1ac   : > { %2336 = vmatpush.msra.mxu3 %v2140_v33  ;;  %2317 = vmatpush.msra.mxu2 %v2100_v29  ;;  %v1909_v21 = vld [vmem:[%s5698_s8 + $0x8] sm:$0xff]  ;;  %v1987_v8 = vld [vmem:[%s5698_s8 + $0x278] sm:$0xff] }
 0x1ad   : > { %2352 = vmatpush.msrb.mxu0 %v1931_v34  ;;  %2373 = vmatpush.msrb.mxu1 %v1967_v35  ;;  %v1945_v34 = vld [vmem:[%s5698_s8 + $0x128] sm:$0xff]  ;;  %v1943_v20 = vld [vmem:[%s5698_s8 + $0x118] sm:$0xff] }
 0x1ae   : > { %2229 = vmatmul.f32.gmra.mxu2 %v5039_v0  ;;  %2337 = vmatpush.msra.mxu3 %v2138_v44  ;;  %v2025_v35 = vld [vmem:[%s5698_s8 + $0x3a8] sm:$0xff] }
 0x1af   : > { %2353 = vmatpush.msrb.mxu0 %v1929_v37  ;;  %2374 = vmatpush.msrb.mxu1 %v1965_v7  ;;  %v1985_v63 = vld [vmem:[%s5698_s8 + $0x268] sm:$0xff]  ;;  %v2023_v7 = vld [vmem:[%s5698_s8 + $0x398] sm:$0xff] }
 0x1b0   : > { %v1657_v10 = vpop.f32.mrf.mxu3  ;;  %2394 = vmatpush.msrb.mxu2 %v2003_v49  ;;  %2338 = vmatpush.msra.mxu3 %v2136_v38  ;;  %v1941_v29 = vld [vmem:[%s5698_s8 + $0x108] sm:$0xff]  ;;  %v2063_v38 = vld [vmem:[%s5698_s8 + $0x4d8] sm:$0xff] }
 0x1b1   : > { %2354 = vmatpush.msrb.mxu0 %v1927_v41  ;;  %2375 = vmatpush.msrb.mxu1 %v1963_v43  ;;  %v5075_v59 = vadd.f32 %v1657_v10, %v1634_v36  ;;  %v2067_v41 = vld [vmem:[%s5698_s8 + $0x4f8] sm:$0xff]  ;;  %v2021_v44 = vld [vmem:[%s5698_s8 + $0x388] sm:$0xff] }
 0x1b2   : > { %2395 = vmatpush.msrb.mxu2 %v2001_v45  ;;  %2339 = vmatpush.msra.mxu3 %v2134_v2  ;;  %v1983_v43 = vld [vmem:[%s5698_s8 + $0x258] sm:$0xff]  ;;  %v1981_v49 = vld [vmem:[%s5698_s8 + $0x248] sm:$0xff] }
 0x1b3   : > { %2355 = vmatpush.msrb.mxu0 %v1925_v46  ;;  %2376 = vmatpush.msrb.mxu1 %v1961_v54  ;;  %v2065_v46 = vld [vmem:[%s5698_s8 + $0x4e8] sm:$0xff]  ;;  %v2019_v54 = vld [vmem:[%s5698_s8 + $0x378] sm:$0xff] }
 0x1b4   : > { %2252 = vmatmul.f32.gmra.mxu3 %v5075_v59  ;;  %2396 = vmatpush.msrb.mxu2 %v1999_v25  ;;  %v2061_v45 = vld [vmem:[%s5698_s8 + $0x4c8] sm:$0xff]  ;;  %v2059_v25 = vld [vmem:[%s5698_s8 + $0x4b8] sm:$0xff] }
 0x1b5   : > { %2356 = vmatpush.msrb.mxu0 %v1923_v60  ;;  %2377 = vmatpush.msrb.mxu1 %v1959_v50  ;;  %v1979_v60 = vld [vmem:[%s5698_s8 + $0x238] sm:$0xff]  ;;  %v2017_v2 = vld [vmem:[%s5698_s8 + $0x368] sm:$0xff] }
 0x1b6   : > { %2340 = vmatpush.msra.mxu3 %v2132_v53  ;;  %2397 = vmatpush.msrb.mxu2 %v1997_v11  ;;  %v2015_v11 = vld [vmem:[%s5698_s8 + $0x358] sm:$0xff] }
 0x1b7   : > { %2357 = vmatpush.msrb.mxu0 %v1921_v56  ;;  %2378 = vmatpush.msrb.mxu1 %v1957_v3  ;;  %v2099_v56 = vld [vmem:[%s5698_s8 + $0x5f8] sm:$0xff]  ;;  %v1977_v3 = vld [vmem:[%s5698_s8 + $0x228] sm:$0xff] }
 0x1b8   : > { %2417 = vmatpush.msrb.mxu3 %v2035_v13  ;;  %2398 = vmatpush.msrb.mxu2 %v1995_v19  ;;  %v2057_v13 = vld [vmem:[%s5698_s8 + $0x4a8] sm:$0xff]  ;;  %v1975_v19 = vld [vmem:[%s5698_s8 + $0x218] sm:$0xff] }
 0x1b9   : > { %2358 = vmatpush.msrb.mxu0 %v1919_v39  ;;  %2379 = vmatpush.msrb.mxu1 %v1955_v15  ;;  %v2097_v39 = vld [vmem:[%s5698_s8 + $0x5e8] sm:$0xff] }
 0x1ba   : > { %2418 = vmatpush.msrb.mxu3 %v2033_v12  ;;  %2399 = vmatpush.msrb.mxu2 %v1993_v1  ;;  %v2055_v12 = vld [vmem:[%s5698_s8 + $0x498] sm:$0xff]  ;;  %v1973_v1 = vld [vmem:[%s5698_s8 + $0x208] sm:$0xff] }
 0x1bb   : > { %2359 = vmatpush.msrb.mxu0 %v1917_v6  ;;  %2380 = vmatpush.msrb.mxu1 %v1953_v14  ;;  %v1677_v47 = vpop.f32.mrf.mxu0  ;;  %v2095_v14 = vld [vmem:[%s5698_s8 + $0x5d8] sm:$0xff] }
 0x1bc   : > { %2419 = vmatpush.msrb.mxu3 %v2031_v4  ;;  %2400 = vmatpush.msrb.mxu2 %v1991_v17  ;;  %v2053_v4 = vld [vmem:[%s5698_s8 + $0x488] sm:$0xff] }
 0x1bd   : > { %2360 = vmatpush.msrb.mxu0 %v1915_v22  ;;  %2381 = vmatpush.msrb.mxu1 %v1951_v24  ;;  %v2013_v22 = vld [vmem:[%s5698_s8 + $0x348] sm:$0xff] }
 0x1be   : > { %2420 = vmatpush.msrb.mxu3 %v2029_v9  ;;  %2401 = vmatpush.msrb.mxu2 %v1989_v31  ;;  %v2093_v24 = vld [vmem:[%s5698_s8 + $0x5c8] sm:$0xff]  ;;  %v2051_v31 = vld [vmem:[%s5698_s8 + $0x478] sm:$0xff] }
 0x1bf   : > { %2361 = vmatpush.msrb.mxu0 %v1913_v51  ;;  %2382 = vmatpush.msrb.mxu1 %v1949_v61  ;;  %v2011_v51 = vld [vmem:[%s5698_s8 + $0x338] sm:$0xff]  ;;  %v2009_v9 = vld [vmem:[%s5698_s8 + $0x328] sm:$0xff] }
 0x1c0   : > { %2421 = vmatpush.msrb.mxu3 %v2027_v32  ;;  %2402 = vmatpush.msrb.mxu2 %v1987_v8  ;;  %v2091_v61 = vld [vmem:[%s5698_s8 + $0x5b8] sm:$0xff] }
 0x1c1   : > { %2362 = vmatpush.msrb.mxu0 %v1911_v27  ;;  %2383 = vmatpush.msrb.mxu1 %v1947_v5  ;;  %v1723_v36 = vpop.f32.mrf.mxu2  ;;  %v2007_v32 = vld [vmem:[%s5698_s8 + $0x318] sm:$0xff] }
 0x1c2   : > { %v1700_v37 = vpop.f32.mrf.mxu1  ;;  %2422 = vmatpush.msrb.mxu3 %v2025_v35  ;;  %2403 = vmatpush.msrb.mxu2 %v1985_v63  ;;  %v2087_v8 = vld [vmem:[%s5698_s8 + $0x598] sm:$0xff]  ;;  %v2005_v35 = vld [vmem:[%s5698_s8 + $0x308] sm:$0xff] }
 0x1c3   : > { %2363 = vmatpush.msrb.mxu0 %v1909_v21  ;;  %2384 = vmatpush.msrb.mxu1 %v1945_v34  ;;  %v5180_v33 = vadd.f32 %v1700_v37, %v1677_v47  ;;  %v2089_v21 = vld [vmem:[%s5698_s8 + $0x5a8] sm:$0xff]  ;;  %v2083_v37 = vld [vmem:[%s5698_s8 + $0x578] sm:$0xff] }
 0x1c4   : > { %2423 = vmatpush.msrb.mxu3 %v2023_v7  ;;  %2404 = vmatpush.msrb.mxu2 %v1983_v43  ;;  %v2049_v34 = vld [vmem:[%s5698_s8 + $0x468] sm:$0xff]  ;;  %v2039_v43 = vld [vmem:[%s5698_s8 + $0x418] sm:$0xff] }
 0x1c5   : > { %2385 = vmatpush.msrb.mxu1 %v1943_v20  ;;  %2272 = vmatmul.f32.vlgmr.msra.gmra.mxu0 %v5180_v33  ;;  %v1680_v53 = vpop.f32.mrf.mxu0  ;;  %v2047_v20 = vld [vmem:[%s5698_s8 + $0x458] sm:$0xff]  ;;  %v2085_v63 = vld [vmem:[%s5698_s8 + $0x588] sm:$0xff] }
 0x1c6   : > { %2440 = vmatpush.msra.mxu0 %v2067_v41  ;;  %2424 = vmatpush.msrb.mxu3 %v2021_v44  ;;  %v2045_v47 = vld [vmem:[%s5698_s8 + $0x448] sm:$0xff] }
 0x1c7   : > { %2386 = vmatpush.msrb.mxu1 %v1941_v29  ;;  %2405 = vmatpush.msrb.mxu2 %v1981_v49  ;;  %v2081_v7 = vld [vmem:[%s5698_s8 + $0x568] sm:$0xff]  ;;  %v2079_v29 = vld [vmem:[%s5698_s8 + $0x558] sm:$0xff] }
 0x1c8   : > { %2441 = vmatpush.msra.mxu0 %v2065_v46  ;;  %v1746_v10 = vpop.f32.mrf.mxu3  ;;  %2425 = vmatpush.msrb.mxu3 %v2019_v54  ;;  %v2041_v41 = vld [vmem:[%s5698_s8 + $0x428] sm:$0xff]  ;;  %v2075_v46 = vld [vmem:[%s5698_s8 + $0x538] sm:$0xff] }
 0x1c9   : > { %v5210_v50 = vadd.f32 %v1746_v10, %v1723_v36  ;;  %2406 = vmatpush.msrb.mxu2 %v1979_v60  ;;  %v2037_v44 = vld [vmem:[%s5698_s8 + $0x408] sm:$0xff]  ;;  %v1872_v36 = vld [vmem:[%s5697_s7 + $0xe0] sm:$0xff]  ;;  %v2131_v60 = vld [vmem:[%s5698_s8 + $0x6f8] sm:$0xff] }
 0x1ca   : > { %2442 = vmatpush.msra.mxu0 %v2063_v38  ;;  %2426 = vmatpush.msrb.mxu3 %v2017_v2  ;;  %v2073_v54 = vld [vmem:[%s5698_s8 + $0x528] sm:$0xff] }
 0x1cb   : > { %2295 = vmatmul.f32.vlgmr.msra.gmra.mxu1 %v5210_v50  ;;  %2407 = vmatpush.msrb.mxu2 %v1977_v3  ;;  %v1726_v17 = vpop.f32.mrf.mxu2  ;;  %v2069_v2 = vld [vmem:[%s5698_s8 + $0x508] sm:$0xff] }
 0x1cc   : > { %v1703_v15 = vpop.f32.mrf.mxu1  ;;  %2443 = vmatpush.msra.mxu0 %v2061_v45  ;;  %2463 = vmatpush.msra.mxu1 %v2099_v56  ;;  %v2071_v45 = vld [vmem:[%s5698_s8 + $0x518] sm:$0xff]  ;;  %v2129_v56 = vld [vmem:[%s5698_s8 + $0x6e8] sm:$0xff] }
 0x1cd   : > { %v5234_v6 = vadd.f32 %v1703_v15, %v1680_v53  ;;  %2427 = vmatpush.msrb.mxu3 %v2015_v11  ;;  %2408 = vmatpush.msrb.mxu2 %v1975_v19  ;;  %v1866_v15 = vld [vmem:[%s5697_s7 + $0xb0] sm:$0xff] }
 0x1ce   : > { %2444 = vmatpush.msra.mxu0 %v2059_v25  ;;  %2464 = vmatpush.msra.mxu1 %v2097_v39  ;;  %v1906_v25 = vld [vmem:[%s5697_s7 + $0x1f0] sm:$0xff]  ;;  %v2127_v39 = vld [vmem:[%s5698_s8 + $0x6d8] sm:$0xff] }
 0x1cf   : > { %2275 = vmatmul.f32.gmra.mxu0 %v5234_v6  ;;  %2428 = vmatpush.msrb.mxu3 %v2013_v22 }
 0x1d0   : > { %2445 = vmatpush.msra.mxu0 %v2057_v13  ;;  %2465 = vmatpush.msra.mxu1 %v2095_v14  ;;  %v2125_v13 = vld [vmem:[%s5698_s8 + $0x6c8] sm:$0xff]  ;;  %v2163_v14 = vld [vmem:[%s5698_s8 + $0x7f8] sm:$0xff] }
 0x1d1   : > { %2409 = vmatpush.msrb.mxu2 %v1973_v1  ;;  %2429 = vmatpush.msrb.mxu3 %v2011_v51  ;;  %v2123_v1 = vld [vmem:[%s5698_s8 + $0x6b8] sm:$0xff]  ;;  %v2161_v51 = vld [vmem:[%s5698_s8 + $0x7e8] sm:$0xff] }
 0x1d2   : > { %v1749_v27 = vpop.f32.mrf.mxu3  ;;  %2446 = vmatpush.msra.mxu0 %v2055_v12  ;;  %2466 = vmatpush.msra.mxu1 %v2093_v24  ;;  %v1904_v12 = vld [vmem:[%s5697_s7 + $0x1e0] sm:$0xff] }
 0x1d3   : > { %v5270_v5 = vadd.f32 %v1749_v27, %v1726_v17  ;;  %2430 = vmatpush.msrb.mxu3 %v2009_v9  ;;  %v1864_v17 = vld [vmem:[%s5697_s7 + $0xa0] sm:$0xff]  ;;  %v2119_v9 = vld [vmem:[%s5698_s8 + $0x698] sm:$0xff] }
 0x1d4   : > { %2447 = vmatpush.msra.mxu0 %v2053_v4  ;;  %2467 = vmatpush.msra.mxu1 %v2091_v61  ;;  %v2121_v4 = vld [vmem:[%s5698_s8 + $0x6a8] sm:$0xff]  ;;  %v2159_v61 = vld [vmem:[%s5698_s8 + $0x7d8] sm:$0xff]  ;;  %v1900_v27 = vld [vmem:[%s5697_s7 + $0x1c0] sm:$0xff] }
 0x1d5   : > { %2298 = vmatmul.f32.gmra.mxu1 %v5270_v5  ;;  %2431 = vmatpush.msrb.mxu3 %v2007_v32 }
 0x1d6   : > { %2448 = vmatpush.msra.mxu0 %v2051_v31  ;;  %2468 = vmatpush.msra.mxu1 %v2089_v21  ;;  %v2157_v31 = vld [vmem:[%s5698_s8 + $0x7c8] sm:$0xff] }
 0x1d7   : > { %2364 = vmatmul.f32.vlgmr.msrb.gmra.mxu0 %v4853_v58  ;;  %2432 = vmatpush.msrb.mxu3 %v2005_v35  ;;  %v2043_v58 = vld [vmem:[%s5698_s8 + $0x438] sm:$0xff] }
 0x1d8   : > { %2449 = vmatpush.msra.mxu0 %v2049_v34  ;;  %2469 = vmatpush.msra.mxu1 %v2087_v8  ;;  %v1862_v34 = vld [vmem:[%s5697_s7 + $0x90] sm:$0xff]  ;;  %v2155_v35 = vld [vmem:[%s5698_s8 + $0x7b8] sm:$0xff] }
 0x1da   : > { %2450 = vmatpush.msra.mxu0 %v2047_v20  ;;  %2470 = vmatpush.msra.mxu1 %v2085_v63  ;;  %v1860_v20 = vld [vmem:[%s5697_s7 + $0x80] sm:$0xff]  ;;  %v1898_v63 = vld [vmem:[%s5697_s7 + $0x1b0] sm:$0xff] }
 0x1dc   : > { %2451 = vmatpush.msra.mxu0 %v2045_v47  ;;  %2471 = vmatpush.msra.mxu1 %v2083_v37  ;;  %v2115_v47 = vld [vmem:[%s5698_s8 + $0x678] sm:$0xff]  ;;  %v2153_v37 = vld [vmem:[%s5698_s8 + $0x7a8] sm:$0xff] }
 0x1dd   : > { %2387 = vmatmul.f32.vlgmr.msrb.gmra.mxu1 %v4889_v28  ;;  %v2077_v28 = vld [vmem:[%s5698_s8 + $0x548] sm:$0xff] }
 0x1de   : > { %2452 = vmatpush.msra.mxu0 %v2043_v58  ;;  %2472 = vmatpush.msra.mxu1 %v2081_v7  ;;  %v1858_v58 = vld [vmem:[%s5697_s7 + $0x70] sm:$0xff]  ;;  %v1896_v7 = vld [vmem:[%s5697_s7 + $0x1a0] sm:$0xff] }
 0x1df   : > { %2367 = vmatmul.f32.gmra.mxu0 %v4910_v40  ;;  %v1874_v40 = vld [vmem:[%s5697_s7 + $0xf0] sm:$0xff]  ;;  %v1769_v49 = vpop.f32.mrf.mxu0 }
 0x1e0   : > { %2453 = vmatpush.msra.mxu0 %v2041_v41  ;;  %2473 = vmatpush.msra.mxu1 %v2079_v29  ;;  %v2113_v41 = vld [vmem:[%s5698_s8 + $0x668] sm:$0xff]  ;;  %v2151_v29 = vld [vmem:[%s5698_s8 + $0x798] sm:$0xff] }
 0x1e2   : > { %2454 = vmatpush.msra.mxu0 %v2039_v43  ;;  %2474 = vmatpush.msra.mxu1 %v2077_v28  ;;  %v1856_v43 = vld [vmem:[%s5697_s7 + $0x60] sm:$0xff]  ;;  %v2149_v28 = vld [vmem:[%s5698_s8 + $0x788] sm:$0xff] }
 0x1e4   : > { %2455 = vmatpush.msra.mxu0 %v2037_v44  ;;  %2475 = vmatpush.msra.mxu1 %v2075_v46  ;;  %v1854_v44 = vld [vmem:[%s5697_s7 + $0x50] sm:$0xff]  ;;  %v1892_v46 = vld [vmem:[%s5697_s7 + $0x180] sm:$0xff] }
 0x1e5   : > { %v1792_v38 = vpop.f32.mrf.mxu1  ;;  %2390 = vmatmul.f32.gmra.mxu1 %v4946_v42  ;;  %v1870_v42 = vld [vmem:[%s5697_s7 + $0xd0] sm:$0xff]  ;;  %v1815_v3 = vpop.f32.mrf.mxu2 }
 0x1e6   : > { %2532 = vmatpush.msrb.mxu0 %v1874_v40  ;;  %v5340_v10 = vadd.f32 %v1792_v38, %v1769_v49  ;;  %2476 = vmatpush.msra.mxu1 %v2073_v54  ;;  %v2109_v40 = vld [vmem:[%s5698_s8 + $0x648] sm:$0xff]  ;;  %v2147_v49 = vld [vmem:[%s5698_s8 + $0x778] sm:$0xff]  ;;  %v1852_v54 = vld [vmem:[%s5697_s7 + $0x40] sm:$0xff] }
 0x1e7   : > { %2456 = vmatmul.f32.vlgmr.msra.gmra.mxu0 %v5180_v33  ;;  %v1868_v33 = vld [vmem:[%s5697_s7 + $0xc0] sm:$0xff]  ;;  %v1772_v19 = vpop.f32.mrf.mxu0  ;;  %v1890_v38 = vld [vmem:[%s5697_s7 + $0x170] sm:$0xff] }
 0x1e8   : > { %2318 = vmatmul.f32.vlgmr.msra.gmra.mxu2 %v5340_v10  ;;  %2533 = vmatpush.msrb.mxu0 %v1872_v36  ;;  %v2107_v36 = vld [vmem:[%s5698_s8 + $0x638] sm:$0xff] }
 0x1e9   : > { %2486 = vmatpush.msra.mxu2 %v2131_v60  ;;  %2477 = vmatpush.msra.mxu1 %v2071_v45  ;;  %v2145_v60 = vld [vmem:[%s5698_s8 + $0x768] sm:$0xff]  ;;  %v1850_v45 = vld [vmem:[%s5697_s7 + $0x30] sm:$0xff] }
 0x1ea   : > { %2534 = vmatpush.msrb.mxu0 %v1870_v42  ;;  %v1888_v42 = vld [vmem:[%s5697_s7 + $0x160] sm:$0xff] }
 0x1eb   : > { %2487 = vmatpush.msra.mxu2 %v2129_v56  ;;  %v1838_v53 = vpop.f32.mrf.mxu3  ;;  %2478 = vmatpush.msra.mxu1 %v2069_v2  ;;  %v2143_v56 = vld [vmem:[%s5698_s8 + $0x758] sm:$0xff]  ;;  %v1848_v2 = vld [vmem:[%s5697_s7 + $0x20] sm:$0xff] }
 0x1ec   : > { %v5371_v11 = vadd.f32 %v1838_v53, %v1815_v3  ;;  %2535 = vmatpush.msrb.mxu0 %v1868_v33  ;;  %v1886_v3 = vld [vmem:[%s5697_s7 + $0x150] sm:$0xff]  ;;  %v2141_v33 = vld [vmem:[%s5698_s8 + $0x748] sm:$0xff] }
 0x1ed   : > { %2555 = vmatpush.msrb.mxu1 %v1906_v25  ;;  %2488 = vmatpush.msra.mxu2 %v2127_v39  ;;  %v1795_v22 = vpop.f32.mrf.mxu1  ;;  %v1818_v21 = vpop.f32.mrf.mxu2  ;;  %v1846_v25 = vld [vmem:[%s5697_s7 + $0x10] sm:$0xff]  ;;  %v1884_v39 = vld [vmem:[%s5697_s7 + $0x140] sm:$0xff]  ;;  %v2101_v53 = vld [vmem:[%s5698_s8 + $0x608] sm:$0xff] }
 0x1ee   : > { %2479 = vmatmul.f32.vlgmr.msra.gmra.mxu1 %v5210_v50  ;;  %v5383_v24 = vadd.f32 %v1795_v22, %v1772_v19  ;;  %2341 = vmatmul.f32.vlgmr.msra.gmra.mxu3 %v5371_v11  ;;  %v1902_v50 = vld [vmem:[%s5697_s7 + $0x1d0] sm:$0xff]  ;;  %v1875_v19 = vld [vmem:[%s5697_s7 + $0xf8] sm:$0xff]  ;;  %v2137_v22 = vld [vmem:[%s5698_s8 + $0x728] sm:$0xff] }
 0x1ef   : > { %2536 = vmatpush.msrb.mxu0 %v1866_v15  ;;  %2489 = vmatpush.msra.mxu2 %v2125_v13  ;;  %v2139_v15 = vld [vmem:[%s5698_s8 + $0x738] sm:$0xff]  ;;  %v1844_v13 = vld [vmem:[%s5697_s7] sm:$0xff] }
 0x1f0   : > { %2509 = vmatpush.msra.mxu3 %v2163_v14  ;;  %2321 = vmatmul.f32.gmra.mxu2 %v5383_v24  ;;  %v1882_v14 = vld [vmem:[%s5697_s7 + $0x130] sm:$0xff] }
 0x1f1   : > { %2556 = vmatpush.msrb.mxu1 %v1904_v12  ;;  %2490 = vmatpush.msra.mxu2 %v2123_v1  ;;  %v1880_v12 = vld [vmem:[%s5697_s7 + $0x120] sm:$0xff]  ;;  %v2135_v1 = vld [vmem:[%s5698_s8 + $0x718] sm:$0xff] }
 0x1f2   : > { %2510 = vmatpush.msra.mxu3 %v2161_v51  ;;  %2459 = vmatmul.f32.gmra.mxu0 %v5234_v6  ;;  %v2117_v6 = vld [vmem:[%s5698_s8 + $0x688] sm:$0xff]  ;;  %v1878_v51 = vld [vmem:[%s5697_s7 + $0x110] sm:$0xff] }
 0x1f3   : > { %2557 = vmatpush.msrb.mxu1 %v1902_v50  ;;  %2491 = vmatpush.msra.mxu2 %v2121_v4  ;;  %v1841_v32 = vpop.f32.mrf.mxu3  ;;  %v1871_v50 = vld [vmem:[%s5697_s7 + $0xd8] sm:$0xff]  ;;  %v2133_v4 = vld [vmem:[%s5698_s8 + $0x708] sm:$0xff] }
 0x1f4   : > { %2511 = vmatpush.msra.mxu3 %v2159_v61  ;;  %2537 = vmatpush.msrb.mxu0 %v1864_v17  ;;  %v5418_v8 = vadd.f32 %v1841_v32, %v1818_v21  ;;  %v1876_v61 = vld [vmem:[%s5697_s7 + $0x100] sm:$0xff]  ;;  %v1907_v17 = vld [vmem:[%s5697_s7 + $0x1f8] sm:$0xff] }
 0x1f5   : > { %2558 = vmatpush.msrb.mxu1 %v1900_v27  ;;  %2492 = vmatpush.msra.mxu2 %v2119_v9  ;;  %v1867_v27 = vld [vmem:[%s5697_s7 + $0xb8] sm:$0xff]  ;;  %v1905_v9 = vld [vmem:[%s5697_s7 + $0x1e8] sm:$0xff] }
 0x1f6   : > { %2512 = vmatpush.msra.mxu3 %v2157_v31  ;;  %2538 = vmatpush.msrb.mxu0 %v1862_v34  ;;  %v1865_v31 = vld [vmem:[%s5697_s7 + $0xa8] sm:$0xff]  ;;  %v1903_v21 = vld [vmem:[%s5697_s7 + $0x1d8] sm:$0xff] }
 0x1f7   : > { %2344 = vmatmul.f32.gmra.mxu3 %v5418_v8  ;;  %2493 = vmatpush.msra.mxu2 %v2117_v6  ;;  %v1863_v32 = vld [vmem:[%s5697_s7 + $0x98] sm:$0xff]  ;;  %v1861_v34 = vld [vmem:[%s5697_s7 + $0x88] sm:$0xff] }
 0x1f8   : > { %2513 = vmatpush.msra.mxu3 %v2155_v35  ;;  %2539 = vmatpush.msrb.mxu0 %v1860_v20  ;;  %v1859_v6 = vld [vmem:[%s5697_s7 + $0x78] sm:$0xff]  ;;  %v1897_v35 = vld [vmem:[%s5697_s7 + $0x1a8] sm:$0xff] }
 0x1f9   : > { %2559 = vmatpush.msrb.mxu1 %v1898_v63  ;;  %2410 = vmatmul.f32.vlgmr.msrb.gmra.mxu2 %v4979_v16  ;;  %v2111_v16 = vld [vmem:[%s5698_s8 + $0x658] sm:$0xff]  ;;  %v1857_v20 = vld [vmem:[%s5697_s7 + $0x68] sm:$0xff] }
 0x1fa   : > { %2482 = vmatmul.f32.gmra.mxu1 %v5270_v5  ;;  %2494 = vmatpush.msra.mxu2 %v2115_v47  ;;  %v1894_v5 = vld [vmem:[%s5697_s7 + $0x190] sm:$0xff]  ;;  %v1895_v63 = vld [vmem:[%s5697_s7 + $0x198] sm:$0xff] }
 0x1fb   : > { %2514 = vmatpush.msra.mxu3 %v2153_v37  ;;  %2540 = vmatpush.msrb.mxu0 %v1858_v58  ;;  %v1855_v47 = vld [vmem:[%s5697_s7 + $0x58] sm:$0xff]  ;;  %v1893_v37 = vld [vmem:[%s5697_s7 + $0x188] sm:$0xff] }
 0x1fc   : > { %2560 = vmatpush.msrb.mxu1 %v1896_v7  ;;  %2495 = vmatpush.msra.mxu2 %v2113_v41  ;;  %v1891_v58 = vld [vmem:[%s5697_s7 + $0x178] sm:$0xff]  ;;  %v1889_v41 = vld [vmem:[%s5697_s7 + $0x168] sm:$0xff] }
 0x1fd   : > { %2515 = vmatpush.msra.mxu3 %v2151_v29  ;;  %2541 = vmatpush.msrb.mxu0 %v1856_v43  ;;  %v1851_v7 = vld [vmem:[%s5697_s7 + $0x38] sm:$0xff]  ;;  %v1849_v29 = vld [vmem:[%s5697_s7 + $0x28] sm:$0xff] }
 0x1fe   : > { %2561 = vmatpush.msrb.mxu1 %v1894_v5  ;;  %2496 = vmatpush.msra.mxu2 %v2111_v16  ;;  %v1887_v43 = vld [vmem:[%s5697_s7 + $0x158] sm:$0xff]  ;;  %v1885_v16 = vld [vmem:[%s5697_s7 + $0x148] sm:$0xff] }
 0x1ff   : > { %2516 = vmatpush.msra.mxu3 %v2149_v28  ;;  %2542 = vmatpush.msrb.mxu0 %v1854_v44  ;;  %v1847_v5 = vld [vmem:[%s5697_s7 + $0x18] sm:$0xff]  ;;  %v1845_v28 = vld [vmem:[%s5697_s7 + $0x8] sm:$0xff] }
 0x200   : > { %2562 = vmatpush.msrb.mxu1 %v1892_v46  ;;  %2433 = vmatmul.f32.vlgmr.msrb.gmra.mxu3 %v5015_v30  ;;  %v2105_v30 = vld [vmem:[%s5698_s8 + $0x628] sm:$0xff]  ;;  %v1883_v44 = vld [vmem:[%s5697_s7 + $0x138] sm:$0xff] }
 0x201   : > { %2497 = vmatpush.msra.mxu2 %v2109_v40  ;;  %2517 = vmatpush.msra.mxu3 %v2147_v49  ;;  %v1881_v46 = vld [vmem:[%s5697_s7 + $0x128] sm:$0xff]  ;;  %v1879_v40 = vld [vmem:[%s5697_s7 + $0x118] sm:$0xff] }
 0x202   : > { %2543 = vmatpush.msrb.mxu0 %v1852_v54  ;;  %2563 = vmatpush.msrb.mxu1 %v1890_v38  ;;  %v1877_v49 = vld [vmem:[%s5697_s7 + $0x108] sm:$0xff] }
 0x203   : > { %2413 = vmatmul.f32.gmra.mxu2 %v5039_v0  ;;  %2518 = vmatpush.msra.mxu3 %v2145_v60  ;;  %v2103_v0 = vld [vmem:[%s5698_s8 + $0x618] sm:$0xff] }
 0x204   : > { %2498 = vmatpush.msra.mxu2 %v2107_v36  ;;  %2544 = vmatpush.msrb.mxu0 %v1850_v45 }
 0x205   : > { %2564 = vmatpush.msrb.mxu1 %v1888_v42  ;;  %2519 = vmatpush.msra.mxu3 %v2143_v56 }
 0x206   : > { %2499 = vmatpush.msra.mxu2 %v2105_v30  ;;  %2545 = vmatpush.msrb.mxu0 %v1848_v2 }
 0x207   : > { %2565 = vmatpush.msrb.mxu1 %v1886_v3  ;;  %2520 = vmatpush.msra.mxu3 %v2141_v33 }
 0x208   : > { %2500 = vmatpush.msra.mxu2 %v2103_v0  ;;  %2546 = vmatpush.msrb.mxu0 %v1846_v25 }
 0x209   : > { %2566 = vmatpush.msrb.mxu1 %v1884_v39  ;;  %2436 = vmatmul.f32.gmra.mxu3 %v5075_v59  ;;  %v1873_v59 = vld [vmem:[%s5697_s7 + $0xe8] sm:$0xff] }
 0x20a   : > { %2501 = vmatpush.msra.mxu2 %v2101_v53  ;;  %2521 = vmatpush.msra.mxu3 %v2139_v15 }
 0x20b   : > { %2547 = vmatpush.msrb.mxu0 %v1844_v13  ;;  %2567 = vmatpush.msrb.mxu1 %v1882_v14  ;;  %v2181_v54 = vpop.f32.mrf.mxu0 }
 0x20c   : > { %2548 = vmatmul.f32.vlgmr.msrb.gmra.mxu0 %v3953_v26  ;;  %2578 = vmatpush.msrb.mxu2 %v1875_v19 }
 0x20d   : > { %2522 = vmatpush.msra.mxu3 %v2137_v22  ;;  %2502 = vmatmul.f32.vlgmr.msra.gmra.mxu2 %v5340_v10  ;;  %v1869_v10 = vld [vmem:[%s5697_s7 + $0xc8] sm:$0xff] }
 0x20e   : > { %2568 = vmatpush.msrb.mxu1 %v1880_v12  ;;  %2579 = vmatpush.msrb.mxu2 %v1873_v59 }
 0x20f   : > { %2523 = vmatpush.msra.mxu3 %v2135_v1 }
 0x210   : > { %2569 = vmatpush.msrb.mxu1 %v1878_v51  ;;  %2580 = vmatpush.msrb.mxu2 %v1871_v50 }
 0x211   : > { %2524 = vmatpush.msra.mxu3 %v2133_v4  ;;  %v2204_v38 = vpop.f32.mrf.mxu1 }
 0x212   : > { %2570 = vmatpush.msrb.mxu1 %v1876_v61  ;;  %2581 = vmatpush.msrb.mxu2 %v1869_v10  ;;  %v2205_v14 = vadd.f32 %v2204_v38, %v2181_v54 }
 0x213   : > { %2601 = vmatpush.msrb.mxu3 %v1907_v17  ;;  %2571 = vmatmul.f32.vlgmr.msrb.gmra.mxu1 %v3975_v57 }
 0x214   : > { %2525 = vmatmul.f32.vlgmr.msra.gmra.mxu3 %v5371_v11  ;;  %2551 = vmatmul.f32.gmra.mxu0 %v3989_v62  ;;  %v1901_v11 = vld [vmem:[%s5697_s7 + $0x1c8] sm:$0xff] }
 0x215   : > { %2582 = vmatpush.msrb.mxu2 %v1867_v27  ;;  %2602 = vmatpush.msrb.mxu3 %v1905_v9  ;;  %v5663_v9 = vld [vmem:[%s5699_s9] sm:$0x3] }
 0x216   : > { %2505 = vmatmul.f32.gmra.mxu2 %v5383_v24  ;;  %v1899_v24 = vld [vmem:[%s5697_s7 + $0x1b8] sm:$0xff] }
 0x217   : > { %2583 = vmatpush.msrb.mxu2 %v1865_v31  ;;  %2603 = vmatpush.msrb.mxu3 %v1903_v21 }
 0x219   : > { %2584 = vmatpush.msrb.mxu2 %v1863_v32  ;;  %2604 = vmatpush.msrb.mxu3 %v1901_v11 }
 0x21b   : > { %2574 = vmatmul.f32.gmra.mxu1 %v4025_v48  ;;  %2585 = vmatpush.msrb.mxu2 %v1861_v34  ;;  %v2207_v36 = vpop.f32.mrf.mxu1  ;;  %v2626_v34 = vperm.slane %v5663_v9, 0 }
 0x21c   : > { %2605 = vmatpush.msrb.mxu3 %v1899_v24 }
 0x21d   : > { %2528 = vmatmul.f32.gmra.mxu3 %v5418_v8  ;;  %2586 = vmatpush.msrb.mxu2 %v1859_v6  ;;  %v1853_v8 = vld [vmem:[%s5697_s7 + $0x48] sm:$0xff] }
 0x21e   : > { %2606 = vmatpush.msrb.mxu3 %v1897_v35  ;;  %v2638_v35 = vld [vmem:[%s5700_s10] sm:$0x3] }
 0x21f   : > { %2587 = vmatpush.msrb.mxu2 %v1857_v20 }
 0x220   : > { %2607 = vmatpush.msrb.mxu3 %v1895_v63 }
 0x221   : > { %2588 = vmatpush.msrb.mxu2 %v1855_v47  ;;  %v2648_v47 = vld [vmem:[%s5701_s11] sm:$0x3] }
 0x222   : > { %2608 = vmatpush.msrb.mxu3 %v1893_v37 }
 0x223   : > { %2589 = vmatpush.msrb.mxu2 %v1853_v8 }
 0x224   : > { %2609 = vmatpush.msrb.mxu3 %v1891_v58  ;;  %v2640_v58 = vperm.slane %v2638_v35, 0 }
 0x225   : > { %2590 = vmatpush.msrb.mxu2 %v1851_v7 }
 0x226   : > { %2610 = vmatpush.msrb.mxu3 %v1889_v41 }
 0x227   : > { %2591 = vmatpush.msrb.mxu2 %v1849_v29  ;;  %v2227_v56 = vpop.f32.mrf.mxu2 }
 0x228   : > { %2611 = vmatpush.msrb.mxu3 %v1887_v43  ;;  %v2228_v22 = vadd.f32 %v2227_v56, %v2205_v14 }
 0x229   : > { %2592 = vmatpush.msrb.mxu2 %v1847_v5  ;;  %v2650_v5 = vperm.slane %v2648_v47, 0 }
 0x22a   : > { %2612 = vmatpush.msrb.mxu3 %v1885_v16 }
 0x22b   : > { %2593 = vmatpush.msrb.mxu2 %v1845_v28 }
 0x22c   : > { %2613 = vmatpush.msrb.mxu3 %v1883_v44  ;;  %2594 = vmatmul.f32.vlgmr.msrb.gmra.mxu2 %v3953_v26  ;;  %v2184_v26 = vpop.f32.mrf.mxu0 }
 0x22d   : > { %v2250_v3 = vpop.f32.mrf.mxu3  ;;  %v2208_v50 = vadd.f32 %v2207_v36, %v2184_v26 }
 0x22e   : > { %2614 = vmatpush.msrb.mxu3 %v1881_v46  ;;  %v2251_v12 = vadd.f32 %v2250_v3, %v2228_v22 }
 0x230   : > { %2615 = vmatpush.msrb.mxu3 %v1879_v40 }
 0x231   : > { %v2230_v33 = vpop.f32.mrf.mxu2 }
 0x232   : > { %2616 = vmatpush.msrb.mxu3 %v1877_v49  ;;  %v2231_v10 = vadd.f32 %v2230_v33, %v2208_v50 }
 0x233   : > { %2617 = vmatmul.f32.vlgmr.msrb.gmra.mxu3 %v3975_v57 }
 0x234   : > { %2597 = vmatmul.f32.gmra.mxu2 %v3989_v62 }
 0x237   : > { %v2253_v39 = vpop.f32.mrf.mxu3 }
 0x238   : > { %v2254_v31 = vadd.f32 %v2253_v39, %v2231_v10 }
 0x23b   : > { %2620 = vmatmul.f32.gmra.mxu3 %v4025_v48 }
 0x242   : > { %v2273_v60 = vpop.f32.mrf.mxu0 }
 0x243   : > { %v2274_v1 = vadd.f32 %v2273_v60, %v2251_v12 }
 0x248   : > { %v2296_v45 = vpop.f32.mrf.mxu1 }
 0x249   : > { %v2297_v4 = vadd.f32 %v2296_v45, %v2274_v1  ;;  %v2627_v1 = vperm.slane %v5663_v9, 1 }
 0x24c   : > { %v2276_v42 = vpop.f32.mrf.mxu0 }
 0x24d   : > { %v2277_v32 = vadd.f32 %v2276_v42, %v2254_v31 }
 0x252   : > { %v2299_v30 = vpop.f32.mrf.mxu1 }
 0x253   : > { %v2300_v20 = vadd.f32 %v2299_v30, %v2277_v32 }
 0x254   : > { %v2365_v2 = vpop.f32.mrf.mxu0 }
 0x25a   : > { %v2388_v0 = vpop.f32.mrf.mxu1 }
 0x25b   : > { %v2389_v60 = vadd.f32 %v2388_v0, %v2365_v2 }
 0x25c   : > { %v2368_v25 = vpop.f32.mrf.mxu0 }
 0x262   : > { %v2391_v57 = vpop.f32.mrf.mxu1 }
 0x263   : > { %v2392_v3 = vadd.f32 %v2391_v57, %v2368_v25  ;;  %v2641_v25 = vperm.slane %v2638_v35, 1 }
 0x264   : > { %v2457_v62 = vpop.f32.mrf.mxu0 }
 0x26b   : > { %v2319_v53 = vpop.f32.mrf.mxu2  ;;  %v2480_v48 = vpop.f32.mrf.mxu1 }
 0x26c   : > { %v2320_v27 = vadd.f32 %v2319_v53, %v2297_v4 }
 0x26f   : > { %v2460_v19 = vpop.f32.mrf.mxu0 }
 0x271   : > { %v2342_v15 = vpop.f32.mrf.mxu3 }
 0x272   : > { %v2343_v21 = vadd.f32 %v2342_v15, %v2320_v27 }
 0x273   : > { %v2322_v13 = vpop.f32.mrf.mxu2 }
 0x274   : > { %v2323_v37 = vadd.f32 %v2322_v13, %v2300_v20 }
 0x277   : > { %v2483_v51 = vpop.f32.mrf.mxu1 }
 0x27a   : > { %v2345_v59 = vpop.f32.mrf.mxu3 }
 0x27b   : > { %v2346_v29 = vadd.f32 %v2345_v59, %v2323_v37 }
 0x27c   : > { %v2411_v61 = vpop.f32.mrf.mxu2 }
 0x27d   : > { %v2412_v42 = vadd.f32 %v2411_v61, %v2389_v60 }
 0x283   : > { %v2434_v24 = vpop.f32.mrf.mxu3 }
 0x284   : > { %v2435_v30 = vadd.f32 %v2434_v24, %v2412_v42 }
 0x286   : > { %v2414_v7 = vpop.f32.mrf.mxu2  ;;  %v2458_v33 = vadd.f32 %v2457_v62, %v2435_v30 }
 0x287   : > { %v2415_v39 = vadd.f32 %v2414_v7, %v2392_v3 }
 0x288   : > { %v2481_v13 = vadd.f32 %v2480_v48, %v2458_v33  ;;  %v2651_v48 = vperm.slane %v2648_v47, 1 }
 0x289   : > { %v2549_v17 = vpop.f32.mrf.mxu0 }
 0x28a   : > { %v2550_v11 = vadd.f32 %v2549_v17, %v2343_v21 }
 0x28c   : > { %v2437_v49 = vpop.f32.mrf.mxu3 }
 0x28d   : > { %v2438_v15 = vadd.f32 %v2437_v49, %v2415_v39 }
 0x28f   : > { %v2461_v12 = vadd.f32 %v2460_v19, %v2438_v15 }
 0x290   : > { %v2572_v6 = vpop.f32.mrf.mxu1  ;;  %v2503_v26 = vpop.f32.mrf.mxu2 }
 0x291   : > { %v2573_v63 = vadd.f32 %v2572_v6, %v2550_v11  ;;  %v2552_v41 = vpop.f32.mrf.mxu0  ;;  %v2504_v22 = vadd.f32 %v2503_v26, %v2481_v13  ;;  %v2484_v0 = vadd.f32 %v2483_v51, %v2461_v12 }
 0x292   : > { %v2553_v28 = vadd.f32 %v2552_v41, %v2346_v29 }
 0x293   : > { %v2630_v8 = vadd.f32 %v2626_v34, %v2573_v63 }
 0x295   : > { %v2634_v43 = vadd.f32 %v2630_v8, %v3596_v23 }
 0x297   : > { %v2644_v16 = vmul.f32 %v2640_v58, %v2634_v43  ;;  %v2526_v45 = vpop.f32.mrf.mxu3 }
 0x298   : > { %v2575_v44 = vpop.f32.mrf.mxu1  ;;  %v2527_v59 = vadd.f32 %v2526_v45, %v2504_v22 }
 0x299   : > { %v2654_v46 = vadd.f32 %v2650_v5, %v2644_v16  ;;  %v2576_v40 = vadd.f32 %v2575_v44, %v2553_v28  ;;  %v2506_v56 = vpop.f32.mrf.mxu2 }
 0x29a   : > { %v2507_v4 = vadd.f32 %v2506_v56, %v2484_v0 }
 0x29b   : > { %2658 = vst [vmem:[%s5677_s18] sm:$0xff] %v2654_v46  ;;  %v2632_v54 = vadd.f32 %v2626_v34, %v2576_v40 }
 0x29d   : > { %v2636_v38 = vadd.f32 %v2632_v54, %v3585_v18 }
 0x29f   : > { %v2646_v23 = vmul.f32 %v2640_v58, %v2636_v38 }
 0x2a0   : > { %v2529_v53 = vpop.f32.mrf.mxu3 }
 0x2a1   : > { %v2656_v36 = vadd.f32 %v2650_v5, %v2646_v23  ;;  %v2530_v62 = vadd.f32 %v2529_v53, %v2507_v4 }
 0x2a3   : > { %2660 = vst [vmem:[%s5677_s18 + $0x10] sm:$0x1f] %v2656_v36 }
 0x2af   : > { %v2595_v14 = vpop.f32.mrf.mxu2 }
 0x2b0   : > { %v2596_v18 = vadd.f32 %v2595_v14, %v2527_v59 }
 0x2b6   : > { %v2618_v2 = vpop.f32.mrf.mxu3 }
 0x2b7   : > { %v2619_v50 = vadd.f32 %v2618_v2, %v2596_v18  ;;  %v2598_v57 = vpop.f32.mrf.mxu2 }
 0x2b8   : > { %v2599_v27 = vadd.f32 %v2598_v57, %v2530_v62 }
 0x2b9   : > { %v2631_v61 = vadd.f32 %v2627_v1, %v2619_v50 }
 0x2bb   : > { %v2635_v17 = vadd.f32 %v2631_v61, %v3680_v55 }
 0x2bd   : > { %v2645_v10 = vmul.f32 %v2641_v25, %v2635_v17 }
 0x2be   : > { %v2621_v19 = vpop.f32.mrf.mxu3 }
 0x2bf   : > { %v2655_v31 = vadd.f32 %v2651_v48, %v2645_v10  ;;  %v2622_v21 = vadd.f32 %v2621_v19, %v2599_v27 }
 0x2c1   : > { %2659 = vst [vmem:[%s5677_s18 + $0x8] sm:$0xff] %v2655_v31  ;;  %v2633_v9 = vadd.f32 %v2627_v1, %v2622_v21 }
 0x2c3   : > { %v2637_v32 = vadd.f32 %v2633_v9, %v3670_v52 }
 0x2c5   : > { %v2647_v51 = vmul.f32 %v2641_v25, %v2637_v32 }
 0x2c7   : > { %v2657_v11 = vadd.f32 %v2651_v48, %v2647_v51 }
 0x2c9   : > { %2661 = vst [vmem:[%s5677_s18 + $0x18] sm:$0x1f] %v2657_v11 }
 0x2ca PF: > { %s24_s25 = sadd.s32 1, %s2891_s25  }
 0x2cb   : > { %p21_p4 = scmp.ge.s32.totalorder %s24_s25, 4  }
 0x2cd   :  { %23 = sbr.rel (!%p21_p4) target bundleno = 1 (0x1), region = 114 }

</bundles_post_ra>
